<compile_context>
chip_gen: v5e
topology: v5e:2x2
jax: 0.10.0
libtpu: 0.0.40
codegen_flags: <defaults>
</compile_context>

<pallas_src>
import functools

import jax
import jax.numpy as jnp
import numpy as np
from jax import lax
from jax.experimental import pallas as pl
from jax.experimental.pallas import tpu as pltpu


# ----------------------------------------------------------------------------
# Descending bitonic sort over the lane (last) axis; returns the first kk.
# ----------------------------------------------------------------------------
def _bitonic_topk_desc(x, kk):
    """Sort x (..., n) descending along the last axis, return x[..., :kk].

    n must be a power of two.  Partner exchange uses pltpu.roll (XLU); the
    partner-select mask is computed from an identically-rolled lane iota, so
    the result is correct for either roll-direction convention.  Values only
    (matches torch.topk(largest=True, sorted=True) value semantics).
    """
    n = x.shape[-1]
    assert n & (n - 1) == 0, "bitonic sort needs a power-of-two lane extent"
    axis = x.ndim - 1
    lane = lax.broadcasted_iota(jnp.int32, x.shape, axis)

    size = 2
    while size <= n:
        kb = size.bit_length() - 1                     # log2(size)
        j = size // 2
        while j >= 1:
            jb = j.bit_length() - 1                    # log2(j)
            # Partner of lane i is lane (i ^ j): one of the two rotations.
            partner_a = pltpu.roll(x, n - j, axis)
            partner_b = pltpu.roll(x, j, axis)
            take_a = pltpu.roll(lane, n - j, axis) == (lane ^ j)
            partner = jnp.where(take_a, partner_a, partner_b)
            # Overall-descending network: keep the max of the pair when bit j
            # and bit `size` of the lane index agree.
            want_max = ((lane >> jb) & 1) == ((lane >> kb) & 1)
            x = jnp.where(want_max, jnp.maximum(x, partner),
                          jnp.minimum(x, partner))
            j //= 2
        size *= 2
    return x[..., :kk]


# ----------------------------------------------------------------------------
# Fully fused kernel: QKV projection -> top-k attention -> reconstruct+BN+res.
# One grid step = one batch element.
# ----------------------------------------------------------------------------
def _dwtnl_fused_kernel(x_ref, wqkv_ref, bqkv_ref, wrec_ref, brec_ref, o_ref,
                        qkv_s, y_s, yflat_s, *, cr, t, hw, kk):
    f32 = jnp.float32

    # -- Phase 1: fused Q/K/V 1x1x1 projection: ONE (3cr, c) @ (c, t*hw) matmul.
    x = x_ref[...].astype(f32)                                    # (c, t*hw)
    qkv = jnp.dot(wqkv_ref[...], x, preferred_element_type=f32) + bqkv_ref[...]
    # Distribute the flat (3cr, t*hw) result into the (3cr, t, hw) attention
    # layout (aligned whole-vreg lane slices in, small VMEM-local stores out).
    for s in range(t):
        qkv_s[:, s, :] = qkv[:, s * hw:(s + 1) * hw]

    # -- Phase 2: sorted top-k over hw per (channel, time) row.  Q and K are
    #    sorted together in one (2cr, t, hw) slab by the bitonic network.
    qk_sorted = _bitonic_topk_desc(qkv_s[0:2 * cr, :, :], kk)     # (2cr, t, kk)
    q_tk = qk_sorted[0:cr]
    k_tk = qk_sorted[cr:2 * cr]
    corr = jnp.einsum('ntk,nsk->nts', q_tk, k_tk,
                      preferred_element_type=f32)                 # (cr, t, t)
    mx = jnp.max(corr, axis=-1, keepdims=True)
    e = jnp.exp(corr - mx)
    inv = pl.reciprocal(jnp.sum(e, axis=-1, keepdims=True), approx=True)
    attn = e * inv
    y_s[...] = jnp.einsum('nts,nsw->ntw', attn, qkv_s[2 * cr:3 * cr, :, :],
                          preferred_element_type=f32)             # (cr, t, hw)

    # Lane-flatten y for the single reconstruct matmul (aligned lane stores).
    for s in range(t):
        yflat_s[:, s * hw:(s + 1) * hw] = y_s[:, s, :]

    # -- Phase 3: reconstruct conv + folded BatchNorm + residual:
    #    ONE (c, cr) @ (cr, t*hw) matmul and ONE dense (c, t*hw) store.
    z = jnp.dot(wrec_ref[...], yflat_s[...], preferred_element_type=f32) \
        + brec_ref[...]
    o_ref[...] = (z + x_ref[...].astype(f32)).astype(o_ref.dtype)


# ----------------------------------------------------------------------------
# Wrapper (only free metadata reshapes / small weight packing outside kernel).
# ----------------------------------------------------------------------------
def dwtnl_forward(x, params, reduction=2):
    b, c, t, h, w = x.shape
    cr = c // reduction
    hw = h * w
    kk = hw // 4
    assert hw % 128 == 0 and (hw & (hw - 1)) == 0, \
        "h*w must be a power of two multiple of 128"
    # TODO(synk): pad the hw lanes with -inf (and mask the projection) to
    # support non-power-of-two spatial sizes (e.g. 14x14, 7x7).

    thw = t * hw
    x3 = x.reshape(b, c, thw)          # free reshape, native dtype (bf16 ok)

    f32 = jnp.float32
    eps = 1e-5
    scale = params['bn_gamma'].astype(f32) * lax.rsqrt(
        params['bn_var'].astype(f32) + eps)
    shift = params['bn_beta'].astype(f32) - params['bn_mean'].astype(f32) * scale
    # TODO(synk): inference-mode BN fold (running stats); training-mode batch
    # statistics are not computed (module inits gamma=beta=0, zeroing branch).

    w_qkv = jnp.concatenate(
        [params['wq'], params['wk'], params['wv']], axis=0).astype(f32)  # (3cr, c)
    b_qkv = jnp.concatenate(
        [params['bq'], params['bk'], params['bv']], axis=0).astype(f32)[:, None]
    w_rec = params['wr'].astype(f32) * scale[:, None]                    # (c, cr)
    b_rec = (params['br'].astype(f32) * scale + shift)[:, None]          # (c, 1)

    full = lambda shp: pl.BlockSpec(shp, lambda i, _n=len(shp): (0,) * _n)

    # VMEM budget per grid step (double-buffered x/o blocks + scratch); raise
    # the scoped limit only when the footprint outgrows the smallest default
    # (16 MiB on v5e).  v7x note: physical VMEM is 64 MiB -> cap the request.
    itemsize = int(np.dtype(x.dtype).itemsize)
    est = (2 * 2 * c * thw * itemsize              # x in + o out, double-buffered
           + (3 * cr + cr) * t * hw * 4            # qkv_s + y_s scratch
           + cr * thw * 4                          # yflat_s scratch
           + 2 * (3 * cr * c + c * cr + 3 * cr + c) * 4)
    cp_kwargs = dict(dimension_semantics=("parallel",))
    if est > 12 * 1024 * 1024:
        cp_kwargs["vmem_limit_bytes"] = min(2 * est, 100 * 1024 * 1024)
    # TODO(synk): for b < 4 on v7x (2 TCs), block several batch elements per
    # grid step (or split cr with partial-sum accumulation) so both cores and
    # the DMA pipeline stay busy.

    kernel = functools.partial(_dwtnl_fused_kernel, cr=cr, t=t, hw=hw, kk=kk)
    out3 = pl.pallas_call(
        kernel,
        out_shape=jax.ShapeDtypeStruct((b, c, thw), x.dtype),
        grid=(b,),
        in_specs=[
            pl.BlockSpec((None, c, thw), lambda i: (i, 0, 0)),   # x
            full((3 * cr, c)), full((3 * cr, 1)),                # stacked Wqkv, bqkv
            full((c, cr)), full((c, 1)),                         # BN-folded Wrec, brec
        ],
        out_specs=pl.BlockSpec((None, c, thw), lambda i: (i, 0, 0)),
        scratch_shapes=[
            pltpu.VMEM((3 * cr, t, hw), jnp.float32),            # Q/K/V slab
            pltpu.VMEM((cr, t, hw), jnp.float32),                # y
            pltpu.VMEM((cr, thw), jnp.float32),                  # y, lane-flat
        ],
        compiler_params=pltpu.CompilerParams(**cp_kwargs),
    )(x3, w_qkv, b_qkv, w_rec, b_rec)
    return out3.reshape(b, c, t, h, w)


# ----------------------------------------------------------------------------
# Pure-JAX reference (mirrors the PyTorch forward) for verification.
# ----------------------------------------------------------------------------
def reference_forward(x, params, reduction=2):
    b, c, t, h, w = x.shape
    cr = c // reduction
    hw = h * w
    hi = lax.Precision.HIGHEST

    def conv1x1(inp, wgt, bias):
        return (jnp.einsum('bcthw,oc->bothw', inp, wgt, precision=hi)
                + bias[None, :, None, None, None])

    Q = conv1x1(x, params['wq'], params['bq']).reshape(b * cr, t, hw)
    K = conv1x1(x, params['wk'], params['bk']).reshape(b * cr, t, hw)
    V = conv1x1(x, params['wv'], params['bv']).reshape(b * cr, t, hw)
    Qtk = lax.top_k(Q, hw // 4)[0]
    Ktk = lax.top_k(K, hw // 4)[0]
    corr = jnp.einsum('ntk,nsk->nts', Qtk, Ktk, precision=hi)
    attn = jax.nn.softmax(corr, axis=-1)
    y = jnp.einsum('nts,nsw->ntw', attn, V, precision=hi)
    y5 = y.reshape(b, cr, t, h, w)
    z = conv1x1(y5, params['wr'], params['br'])
    eps = 1e-5
    scale = params['bn_gamma'] / jnp.sqrt(params['bn_var'] + eps)
    shift = params['bn_beta'] - params['bn_mean'] * scale
    z = z * scale[None, :, None, None, None] + shift[None, :, None, None, None]
    return z + x


if __name__ == "__main__":
    # Small, module-consistent shapes; h*w = 256 (lane-friendly), kk = 64.
    b, c, t, h, w = 2, 4, 8, 16, 16
    cr = c // 2

    key = jax.random.PRNGKey(0)
    ks = jax.random.split(key, 13)
    # Note: the module *initializes* BN gamma=beta=0 (output == x exactly).
    # Test with non-trivial BN parameters (as after training) so the whole
    # fused path is exercised; the forward math is identical.
    params = {
        'wq': jax.random.normal(ks[0], (cr, c), jnp.float32) * 0.2,
        'bq': jax.random.normal(ks[1], (cr,), jnp.float32) * 0.1,
        'wk': jax.random.normal(ks[2], (cr, c), jnp.float32) * 0.2,
        'bk': jax.random.normal(ks[3], (cr,), jnp.float32) * 0.1,
        'wv': jax.random.normal(ks[4], (cr, c), jnp.float32) * 0.2,
        'bv': jax.random.normal(ks[5], (cr,), jnp.float32) * 0.1,
        'wr': jax.random.normal(ks[6], (c, cr), jnp.float32) * 0.2,
        'br': jax.random.normal(ks[7], (c,), jnp.float32) * 0.1,
        'bn_gamma': jax.random.normal(ks[9], (c,), jnp.float32) * 0.5,
        'bn_beta': jax.random.normal(ks[10], (c,), jnp.float32) * 0.1,
        'bn_mean': jax.random.normal(ks[11], (c,), jnp.float32) * 0.1,
        'bn_var': jax.random.uniform(ks[12], (c,), jnp.float32,
                                     minval=0.5, maxval=1.5),
    }
    x = jax.random.normal(ks[8], (b, c, t, h, w), jnp.float32)

    fwd = jax.jit(dwtnl_forward)
    out = jax.block_until_ready(fwd(x, params))

    ref = jax.block_until_ready(reference_forward(x, params))
    # Tolerance covers pl.reciprocal(approx=True) in the softmax denominator.
    np.testing.assert_allclose(np.asarray(out), np.asarray(ref),
                               rtol=2e-3, atol=2e-3)
    print("KERNEL_OK")
</pallas_src>

<mosaic_0001>
module attributes {stable_mosaic.version = 11 : i64} {
  func.func @_dwtnl_fused_kernel(%arg0: i32, %arg1: memref<1x4x2048xf32, #tpu.memory_space<vmem>>, %arg2: memref<6x4xf32, #tpu.memory_space<vmem>>, %arg3: memref<6x1xf32, #tpu.memory_space<vmem>>, %arg4: memref<4x2xf32, #tpu.memory_space<vmem>>, %arg5: memref<4x1xf32, #tpu.memory_space<vmem>>, %arg6: memref<1x4x2048xf32, #tpu.memory_space<vmem>>, %arg7: memref<6x8x256xf32, #tpu.memory_space<vmem>>, %arg8: memref<2x8x256xf32, #tpu.memory_space<vmem>>, %arg9: memref<2x2048xf32, #tpu.memory_space<vmem>>) attributes {dimension_semantics = [#tpu.dimension_semantics<parallel>], iteration_bounds = array<i64: 2>, scalar_prefetch = 0 : i64, scratch_operands = 3 : i64, tpu.core_type = #tpu.core_type<tc>, window_params = [{transform_indices = @transform_0, window_bounds = array<i64: 1, 4, 2048>}, {pipeline_mode = #tpu.pipeline_mode<synchronous>, transform_indices = @transform_1, window_bounds = array<i64: 6, 4>}, {pipeline_mode = #tpu.pipeline_mode<synchronous>, transform_indices = @transform_2, window_bounds = array<i64: 6, 1>}, {pipeline_mode = #tpu.pipeline_mode<synchronous>, transform_indices = @transform_3, window_bounds = array<i64: 4, 2>}, {pipeline_mode = #tpu.pipeline_mode<synchronous>, transform_indices = @transform_4, window_bounds = array<i64: 4, 1>}, {transform_indices = @transform_5, window_bounds = array<i64: 1, 4, 2048>}]} {
    %c0 = arith.constant 0 : index
    %c0_0 = arith.constant 0 : index
    %c0_1 = arith.constant 0 : index
    %0 = vector.load %arg1[%c0, %c0_0, %c0_1] : memref<1x4x2048xf32, #tpu.memory_space<vmem>>, vector<1x4x2048xf32>
    %1 = vector.shape_cast %0 : vector<1x4x2048xf32> to vector<4x2048xf32>
    %c0_2 = arith.constant 0 : index
    %c0_3 = arith.constant 0 : index
    %2 = vector.load %arg2[%c0_2, %c0_3] : memref<6x4xf32, #tpu.memory_space<vmem>>, vector<6x4xf32>
    %cst = arith.constant dense<0.000000e+00> : vector<6x2048xf32>
    %3 = tpu.matmul %2, %1, %cst {dimension_numbers = #tpu.dot_dimension_numbers<[1], [0], [0], [1], [0, 0, 1, 1], [], []>} : vector<6x4xf32>, vector<4x2048xf32>, vector<6x2048xf32> -> vector<6x2048xf32>
    %c0_4 = arith.constant 0 : index
    %c0_5 = arith.constant 0 : index
    %4 = vector.load %arg3[%c0_4, %c0_5] : memref<6x1xf32, #tpu.memory_space<vmem>>, vector<6x1xf32>
    %5 = vector.broadcast %4 : vector<6x1xf32> to vector<6x2048xf32>
    %6 = arith.addf %3, %5 : vector<6x2048xf32>
    %7 = vector.extract_strided_slice %6 {offsets = [0, 0], sizes = [6, 256], strides = [1, 1]} : vector<6x2048xf32> to vector<6x256xf32>
    %c0_6 = arith.constant 0 : index
    %c0_7 = arith.constant 0 : index
    %c0_8 = arith.constant 0 : index
    %8 = vector.load %arg7[%c0_6, %c0_7, %c0_8] : memref<6x8x256xf32, #tpu.memory_space<vmem>>, vector<6x1x256xf32>
    %9 = vector.shape_cast %8 : vector<6x1x256xf32> to vector<6x256xf32>
    %10 = vector.shape_cast %7 : vector<6x256xf32> to vector<6x1x256xf32>
    tpu.vector_store %arg7[%c0_6, %c0_7, %c0_8], %10 {strides = array<i32>} : memref<6x8x256xf32, #tpu.memory_space<vmem>>, vector<6x1x256xf32>,
    %11 = vector.extract_strided_slice %6 {offsets = [0, 256], sizes = [6, 256], strides = [1, 1]} : vector<6x2048xf32> to vector<6x256xf32>
    %c0_9 = arith.constant 0 : index
    %c1 = arith.constant 1 : index
    %c0_10 = arith.constant 0 : index
    %12 = vector.load %arg7[%c0_9, %c1, %c0_10] : memref<6x8x256xf32, #tpu.memory_space<vmem>>, vector<6x1x256xf32>
    %13 = vector.shape_cast %12 : vector<6x1x256xf32> to vector<6x256xf32>
    %14 = vector.shape_cast %11 : vector<6x256xf32> to vector<6x1x256xf32>
    tpu.vector_store %arg7[%c0_9, %c1, %c0_10], %14 {strides = array<i32>} : memref<6x8x256xf32, #tpu.memory_space<vmem>>, vector<6x1x256xf32>,
    %15 = vector.extract_strided_slice %6 {offsets = [0, 512], sizes = [6, 256], strides = [1, 1]} : vector<6x2048xf32> to vector<6x256xf32>
    %c0_11 = arith.constant 0 : index
    %c2 = arith.constant 2 : index
    %c0_12 = arith.constant 0 : index
    %16 = vector.load %arg7[%c0_11, %c2, %c0_12] : memref<6x8x256xf32, #tpu.memory_space<vmem>>, vector<6x1x256xf32>
    %17 = vector.shape_cast %16 : vector<6x1x256xf32> to vector<6x256xf32>
    %18 = vector.shape_cast %15 : vector<6x256xf32> to vector<6x1x256xf32>
    tpu.vector_store %arg7[%c0_11, %c2, %c0_12], %18 {strides = array<i32>} : memref<6x8x256xf32, #tpu.memory_space<vmem>>, vector<6x1x256xf32>,
    %19 = vector.extract_strided_slice %6 {offsets = [0, 768], sizes = [6, 256], strides = [1, 1]} : vector<6x2048xf32> to vector<6x256xf32>
    %c0_13 = arith.constant 0 : index
    %c3 = arith.constant 3 : index
    %c0_14 = arith.constant 0 : index
    %20 = vector.load %arg7[%c0_13, %c3, %c0_14] : memref<6x8x256xf32, #tpu.memory_space<vmem>>, vector<6x1x256xf32>
    %21 = vector.shape_cast %20 : vector<6x1x256xf32> to vector<6x256xf32>
    %22 = vector.shape_cast %19 : vector<6x256xf32> to vector<6x1x256xf32>
    tpu.vector_store %arg7[%c0_13, %c3, %c0_14], %22 {strides = array<i32>} : memref<6x8x256xf32, #tpu.memory_space<vmem>>, vector<6x1x256xf32>,
    %23 = vector.extract_strided_slice %6 {offsets = [0, 1024], sizes = [6, 256], strides = [1, 1]} : vector<6x2048xf32> to vector<6x256xf32>
    %c0_15 = arith.constant 0 : index
    %c4 = arith.constant 4 : index
    %c0_16 = arith.constant 0 : index
    %24 = vector.load %arg7[%c0_15, %c4, %c0_16] : memref<6x8x256xf32, #tpu.memory_space<vmem>>, vector<6x1x256xf32>
    %25 = vector.shape_cast %24 : vector<6x1x256xf32> to vector<6x256xf32>
    %26 = vector.shape_cast %23 : vector<6x256xf32> to vector<6x1x256xf32>
    tpu.vector_store %arg7[%c0_15, %c4, %c0_16], %26 {strides = array<i32>} : memref<6x8x256xf32, #tpu.memory_space<vmem>>, vector<6x1x256xf32>,
    %27 = vector.extract_strided_slice %6 {offsets = [0, 1280], sizes = [6, 256], strides = [1, 1]} : vector<6x2048xf32> to vector<6x256xf32>
    %c0_17 = arith.constant 0 : index
    %c5 = arith.constant 5 : index
    %c0_18 = arith.constant 0 : index
    %28 = vector.load %arg7[%c0_17, %c5, %c0_18] : memref<6x8x256xf32, #tpu.memory_space<vmem>>, vector<6x1x256xf32>
    %29 = vector.shape_cast %28 : vector<6x1x256xf32> to vector<6x256xf32>
    %30 = vector.shape_cast %27 : vector<6x256xf32> to vector<6x1x256xf32>
    tpu.vector_store %arg7[%c0_17, %c5, %c0_18], %30 {strides = array<i32>} : memref<6x8x256xf32, #tpu.memory_space<vmem>>, vector<6x1x256xf32>,
    %31 = vector.extract_strided_slice %6 {offsets = [0, 1536], sizes = [6, 256], strides = [1, 1]} : vector<6x2048xf32> to vector<6x256xf32>
    %c0_19 = arith.constant 0 : index
    %c6 = arith.constant 6 : index
    %c0_20 = arith.constant 0 : index
    %32 = vector.load %arg7[%c0_19, %c6, %c0_20] : memref<6x8x256xf32, #tpu.memory_space<vmem>>, vector<6x1x256xf32>
    %33 = vector.shape_cast %32 : vector<6x1x256xf32> to vector<6x256xf32>
    %34 = vector.shape_cast %31 : vector<6x256xf32> to vector<6x1x256xf32>
    tpu.vector_store %arg7[%c0_19, %c6, %c0_20], %34 {strides = array<i32>} : memref<6x8x256xf32, #tpu.memory_space<vmem>>, vector<6x1x256xf32>,
    %35 = vector.extract_strided_slice %6 {offsets = [0, 1792], sizes = [6, 256], strides = [1, 1]} : vector<6x2048xf32> to vector<6x256xf32>
    %c0_21 = arith.constant 0 : index
    %c7 = arith.constant 7 : index
    %c0_22 = arith.constant 0 : index
    %36 = vector.load %arg7[%c0_21, %c7, %c0_22] : memref<6x8x256xf32, #tpu.memory_space<vmem>>, vector<6x1x256xf32>
    %37 = vector.shape_cast %36 : vector<6x1x256xf32> to vector<6x256xf32>
    %38 = vector.shape_cast %35 : vector<6x256xf32> to vector<6x1x256xf32>
    tpu.vector_store %arg7[%c0_21, %c7, %c0_22], %38 {strides = array<i32>} : memref<6x8x256xf32, #tpu.memory_space<vmem>>, vector<6x1x256xf32>,
    %c0_23 = arith.constant 0 : index
    %c0_24 = arith.constant 0 : index
    %c0_25 = arith.constant 0 : index
    %39 = vector.load %arg7[%c0_23, %c0_24, %c0_25] : memref<6x8x256xf32, #tpu.memory_space<vmem>>, vector<4x8x256xf32>
    %40 = tpu.iota {dimensions = array<i32: 2>} : vector<4x8x256xi32>
    %c255_i32 = arith.constant 255 : i32
    %41 = tpu.dynamic_rotate %39 by %c255_i32 dim 2 : vector<4x8x256xf32>, i32 -> vector<4x8x256xf32>
    %c1_i32 = arith.constant 1 : i32
    %42 = tpu.dynamic_rotate %39 by %c1_i32 dim 2 : vector<4x8x256xf32>, i32 -> vector<4x8x256xf32>
    %c255_i32_26 = arith.constant 255 : i32
    %43 = tpu.dynamic_rotate %40 by %c255_i32_26 dim 2 : vector<4x8x256xi32>, i32 -> vector<4x8x256xi32>
    %c1_i32_27 = arith.constant 1 : i32
    %44 = vector.broadcast %c1_i32_27 : i32 to vector<4x8x256xi32>
    %45 = arith.xori %40, %44 : vector<4x8x256xi32>
    %46 = arith.cmpi eq, %43, %45 : vector<4x8x256xi32>
    %47 = arith.select %46, %41, %42 : vector<4x8x256xi1>, vector<4x8x256xf32>
    %c0_i32 = arith.constant 0 : i32
    %48 = vector.broadcast %c0_i32 : i32 to vector<4x8x256xi32>
    %49 = arith.shrsi %40, %48 : vector<4x8x256xi32>
    %c1_i32_28 = arith.constant 1 : i32
    %50 = vector.broadcast %c1_i32_28 : i32 to vector<4x8x256xi32>
    %51 = arith.andi %49, %50 : vector<4x8x256xi32>
    %c1_i32_29 = arith.constant 1 : i32
    %52 = vector.broadcast %c1_i32_29 : i32 to vector<4x8x256xi32>
    %53 = arith.shrsi %40, %52 : vector<4x8x256xi32>
    %c1_i32_30 = arith.constant 1 : i32
    %54 = vector.broadcast %c1_i32_30 : i32 to vector<4x8x256xi32>
    %55 = arith.andi %53, %54 : vector<4x8x256xi32>
    %56 = arith.cmpi eq, %51, %55 : vector<4x8x256xi32>
    %57 = arith.maximumf %39, %47 : vector<4x8x256xf32>
    %58 = arith.minimumf %39, %47 : vector<4x8x256xf32>
    %59 = arith.select %56, %57, %58 : vector<4x8x256xi1>, vector<4x8x256xf32>
    %c254_i32 = arith.constant 254 : i32
    %60 = tpu.dynamic_rotate %59 by %c254_i32 dim 2 : vector<4x8x256xf32>, i32 -> vector<4x8x256xf32>
    %c2_i32 = arith.constant 2 : i32
    %61 = tpu.dynamic_rotate %59 by %c2_i32 dim 2 : vector<4x8x256xf32>, i32 -> vector<4x8x256xf32>
    %c254_i32_31 = arith.constant 254 : i32
    %62 = tpu.dynamic_rotate %40 by %c254_i32_31 dim 2 : vector<4x8x256xi32>, i32 -> vector<4x8x256xi32>
    %c2_i32_32 = arith.constant 2 : i32
    %63 = vector.broadcast %c2_i32_32 : i32 to vector<4x8x256xi32>
    %64 = arith.xori %40, %63 : vector<4x8x256xi32>
    %65 = arith.cmpi eq, %62, %64 : vector<4x8x256xi32>
    %66 = arith.select %65, %60, %61 : vector<4x8x256xi1>, vector<4x8x256xf32>
    %c1_i32_33 = arith.constant 1 : i32
    %67 = vector.broadcast %c1_i32_33 : i32 to vector<4x8x256xi32>
    %68 = arith.shrsi %40, %67 : vector<4x8x256xi32>
    %c1_i32_34 = arith.constant 1 : i32
    %69 = vector.broadcast %c1_i32_34 : i32 to vector<4x8x256xi32>
    %70 = arith.andi %68, %69 : vector<4x8x256xi32>
    %c2_i32_35 = arith.constant 2 : i32
    %71 = vector.broadcast %c2_i32_35 : i32 to vector<4x8x256xi32>
    %72 = arith.shrsi %40, %71 : vector<4x8x256xi32>
    %c1_i32_36 = arith.constant 1 : i32
    %73 = vector.broadcast %c1_i32_36 : i32 to vector<4x8x256xi32>
    %74 = arith.andi %72, %73 : vector<4x8x256xi32>
    %75 = arith.cmpi eq, %70, %74 : vector<4x8x256xi32>
    %76 = arith.maximumf %59, %66 : vector<4x8x256xf32>
    %77 = arith.minimumf %59, %66 : vector<4x8x256xf32>
    %78 = arith.select %75, %76, %77 : vector<4x8x256xi1>, vector<4x8x256xf32>
    %c255_i32_37 = arith.constant 255 : i32
    %79 = tpu.dynamic_rotate %78 by %c255_i32_37 dim 2 : vector<4x8x256xf32>, i32 -> vector<4x8x256xf32>
    %c1_i32_38 = arith.constant 1 : i32
    %80 = tpu.dynamic_rotate %78 by %c1_i32_38 dim 2 : vector<4x8x256xf32>, i32 -> vector<4x8x256xf32>
    %c255_i32_39 = arith.constant 255 : i32
    %81 = tpu.dynamic_rotate %40 by %c255_i32_39 dim 2 : vector<4x8x256xi32>, i32 -> vector<4x8x256xi32>
    %c1_i32_40 = arith.constant 1 : i32
    %82 = vector.broadcast %c1_i32_40 : i32 to vector<4x8x256xi32>
    %83 = arith.xori %40, %82 : vector<4x8x256xi32>
    %84 = arith.cmpi eq, %81, %83 : vector<4x8x256xi32>
    %85 = arith.select %84, %79, %80 : vector<4x8x256xi1>, vector<4x8x256xf32>
    %c0_i32_41 = arith.constant 0 : i32
    %86 = vector.broadcast %c0_i32_41 : i32 to vector<4x8x256xi32>
    %87 = arith.shrsi %40, %86 : vector<4x8x256xi32>
    %c1_i32_42 = arith.constant 1 : i32
    %88 = vector.broadcast %c1_i32_42 : i32 to vector<4x8x256xi32>
    %89 = arith.andi %87, %88 : vector<4x8x256xi32>
    %c2_i32_43 = arith.constant 2 : i32
    %90 = vector.broadcast %c2_i32_43 : i32 to vector<4x8x256xi32>
    %91 = arith.shrsi %40, %90 : vector<4x8x256xi32>
    %c1_i32_44 = arith.constant 1 : i32
    %92 = vector.broadcast %c1_i32_44 : i32 to vector<4x8x256xi32>
    %93 = arith.andi %91, %92 : vector<4x8x256xi32>
    %94 = arith.cmpi eq, %89, %93 : vector<4x8x256xi32>
    %95 = arith.maximumf %78, %85 : vector<4x8x256xf32>
    %96 = arith.minimumf %78, %85 : vector<4x8x256xf32>
    %97 = arith.select %94, %95, %96 : vector<4x8x256xi1>, vector<4x8x256xf32>
    %c252_i32 = arith.constant 252 : i32
    %98 = tpu.dynamic_rotate %97 by %c252_i32 dim 2 : vector<4x8x256xf32>, i32 -> vector<4x8x256xf32>
    %c4_i32 = arith.constant 4 : i32
    %99 = tpu.dynamic_rotate %97 by %c4_i32 dim 2 : vector<4x8x256xf32>, i32 -> vector<4x8x256xf32>
    %c252_i32_45 = arith.constant 252 : i32
    %100 = tpu.dynamic_rotate %40 by %c252_i32_45 dim 2 : vector<4x8x256xi32>, i32 -> vector<4x8x256xi32>
    %c4_i32_46 = arith.constant 4 : i32
    %101 = vector.broadcast %c4_i32_46 : i32 to vector<4x8x256xi32>
    %102 = arith.xori %40, %101 : vector<4x8x256xi32>
    %103 = arith.cmpi eq, %100, %102 : vector<4x8x256xi32>
    %104 = arith.select %103, %98, %99 : vector<4x8x256xi1>, vector<4x8x256xf32>
    %c2_i32_47 = arith.constant 2 : i32
    %105 = vector.broadcast %c2_i32_47 : i32 to vector<4x8x256xi32>
    %106 = arith.shrsi %40, %105 : vector<4x8x256xi32>
    %c1_i32_48 = arith.constant 1 : i32
    %107 = vector.broadcast %c1_i32_48 : i32 to vector<4x8x256xi32>
    %108 = arith.andi %106, %107 : vector<4x8x256xi32>
    %c3_i32 = arith.constant 3 : i32
    %109 = vector.broadcast %c3_i32 : i32 to vector<4x8x256xi32>
    %110 = arith.shrsi %40, %109 : vector<4x8x256xi32>
    %c1_i32_49 = arith.constant 1 : i32
    %111 = vector.broadcast %c1_i32_49 : i32 to vector<4x8x256xi32>
    %112 = arith.andi %110, %111 : vector<4x8x256xi32>
    %113 = arith.cmpi eq, %108, %112 : vector<4x8x256xi32>
    %114 = arith.maximumf %97, %104 : vector<4x8x256xf32>
    %115 = arith.minimumf %97, %104 : vector<4x8x256xf32>
    %116 = arith.select %113, %114, %115 : vector<4x8x256xi1>, vector<4x8x256xf32>
    %c254_i32_50 = arith.constant 254 : i32
    %117 = tpu.dynamic_rotate %116 by %c254_i32_50 dim 2 : vector<4x8x256xf32>, i32 -> vector<4x8x256xf32>
    %c2_i32_51 = arith.constant 2 : i32
    %118 = tpu.dynamic_rotate %116 by %c2_i32_51 dim 2 : vector<4x8x256xf32>, i32 -> vector<4x8x256xf32>
    %c254_i32_52 = arith.constant 254 : i32
    %119 = tpu.dynamic_rotate %40 by %c254_i32_52 dim 2 : vector<4x8x256xi32>, i32 -> vector<4x8x256xi32>
    %c2_i32_53 = arith.constant 2 : i32
    %120 = vector.broadcast %c2_i32_53 : i32 to vector<4x8x256xi32>
    %121 = arith.xori %40, %120 : vector<4x8x256xi32>
    %122 = arith.cmpi eq, %119, %121 : vector<4x8x256xi32>
    %123 = arith.select %122, %117, %118 : vector<4x8x256xi1>, vector<4x8x256xf32>
    %c1_i32_54 = arith.constant 1 : i32
    %124 = vector.broadcast %c1_i32_54 : i32 to vector<4x8x256xi32>
    %125 = arith.shrsi %40, %124 : vector<4x8x256xi32>
    %c1_i32_55 = arith.constant 1 : i32
    %126 = vector.broadcast %c1_i32_55 : i32 to vector<4x8x256xi32>
    %127 = arith.andi %125, %126 : vector<4x8x256xi32>
    %c3_i32_56 = arith.constant 3 : i32
    %128 = vector.broadcast %c3_i32_56 : i32 to vector<4x8x256xi32>
    %129 = arith.shrsi %40, %128 : vector<4x8x256xi32>
    %c1_i32_57 = arith.constant 1 : i32
    %130 = vector.broadcast %c1_i32_57 : i32 to vector<4x8x256xi32>
    %131 = arith.andi %129, %130 : vector<4x8x256xi32>
    %132 = arith.cmpi eq, %127, %131 : vector<4x8x256xi32>
    %133 = arith.maximumf %116, %123 : vector<4x8x256xf32>
    %134 = arith.minimumf %116, %123 : vector<4x8x256xf32>
    %135 = arith.select %132, %133, %134 : vector<4x8x256xi1>, vector<4x8x256xf32>
    %c255_i32_58 = arith.constant 255 : i32
    %136 = tpu.dynamic_rotate %135 by %c255_i32_58 dim 2 : vector<4x8x256xf32>, i32 -> vector<4x8x256xf32>
    %c1_i32_59 = arith.constant 1 : i32
    %137 = tpu.dynamic_rotate %135 by %c1_i32_59 dim 2 : vector<4x8x256xf32>, i32 -> vector<4x8x256xf32>
    %c255_i32_60 = arith.constant 255 : i32
    %138 = tpu.dynamic_rotate %40 by %c255_i32_60 dim 2 : vector<4x8x256xi32>, i32 -> vector<4x8x256xi32>
    %c1_i32_61 = arith.constant 1 : i32
    %139 = vector.broadcast %c1_i32_61 : i32 to vector<4x8x256xi32>
    %140 = arith.xori %40, %139 : vector<4x8x256xi32>
    %141 = arith.cmpi eq, %138, %140 : vector<4x8x256xi32>
    %142 = arith.select %141, %136, %137 : vector<4x8x256xi1>, vector<4x8x256xf32>
    %c0_i32_62 = arith.constant 0 : i32
    %143 = vector.broadcast %c0_i32_62 : i32 to vector<4x8x256xi32>
    %144 = arith.shrsi %40, %143 : vector<4x8x256xi32>
    %c1_i32_63 = arith.constant 1 : i32
    %145 = vector.broadcast %c1_i32_63 : i32 to vector<4x8x256xi32>
    %146 = arith.andi %144, %145 : vector<4x8x256xi32>
    %c3_i32_64 = arith.constant 3 : i32
    %147 = vector.broadcast %c3_i32_64 : i32 to vector<4x8x256xi32>
    %148 = arith.shrsi %40, %147 : vector<4x8x256xi32>
    %c1_i32_65 = arith.constant 1 : i32
    %149 = vector.broadcast %c1_i32_65 : i32 to vector<4x8x256xi32>
    %150 = arith.andi %148, %149 : vector<4x8x256xi32>
    %151 = arith.cmpi eq, %146, %150 : vector<4x8x256xi32>
    %152 = arith.maximumf %135, %142 : vector<4x8x256xf32>
    %153 = arith.minimumf %135, %142 : vector<4x8x256xf32>
    %154 = arith.select %151, %152, %153 : vector<4x8x256xi1>, vector<4x8x256xf32>
    %c248_i32 = arith.constant 248 : i32
    %155 = tpu.dynamic_rotate %154 by %c248_i32 dim 2 : vector<4x8x256xf32>, i32 -> vector<4x8x256xf32>
    %c8_i32 = arith.constant 8 : i32
    %156 = tpu.dynamic_rotate %154 by %c8_i32 dim 2 : vector<4x8x256xf32>, i32 -> vector<4x8x256xf32>
    %c248_i32_66 = arith.constant 248 : i32
    %157 = tpu.dynamic_rotate %40 by %c248_i32_66 dim 2 : vector<4x8x256xi32>, i32 -> vector<4x8x256xi32>
    %c8_i32_67 = arith.constant 8 : i32
    %158 = vector.broadcast %c8_i32_67 : i32 to vector<4x8x256xi32>
    %159 = arith.xori %40, %158 : vector<4x8x256xi32>
    %160 = arith.cmpi eq, %157, %159 : vector<4x8x256xi32>
    %161 = arith.select %160, %155, %156 : vector<4x8x256xi1>, vector<4x8x256xf32>
    %c3_i32_68 = arith.constant 3 : i32
    %162 = vector.broadcast %c3_i32_68 : i32 to vector<4x8x256xi32>
    %163 = arith.shrsi %40, %162 : vector<4x8x256xi32>
    %c1_i32_69 = arith.constant 1 : i32
    %164 = vector.broadcast %c1_i32_69 : i32 to vector<4x8x256xi32>
    %165 = arith.andi %163, %164 : vector<4x8x256xi32>
    %c4_i32_70 = arith.constant 4 : i32
    %166 = vector.broadcast %c4_i32_70 : i32 to vector<4x8x256xi32>
    %167 = arith.shrsi %40, %166 : vector<4x8x256xi32>
    %c1_i32_71 = arith.constant 1 : i32
    %168 = vector.broadcast %c1_i32_71 : i32 to vector<4x8x256xi32>
    %169 = arith.andi %167, %168 : vector<4x8x256xi32>
    %170 = arith.cmpi eq, %165, %169 : vector<4x8x256xi32>
    %171 = arith.maximumf %154, %161 : vector<4x8x256xf32>
    %172 = arith.minimumf %154, %161 : vector<4x8x256xf32>
    %173 = arith.select %170, %171, %172 : vector<4x8x256xi1>, vector<4x8x256xf32>
    %c252_i32_72 = arith.constant 252 : i32
    %174 = tpu.dynamic_rotate %173 by %c252_i32_72 dim 2 : vector<4x8x256xf32>, i32 -> vector<4x8x256xf32>
    %c4_i32_73 = arith.constant 4 : i32
    %175 = tpu.dynamic_rotate %173 by %c4_i32_73 dim 2 : vector<4x8x256xf32>, i32 -> vector<4x8x256xf32>
    %c252_i32_74 = arith.constant 252 : i32
    %176 = tpu.dynamic_rotate %40 by %c252_i32_74 dim 2 : vector<4x8x256xi32>, i32 -> vector<4x8x256xi32>
    %c4_i32_75 = arith.constant 4 : i32
    %177 = vector.broadcast %c4_i32_75 : i32 to vector<4x8x256xi32>
    %178 = arith.xori %40, %177 : vector<4x8x256xi32>
    %179 = arith.cmpi eq, %176, %178 : vector<4x8x256xi32>
    %180 = arith.select %179, %174, %175 : vector<4x8x256xi1>, vector<4x8x256xf32>
    %c2_i32_76 = arith.constant 2 : i32
    %181 = vector.broadcast %c2_i32_76 : i32 to vector<4x8x256xi32>
    %182 = arith.shrsi %40, %181 : vector<4x8x256xi32>
    %c1_i32_77 = arith.constant 1 : i32
    %183 = vector.broadcast %c1_i32_77 : i32 to vector<4x8x256xi32>
    %184 = arith.andi %182, %183 : vector<4x8x256xi32>
    %c4_i32_78 = arith.constant 4 : i32
    %185 = vector.broadcast %c4_i32_78 : i32 to vector<4x8x256xi32>
    %186 = arith.shrsi %40, %185 : vector<4x8x256xi32>
    %c1_i32_79 = arith.constant 1 : i32
    %187 = vector.broadcast %c1_i32_79 : i32 to vector<4x8x256xi32>
    %188 = arith.andi %186, %187 : vector<4x8x256xi32>
    %189 = arith.cmpi eq, %184, %188 : vector<4x8x256xi32>
    %190 = arith.maximumf %173, %180 : vector<4x8x256xf32>
    %191 = arith.minimumf %173, %180 : vector<4x8x256xf32>
    %192 = arith.select %189, %190, %191 : vector<4x8x256xi1>, vector<4x8x256xf32>
    %c254_i32_80 = arith.constant 254 : i32
    %193 = tpu.dynamic_rotate %192 by %c254_i32_80 dim 2 : vector<4x8x256xf32>, i32 -> vector<4x8x256xf32>
    %c2_i32_81 = arith.constant 2 : i32
    %194 = tpu.dynamic_rotate %192 by %c2_i32_81 dim 2 : vector<4x8x256xf32>, i32 -> vector<4x8x256xf32>
    %c254_i32_82 = arith.constant 254 : i32
    %195 = tpu.dynamic_rotate %40 by %c254_i32_82 dim 2 : vector<4x8x256xi32>, i32 -> vector<4x8x256xi32>
    %c2_i32_83 = arith.constant 2 : i32
    %196 = vector.broadcast %c2_i32_83 : i32 to vector<4x8x256xi32>
    %197 = arith.xori %40, %196 : vector<4x8x256xi32>
    %198 = arith.cmpi eq, %195, %197 : vector<4x8x256xi32>
    %199 = arith.select %198, %193, %194 : vector<4x8x256xi1>, vector<4x8x256xf32>
    %c1_i32_84 = arith.constant 1 : i32
    %200 = vector.broadcast %c1_i32_84 : i32 to vector<4x8x256xi32>
    %201 = arith.shrsi %40, %200 : vector<4x8x256xi32>
    %c1_i32_85 = arith.constant 1 : i32
    %202 = vector.broadcast %c1_i32_85 : i32 to vector<4x8x256xi32>
    %203 = arith.andi %201, %202 : vector<4x8x256xi32>
    %c4_i32_86 = arith.constant 4 : i32
    %204 = vector.broadcast %c4_i32_86 : i32 to vector<4x8x256xi32>
    %205 = arith.shrsi %40, %204 : vector<4x8x256xi32>
    %c1_i32_87 = arith.constant 1 : i32
    %206 = vector.broadcast %c1_i32_87 : i32 to vector<4x8x256xi32>
    %207 = arith.andi %205, %206 : vector<4x8x256xi32>
    %208 = arith.cmpi eq, %203, %207 : vector<4x8x256xi32>
    %209 = arith.maximumf %192, %199 : vector<4x8x256xf32>
    %210 = arith.minimumf %192, %199 : vector<4x8x256xf32>
    %211 = arith.select %208, %209, %210 : vector<4x8x256xi1>, vector<4x8x256xf32>
    %c255_i32_88 = arith.constant 255 : i32
    %212 = tpu.dynamic_rotate %211 by %c255_i32_88 dim 2 : vector<4x8x256xf32>, i32 -> vector<4x8x256xf32>
    %c1_i32_89 = arith.constant 1 : i32
    %213 = tpu.dynamic_rotate %211 by %c1_i32_89 dim 2 : vector<4x8x256xf32>, i32 -> vector<4x8x256xf32>
    %c255_i32_90 = arith.constant 255 : i32
    %214 = tpu.dynamic_rotate %40 by %c255_i32_90 dim 2 : vector<4x8x256xi32>, i32 -> vector<4x8x256xi32>
    %c1_i32_91 = arith.constant 1 : i32
    %215 = vector.broadcast %c1_i32_91 : i32 to vector<4x8x256xi32>
    %216 = arith.xori %40, %215 : vector<4x8x256xi32>
    %217 = arith.cmpi eq, %214, %216 : vector<4x8x256xi32>
    %218 = arith.select %217, %212, %213 : vector<4x8x256xi1>, vector<4x8x256xf32>
    %c0_i32_92 = arith.constant 0 : i32
    %219 = vector.broadcast %c0_i32_92 : i32 to vector<4x8x256xi32>
    %220 = arith.shrsi %40, %219 : vector<4x8x256xi32>
    %c1_i32_93 = arith.constant 1 : i32
    %221 = vector.broadcast %c1_i32_93 : i32 to vector<4x8x256xi32>
    %222 = arith.andi %220, %221 : vector<4x8x256xi32>
    %c4_i32_94 = arith.constant 4 : i32
    %223 = vector.broadcast %c4_i32_94 : i32 to vector<4x8x256xi32>
    %224 = arith.shrsi %40, %223 : vector<4x8x256xi32>
    %c1_i32_95 = arith.constant 1 : i32
    %225 = vector.broadcast %c1_i32_95 : i32 to vector<4x8x256xi32>
    %226 = arith.andi %224, %225 : vector<4x8x256xi32>
    %227 = arith.cmpi eq, %222, %226 : vector<4x8x256xi32>
    %228 = arith.maximumf %211, %218 : vector<4x8x256xf32>
    %229 = arith.minimumf %211, %218 : vector<4x8x256xf32>
    %230 = arith.select %227, %228, %229 : vector<4x8x256xi1>, vector<4x8x256xf32>
    %c240_i32 = arith.constant 240 : i32
    %231 = tpu.dynamic_rotate %230 by %c240_i32 dim 2 : vector<4x8x256xf32>, i32 -> vector<4x8x256xf32>
    %c16_i32 = arith.constant 16 : i32
    %232 = tpu.dynamic_rotate %230 by %c16_i32 dim 2 : vector<4x8x256xf32>, i32 -> vector<4x8x256xf32>
    %c240_i32_96 = arith.constant 240 : i32
    %233 = tpu.dynamic_rotate %40 by %c240_i32_96 dim 2 : vector<4x8x256xi32>, i32 -> vector<4x8x256xi32>
    %c16_i32_97 = arith.constant 16 : i32
    %234 = vector.broadcast %c16_i32_97 : i32 to vector<4x8x256xi32>
    %235 = arith.xori %40, %234 : vector<4x8x256xi32>
    %236 = arith.cmpi eq, %233, %235 : vector<4x8x256xi32>
    %237 = arith.select %236, %231, %232 : vector<4x8x256xi1>, vector<4x8x256xf32>
    %c4_i32_98 = arith.constant 4 : i32
    %238 = vector.broadcast %c4_i32_98 : i32 to vector<4x8x256xi32>
    %239 = arith.shrsi %40, %238 : vector<4x8x256xi32>
    %c1_i32_99 = arith.constant 1 : i32
    %240 = vector.broadcast %c1_i32_99 : i32 to vector<4x8x256xi32>
    %241 = arith.andi %239, %240 : vector<4x8x256xi32>
    %c5_i32 = arith.constant 5 : i32
    %242 = vector.broadcast %c5_i32 : i32 to vector<4x8x256xi32>
    %243 = arith.shrsi %40, %242 : vector<4x8x256xi32>
    %c1_i32_100 = arith.constant 1 : i32
    %244 = vector.broadcast %c1_i32_100 : i32 to vector<4x8x256xi32>
    %245 = arith.andi %243, %244 : vector<4x8x256xi32>
    %246 = arith.cmpi eq, %241, %245 : vector<4x8x256xi32>
    %247 = arith.maximumf %230, %237 : vector<4x8x256xf32>
    %248 = arith.minimumf %230, %237 : vector<4x8x256xf32>
    %249 = arith.select %246, %247, %248 : vector<4x8x256xi1>, vector<4x8x256xf32>
    %c248_i32_101 = arith.constant 248 : i32
    %250 = tpu.dynamic_rotate %249 by %c248_i32_101 dim 2 : vector<4x8x256xf32>, i32 -> vector<4x8x256xf32>
    %c8_i32_102 = arith.constant 8 : i32
    %251 = tpu.dynamic_rotate %249 by %c8_i32_102 dim 2 : vector<4x8x256xf32>, i32 -> vector<4x8x256xf32>
    %c248_i32_103 = arith.constant 248 : i32
    %252 = tpu.dynamic_rotate %40 by %c248_i32_103 dim 2 : vector<4x8x256xi32>, i32 -> vector<4x8x256xi32>
    %c8_i32_104 = arith.constant 8 : i32
    %253 = vector.broadcast %c8_i32_104 : i32 to vector<4x8x256xi32>
    %254 = arith.xori %40, %253 : vector<4x8x256xi32>
    %255 = arith.cmpi eq, %252, %254 : vector<4x8x256xi32>
    %256 = arith.select %255, %250, %251 : vector<4x8x256xi1>, vector<4x8x256xf32>
    %c3_i32_105 = arith.constant 3 : i32
    %257 = vector.broadcast %c3_i32_105 : i32 to vector<4x8x256xi32>
    %258 = arith.shrsi %40, %257 : vector<4x8x256xi32>
    %c1_i32_106 = arith.constant 1 : i32
    %259 = vector.broadcast %c1_i32_106 : i32 to vector<4x8x256xi32>
    %260 = arith.andi %258, %259 : vector<4x8x256xi32>
    %c5_i32_107 = arith.constant 5 : i32
    %261 = vector.broadcast %c5_i32_107 : i32 to vector<4x8x256xi32>
    %262 = arith.shrsi %40, %261 : vector<4x8x256xi32>
    %c1_i32_108 = arith.constant 1 : i32
    %263 = vector.broadcast %c1_i32_108 : i32 to vector<4x8x256xi32>
    %264 = arith.andi %262, %263 : vector<4x8x256xi32>
    %265 = arith.cmpi eq, %260, %264 : vector<4x8x256xi32>
    %266 = arith.maximumf %249, %256 : vector<4x8x256xf32>
    %267 = arith.minimumf %249, %256 : vector<4x8x256xf32>
    %268 = arith.select %265, %266, %267 : vector<4x8x256xi1>, vector<4x8x256xf32>
    %c252_i32_109 = arith.constant 252 : i32
    %269 = tpu.dynamic_rotate %268 by %c252_i32_109 dim 2 : vector<4x8x256xf32>, i32 -> vector<4x8x256xf32>
    %c4_i32_110 = arith.constant 4 : i32
    %270 = tpu.dynamic_rotate %268 by %c4_i32_110 dim 2 : vector<4x8x256xf32>, i32 -> vector<4x8x256xf32>
    %c252_i32_111 = arith.constant 252 : i32
    %271 = tpu.dynamic_rotate %40 by %c252_i32_111 dim 2 : vector<4x8x256xi32>, i32 -> vector<4x8x256xi32>
    %c4_i32_112 = arith.constant 4 : i32
    %272 = vector.broadcast %c4_i32_112 : i32 to vector<4x8x256xi32>
    %273 = arith.xori %40, %272 : vector<4x8x256xi32>
    %274 = arith.cmpi eq, %271, %273 : vector<4x8x256xi32>
    %275 = arith.select %274, %269, %270 : vector<4x8x256xi1>, vector<4x8x256xf32>
    %c2_i32_113 = arith.constant 2 : i32
    %276 = vector.broadcast %c2_i32_113 : i32 to vector<4x8x256xi32>
    %277 = arith.shrsi %40, %276 : vector<4x8x256xi32>
    %c1_i32_114 = arith.constant 1 : i32
    %278 = vector.broadcast %c1_i32_114 : i32 to vector<4x8x256xi32>
    %279 = arith.andi %277, %278 : vector<4x8x256xi32>
    %c5_i32_115 = arith.constant 5 : i32
    %280 = vector.broadcast %c5_i32_115 : i32 to vector<4x8x256xi32>
    %281 = arith.shrsi %40, %280 : vector<4x8x256xi32>
    %c1_i32_116 = arith.constant 1 : i32
    %282 = vector.broadcast %c1_i32_116 : i32 to vector<4x8x256xi32>
    %283 = arith.andi %281, %282 : vector<4x8x256xi32>
    %284 = arith.cmpi eq, %279, %283 : vector<4x8x256xi32>
    %285 = arith.maximumf %268, %275 : vector<4x8x256xf32>
    %286 = arith.minimumf %268, %275 : vector<4x8x256xf32>
    %287 = arith.select %284, %285, %286 : vector<4x8x256xi1>, vector<4x8x256xf32>
    %c254_i32_117 = arith.constant 254 : i32
    %288 = tpu.dynamic_rotate %287 by %c254_i32_117 dim 2 : vector<4x8x256xf32>, i32 -> vector<4x8x256xf32>
    %c2_i32_118 = arith.constant 2 : i32
    %289 = tpu.dynamic_rotate %287 by %c2_i32_118 dim 2 : vector<4x8x256xf32>, i32 -> vector<4x8x256xf32>
    %c254_i32_119 = arith.constant 254 : i32
    %290 = tpu.dynamic_rotate %40 by %c254_i32_119 dim 2 : vector<4x8x256xi32>, i32 -> vector<4x8x256xi32>
    %c2_i32_120 = arith.constant 2 : i32
    %291 = vector.broadcast %c2_i32_120 : i32 to vector<4x8x256xi32>
    %292 = arith.xori %40, %291 : vector<4x8x256xi32>
    %293 = arith.cmpi eq, %290, %292 : vector<4x8x256xi32>
    %294 = arith.select %293, %288, %289 : vector<4x8x256xi1>, vector<4x8x256xf32>
    %c1_i32_121 = arith.constant 1 : i32
    %295 = vector.broadcast %c1_i32_121 : i32 to vector<4x8x256xi32>
    %296 = arith.shrsi %40, %295 : vector<4x8x256xi32>
    %c1_i32_122 = arith.constant 1 : i32
    %297 = vector.broadcast %c1_i32_122 : i32 to vector<4x8x256xi32>
    %298 = arith.andi %296, %297 : vector<4x8x256xi32>
    %c5_i32_123 = arith.constant 5 : i32
    %299 = vector.broadcast %c5_i32_123 : i32 to vector<4x8x256xi32>
    %300 = arith.shrsi %40, %299 : vector<4x8x256xi32>
    %c1_i32_124 = arith.constant 1 : i32
    %301 = vector.broadcast %c1_i32_124 : i32 to vector<4x8x256xi32>
    %302 = arith.andi %300, %301 : vector<4x8x256xi32>
    %303 = arith.cmpi eq, %298, %302 : vector<4x8x256xi32>
    %304 = arith.maximumf %287, %294 : vector<4x8x256xf32>
    %305 = arith.minimumf %287, %294 : vector<4x8x256xf32>
    %306 = arith.select %303, %304, %305 : vector<4x8x256xi1>, vector<4x8x256xf32>
    %c255_i32_125 = arith.constant 255 : i32
    %307 = tpu.dynamic_rotate %306 by %c255_i32_125 dim 2 : vector<4x8x256xf32>, i32 -> vector<4x8x256xf32>
    %c1_i32_126 = arith.constant 1 : i32
    %308 = tpu.dynamic_rotate %306 by %c1_i32_126 dim 2 : vector<4x8x256xf32>, i32 -> vector<4x8x256xf32>
    %c255_i32_127 = arith.constant 255 : i32
    %309 = tpu.dynamic_rotate %40 by %c255_i32_127 dim 2 : vector<4x8x256xi32>, i32 -> vector<4x8x256xi32>
    %c1_i32_128 = arith.constant 1 : i32
    %310 = vector.broadcast %c1_i32_128 : i32 to vector<4x8x256xi32>
    %311 = arith.xori %40, %310 : vector<4x8x256xi32>
    %312 = arith.cmpi eq, %309, %311 : vector<4x8x256xi32>
    %313 = arith.select %312, %307, %308 : vector<4x8x256xi1>, vector<4x8x256xf32>
    %c0_i32_129 = arith.constant 0 : i32
    %314 = vector.broadcast %c0_i32_129 : i32 to vector<4x8x256xi32>
    %315 = arith.shrsi %40, %314 : vector<4x8x256xi32>
    %c1_i32_130 = arith.constant 1 : i32
    %316 = vector.broadcast %c1_i32_130 : i32 to vector<4x8x256xi32>
    %317 = arith.andi %315, %316 : vector<4x8x256xi32>
    %c5_i32_131 = arith.constant 5 : i32
    %318 = vector.broadcast %c5_i32_131 : i32 to vector<4x8x256xi32>
    %319 = arith.shrsi %40, %318 : vector<4x8x256xi32>
    %c1_i32_132 = arith.constant 1 : i32
    %320 = vector.broadcast %c1_i32_132 : i32 to vector<4x8x256xi32>
    %321 = arith.andi %319, %320 : vector<4x8x256xi32>
    %322 = arith.cmpi eq, %317, %321 : vector<4x8x256xi32>
    %323 = arith.maximumf %306, %313 : vector<4x8x256xf32>
    %324 = arith.minimumf %306, %313 : vector<4x8x256xf32>
    %325 = arith.select %322, %323, %324 : vector<4x8x256xi1>, vector<4x8x256xf32>
    %c224_i32 = arith.constant 224 : i32
    %326 = tpu.dynamic_rotate %325 by %c224_i32 dim 2 : vector<4x8x256xf32>, i32 -> vector<4x8x256xf32>
    %c32_i32 = arith.constant 32 : i32
    %327 = tpu.dynamic_rotate %325 by %c32_i32 dim 2 : vector<4x8x256xf32>, i32 -> vector<4x8x256xf32>
    %c224_i32_133 = arith.constant 224 : i32
    %328 = tpu.dynamic_rotate %40 by %c224_i32_133 dim 2 : vector<4x8x256xi32>, i32 -> vector<4x8x256xi32>
    %c32_i32_134 = arith.constant 32 : i32
    %329 = vector.broadcast %c32_i32_134 : i32 to vector<4x8x256xi32>
    %330 = arith.xori %40, %329 : vector<4x8x256xi32>
    %331 = arith.cmpi eq, %328, %330 : vector<4x8x256xi32>
    %332 = arith.select %331, %326, %327 : vector<4x8x256xi1>, vector<4x8x256xf32>
    %c5_i32_135 = arith.constant 5 : i32
    %333 = vector.broadcast %c5_i32_135 : i32 to vector<4x8x256xi32>
    %334 = arith.shrsi %40, %333 : vector<4x8x256xi32>
    %c1_i32_136 = arith.constant 1 : i32
    %335 = vector.broadcast %c1_i32_136 : i32 to vector<4x8x256xi32>
    %336 = arith.andi %334, %335 : vector<4x8x256xi32>
    %c6_i32 = arith.constant 6 : i32
    %337 = vector.broadcast %c6_i32 : i32 to vector<4x8x256xi32>
    %338 = arith.shrsi %40, %337 : vector<4x8x256xi32>
    %c1_i32_137 = arith.constant 1 : i32
    %339 = vector.broadcast %c1_i32_137 : i32 to vector<4x8x256xi32>
    %340 = arith.andi %338, %339 : vector<4x8x256xi32>
    %341 = arith.cmpi eq, %336, %340 : vector<4x8x256xi32>
    %342 = arith.maximumf %325, %332 : vector<4x8x256xf32>
    %343 = arith.minimumf %325, %332 : vector<4x8x256xf32>
    %344 = arith.select %341, %342, %343 : vector<4x8x256xi1>, vector<4x8x256xf32>
    %c240_i32_138 = arith.constant 240 : i32
    %345 = tpu.dynamic_rotate %344 by %c240_i32_138 dim 2 : vector<4x8x256xf32>, i32 -> vector<4x8x256xf32>
    %c16_i32_139 = arith.constant 16 : i32
    %346 = tpu.dynamic_rotate %344 by %c16_i32_139 dim 2 : vector<4x8x256xf32>, i32 -> vector<4x8x256xf32>
    %c240_i32_140 = arith.constant 240 : i32
    %347 = tpu.dynamic_rotate %40 by %c240_i32_140 dim 2 : vector<4x8x256xi32>, i32 -> vector<4x8x256xi32>
    %c16_i32_141 = arith.constant 16 : i32
    %348 = vector.broadcast %c16_i32_141 : i32 to vector<4x8x256xi32>
    %349 = arith.xori %40, %348 : vector<4x8x256xi32>
    %350 = arith.cmpi eq, %347, %349 : vector<4x8x256xi32>
    %351 = arith.select %350, %345, %346 : vector<4x8x256xi1>, vector<4x8x256xf32>
    %c4_i32_142 = arith.constant 4 : i32
    %352 = vector.broadcast %c4_i32_142 : i32 to vector<4x8x256xi32>
    %353 = arith.shrsi %40, %352 : vector<4x8x256xi32>
    %c1_i32_143 = arith.constant 1 : i32
    %354 = vector.broadcast %c1_i32_143 : i32 to vector<4x8x256xi32>
    %355 = arith.andi %353, %354 : vector<4x8x256xi32>
    %c6_i32_144 = arith.constant 6 : i32
    %356 = vector.broadcast %c6_i32_144 : i32 to vector<4x8x256xi32>
    %357 = arith.shrsi %40, %356 : vector<4x8x256xi32>
    %c1_i32_145 = arith.constant 1 : i32
    %358 = vector.broadcast %c1_i32_145 : i32 to vector<4x8x256xi32>
    %359 = arith.andi %357, %358 : vector<4x8x256xi32>
    %360 = arith.cmpi eq, %355, %359 : vector<4x8x256xi32>
    %361 = arith.maximumf %344, %351 : vector<4x8x256xf32>
    %362 = arith.minimumf %344, %351 : vector<4x8x256xf32>
    %363 = arith.select %360, %361, %362 : vector<4x8x256xi1>, vector<4x8x256xf32>
    %c248_i32_146 = arith.constant 248 : i32
    %364 = tpu.dynamic_rotate %363 by %c248_i32_146 dim 2 : vector<4x8x256xf32>, i32 -> vector<4x8x256xf32>
    %c8_i32_147 = arith.constant 8 : i32
    %365 = tpu.dynamic_rotate %363 by %c8_i32_147 dim 2 : vector<4x8x256xf32>, i32 -> vector<4x8x256xf32>
    %c248_i32_148 = arith.constant 248 : i32
    %366 = tpu.dynamic_rotate %40 by %c248_i32_148 dim 2 : vector<4x8x256xi32>, i32 -> vector<4x8x256xi32>
    %c8_i32_149 = arith.constant 8 : i32
    %367 = vector.broadcast %c8_i32_149 : i32 to vector<4x8x256xi32>
    %368 = arith.xori %40, %367 : vector<4x8x256xi32>
    %369 = arith.cmpi eq, %366, %368 : vector<4x8x256xi32>
    %370 = arith.select %369, %364, %365 : vector<4x8x256xi1>, vector<4x8x256xf32>
    %c3_i32_150 = arith.constant 3 : i32
    %371 = vector.broadcast %c3_i32_150 : i32 to vector<4x8x256xi32>
    %372 = arith.shrsi %40, %371 : vector<4x8x256xi32>
    %c1_i32_151 = arith.constant 1 : i32
    %373 = vector.broadcast %c1_i32_151 : i32 to vector<4x8x256xi32>
    %374 = arith.andi %372, %373 : vector<4x8x256xi32>
    %c6_i32_152 = arith.constant 6 : i32
    %375 = vector.broadcast %c6_i32_152 : i32 to vector<4x8x256xi32>
    %376 = arith.shrsi %40, %375 : vector<4x8x256xi32>
    %c1_i32_153 = arith.constant 1 : i32
    %377 = vector.broadcast %c1_i32_153 : i32 to vector<4x8x256xi32>
    %378 = arith.andi %376, %377 : vector<4x8x256xi32>
    %379 = arith.cmpi eq, %374, %378 : vector<4x8x256xi32>
    %380 = arith.maximumf %363, %370 : vector<4x8x256xf32>
    %381 = arith.minimumf %363, %370 : vector<4x8x256xf32>
    %382 = arith.select %379, %380, %381 : vector<4x8x256xi1>, vector<4x8x256xf32>
    %c252_i32_154 = arith.constant 252 : i32
    %383 = tpu.dynamic_rotate %382 by %c252_i32_154 dim 2 : vector<4x8x256xf32>, i32 -> vector<4x8x256xf32>
    %c4_i32_155 = arith.constant 4 : i32
    %384 = tpu.dynamic_rotate %382 by %c4_i32_155 dim 2 : vector<4x8x256xf32>, i32 -> vector<4x8x256xf32>
    %c252_i32_156 = arith.constant 252 : i32
    %385 = tpu.dynamic_rotate %40 by %c252_i32_156 dim 2 : vector<4x8x256xi32>, i32 -> vector<4x8x256xi32>
    %c4_i32_157 = arith.constant 4 : i32
    %386 = vector.broadcast %c4_i32_157 : i32 to vector<4x8x256xi32>
    %387 = arith.xori %40, %386 : vector<4x8x256xi32>
    %388 = arith.cmpi eq, %385, %387 : vector<4x8x256xi32>
    %389 = arith.select %388, %383, %384 : vector<4x8x256xi1>, vector<4x8x256xf32>
    %c2_i32_158 = arith.constant 2 : i32
    %390 = vector.broadcast %c2_i32_158 : i32 to vector<4x8x256xi32>
    %391 = arith.shrsi %40, %390 : vector<4x8x256xi32>
    %c1_i32_159 = arith.constant 1 : i32
    %392 = vector.broadcast %c1_i32_159 : i32 to vector<4x8x256xi32>
    %393 = arith.andi %391, %392 : vector<4x8x256xi32>
    %c6_i32_160 = arith.constant 6 : i32
    %394 = vector.broadcast %c6_i32_160 : i32 to vector<4x8x256xi32>
    %395 = arith.shrsi %40, %394 : vector<4x8x256xi32>
    %c1_i32_161 = arith.constant 1 : i32
    %396 = vector.broadcast %c1_i32_161 : i32 to vector<4x8x256xi32>
    %397 = arith.andi %395, %396 : vector<4x8x256xi32>
    %398 = arith.cmpi eq, %393, %397 : vector<4x8x256xi32>
    %399 = arith.maximumf %382, %389 : vector<4x8x256xf32>
    %400 = arith.minimumf %382, %389 : vector<4x8x256xf32>
    %401 = arith.select %398, %399, %400 : vector<4x8x256xi1>, vector<4x8x256xf32>
    %c254_i32_162 = arith.constant 254 : i32
    %402 = tpu.dynamic_rotate %401 by %c254_i32_162 dim 2 : vector<4x8x256xf32>, i32 -> vector<4x8x256xf32>
    %c2_i32_163 = arith.constant 2 : i32
    %403 = tpu.dynamic_rotate %401 by %c2_i32_163 dim 2 : vector<4x8x256xf32>, i32 -> vector<4x8x256xf32>
    %c254_i32_164 = arith.constant 254 : i32
    %404 = tpu.dynamic_rotate %40 by %c254_i32_164 dim 2 : vector<4x8x256xi32>, i32 -> vector<4x8x256xi32>
    %c2_i32_165 = arith.constant 2 : i32
    %405 = vector.broadcast %c2_i32_165 : i32 to vector<4x8x256xi32>
    %406 = arith.xori %40, %405 : vector<4x8x256xi32>
    %407 = arith.cmpi eq, %404, %406 : vector<4x8x256xi32>
    %408 = arith.select %407, %402, %403 : vector<4x8x256xi1>, vector<4x8x256xf32>
    %c1_i32_166 = arith.constant 1 : i32
    %409 = vector.broadcast %c1_i32_166 : i32 to vector<4x8x256xi32>
    %410 = arith.shrsi %40, %409 : vector<4x8x256xi32>
    %c1_i32_167 = arith.constant 1 : i32
    %411 = vector.broadcast %c1_i32_167 : i32 to vector<4x8x256xi32>
    %412 = arith.andi %410, %411 : vector<4x8x256xi32>
    %c6_i32_168 = arith.constant 6 : i32
    %413 = vector.broadcast %c6_i32_168 : i32 to vector<4x8x256xi32>
    %414 = arith.shrsi %40, %413 : vector<4x8x256xi32>
    %c1_i32_169 = arith.constant 1 : i32
    %415 = vector.broadcast %c1_i32_169 : i32 to vector<4x8x256xi32>
    %416 = arith.andi %414, %415 : vector<4x8x256xi32>
    %417 = arith.cmpi eq, %412, %416 : vector<4x8x256xi32>
    %418 = arith.maximumf %401, %408 : vector<4x8x256xf32>
    %419 = arith.minimumf %401, %408 : vector<4x8x256xf32>
    %420 = arith.select %417, %418, %419 : vector<4x8x256xi1>, vector<4x8x256xf32>
    %c255_i32_170 = arith.constant 255 : i32
    %421 = tpu.dynamic_rotate %420 by %c255_i32_170 dim 2 : vector<4x8x256xf32>, i32 -> vector<4x8x256xf32>
    %c1_i32_171 = arith.constant 1 : i32
    %422 = tpu.dynamic_rotate %420 by %c1_i32_171 dim 2 : vector<4x8x256xf32>, i32 -> vector<4x8x256xf32>
    %c255_i32_172 = arith.constant 255 : i32
    %423 = tpu.dynamic_rotate %40 by %c255_i32_172 dim 2 : vector<4x8x256xi32>, i32 -> vector<4x8x256xi32>
    %c1_i32_173 = arith.constant 1 : i32
    %424 = vector.broadcast %c1_i32_173 : i32 to vector<4x8x256xi32>
    %425 = arith.xori %40, %424 : vector<4x8x256xi32>
    %426 = arith.cmpi eq, %423, %425 : vector<4x8x256xi32>
    %427 = arith.select %426, %421, %422 : vector<4x8x256xi1>, vector<4x8x256xf32>
    %c0_i32_174 = arith.constant 0 : i32
    %428 = vector.broadcast %c0_i32_174 : i32 to vector<4x8x256xi32>
    %429 = arith.shrsi %40, %428 : vector<4x8x256xi32>
    %c1_i32_175 = arith.constant 1 : i32
    %430 = vector.broadcast %c1_i32_175 : i32 to vector<4x8x256xi32>
    %431 = arith.andi %429, %430 : vector<4x8x256xi32>
    %c6_i32_176 = arith.constant 6 : i32
    %432 = vector.broadcast %c6_i32_176 : i32 to vector<4x8x256xi32>
    %433 = arith.shrsi %40, %432 : vector<4x8x256xi32>
    %c1_i32_177 = arith.constant 1 : i32
    %434 = vector.broadcast %c1_i32_177 : i32 to vector<4x8x256xi32>
    %435 = arith.andi %433, %434 : vector<4x8x256xi32>
    %436 = arith.cmpi eq, %431, %435 : vector<4x8x256xi32>
    %437 = arith.maximumf %420, %427 : vector<4x8x256xf32>
    %438 = arith.minimumf %420, %427 : vector<4x8x256xf32>
    %439 = arith.select %436, %437, %438 : vector<4x8x256xi1>, vector<4x8x256xf32>
    %c192_i32 = arith.constant 192 : i32
    %440 = tpu.dynamic_rotate %439 by %c192_i32 dim 2 : vector<4x8x256xf32>, i32 -> vector<4x8x256xf32>
    %c64_i32 = arith.constant 64 : i32
    %441 = tpu.dynamic_rotate %439 by %c64_i32 dim 2 : vector<4x8x256xf32>, i32 -> vector<4x8x256xf32>
    %c192_i32_178 = arith.constant 192 : i32
    %442 = tpu.dynamic_rotate %40 by %c192_i32_178 dim 2 : vector<4x8x256xi32>, i32 -> vector<4x8x256xi32>
    %c64_i32_179 = arith.constant 64 : i32
    %443 = vector.broadcast %c64_i32_179 : i32 to vector<4x8x256xi32>
    %444 = arith.xori %40, %443 : vector<4x8x256xi32>
    %445 = arith.cmpi eq, %442, %444 : vector<4x8x256xi32>
    %446 = arith.select %445, %440, %441 : vector<4x8x256xi1>, vector<4x8x256xf32>
    %c6_i32_180 = arith.constant 6 : i32
    %447 = vector.broadcast %c6_i32_180 : i32 to vector<4x8x256xi32>
    %448 = arith.shrsi %40, %447 : vector<4x8x256xi32>
    %c1_i32_181 = arith.constant 1 : i32
    %449 = vector.broadcast %c1_i32_181 : i32 to vector<4x8x256xi32>
    %450 = arith.andi %448, %449 : vector<4x8x256xi32>
    %c7_i32 = arith.constant 7 : i32
    %451 = vector.broadcast %c7_i32 : i32 to vector<4x8x256xi32>
    %452 = arith.shrsi %40, %451 : vector<4x8x256xi32>
    %c1_i32_182 = arith.constant 1 : i32
    %453 = vector.broadcast %c1_i32_182 : i32 to vector<4x8x256xi32>
    %454 = arith.andi %452, %453 : vector<4x8x256xi32>
    %455 = arith.cmpi eq, %450, %454 : vector<4x8x256xi32>
    %456 = arith.maximumf %439, %446 : vector<4x8x256xf32>
    %457 = arith.minimumf %439, %446 : vector<4x8x256xf32>
    %458 = arith.select %455, %456, %457 : vector<4x8x256xi1>, vector<4x8x256xf32>
    %c224_i32_183 = arith.constant 224 : i32
    %459 = tpu.dynamic_rotate %458 by %c224_i32_183 dim 2 : vector<4x8x256xf32>, i32 -> vector<4x8x256xf32>
    %c32_i32_184 = arith.constant 32 : i32
    %460 = tpu.dynamic_rotate %458 by %c32_i32_184 dim 2 : vector<4x8x256xf32>, i32 -> vector<4x8x256xf32>
    %c224_i32_185 = arith.constant 224 : i32
    %461 = tpu.dynamic_rotate %40 by %c224_i32_185 dim 2 : vector<4x8x256xi32>, i32 -> vector<4x8x256xi32>
    %c32_i32_186 = arith.constant 32 : i32
    %462 = vector.broadcast %c32_i32_186 : i32 to vector<4x8x256xi32>
    %463 = arith.xori %40, %462 : vector<4x8x256xi32>
    %464 = arith.cmpi eq, %461, %463 : vector<4x8x256xi32>
    %465 = arith.select %464, %459, %460 : vector<4x8x256xi1>, vector<4x8x256xf32>
    %c5_i32_187 = arith.constant 5 : i32
    %466 = vector.broadcast %c5_i32_187 : i32 to vector<4x8x256xi32>
    %467 = arith.shrsi %40, %466 : vector<4x8x256xi32>
    %c1_i32_188 = arith.constant 1 : i32
    %468 = vector.broadcast %c1_i32_188 : i32 to vector<4x8x256xi32>
    %469 = arith.andi %467, %468 : vector<4x8x256xi32>
    %c7_i32_189 = arith.constant 7 : i32
    %470 = vector.broadcast %c7_i32_189 : i32 to vector<4x8x256xi32>
    %471 = arith.shrsi %40, %470 : vector<4x8x256xi32>
    %c1_i32_190 = arith.constant 1 : i32
    %472 = vector.broadcast %c1_i32_190 : i32 to vector<4x8x256xi32>
    %473 = arith.andi %471, %472 : vector<4x8x256xi32>
    %474 = arith.cmpi eq, %469, %473 : vector<4x8x256xi32>
    %475 = arith.maximumf %458, %465 : vector<4x8x256xf32>
    %476 = arith.minimumf %458, %465 : vector<4x8x256xf32>
    %477 = arith.select %474, %475, %476 : vector<4x8x256xi1>, vector<4x8x256xf32>
    %c240_i32_191 = arith.constant 240 : i32
    %478 = tpu.dynamic_rotate %477 by %c240_i32_191 dim 2 : vector<4x8x256xf32>, i32 -> vector<4x8x256xf32>
    %c16_i32_192 = arith.constant 16 : i32
    %479 = tpu.dynamic_rotate %477 by %c16_i32_192 dim 2 : vector<4x8x256xf32>, i32 -> vector<4x8x256xf32>
    %c240_i32_193 = arith.constant 240 : i32
    %480 = tpu.dynamic_rotate %40 by %c240_i32_193 dim 2 : vector<4x8x256xi32>, i32 -> vector<4x8x256xi32>
    %c16_i32_194 = arith.constant 16 : i32
    %481 = vector.broadcast %c16_i32_194 : i32 to vector<4x8x256xi32>
    %482 = arith.xori %40, %481 : vector<4x8x256xi32>
    %483 = arith.cmpi eq, %480, %482 : vector<4x8x256xi32>
    %484 = arith.select %483, %478, %479 : vector<4x8x256xi1>, vector<4x8x256xf32>
    %c4_i32_195 = arith.constant 4 : i32
    %485 = vector.broadcast %c4_i32_195 : i32 to vector<4x8x256xi32>
    %486 = arith.shrsi %40, %485 : vector<4x8x256xi32>
    %c1_i32_196 = arith.constant 1 : i32
    %487 = vector.broadcast %c1_i32_196 : i32 to vector<4x8x256xi32>
    %488 = arith.andi %486, %487 : vector<4x8x256xi32>
    %c7_i32_197 = arith.constant 7 : i32
    %489 = vector.broadcast %c7_i32_197 : i32 to vector<4x8x256xi32>
    %490 = arith.shrsi %40, %489 : vector<4x8x256xi32>
    %c1_i32_198 = arith.constant 1 : i32
    %491 = vector.broadcast %c1_i32_198 : i32 to vector<4x8x256xi32>
    %492 = arith.andi %490, %491 : vector<4x8x256xi32>
    %493 = arith.cmpi eq, %488, %492 : vector<4x8x256xi32>
    %494 = arith.maximumf %477, %484 : vector<4x8x256xf32>
    %495 = arith.minimumf %477, %484 : vector<4x8x256xf32>
    %496 = arith.select %493, %494, %495 : vector<4x8x256xi1>, vector<4x8x256xf32>
    %c248_i32_199 = arith.constant 248 : i32
    %497 = tpu.dynamic_rotate %496 by %c248_i32_199 dim 2 : vector<4x8x256xf32>, i32 -> vector<4x8x256xf32>
    %c8_i32_200 = arith.constant 8 : i32
    %498 = tpu.dynamic_rotate %496 by %c8_i32_200 dim 2 : vector<4x8x256xf32>, i32 -> vector<4x8x256xf32>
    %c248_i32_201 = arith.constant 248 : i32
    %499 = tpu.dynamic_rotate %40 by %c248_i32_201 dim 2 : vector<4x8x256xi32>, i32 -> vector<4x8x256xi32>
    %c8_i32_202 = arith.constant 8 : i32
    %500 = vector.broadcast %c8_i32_202 : i32 to vector<4x8x256xi32>
    %501 = arith.xori %40, %500 : vector<4x8x256xi32>
    %502 = arith.cmpi eq, %499, %501 : vector<4x8x256xi32>
    %503 = arith.select %502, %497, %498 : vector<4x8x256xi1>, vector<4x8x256xf32>
    %c3_i32_203 = arith.constant 3 : i32
    %504 = vector.broadcast %c3_i32_203 : i32 to vector<4x8x256xi32>
    %505 = arith.shrsi %40, %504 : vector<4x8x256xi32>
    %c1_i32_204 = arith.constant 1 : i32
    %506 = vector.broadcast %c1_i32_204 : i32 to vector<4x8x256xi32>
    %507 = arith.andi %505, %506 : vector<4x8x256xi32>
    %c7_i32_205 = arith.constant 7 : i32
    %508 = vector.broadcast %c7_i32_205 : i32 to vector<4x8x256xi32>
    %509 = arith.shrsi %40, %508 : vector<4x8x256xi32>
    %c1_i32_206 = arith.constant 1 : i32
    %510 = vector.broadcast %c1_i32_206 : i32 to vector<4x8x256xi32>
    %511 = arith.andi %509, %510 : vector<4x8x256xi32>
    %512 = arith.cmpi eq, %507, %511 : vector<4x8x256xi32>
    %513 = arith.maximumf %496, %503 : vector<4x8x256xf32>
    %514 = arith.minimumf %496, %503 : vector<4x8x256xf32>
    %515 = arith.select %512, %513, %514 : vector<4x8x256xi1>, vector<4x8x256xf32>
    %c252_i32_207 = arith.constant 252 : i32
    %516 = tpu.dynamic_rotate %515 by %c252_i32_207 dim 2 : vector<4x8x256xf32>, i32 -> vector<4x8x256xf32>
    %c4_i32_208 = arith.constant 4 : i32
    %517 = tpu.dynamic_rotate %515 by %c4_i32_208 dim 2 : vector<4x8x256xf32>, i32 -> vector<4x8x256xf32>
    %c252_i32_209 = arith.constant 252 : i32
    %518 = tpu.dynamic_rotate %40 by %c252_i32_209 dim 2 : vector<4x8x256xi32>, i32 -> vector<4x8x256xi32>
    %c4_i32_210 = arith.constant 4 : i32
    %519 = vector.broadcast %c4_i32_210 : i32 to vector<4x8x256xi32>
    %520 = arith.xori %40, %519 : vector<4x8x256xi32>
    %521 = arith.cmpi eq, %518, %520 : vector<4x8x256xi32>
    %522 = arith.select %521, %516, %517 : vector<4x8x256xi1>, vector<4x8x256xf32>
    %c2_i32_211 = arith.constant 2 : i32
    %523 = vector.broadcast %c2_i32_211 : i32 to vector<4x8x256xi32>
    %524 = arith.shrsi %40, %523 : vector<4x8x256xi32>
    %c1_i32_212 = arith.constant 1 : i32
    %525 = vector.broadcast %c1_i32_212 : i32 to vector<4x8x256xi32>
    %526 = arith.andi %524, %525 : vector<4x8x256xi32>
    %c7_i32_213 = arith.constant 7 : i32
    %527 = vector.broadcast %c7_i32_213 : i32 to vector<4x8x256xi32>
    %528 = arith.shrsi %40, %527 : vector<4x8x256xi32>
    %c1_i32_214 = arith.constant 1 : i32
    %529 = vector.broadcast %c1_i32_214 : i32 to vector<4x8x256xi32>
    %530 = arith.andi %528, %529 : vector<4x8x256xi32>
    %531 = arith.cmpi eq, %526, %530 : vector<4x8x256xi32>
    %532 = arith.maximumf %515, %522 : vector<4x8x256xf32>
    %533 = arith.minimumf %515, %522 : vector<4x8x256xf32>
    %534 = arith.select %531, %532, %533 : vector<4x8x256xi1>, vector<4x8x256xf32>
    %c254_i32_215 = arith.constant 254 : i32
    %535 = tpu.dynamic_rotate %534 by %c254_i32_215 dim 2 : vector<4x8x256xf32>, i32 -> vector<4x8x256xf32>
    %c2_i32_216 = arith.constant 2 : i32
    %536 = tpu.dynamic_rotate %534 by %c2_i32_216 dim 2 : vector<4x8x256xf32>, i32 -> vector<4x8x256xf32>
    %c254_i32_217 = arith.constant 254 : i32
    %537 = tpu.dynamic_rotate %40 by %c254_i32_217 dim 2 : vector<4x8x256xi32>, i32 -> vector<4x8x256xi32>
    %c2_i32_218 = arith.constant 2 : i32
    %538 = vector.broadcast %c2_i32_218 : i32 to vector<4x8x256xi32>
    %539 = arith.xori %40, %538 : vector<4x8x256xi32>
    %540 = arith.cmpi eq, %537, %539 : vector<4x8x256xi32>
    %541 = arith.select %540, %535, %536 : vector<4x8x256xi1>, vector<4x8x256xf32>
    %c1_i32_219 = arith.constant 1 : i32
    %542 = vector.broadcast %c1_i32_219 : i32 to vector<4x8x256xi32>
    %543 = arith.shrsi %40, %542 : vector<4x8x256xi32>
    %c1_i32_220 = arith.constant 1 : i32
    %544 = vector.broadcast %c1_i32_220 : i32 to vector<4x8x256xi32>
    %545 = arith.andi %543, %544 : vector<4x8x256xi32>
    %c7_i32_221 = arith.constant 7 : i32
    %546 = vector.broadcast %c7_i32_221 : i32 to vector<4x8x256xi32>
    %547 = arith.shrsi %40, %546 : vector<4x8x256xi32>
    %c1_i32_222 = arith.constant 1 : i32
    %548 = vector.broadcast %c1_i32_222 : i32 to vector<4x8x256xi32>
    %549 = arith.andi %547, %548 : vector<4x8x256xi32>
    %550 = arith.cmpi eq, %545, %549 : vector<4x8x256xi32>
    %551 = arith.maximumf %534, %541 : vector<4x8x256xf32>
    %552 = arith.minimumf %534, %541 : vector<4x8x256xf32>
    %553 = arith.select %550, %551, %552 : vector<4x8x256xi1>, vector<4x8x256xf32>
    %c255_i32_223 = arith.constant 255 : i32
    %554 = tpu.dynamic_rotate %553 by %c255_i32_223 dim 2 : vector<4x8x256xf32>, i32 -> vector<4x8x256xf32>
    %c1_i32_224 = arith.constant 1 : i32
    %555 = tpu.dynamic_rotate %553 by %c1_i32_224 dim 2 : vector<4x8x256xf32>, i32 -> vector<4x8x256xf32>
    %c255_i32_225 = arith.constant 255 : i32
    %556 = tpu.dynamic_rotate %40 by %c255_i32_225 dim 2 : vector<4x8x256xi32>, i32 -> vector<4x8x256xi32>
    %c1_i32_226 = arith.constant 1 : i32
    %557 = vector.broadcast %c1_i32_226 : i32 to vector<4x8x256xi32>
    %558 = arith.xori %40, %557 : vector<4x8x256xi32>
    %559 = arith.cmpi eq, %556, %558 : vector<4x8x256xi32>
    %560 = arith.select %559, %554, %555 : vector<4x8x256xi1>, vector<4x8x256xf32>
    %c0_i32_227 = arith.constant 0 : i32
    %561 = vector.broadcast %c0_i32_227 : i32 to vector<4x8x256xi32>
    %562 = arith.shrsi %40, %561 : vector<4x8x256xi32>
    %c1_i32_228 = arith.constant 1 : i32
    %563 = vector.broadcast %c1_i32_228 : i32 to vector<4x8x256xi32>
    %564 = arith.andi %562, %563 : vector<4x8x256xi32>
    %c7_i32_229 = arith.constant 7 : i32
    %565 = vector.broadcast %c7_i32_229 : i32 to vector<4x8x256xi32>
    %566 = arith.shrsi %40, %565 : vector<4x8x256xi32>
    %c1_i32_230 = arith.constant 1 : i32
    %567 = vector.broadcast %c1_i32_230 : i32 to vector<4x8x256xi32>
    %568 = arith.andi %566, %567 : vector<4x8x256xi32>
    %569 = arith.cmpi eq, %564, %568 : vector<4x8x256xi32>
    %570 = arith.maximumf %553, %560 : vector<4x8x256xf32>
    %571 = arith.minimumf %553, %560 : vector<4x8x256xf32>
    %572 = arith.select %569, %570, %571 : vector<4x8x256xi1>, vector<4x8x256xf32>
    %c128_i32 = arith.constant 128 : i32
    %573 = tpu.dynamic_rotate %572 by %c128_i32 dim 2 : vector<4x8x256xf32>, i32 -> vector<4x8x256xf32>
    %c128_i32_231 = arith.constant 128 : i32
    %574 = tpu.dynamic_rotate %572 by %c128_i32_231 dim 2 : vector<4x8x256xf32>, i32 -> vector<4x8x256xf32>
    %c128_i32_232 = arith.constant 128 : i32
    %575 = tpu.dynamic_rotate %40 by %c128_i32_232 dim 2 : vector<4x8x256xi32>, i32 -> vector<4x8x256xi32>
    %c128_i32_233 = arith.constant 128 : i32
    %576 = vector.broadcast %c128_i32_233 : i32 to vector<4x8x256xi32>
    %577 = arith.xori %40, %576 : vector<4x8x256xi32>
    %578 = arith.cmpi eq, %575, %577 : vector<4x8x256xi32>
    %579 = arith.select %578, %573, %574 : vector<4x8x256xi1>, vector<4x8x256xf32>
    %c7_i32_234 = arith.constant 7 : i32
    %580 = vector.broadcast %c7_i32_234 : i32 to vector<4x8x256xi32>
    %581 = arith.shrsi %40, %580 : vector<4x8x256xi32>
    %c1_i32_235 = arith.constant 1 : i32
    %582 = vector.broadcast %c1_i32_235 : i32 to vector<4x8x256xi32>
    %583 = arith.andi %581, %582 : vector<4x8x256xi32>
    %c8_i32_236 = arith.constant 8 : i32
    %584 = vector.broadcast %c8_i32_236 : i32 to vector<4x8x256xi32>
    %585 = arith.shrsi %40, %584 : vector<4x8x256xi32>
    %c1_i32_237 = arith.constant 1 : i32
    %586 = vector.broadcast %c1_i32_237 : i32 to vector<4x8x256xi32>
    %587 = arith.andi %585, %586 : vector<4x8x256xi32>
    %588 = arith.cmpi eq, %583, %587 : vector<4x8x256xi32>
    %589 = arith.maximumf %572, %579 : vector<4x8x256xf32>
    %590 = arith.minimumf %572, %579 : vector<4x8x256xf32>
    %591 = arith.select %588, %589, %590 : vector<4x8x256xi1>, vector<4x8x256xf32>
    %c192_i32_238 = arith.constant 192 : i32
    %592 = tpu.dynamic_rotate %591 by %c192_i32_238 dim 2 : vector<4x8x256xf32>, i32 -> vector<4x8x256xf32>
    %c64_i32_239 = arith.constant 64 : i32
    %593 = tpu.dynamic_rotate %591 by %c64_i32_239 dim 2 : vector<4x8x256xf32>, i32 -> vector<4x8x256xf32>
    %c192_i32_240 = arith.constant 192 : i32
    %594 = tpu.dynamic_rotate %40 by %c192_i32_240 dim 2 : vector<4x8x256xi32>, i32 -> vector<4x8x256xi32>
    %c64_i32_241 = arith.constant 64 : i32
    %595 = vector.broadcast %c64_i32_241 : i32 to vector<4x8x256xi32>
    %596 = arith.xori %40, %595 : vector<4x8x256xi32>
    %597 = arith.cmpi eq, %594, %596 : vector<4x8x256xi32>
    %598 = arith.select %597, %592, %593 : vector<4x8x256xi1>, vector<4x8x256xf32>
    %c6_i32_242 = arith.constant 6 : i32
    %599 = vector.broadcast %c6_i32_242 : i32 to vector<4x8x256xi32>
    %600 = arith.shrsi %40, %599 : vector<4x8x256xi32>
    %c1_i32_243 = arith.constant 1 : i32
    %601 = vector.broadcast %c1_i32_243 : i32 to vector<4x8x256xi32>
    %602 = arith.andi %600, %601 : vector<4x8x256xi32>
    %c8_i32_244 = arith.constant 8 : i32
    %603 = vector.broadcast %c8_i32_244 : i32 to vector<4x8x256xi32>
    %604 = arith.shrsi %40, %603 : vector<4x8x256xi32>
    %c1_i32_245 = arith.constant 1 : i32
    %605 = vector.broadcast %c1_i32_245 : i32 to vector<4x8x256xi32>
    %606 = arith.andi %604, %605 : vector<4x8x256xi32>
    %607 = arith.cmpi eq, %602, %606 : vector<4x8x256xi32>
    %608 = arith.maximumf %591, %598 : vector<4x8x256xf32>
    %609 = arith.minimumf %591, %598 : vector<4x8x256xf32>
    %610 = arith.select %607, %608, %609 : vector<4x8x256xi1>, vector<4x8x256xf32>
    %c224_i32_246 = arith.constant 224 : i32
    %611 = tpu.dynamic_rotate %610 by %c224_i32_246 dim 2 : vector<4x8x256xf32>, i32 -> vector<4x8x256xf32>
    %c32_i32_247 = arith.constant 32 : i32
    %612 = tpu.dynamic_rotate %610 by %c32_i32_247 dim 2 : vector<4x8x256xf32>, i32 -> vector<4x8x256xf32>
    %c224_i32_248 = arith.constant 224 : i32
    %613 = tpu.dynamic_rotate %40 by %c224_i32_248 dim 2 : vector<4x8x256xi32>, i32 -> vector<4x8x256xi32>
    %c32_i32_249 = arith.constant 32 : i32
    %614 = vector.broadcast %c32_i32_249 : i32 to vector<4x8x256xi32>
    %615 = arith.xori %40, %614 : vector<4x8x256xi32>
    %616 = arith.cmpi eq, %613, %615 : vector<4x8x256xi32>
    %617 = arith.select %616, %611, %612 : vector<4x8x256xi1>, vector<4x8x256xf32>
    %c5_i32_250 = arith.constant 5 : i32
    %618 = vector.broadcast %c5_i32_250 : i32 to vector<4x8x256xi32>
    %619 = arith.shrsi %40, %618 : vector<4x8x256xi32>
    %c1_i32_251 = arith.constant 1 : i32
    %620 = vector.broadcast %c1_i32_251 : i32 to vector<4x8x256xi32>
    %621 = arith.andi %619, %620 : vector<4x8x256xi32>
    %c8_i32_252 = arith.constant 8 : i32
    %622 = vector.broadcast %c8_i32_252 : i32 to vector<4x8x256xi32>
    %623 = arith.shrsi %40, %622 : vector<4x8x256xi32>
    %c1_i32_253 = arith.constant 1 : i32
    %624 = vector.broadcast %c1_i32_253 : i32 to vector<4x8x256xi32>
    %625 = arith.andi %623, %624 : vector<4x8x256xi32>
    %626 = arith.cmpi eq, %621, %625 : vector<4x8x256xi32>
    %627 = arith.maximumf %610, %617 : vector<4x8x256xf32>
    %628 = arith.minimumf %610, %617 : vector<4x8x256xf32>
    %629 = arith.select %626, %627, %628 : vector<4x8x256xi1>, vector<4x8x256xf32>
    %c240_i32_254 = arith.constant 240 : i32
    %630 = tpu.dynamic_rotate %629 by %c240_i32_254 dim 2 : vector<4x8x256xf32>, i32 -> vector<4x8x256xf32>
    %c16_i32_255 = arith.constant 16 : i32
    %631 = tpu.dynamic_rotate %629 by %c16_i32_255 dim 2 : vector<4x8x256xf32>, i32 -> vector<4x8x256xf32>
    %c240_i32_256 = arith.constant 240 : i32
    %632 = tpu.dynamic_rotate %40 by %c240_i32_256 dim 2 : vector<4x8x256xi32>, i32 -> vector<4x8x256xi32>
    %c16_i32_257 = arith.constant 16 : i32
    %633 = vector.broadcast %c16_i32_257 : i32 to vector<4x8x256xi32>
    %634 = arith.xori %40, %633 : vector<4x8x256xi32>
    %635 = arith.cmpi eq, %632, %634 : vector<4x8x256xi32>
    %636 = arith.select %635, %630, %631 : vector<4x8x256xi1>, vector<4x8x256xf32>
    %c4_i32_258 = arith.constant 4 : i32
    %637 = vector.broadcast %c4_i32_258 : i32 to vector<4x8x256xi32>
    %638 = arith.shrsi %40, %637 : vector<4x8x256xi32>
    %c1_i32_259 = arith.constant 1 : i32
    %639 = vector.broadcast %c1_i32_259 : i32 to vector<4x8x256xi32>
    %640 = arith.andi %638, %639 : vector<4x8x256xi32>
    %c8_i32_260 = arith.constant 8 : i32
    %641 = vector.broadcast %c8_i32_260 : i32 to vector<4x8x256xi32>
    %642 = arith.shrsi %40, %641 : vector<4x8x256xi32>
    %c1_i32_261 = arith.constant 1 : i32
    %643 = vector.broadcast %c1_i32_261 : i32 to vector<4x8x256xi32>
    %644 = arith.andi %642, %643 : vector<4x8x256xi32>
    %645 = arith.cmpi eq, %640, %644 : vector<4x8x256xi32>
    %646 = arith.maximumf %629, %636 : vector<4x8x256xf32>
    %647 = arith.minimumf %629, %636 : vector<4x8x256xf32>
    %648 = arith.select %645, %646, %647 : vector<4x8x256xi1>, vector<4x8x256xf32>
    %c248_i32_262 = arith.constant 248 : i32
    %649 = tpu.dynamic_rotate %648 by %c248_i32_262 dim 2 : vector<4x8x256xf32>, i32 -> vector<4x8x256xf32>
    %c8_i32_263 = arith.constant 8 : i32
    %650 = tpu.dynamic_rotate %648 by %c8_i32_263 dim 2 : vector<4x8x256xf32>, i32 -> vector<4x8x256xf32>
    %c248_i32_264 = arith.constant 248 : i32
    %651 = tpu.dynamic_rotate %40 by %c248_i32_264 dim 2 : vector<4x8x256xi32>, i32 -> vector<4x8x256xi32>
    %c8_i32_265 = arith.constant 8 : i32
    %652 = vector.broadcast %c8_i32_265 : i32 to vector<4x8x256xi32>
    %653 = arith.xori %40, %652 : vector<4x8x256xi32>
    %654 = arith.cmpi eq, %651, %653 : vector<4x8x256xi32>
    %655 = arith.select %654, %649, %650 : vector<4x8x256xi1>, vector<4x8x256xf32>
    %c3_i32_266 = arith.constant 3 : i32
    %656 = vector.broadcast %c3_i32_266 : i32 to vector<4x8x256xi32>
    %657 = arith.shrsi %40, %656 : vector<4x8x256xi32>
    %c1_i32_267 = arith.constant 1 : i32
    %658 = vector.broadcast %c1_i32_267 : i32 to vector<4x8x256xi32>
    %659 = arith.andi %657, %658 : vector<4x8x256xi32>
    %c8_i32_268 = arith.constant 8 : i32
    %660 = vector.broadcast %c8_i32_268 : i32 to vector<4x8x256xi32>
    %661 = arith.shrsi %40, %660 : vector<4x8x256xi32>
    %c1_i32_269 = arith.constant 1 : i32
    %662 = vector.broadcast %c1_i32_269 : i32 to vector<4x8x256xi32>
    %663 = arith.andi %661, %662 : vector<4x8x256xi32>
    %664 = arith.cmpi eq, %659, %663 : vector<4x8x256xi32>
    %665 = arith.maximumf %648, %655 : vector<4x8x256xf32>
    %666 = arith.minimumf %648, %655 : vector<4x8x256xf32>
    %667 = arith.select %664, %665, %666 : vector<4x8x256xi1>, vector<4x8x256xf32>
    %c252_i32_270 = arith.constant 252 : i32
    %668 = tpu.dynamic_rotate %667 by %c252_i32_270 dim 2 : vector<4x8x256xf32>, i32 -> vector<4x8x256xf32>
    %c4_i32_271 = arith.constant 4 : i32
    %669 = tpu.dynamic_rotate %667 by %c4_i32_271 dim 2 : vector<4x8x256xf32>, i32 -> vector<4x8x256xf32>
    %c252_i32_272 = arith.constant 252 : i32
    %670 = tpu.dynamic_rotate %40 by %c252_i32_272 dim 2 : vector<4x8x256xi32>, i32 -> vector<4x8x256xi32>
    %c4_i32_273 = arith.constant 4 : i32
    %671 = vector.broadcast %c4_i32_273 : i32 to vector<4x8x256xi32>
    %672 = arith.xori %40, %671 : vector<4x8x256xi32>
    %673 = arith.cmpi eq, %670, %672 : vector<4x8x256xi32>
    %674 = arith.select %673, %668, %669 : vector<4x8x256xi1>, vector<4x8x256xf32>
    %c2_i32_274 = arith.constant 2 : i32
    %675 = vector.broadcast %c2_i32_274 : i32 to vector<4x8x256xi32>
    %676 = arith.shrsi %40, %675 : vector<4x8x256xi32>
    %c1_i32_275 = arith.constant 1 : i32
    %677 = vector.broadcast %c1_i32_275 : i32 to vector<4x8x256xi32>
    %678 = arith.andi %676, %677 : vector<4x8x256xi32>
    %c8_i32_276 = arith.constant 8 : i32
    %679 = vector.broadcast %c8_i32_276 : i32 to vector<4x8x256xi32>
    %680 = arith.shrsi %40, %679 : vector<4x8x256xi32>
    %c1_i32_277 = arith.constant 1 : i32
    %681 = vector.broadcast %c1_i32_277 : i32 to vector<4x8x256xi32>
    %682 = arith.andi %680, %681 : vector<4x8x256xi32>
    %683 = arith.cmpi eq, %678, %682 : vector<4x8x256xi32>
    %684 = arith.maximumf %667, %674 : vector<4x8x256xf32>
    %685 = arith.minimumf %667, %674 : vector<4x8x256xf32>
    %686 = arith.select %683, %684, %685 : vector<4x8x256xi1>, vector<4x8x256xf32>
    %c254_i32_278 = arith.constant 254 : i32
    %687 = tpu.dynamic_rotate %686 by %c254_i32_278 dim 2 : vector<4x8x256xf32>, i32 -> vector<4x8x256xf32>
    %c2_i32_279 = arith.constant 2 : i32
    %688 = tpu.dynamic_rotate %686 by %c2_i32_279 dim 2 : vector<4x8x256xf32>, i32 -> vector<4x8x256xf32>
    %c254_i32_280 = arith.constant 254 : i32
    %689 = tpu.dynamic_rotate %40 by %c254_i32_280 dim 2 : vector<4x8x256xi32>, i32 -> vector<4x8x256xi32>
    %c2_i32_281 = arith.constant 2 : i32
    %690 = vector.broadcast %c2_i32_281 : i32 to vector<4x8x256xi32>
    %691 = arith.xori %40, %690 : vector<4x8x256xi32>
    %692 = arith.cmpi eq, %689, %691 : vector<4x8x256xi32>
    %693 = arith.select %692, %687, %688 : vector<4x8x256xi1>, vector<4x8x256xf32>
    %c1_i32_282 = arith.constant 1 : i32
    %694 = vector.broadcast %c1_i32_282 : i32 to vector<4x8x256xi32>
    %695 = arith.shrsi %40, %694 : vector<4x8x256xi32>
    %c1_i32_283 = arith.constant 1 : i32
    %696 = vector.broadcast %c1_i32_283 : i32 to vector<4x8x256xi32>
    %697 = arith.andi %695, %696 : vector<4x8x256xi32>
    %c8_i32_284 = arith.constant 8 : i32
    %698 = vector.broadcast %c8_i32_284 : i32 to vector<4x8x256xi32>
    %699 = arith.shrsi %40, %698 : vector<4x8x256xi32>
    %c1_i32_285 = arith.constant 1 : i32
    %700 = vector.broadcast %c1_i32_285 : i32 to vector<4x8x256xi32>
    %701 = arith.andi %699, %700 : vector<4x8x256xi32>
    %702 = arith.cmpi eq, %697, %701 : vector<4x8x256xi32>
    %703 = arith.maximumf %686, %693 : vector<4x8x256xf32>
    %704 = arith.minimumf %686, %693 : vector<4x8x256xf32>
    %705 = arith.select %702, %703, %704 : vector<4x8x256xi1>, vector<4x8x256xf32>
    %c255_i32_286 = arith.constant 255 : i32
    %706 = tpu.dynamic_rotate %705 by %c255_i32_286 dim 2 : vector<4x8x256xf32>, i32 -> vector<4x8x256xf32>
    %c1_i32_287 = arith.constant 1 : i32
    %707 = tpu.dynamic_rotate %705 by %c1_i32_287 dim 2 : vector<4x8x256xf32>, i32 -> vector<4x8x256xf32>
    %c255_i32_288 = arith.constant 255 : i32
    %708 = tpu.dynamic_rotate %40 by %c255_i32_288 dim 2 : vector<4x8x256xi32>, i32 -> vector<4x8x256xi32>
    %c1_i32_289 = arith.constant 1 : i32
    %709 = vector.broadcast %c1_i32_289 : i32 to vector<4x8x256xi32>
    %710 = arith.xori %40, %709 : vector<4x8x256xi32>
    %711 = arith.cmpi eq, %708, %710 : vector<4x8x256xi32>
    %712 = arith.select %711, %706, %707 : vector<4x8x256xi1>, vector<4x8x256xf32>
    %c0_i32_290 = arith.constant 0 : i32
    %713 = vector.broadcast %c0_i32_290 : i32 to vector<4x8x256xi32>
    %714 = arith.shrsi %40, %713 : vector<4x8x256xi32>
    %c1_i32_291 = arith.constant 1 : i32
    %715 = vector.broadcast %c1_i32_291 : i32 to vector<4x8x256xi32>
    %716 = arith.andi %714, %715 : vector<4x8x256xi32>
    %c8_i32_292 = arith.constant 8 : i32
    %717 = vector.broadcast %c8_i32_292 : i32 to vector<4x8x256xi32>
    %718 = arith.shrsi %40, %717 : vector<4x8x256xi32>
    %c1_i32_293 = arith.constant 1 : i32
    %719 = vector.broadcast %c1_i32_293 : i32 to vector<4x8x256xi32>
    %720 = arith.andi %718, %719 : vector<4x8x256xi32>
    %721 = arith.cmpi eq, %716, %720 : vector<4x8x256xi32>
    %722 = arith.maximumf %705, %712 : vector<4x8x256xf32>
    %723 = arith.minimumf %705, %712 : vector<4x8x256xf32>
    %724 = arith.select %721, %722, %723 : vector<4x8x256xi1>, vector<4x8x256xf32>
    %725 = vector.extract_strided_slice %724 {offsets = [0, 0, 0], sizes = [4, 8, 64], strides = [1, 1, 1]} : vector<4x8x256xf32> to vector<4x8x64xf32>
    %726 = vector.extract_strided_slice %725 {offsets = [0, 0, 0], sizes = [2, 8, 64], strides = [1, 1, 1]} : vector<4x8x64xf32> to vector<2x8x64xf32>
    %727 = vector.extract_strided_slice %725 {offsets = [2, 0, 0], sizes = [2, 8, 64], strides = [1, 1, 1]} : vector<4x8x64xf32> to vector<2x8x64xf32>
    "tpu.trace_start"() <{level = 10 : i32, message = "ntk,nsk->nts"}> : () -> ()
    %cst_294 = arith.constant dense<0.000000e+00> : vector<2x8x8xf32>
    %728 = tpu.matmul %726, %727, %cst_294 {dimension_numbers = #tpu.dot_dimension_numbers<[2], [2], [1], [1], [0, 0, 0, 1, 1, 1], [0], [0]>} : vector<2x8x64xf32>, vector<2x8x64xf32>, vector<2x8x8xf32> -> vector<2x8x8xf32>
    "tpu.trace_stop"() : () -> ()
    %cst_295 = arith.constant dense<0xFF800000> : vector<2x8xf32>
    %729 = vector.multi_reduction <maximumf>, %728, %cst_295 [2] : vector<2x8x8xf32> to vector<2x8xf32>
    %730 = vector.shape_cast %729 : vector<2x8xf32> to vector<2x8x1xf32>
    %731 = vector.broadcast %730 : vector<2x8x1xf32> to vector<2x8x8xf32>
    %732 = arith.subf %728, %731 : vector<2x8x8xf32>
    %733 = math.exp %732 : vector<2x8x8xf32>
    %cst_296 = arith.constant dense<0.000000e+00> : vector<2x8xf32>
    %734 = vector.multi_reduction <add>, %733, %cst_296 [2] : vector<2x8x8xf32> to vector<2x8xf32>
    %735 = vector.shape_cast %734 : vector<2x8xf32> to vector<2x8x1xf32>
    %736 = tpu.reciprocal %735 {approx = true} : vector<2x8x1xf32> -> vector<2x8x1xf32>
    %737 = vector.broadcast %736 : vector<2x8x1xf32> to vector<2x8x8xf32>
    %738 = arith.mulf %733, %737 : vector<2x8x8xf32>
    %c4_297 = arith.constant 4 : index
    %c0_298 = arith.constant 0 : index
    %c0_299 = arith.constant 0 : index
    %739 = vector.load %arg7[%c4_297, %c0_298, %c0_299] : memref<6x8x256xf32, #tpu.memory_space<vmem>>, vector<2x8x256xf32>
    "tpu.trace_start"() <{level = 10 : i32, message = "nts,nsw->ntw"}> : () -> ()
    %cst_300 = arith.constant dense<0.000000e+00> : vector<2x8x256xf32>
    %740 = tpu.matmul %738, %739, %cst_300 {dimension_numbers = #tpu.dot_dimension_numbers<[2], [1], [1], [2], [0, 0, 0, 1, 1, 2], [0], [0]>} : vector<2x8x8xf32>, vector<2x8x256xf32>, vector<2x8x256xf32> -> vector<2x8x256xf32>
    "tpu.trace_stop"() : () -> ()
    %c0_301 = arith.constant 0 : index
    %c0_302 = arith.constant 0 : index
    %c0_303 = arith.constant 0 : index
    %741 = vector.load %arg8[%c0_301, %c0_302, %c0_303] : memref<2x8x256xf32, #tpu.memory_space<vmem>>, vector<2x8x256xf32>
    tpu.vector_store %arg8[%c0_301, %c0_302, %c0_303], %740 {strides = array<i32>} : memref<2x8x256xf32, #tpu.memory_space<vmem>>, vector<2x8x256xf32>,
    %c0_304 = arith.constant 0 : index
    %c0_305 = arith.constant 0 : index
    %c0_306 = arith.constant 0 : index
    %742 = vector.load %arg8[%c0_304, %c0_305, %c0_306] : memref<2x8x256xf32, #tpu.memory_space<vmem>>, vector<2x1x256xf32>
    %743 = vector.shape_cast %742 : vector<2x1x256xf32> to vector<2x256xf32>
    %c0_307 = arith.constant 0 : index
    %c0_308 = arith.constant 0 : index
    %744 = vector.load %arg9[%c0_307, %c0_308] : memref<2x2048xf32, #tpu.memory_space<vmem>>, vector<2x256xf32>
    tpu.vector_store %arg9[%c0_307, %c0_308], %743 {strides = array<i32>} : memref<2x2048xf32, #tpu.memory_space<vmem>>, vector<2x256xf32>,
    %c0_309 = arith.constant 0 : index
    %c1_310 = arith.constant 1 : index
    %c0_311 = arith.constant 0 : index
    %745 = vector.load %arg8[%c0_309, %c1_310, %c0_311] : memref<2x8x256xf32, #tpu.memory_space<vmem>>, vector<2x1x256xf32>
    %746 = vector.shape_cast %745 : vector<2x1x256xf32> to vector<2x256xf32>
    %c0_312 = arith.constant 0 : index
    %c256 = arith.constant 256 : index
    %747 = vector.load %arg9[%c0_312, %c256] : memref<2x2048xf32, #tpu.memory_space<vmem>>, vector<2x256xf32>
    tpu.vector_store %arg9[%c0_312, %c256], %746 {strides = array<i32>} : memref<2x2048xf32, #tpu.memory_space<vmem>>, vector<2x256xf32>,
    %c0_313 = arith.constant 0 : index
    %c2_314 = arith.constant 2 : index
    %c0_315 = arith.constant 0 : index
    %748 = vector.load %arg8[%c0_313, %c2_314, %c0_315] : memref<2x8x256xf32, #tpu.memory_space<vmem>>, vector<2x1x256xf32>
    %749 = vector.shape_cast %748 : vector<2x1x256xf32> to vector<2x256xf32>
    %c0_316 = arith.constant 0 : index
    %c512 = arith.constant 512 : index
    %750 = vector.load %arg9[%c0_316, %c512] : memref<2x2048xf32, #tpu.memory_space<vmem>>, vector<2x256xf32>
    tpu.vector_store %arg9[%c0_316, %c512], %749 {strides = array<i32>} : memref<2x2048xf32, #tpu.memory_space<vmem>>, vector<2x256xf32>,
    %c0_317 = arith.constant 0 : index
    %c3_318 = arith.constant 3 : index
    %c0_319 = arith.constant 0 : index
    %751 = vector.load %arg8[%c0_317, %c3_318, %c0_319] : memref<2x8x256xf32, #tpu.memory_space<vmem>>, vector<2x1x256xf32>
    %752 = vector.shape_cast %751 : vector<2x1x256xf32> to vector<2x256xf32>
    %c0_320 = arith.constant 0 : index
    %c768 = arith.constant 768 : index
    %753 = vector.load %arg9[%c0_320, %c768] : memref<2x2048xf32, #tpu.memory_space<vmem>>, vector<2x256xf32>
    tpu.vector_store %arg9[%c0_320, %c768], %752 {strides = array<i32>} : memref<2x2048xf32, #tpu.memory_space<vmem>>, vector<2x256xf32>,
    %c0_321 = arith.constant 0 : index
    %c4_322 = arith.constant 4 : index
    %c0_323 = arith.constant 0 : index
    %754 = vector.load %arg8[%c0_321, %c4_322, %c0_323] : memref<2x8x256xf32, #tpu.memory_space<vmem>>, vector<2x1x256xf32>
    %755 = vector.shape_cast %754 : vector<2x1x256xf32> to vector<2x256xf32>
    %c0_324 = arith.constant 0 : index
    %c1024 = arith.constant 1024 : index
    %756 = vector.load %arg9[%c0_324, %c1024] : memref<2x2048xf32, #tpu.memory_space<vmem>>, vector<2x256xf32>
    tpu.vector_store %arg9[%c0_324, %c1024], %755 {strides = array<i32>} : memref<2x2048xf32, #tpu.memory_space<vmem>>, vector<2x256xf32>,
    %c0_325 = arith.constant 0 : index
    %c5_326 = arith.constant 5 : index
    %c0_327 = arith.constant 0 : index
    %757 = vector.load %arg8[%c0_325, %c5_326, %c0_327] : memref<2x8x256xf32, #tpu.memory_space<vmem>>, vector<2x1x256xf32>
    %758 = vector.shape_cast %757 : vector<2x1x256xf32> to vector<2x256xf32>
    %c0_328 = arith.constant 0 : index
    %c1280 = arith.constant 1280 : index
    %759 = vector.load %arg9[%c0_328, %c1280] : memref<2x2048xf32, #tpu.memory_space<vmem>>, vector<2x256xf32>
    tpu.vector_store %arg9[%c0_328, %c1280], %758 {strides = array<i32>} : memref<2x2048xf32, #tpu.memory_space<vmem>>, vector<2x256xf32>,
    %c0_329 = arith.constant 0 : index
    %c6_330 = arith.constant 6 : index
    %c0_331 = arith.constant 0 : index
    %760 = vector.load %arg8[%c0_329, %c6_330, %c0_331] : memref<2x8x256xf32, #tpu.memory_space<vmem>>, vector<2x1x256xf32>
    %761 = vector.shape_cast %760 : vector<2x1x256xf32> to vector<2x256xf32>
    %c0_332 = arith.constant 0 : index
    %c1536 = arith.constant 1536 : index
    %762 = vector.load %arg9[%c0_332, %c1536] : memref<2x2048xf32, #tpu.memory_space<vmem>>, vector<2x256xf32>
    tpu.vector_store %arg9[%c0_332, %c1536], %761 {strides = array<i32>} : memref<2x2048xf32, #tpu.memory_space<vmem>>, vector<2x256xf32>,
    %c0_333 = arith.constant 0 : index
    %c7_334 = arith.constant 7 : index
    %c0_335 = arith.constant 0 : index
    %763 = vector.load %arg8[%c0_333, %c7_334, %c0_335] : memref<2x8x256xf32, #tpu.memory_space<vmem>>, vector<2x1x256xf32>
    %764 = vector.shape_cast %763 : vector<2x1x256xf32> to vector<2x256xf32>
    %c0_336 = arith.constant 0 : index
    %c1792 = arith.constant 1792 : index
    %765 = vector.load %arg9[%c0_336, %c1792] : memref<2x2048xf32, #tpu.memory_space<vmem>>, vector<2x256xf32>
    tpu.vector_store %arg9[%c0_336, %c1792], %764 {strides = array<i32>} : memref<2x2048xf32, #tpu.memory_space<vmem>>, vector<2x256xf32>,
    %c0_337 = arith.constant 0 : index
    %c0_338 = arith.constant 0 : index
    %766 = vector.load %arg4[%c0_337, %c0_338] : memref<4x2xf32, #tpu.memory_space<vmem>>, vector<4x2xf32>
    %c0_339 = arith.constant 0 : index
    %c0_340 = arith.constant 0 : index
    %767 = vector.load %arg9[%c0_339, %c0_340] : memref<2x2048xf32, #tpu.memory_space<vmem>>, vector<2x2048xf32>
    %cst_341 = arith.constant dense<0.000000e+00> : vector<4x2048xf32>
    %768 = tpu.matmul %766, %767, %cst_341 {dimension_numbers = #tpu.dot_dimension_numbers<[1], [0], [0], [1], [0, 0, 1, 1], [], []>} : vector<4x2xf32>, vector<2x2048xf32>, vector<4x2048xf32> -> vector<4x2048xf32>
    %c0_342 = arith.constant 0 : index
    %c0_343 = arith.constant 0 : index
    %769 = vector.load %arg5[%c0_342, %c0_343] : memref<4x1xf32, #tpu.memory_space<vmem>>, vector<4x1xf32>
    %770 = vector.broadcast %769 : vector<4x1xf32> to vector<4x2048xf32>
    %771 = arith.addf %768, %770 : vector<4x2048xf32>
    %c0_344 = arith.constant 0 : index
    %c0_345 = arith.constant 0 : index
    %c0_346 = arith.constant 0 : index
    %772 = vector.load %arg1[%c0_344, %c0_345, %c0_346] : memref<1x4x2048xf32, #tpu.memory_space<vmem>>, vector<1x4x2048xf32>
    %773 = vector.shape_cast %772 : vector<1x4x2048xf32> to vector<4x2048xf32>
    %774 = arith.addf %771, %773 : vector<4x2048xf32>
    %c0_347 = arith.constant 0 : index
    %c0_348 = arith.constant 0 : index
    %c0_349 = arith.constant 0 : index
    %775 = vector.load %arg6[%c0_347, %c0_348, %c0_349] : memref<1x4x2048xf32, #tpu.memory_space<vmem>>, vector<1x4x2048xf32>
    %776 = vector.shape_cast %775 : vector<1x4x2048xf32> to vector<4x2048xf32>
    %777 = vector.shape_cast %774 : vector<4x2048xf32> to vector<1x4x2048xf32>
    tpu.vector_store %arg6[%c0_347, %c0_348, %c0_349], %777 {strides = array<i32>} : memref<1x4x2048xf32, #tpu.memory_space<vmem>>, vector<1x4x2048xf32>,
    return
  }
  func.func @transform_0(%arg0: i32) -> (i32, i32, i32) {
    %c0_i32 = arith.constant 0 : i32
    %c0_i32_0 = arith.constant 0 : i32
    %c0_i32_1 = arith.constant 0 : i32
    return %arg0, %c0_i32, %c0_i32_0 : i32, i32, i32
  }
  func.func @transform_1(%arg0: i32) -> (i32, i32) {
    %c0_i32 = arith.constant 0 : i32
    %c0_i32_0 = arith.constant 0 : i32
    %c0_i32_1 = arith.constant 0 : i32
    return %c0_i32, %c0_i32_0 : i32, i32
  }
  func.func @transform_2(%arg0: i32) -> (i32, i32) {
    %c0_i32 = arith.constant 0 : i32
    %c0_i32_0 = arith.constant 0 : i32
    %c0_i32_1 = arith.constant 0 : i32
    return %c0_i32, %c0_i32_0 : i32, i32
  }
  func.func @transform_3(%arg0: i32) -> (i32, i32) {
    %c0_i32 = arith.constant 0 : i32
    %c0_i32_0 = arith.constant 0 : i32
    %c0_i32_1 = arith.constant 0 : i32
    return %c0_i32, %c0_i32_0 : i32, i32
  }
  func.func @transform_4(%arg0: i32) -> (i32, i32) {
    %c0_i32 = arith.constant 0 : i32
    %c0_i32_0 = arith.constant 0 : i32
    %c0_i32_1 = arith.constant 0 : i32
    return %c0_i32, %c0_i32_0 : i32, i32
  }
  func.func @transform_5(%arg0: i32) -> (i32, i32, i32) {
    %c0_i32 = arith.constant 0 : i32
    %c0_i32_0 = arith.constant 0 : i32
    %c0_i32_1 = arith.constant 0 : i32
    return %arg0, %c0_i32, %c0_i32_0 : i32, i32, i32
  }
}

</mosaic_0001>

<bundles_post_ra>
// kernel: dwtnl_forward.1
= control target key start
LH: loop header
LB: loop body
LE: loop exit
PB: predicated region body
PF: predicated region fallthrough
CT: control target
= control target key end

     0   :  { %s4894_s18 = smov 0   ;;  %s10232_s0 = inlined_call_operand.vmem [shape: f32[2,4,2048], index: 0, kind: input, shape index: {}]   ;;  %s10233_s1 = inlined_call_operand.vmem [shape: f32[6,4], index: 1, kind: input, shape index: {}]   ;;  %s10234_s2 = inlined_call_operand.vmem [shape: f32[6,1], index: 2, kind: input, shape index: {}]   ;;  %s10235_s3 = inlined_call_operand.vmem [shape: f32[4,2], index: 3, kind: input, shape index: {}]   ;;  %s10236_s4 = inlined_call_operand.vmem [shape: f32[4,1], index: 4, kind: input, shape index: {}]   ;;  %s10237_s5 = inlined_call_operand.vmem [shape: f32[2,4,2048], index: 5, kind: output, shape index: {}]  }
   0x1 LB: > { %s4725_s19 = sadd.s32 4294967295, %s4848_s18   ;;  %p4729_p0 = scmp.ge.s32.totalorder %s4848_s18, 1  ;;  %s4848_s18 = sphi %s4894_s18, %s15_s18  }
   0x2   : > { %p187_p1 = scmp.lt.s32.totalorder %s4848_s18, 3 }
   0x4   : > { %p188_p2 = pnand %p4729_p0, %p187_p1 }
   0x5   : > { %p215_p3 = scmp.lt.s32.totalorder (!%p188_p2), %s4725_s19, 1  ;;  %s4851_s28 = smov (!%p188_p2), 127  }
   0x6   : > { %191 = sbr.rel (%p188_p2) target bundleno = 5440 (0x1540), region = 40  ;;  %s4852_s29 = smov (!%p188_p2), 126  }
   0x7   : > { %s4853_s30 = smov (!%p188_p2), 1   ;;  %s4854_s6 = smov (!%p188_p2), 2  }
   0x8   : > { %s4855_s7 = smov (!%p188_p2), 124   ;;  %s4856_s8 = smov (!%p188_p2), 4  }
   0x9   : > { %s4857_s9 = smov (!%p188_p2), 120   ;;  %s4858_s10 = smov (!%p188_p2), 8  }
   0xa   : > { %s4859_s11 = smov (!%p188_p2), 112   ;;  %s4860_s12 = smov (!%p188_p2), 16  }
   0xb   : > { %v4850_v0 = vmov 0   ;;  %v234_v1 = vld [vmem:[%s10234_s2] sm:$0x3f]  ;;  %s10646_s19 = smov (!%p215_p3, %s4725_s19), 1  ;;  %vm10238_vm0 = vcmask 1043456   ;;  %vm275_vm1 = vcmask 31744   ;;  %v658_v28 = vlaneseq }
   0xc   : > { %4832 = vset.pattern.permute.xlu0 %v4850_v0  ;;  %4833 = vset.pattern.permute.xlu1 %v4850_v0  ;;  %s4808_s22 = sshll.u32 %s10646_s19, 6  ;;  %v233_v7 = vld [vmem:[%s10233_s1] sm:$0x3f]  ;;  %vm635_vm2 = vcmask 1040384   ;;  %vm637_vm3 = vcmask 1041409   ;;  %vm640_vm4 = vcmask 1042434  }
   0xd   : > { %237 = vperm.xlu0 %4832, %v234_v1   ;;  %s4913_s25 = scalar_lea.vmem %s10232_s0, %s4808_s22  ;;  %vm643_vm5 = vcmask 1043459   ;;  %vm646_vm6 = vcmask 1044484   ;;  %vm4962_vm7 = vcmp.lt.s32.totalorder %v658_v28, 256  ;;  %vm649_vm8 = vcmask 1045509   ;;  %s4861_s13 = smov 96  }
   0xe   : > { %v226_v2 = vld [vmem:[%s4913_s25 + $0x8] sm:$0xff]  ;;  %v225_v3 = vld [vmem:[%s4913_s25] sm:$0xff]  ;;  %v228_v4 = vld [vmem:[%s4913_s25 + $0x18] sm:$0xff]  ;;  %v4966_v37 = vand.u32 127, %v658_v28  ;;  %s4862_s14 = smov 32   ;;  %s4863_s15 = smov 64  }
   0xf   : > { %250 = vst [vmem:[#allocation1 + $0x10] ss:$2 sm:$0xff] %v226_v2  ;;  %v227_v5 = vld [vmem:[%s4913_s25 + $0x10] sm:$0xff]  ;;  %v230_v6 = vld [vmem:[%s4913_s25 + $0x28] sm:$0xff]  ;;  %v232_v8 = vld [vmem:[%s4913_s25 + $0x38] sm:$0xff]  ;;  %s10197_s26 = scalar_lea.vmem %s10237_s5, %s4808_s22 }
  0x10   : > { %248 = vst [vmem:[#allocation1] ss:$2 sm:$0xff] %v225_v3  ;;  %v231_v11 = vld [vmem:[%s4913_s25 + $0x30] sm:$0xff]  ;;  %v229_v13 = vld [vmem:[%s4913_s25 + $0x20] sm:$0xff]  ;;  %v4983_v52 = vadd.s32 128, %v4966_v37  ;;  %vm10240_vm9 = vcmp.lt.s32.totalorder %v4966_v37, 127 }
  0x11   : > { %254 = vst [vmem:[#allocation1 + $0x30] ss:$2 sm:$0xff] %v228_v4  ;;  %vm10239_vm10 = vcmp.lt.s32.totalorder %v4966_v37, 1  ;;  %vm10242_vm15 = vcmp.lt.s32.totalorder %v4966_v37, 126 }
  0x12   : > { %252 = vst [vmem:[#allocation1 + $0x20] ss:$2 sm:$0xff] %v227_v5  ;;  %1008 = vrot.lane.b32.xlu1 %v4983_v52, %s4851_s28  ;;  %1108 = vrot.lane.b32.xlu2 %v4983_v52, %s4852_s29 }
  0x15   : > { %1006 = vrot.lane.b32.xlu0 %v4966_v37, %s4851_s28 }
  0x16   : > { %v257_v9 = vld.sshfl [vmem:[#allocation1 + $0x10] sm:$0xff pattern:$0x75316420]  ;;  %v258_v10 = vld.sshfl [vmem:[#allocation1 + $0x18] sm:$0xff pattern:$0x75316420] }
  0x17   : > { %4738 = vmatpush.msk.msra.mxu2 %vm10238_vm0, %v257_v9  ;;  %264 = vst [vmem:[#allocation1 + $0x10] ss:$2 sm:$0xff] %v230_v6  ;;  %4740 = vmatpush.msk.msra.mxu3 %vm10238_vm0, %v258_v10  ;;  %v256_v12 = vld.sshfl [vmem:[#allocation1 + $0x8] sm:$0xff pattern:$0x75316420] }
  0x18   : > { %4739 = vmatmul.msk.f32.vlgmr.msra.gmra.mxu2 %vm275_vm1, %v233_v7  ;;  %4741 = vmatmul.msk.f32.vlgmr.msra.gmra.mxu3 %vm275_vm1, %v233_v7  ;;  %v255_v14 = vld.sshfl [vmem:[#allocation1] sm:$0xff pattern:$0x75316420]  ;;  %v261_v15 = vld.sshfl [vmem:[#allocation1 + $0x30] sm:$0xff pattern:$0x75316420] }
  0x19   : > { %4736 = vmatpush.msk.msra.mxu1 %vm10238_vm0, %v256_v12  ;;  %4734 = vmatpush.msk.msra.mxu0 %vm10238_vm0, %v255_v14  ;;  %v262_v16 = vld.sshfl [vmem:[#allocation1 + $0x38] sm:$0xff pattern:$0x75316420]  ;;  %v260_v17 = vld.sshfl [vmem:[#allocation1 + $0x28] sm:$0xff pattern:$0x75316420] }
  0x1a   : > { %4737 = vmatmul.msk.f32.vlgmr.msra.gmra.mxu1 %vm275_vm1, %v233_v7  ;;  %4735 = vmatmul.msk.f32.vlgmr.msra.gmra.mxu0 %vm275_vm1, %v233_v7  ;;  %266 = vst [vmem:[#allocation1 + $0x30] ss:$2 sm:$0xff] %v232_v8  ;;  %v259_v18 = vld.sshfl [vmem:[#allocation1 + $0x20] sm:$0xff pattern:$0x75316420] }
  0x1b   : > { %4746 = vmatpush.msk.msrb.mxu2 %vm10238_vm0, %v261_v15  ;;  %4748 = vmatpush.msk.msrb.mxu3 %vm10238_vm0, %v262_v16  ;;  %265 = vst [vmem:[#allocation1 + $0x20] ss:$2 sm:$0xff] %v231_v11 }
  0x1c   : > { %4744 = vmatpush.msk.msrb.mxu1 %vm10238_vm0, %v260_v17  ;;  %4742 = vmatpush.msk.msrb.mxu0 %vm10238_vm0, %v259_v18  ;;  %263 = vst [vmem:[#allocation1] ss:$2 sm:$0xff] %v229_v13 }
  0x1d   : > { %1106 = vrot.lane.b32.xlu1 %v4966_v37, %s4852_s29 }
  0x1e   : > { %v269_v19 = vld.sshfl [vmem:[#allocation1 + $0x10] sm:$0xff pattern:$0x75316420]  ;;  %v270_v20 = vld.sshfl [vmem:[#allocation1 + $0x18] sm:$0xff pattern:$0x75316420] }
  0x1f   : > { %4754 = vmatpush.msk.msra.mxu2 %vm10238_vm0, %v269_v19  ;;  %4756 = vmatpush.msk.msra.mxu3 %vm10238_vm0, %v270_v20 }
  0x20   : > { %4747 = vmatmul.msk.f32.vlgmr.msrb.gmra.mxu2 %vm275_vm1, %v233_v7  ;;  %4749 = vmatmul.msk.f32.vlgmr.msrb.gmra.mxu3 %vm275_vm1, %v233_v7 }
  0x21   : > { %v273_v21 = vld.sshfl [vmem:[#allocation1 + $0x30] sm:$0xff pattern:$0x75316420]  ;;  %v274_v22 = vld.sshfl [vmem:[#allocation1 + $0x38] sm:$0xff pattern:$0x75316420] }
  0x22   : > { %4745 = vmatmul.msk.f32.vlgmr.msrb.gmra.mxu1 %vm275_vm1, %v233_v7  ;;  %4743 = vmatmul.msk.f32.vlgmr.msrb.gmra.mxu0 %vm275_vm1, %v233_v7  ;;  %v272_v23 = vld.sshfl [vmem:[#allocation1 + $0x28] sm:$0xff pattern:$0x75316420]  ;;  %v271_v24 = vld.sshfl [vmem:[#allocation1 + $0x20] sm:$0xff pattern:$0x75316420] }
  0x23   : > { %v268_v25 = vld.sshfl [vmem:[#allocation1 + $0x8] sm:$0xff pattern:$0x75316420]  ;;  %v267_v26 = vld.sshfl [vmem:[#allocation1] sm:$0xff pattern:$0x75316420]  ;;  %4762 = vmatpush.msk.msrb.mxu2 %vm10238_vm0, %v273_v21  ;;  %4764 = vmatpush.msk.msrb.mxu3 %vm10238_vm0, %v274_v22 }
  0x24   : > { %4752 = vmatpush.msk.msra.mxu1 %vm10238_vm0, %v268_v25  ;;  %4750 = vmatpush.msk.msra.mxu0 %vm10238_vm0, %v267_v26 }
  0x26   : > { %4760 = vmatpush.msk.msrb.mxu1 %vm10238_vm0, %v272_v23  ;;  %4758 = vmatpush.msk.msrb.mxu0 %vm10238_vm0, %v271_v24 }
  0x28   : > { %4755 = vmatmul.msk.f32.vlgmr.msra.gmra.mxu2 %vm275_vm1, %v233_v7  ;;  %4757 = vmatmul.msk.f32.vlgmr.msra.gmra.mxu3 %vm275_vm1, %v233_v7 }
  0x2a   : > { %4753 = vmatmul.msk.f32.vlgmr.msra.gmra.mxu1 %vm275_vm1, %v233_v7  ;;  %4751 = vmatmul.msk.f32.vlgmr.msra.gmra.mxu0 %vm275_vm1, %v233_v7 }
  0x30   : > { %4763 = vmatmul.msk.f32.vlgmr.msrb.gmra.mxu2 %vm275_vm1, %v233_v7  ;;  %4765 = vmatmul.msk.f32.vlgmr.msrb.gmra.mxu3 %vm275_vm1, %v233_v7 }
  0x32   : > { %4761 = vmatmul.msk.f32.vlgmr.msrb.gmra.mxu1 %vm275_vm1, %v233_v7  ;;  %4759 = vmatmul.msk.f32.vlgmr.msrb.gmra.mxu0 %vm275_vm1, %v233_v7  ;;  %vm10241_vm1 = vcmp.lt.s32.totalorder %v4966_v37, 2 }
  0x7f   : > { %v4958_v27 = vpop.permute.xlu0 %237 }
  0x97   : > { %v349_v29 = vpop.f32.mrf.mxu1  ;;  %v329_v30 = vpop.f32.mrf.mxu0 }
  0x98   : > { %v330_v31 = vadd.f32 %v329_v30, %v4958_v27  ;;  %v350_v32 = vadd.f32 %v349_v29, %v4958_v27 }
  0x9a   : > { %v634_v33 = vrot.slane %v350_v32, 7 }
  0x9b   : > { %v369_v35 = vpop.f32.mrf.mxu2  ;;  %v389_v36 = vpop.f32.mrf.mxu3 }
  0x9c   : > { %v636_v38 = vsel %vm635_vm2, %v330_v31, %v634_v33  ;;  %v638_v39 = vsel %vm637_vm3, %v330_v31, %v634_v33  ;;  %v641_v40 = vsel %vm640_vm4, %v330_v31, %v634_v33  ;;  %v644_v41 = vsel %vm643_vm5, %v330_v31, %v634_v33 }
  0x9d   : > { %v639_v42 = vrot.slane %v638_v39, 1  ;;  %v642_v43 = vrot.slane %v641_v40, 2  ;;  %v645_v44 = vrot.slane %v644_v41, 3  ;;  %v647_v45 = vsel %vm646_vm6, %v330_v31, %v634_v33  ;;  %662 = vst.msk [vmem:[#allocation2] ss:$8 sm:$0x3] %vm4962_vm7, %v636_v38 }
  0x9e   : > { %v648_v46 = vrot.slane %v647_v45, 4  ;;  %v650_v47 = vsel %vm649_vm8, %v330_v31, %v634_v33  ;;  %v370_v48 = vadd.f32 %v369_v35, %v4958_v27  ;;  %v390_v49 = vadd.f32 %v389_v36, %v4958_v27 }
  0x9f   : > { %v651_v50 = vrot.slane %v650_v47, 5  ;;  %665 = vst.msk [vmem:[#allocation2 + $0x10] ss:$8 sm:$0x3] %vm4962_vm7, %v639_v42  ;;  %v429_v51 = vpop.f32.mrf.mxu1  ;;  %v409_v55 = vpop.f32.mrf.mxu0 }
  0xa0   : > { %668 = vst.msk [vmem:[#allocation2 + $0x20] ss:$8 sm:$0x3] %vm4962_vm7, %v642_v43  ;;  %v681_v53 = vrot.slane %v390_v49, 7  ;;  %v430_v54 = vadd.f32 %v429_v51, %v4958_v27  ;;  %v410_v56 = vadd.f32 %v409_v55, %v4958_v27 }
  0xa1   : > { %671 = vst.msk [vmem:[#allocation2 + $0x30] ss:$8 sm:$0x3] %vm4962_vm7, %v645_v44 }
  0xa2   : > { %674 = vst.msk [vmem:[#allocation2 + $0x40] ss:$8 sm:$0x3] %vm4962_vm7, %v648_v46  ;;  %v682_v57 = vsel %vm635_vm2, %v370_v48, %v681_v53  ;;  %v683_v58 = vsel %vm637_vm3, %v370_v48, %v681_v53  ;;  %v685_v59 = vsel %vm640_vm4, %v370_v48, %v681_v53  ;;  %v687_v60 = vsel %vm643_vm5, %v370_v48, %v681_v53 }
  0xa3   : > { %677 = vst.msk [vmem:[#allocation2 + $0x50] ss:$8 sm:$0x3] %vm4962_vm7, %v651_v50  ;;  %v684_v61 = vrot.slane %v683_v58, 1  ;;  %v686_v62 = vrot.slane %v685_v59, 2  ;;  %v688_v63 = vrot.slane %v687_v60, 3  ;;  %v689_v0 = vsel %vm646_vm6, %v370_v48, %v681_v53  ;;  %v469_v1 = vpop.f32.mrf.mxu3  ;;  %v449_v6 = vpop.f32.mrf.mxu2 }
  0xa4   : > { %v690_v2 = vrot.slane %v689_v0, 4  ;;  %v691_v3 = vsel %vm649_vm8, %v370_v48, %v681_v53  ;;  %700 = vst.msk [vmem:[#allocation2 + $0x1] ss:$8 sm:$0x3] %vm4962_vm7, %v682_v57  ;;  %v719_v4 = vrot.slane %v430_v54, 7  ;;  %v470_v7 = vadd.f32 %v469_v1, %v4958_v27 }
  0xa5   : > { %v692_v5 = vrot.slane %v691_v3, 5  ;;  %703 = vst.msk [vmem:[#allocation2 + $0x11] ss:$8 sm:$0x3] %vm4962_vm7, %v684_v61  ;;  %v450_v11 = vadd.f32 %v449_v6, %v4958_v27 }
  0xa6   : > { %706 = vst.msk [vmem:[#allocation2 + $0x21] ss:$8 sm:$0x3] %vm4962_vm7, %v686_v62  ;;  %v721_v8 = vsel %vm637_vm3, %v410_v56, %v719_v4  ;;  %v723_v9 = vsel %vm640_vm4, %v410_v56, %v719_v4  ;;  %v725_v10 = vsel %vm643_vm5, %v410_v56, %v719_v4  ;;  %v720_v12 = vsel %vm635_vm2, %v410_v56, %v719_v4 }
  0xa7   : > { %709 = vst.msk [vmem:[#allocation2 + $0x31] ss:$8 sm:$0x3] %vm4962_vm7, %v688_v63  ;;  %v722_v13 = vrot.slane %v721_v8, 1  ;;  %v727_v14 = vsel %vm646_vm6, %v410_v56, %v719_v4  ;;  %v509_v15 = vpop.f32.mrf.mxu1  ;;  %v724_v16 = vrot.slane %v723_v9, 2  ;;  %v729_v17 = vsel %vm649_vm8, %v410_v56, %v719_v4  ;;  %v489_v25 = vpop.f32.mrf.mxu0 }
  0xa8   : > { %712 = vst.msk [vmem:[#allocation2 + $0x41] ss:$8 sm:$0x3] %vm4962_vm7, %v690_v2  ;;  %v757_v18 = vrot.slane %v470_v7, 7  ;;  %v510_v19 = vadd.f32 %v509_v15, %v4958_v27  ;;  %v726_v20 = vrot.slane %v725_v10, 3  ;;  %v728_v21 = vrot.slane %v727_v14, 4 }
  0xa9   : > { %715 = vst.msk [vmem:[#allocation2 + $0x51] ss:$8 sm:$0x3] %vm4962_vm7, %v692_v5  ;;  %v730_v23 = vrot.slane %v729_v17, 5  ;;  %v490_v30 = vadd.f32 %v489_v25, %v4958_v27 }
  0xaa   : > { %738 = vst.msk [vmem:[#allocation2 + $0x2] ss:$8 sm:$0x3] %vm4962_vm7, %v720_v12  ;;  %v759_v22 = vsel %vm637_vm3, %v450_v11, %v757_v18  ;;  %v761_v24 = vsel %vm640_vm4, %v450_v11, %v757_v18  ;;  %v763_v28 = vsel %vm643_vm5, %v450_v11, %v757_v18  ;;  %v795_v29 = vrot.slane %v510_v19, 7 }
  0xab   : > { %741 = vst.msk [vmem:[#allocation2 + $0x12] ss:$8 sm:$0x3] %vm4962_vm7, %v722_v13  ;;  %v549_v26 = vpop.f32.mrf.mxu3  ;;  %v758_v31 = vsel %vm635_vm2, %v450_v11, %v757_v18  ;;  %v760_v32 = vrot.slane %v759_v22, 1  ;;  %v765_v33 = vsel %vm646_vm6, %v450_v11, %v757_v18  ;;  %v762_v35 = vrot.slane %v761_v24, 2  ;;  %v529_v44 = vpop.f32.mrf.mxu2 }
  0xac   : > { %744 = vst.msk [vmem:[#allocation2 + $0x22] ss:$8 sm:$0x3] %vm4962_vm7, %v724_v16  ;;  %v767_v36 = vsel %vm649_vm8, %v450_v11, %v757_v18  ;;  %v550_v38 = vadd.f32 %v549_v26, %v4958_v27  ;;  %v764_v39 = vrot.slane %v763_v28, 3  ;;  %v766_v40 = vrot.slane %v765_v33, 4 }
  0xad   : > { %747 = vst.msk [vmem:[#allocation2 + $0x32] ss:$8 sm:$0x3] %vm4962_vm7, %v726_v20  ;;  %v797_v41 = vsel %vm637_vm3, %v490_v30, %v795_v29  ;;  %v768_v42 = vrot.slane %v767_v36, 5  ;;  %v799_v43 = vsel %vm640_vm4, %v490_v30, %v795_v29  ;;  %v801_v46 = vsel %vm643_vm5, %v490_v30, %v795_v29 }
  0xae   : > { %750 = vst.msk [vmem:[#allocation2 + $0x42] ss:$8 sm:$0x3] %vm4962_vm7, %v728_v21  ;;  %v530_v47 = vadd.f32 %v529_v44, %v4958_v27  ;;  %v833_v48 = vrot.slane %v550_v38, 7  ;;  %v796_v49 = vsel %vm635_vm2, %v490_v30, %v795_v29  ;;  %v798_v50 = vrot.slane %v797_v41, 1 }
  0xaf   : > { %753 = vst.msk [vmem:[#allocation2 + $0x52] ss:$8 sm:$0x3] %vm4962_vm7, %v730_v23  ;;  %v589_v45 = vpop.f32.mrf.mxu1  ;;  %v803_v51 = vsel %vm646_vm6, %v490_v30, %v795_v29  ;;  %v800_v53 = vrot.slane %v799_v43, 2  ;;  %v805_v54 = vsel %vm649_vm8, %v490_v30, %v795_v29  ;;  %v802_v56 = vrot.slane %v801_v46, 3  ;;  %v569_v57 = vpop.f32.mrf.mxu0 }
  0xb0   : > { %776 = vst.msk [vmem:[#allocation2 + $0x3] ss:$8 sm:$0x3] %vm4962_vm7, %v758_v31  ;;  %v590_v55 = vadd.f32 %v589_v45, %v4958_v27  ;;  %v804_v58 = vrot.slane %v803_v51, 4  ;;  %v835_v59 = vsel %vm637_vm3, %v530_v47, %v833_v48  ;;  %v806_v60 = vrot.slane %v805_v54, 5  ;;  %v1007_v51 = vpop.permute.xlu0 %1006 }
  0xb1   : > { %779 = vst.msk [vmem:[#allocation2 + $0x13] ss:$8 sm:$0x3] %vm4962_vm7, %v760_v32  ;;  %v837_v61 = vsel %vm640_vm4, %v530_v47, %v833_v48  ;;  %v839_v63 = vsel %vm643_vm5, %v530_v47, %v833_v48  ;;  %v570_v1 = vadd.f32 %v569_v57, %v4958_v27  ;;  %v834_v2 = vsel %vm635_vm2, %v530_v47, %v833_v48 }
  0xb2   : > { %782 = vst.msk [vmem:[#allocation2 + $0x23] ss:$8 sm:$0x3] %vm4962_vm7, %v762_v35  ;;  %v871_v0 = vrot.slane %v590_v55, 7  ;;  %v836_v3 = vrot.slane %v835_v59, 1  ;;  %v841_v4 = vsel %vm646_vm6, %v530_v47, %v833_v48  ;;  %v838_v5 = vrot.slane %v837_v61, 2 }
  0xb3   : > { %785 = vst.msk [vmem:[#allocation2 + $0x33] ss:$8 sm:$0x3] %vm4962_vm7, %v764_v39  ;;  %v629_v62 = vpop.f32.mrf.mxu3  ;;  %v843_v6 = vsel %vm649_vm8, %v530_v47, %v833_v48  ;;  %v840_v8 = vrot.slane %v839_v63, 3  ;;  %v842_v9 = vrot.slane %v841_v4, 4  ;;  %v609_v13 = vpop.f32.mrf.mxu2  ;;  %v1027_v57 = vshra.s32 %v4983_v52, 1 }
  0xb4   : > { %788 = vst.msk [vmem:[#allocation2 + $0x43] ss:$8 sm:$0x3] %vm4962_vm7, %v766_v40  ;;  %v630_v7 = vadd.f32 %v629_v62, %v4958_v27  ;;  %v873_v10 = vsel %vm637_vm3, %v570_v1, %v871_v0  ;;  %v844_v11 = vrot.slane %v843_v6, 5  ;;  %v875_v12 = vsel %vm640_vm4, %v570_v1, %v871_v0  ;;  %v5185_v47 = vpop.permute.xlu2 %1108  ;;  %v1009_v48 = vpop.permute.xlu1 %1008 }
  0xb5   : > { %791 = vst.msk [vmem:[#allocation2 + $0x53] ss:$8 sm:$0x3] %vm4962_vm7, %v768_v42  ;;  %v877_v14 = vsel %vm643_vm5, %v570_v1, %v871_v0  ;;  %v872_v16 = vsel %vm635_vm2, %v570_v1, %v871_v0  ;;  %v874_v17 = vrot.slane %v873_v10, 1  ;;  %v879_v18 = vsel %vm646_vm6, %v570_v1, %v871_v0 }
  0xb6   : > { %814 = vst.msk [vmem:[#allocation2 + $0x4] ss:$8 sm:$0x3] %vm4962_vm7, %v796_v49  ;;  %v909_v15 = vrot.slane %v630_v7, 7  ;;  %v876_v19 = vrot.slane %v875_v12, 2  ;;  %v881_v20 = vsel %vm649_vm8, %v570_v1, %v871_v0  ;;  %v610_v21 = vadd.f32 %v609_v13, %v4958_v27 }
  0xb7   : > { %817 = vst.msk [vmem:[#allocation2 + $0x14] ss:$8 sm:$0x3] %vm4962_vm7, %v798_v50  ;;  %v878_v22 = vrot.slane %v877_v14, 3  ;;  %v880_v23 = vrot.slane %v879_v18, 4  ;;  %v882_v25 = vrot.slane %v881_v20, 5  ;;  %v1010_v61 = vsel %vm10240_vm9, %v1007_v51, %v1009_v48 }
  0xb8   : > { %820 = vst.msk [vmem:[#allocation2 + $0x24] ss:$8 sm:$0x3] %vm4962_vm7, %v800_v53  ;;  %v911_v24 = vsel %vm637_vm3, %v610_v21, %v909_v15  ;;  %v913_v26 = vsel %vm640_vm4, %v610_v21, %v909_v15  ;;  %v915_v27 = vsel %vm643_vm5, %v610_v21, %v909_v15  ;;  %v910_v28 = vsel %vm635_vm2, %v610_v21, %v909_v15 }
  0xb9   : > { %823 = vst.msk [vmem:[#allocation2 + $0x34] ss:$8 sm:$0x3] %vm4962_vm7, %v802_v56  ;;  %v912_v29 = vrot.slane %v911_v24, 1  ;;  %v917_v30 = vsel %vm646_vm6, %v610_v21, %v909_v15  ;;  %v914_v31 = vrot.slane %v913_v26, 2  ;;  %v919_v32 = vsel %vm649_vm8, %v610_v21, %v909_v15 }
  0xba   : > { %826 = vst.msk [vmem:[#allocation2 + $0x44] ss:$8 sm:$0x3] %vm4962_vm7, %v804_v58  ;;  %v916_v33 = vrot.slane %v915_v27, 3  ;;  %v918_v35 = vrot.slane %v917_v30, 4  ;;  %v920_v36 = vrot.slane %v919_v32, 5  ;;  %v1011_v62 = vsel %vm10240_vm9, %v1009_v48, %v1007_v51 }
  0xbb   : > { %829 = vst.msk [vmem:[#allocation2 + $0x54] ss:$8 sm:$0x3] %vm4962_vm7, %v806_v60  ;;  %v1026_v56 = vshra.s32 %v4966_v37, 1  ;;  %v1012_v58 = vxor.u32 1, %v4966_v37  ;;  %v1013_v59 = vxor.u32 1, %v4983_v52 }
  0xbc   : > { %852 = vst.msk [vmem:[#allocation2 + $0x5] ss:$8 sm:$0x3] %vm4962_vm7, %v834_v2  ;;  %v5187_v50 = vpop.permute.xlu1 %1106  ;;  %v5200_v63 = vand.u32 1, %v4966_v37  ;;  %v5205_v1 = vand.u32 1, %v4983_v52  ;;  %v5207_v2 = vand.u32 1, %v1027_v57 }
  0xbd   : > { %855 = vst.msk [vmem:[#allocation2 + $0x15] ss:$8 sm:$0x3] %vm4962_vm7, %v836_v3  ;;  %v5202_v0 = vand.u32 1, %v1026_v56  ;;  %vm5209_vm11 = vcmp.eq.s32.totalorder %v1010_v61, %v1012_v58  ;;  %v10280_v4 = vmov 0  ;;  %vm5213_vm12 = vcmp.eq.s32.totalorder %v1011_v62, %v1013_v59 }
  0xbe   : > { %858 = vst.msk [vmem:[#allocation2 + $0x25] ss:$8 sm:$0x3] %vm4962_vm7, %v838_v5  ;;  %v10281_v4 = vsel %vm5209_vm11, 4294967295, %v10280_v4  ;;  %v10282_v5 = vmov 0  ;;  %vm1031_vm14 = vcmp.eq.s32.totalorder %v5205_v1, %v5207_v2  ;;  %vm10244_vm8 = vcmp.lt.s32.totalorder %v4966_v37, 124 }
  0xbf   : > { %861 = vst.msk [vmem:[#allocation2 + $0x35] ss:$8 sm:$0x3] %vm4962_vm7, %v840_v8  ;;  %v10283_v5 = vsel %vm5213_vm12, 4294967295, %v10282_v5  ;;  %vm1030_vm13 = vcmp.eq.s32.totalorder %v5200_v63, %v5202_v0 }
  0xc0   : > { %864 = vst.msk [vmem:[#allocation2 + $0x45] ss:$8 sm:$0x3] %vm4962_vm7, %v842_v9 }
  0xc1   : > { %867 = vst.msk [vmem:[#allocation2 + $0x55] ss:$8 sm:$0x3] %vm4962_vm7, %v844_v11 }
  0xc2   : > { %890 = vst.msk [vmem:[#allocation2 + $0x6] ss:$8 sm:$0x3] %vm4962_vm7, %v872_v16 }
  0xc3   : > { %893 = vst.msk [vmem:[#allocation2 + $0x16] ss:$8 sm:$0x3] %vm4962_vm7, %v874_v17 }
  0xc4   : > { %896 = vst.msk [vmem:[#allocation2 + $0x26] ss:$8 sm:$0x3] %vm4962_vm7, %v876_v19 }
  0xc5   : > { %899 = vst.msk [vmem:[#allocation2 + $0x36] ss:$8 sm:$0x3] %vm4962_vm7, %v878_v22 }
  0xc6   : > { %902 = vst.msk [vmem:[#allocation2 + $0x46] ss:$8 sm:$0x3] %vm4962_vm7, %v880_v23 }
  0xc7   : > { %905 = vst.msk [vmem:[#allocation2 + $0x56] ss:$8 sm:$0x3] %vm4962_vm7, %v882_v25 }
  0xc8   : > { %928 = vst.msk [vmem:[#allocation2 + $0x7] ss:$8 sm:$0x3] %vm4962_vm7, %v910_v28 }
  0xc9   : > { %931 = vst.msk [vmem:[#allocation2 + $0x17] ss:$8 sm:$0x3] %vm4962_vm7, %v912_v29 }
  0xca   : > { %934 = vst.msk [vmem:[#allocation2 + $0x27] ss:$8 sm:$0x3] %vm4962_vm7, %v914_v31 }
  0xcb   : > { %937 = vst.msk [vmem:[#allocation2 + $0x37] ss:$8 sm:$0x3] %vm4962_vm7, %v916_v33 }
  0xcc   : > { %940 = vst.msk [vmem:[#allocation2 + $0x47] ss:$8 sm:$0x3] %vm4962_vm7, %v918_v35 }
  0xcd   : > { %943 = vst.msk [vmem:[#allocation2 + $0x57] ss:$8 sm:$0x3] %vm4962_vm7, %v920_v36 }
  0xcf   : > { %v5137_v38 = vld [vmem:[#allocation2 + $0x8] sm:$0xff]  ;;  %v5139_v39 = vld [vmem:[#allocation2] sm:$0xff] }
  0xd0   : > { %964 = vrot.lane.b32.xlu2 %v5137_v38, %s4851_s28  ;;  %981 = vrot.lane.b32.xlu0 %v5139_v39, %s4853_s30  ;;  %v5167_v45 = vld [vmem:[#allocation2 + $0x10] sm:$0xff]  ;;  %v5175_v46 = vld [vmem:[#allocation2 + $0x18] sm:$0xff] }
  0xd1   : > { %956 = vrot.lane.b32.xlu1 %v5139_v39, %s4851_s28  ;;  %v5147_v34 = vld [vmem:[#allocation2 + $0x28] sm:$0xff]  ;;  %v5155_v42 = vld [vmem:[#allocation2 + $0x20] sm:$0xff] }
  0xd2   : > { %v5157_v43 = vld [vmem:[#allocation2 + $0x38] sm:$0xff]  ;;  %v5165_v44 = vld [vmem:[#allocation2 + $0x30] sm:$0xff] }
  0xd3   : > { %v3965_v40 = vld [vmem:[#allocation2 + $0x40] sm:$0xff]  ;;  %v3966_v41 = vld [vmem:[#allocation2 + $0x48] sm:$0xff] }
  0xd4   : > { %3987 = vmatpush.msra.mxu2 %v3965_v40  ;;  %4007 = vmatpush.msra.mxu3 %v3966_v41 }
  0xd8   : > { %968 = vrot.lane.b32.xlu2 %v5147_v34, %s4851_s28  ;;  %993 = vrot.lane.b32.xlu0 %v5147_v34, %s4853_s30 }
  0xd9   : > { %989 = vrot.lane.b32.xlu1 %v5137_v38, %s4853_s30 }
  0xe0   : > { %985 = vrot.lane.b32.xlu2 %v5155_v42, %s4853_s30  ;;  %970 = vrot.lane.b32.xlu0 %v5157_v43, %s4851_s28 }
  0xe1   : > { %960 = vrot.lane.b32.xlu1 %v5155_v42, %s4851_s28 }
  0xe8   : > { %962 = vrot.lane.b32.xlu2 %v5165_v44, %s4851_s28  ;;  %958 = vrot.lane.b32.xlu0 %v5167_v45, %s4851_s28 }
  0xe9   : > { %987 = vrot.lane.b32.xlu1 %v5165_v44, %s4853_s30 }
  0xf0   : > { %995 = vrot.lane.b32.xlu2 %v5157_v43, %s4853_s30  ;;  %991 = vrot.lane.b32.xlu0 %v5175_v46, %s4853_s30 }
  0xf1   : > { %966 = vrot.lane.b32.xlu1 %v5175_v46, %s4851_s28 }
  0xf8   : > { %983 = vrot.lane.b32.xlu2 %v5167_v45, %s4853_s30 }
 0x12a   : > { %v965_v49 = vpop.permute.xlu2 %964 }
 0x132   : > { %v969_v53 = vpop.permute.xlu2 %968 }
 0x13a   : > { %v986_v60 = vpop.permute.xlu2 %985 }
 0x142   : > { %v982_v54 = vpop.permute.xlu0 %981  ;;  %v963_v19 = vpop.permute.xlu2 %962 }
 0x143   : > { %v957_v55 = vpop.permute.xlu1 %956 }
 0x144   : > { %v973_v7 = vsel %vm10240_vm9, %v957_v55, %v965_v49  ;;  %v977_v8 = vsel %vm10240_vm9, %v965_v49, %v957_v55 }
 0x14a   : > { %v994_v3 = vpop.permute.xlu0 %993  ;;  %v996_v32 = vpop.permute.xlu2 %995 }
 0x14b   : > { %v990_v6 = vpop.permute.xlu1 %989  ;;  %v1004_v22 = vsel %vm10239_vm10, %v994_v3, %v986_v60  ;;  %v1000_v28 = vsel %vm10239_vm10, %v986_v60, %v994_v3 }
 0x14c   : > { %v998_v9 = vsel %vm10239_vm10, %v982_v54, %v990_v6  ;;  %v1002_v10 = vsel %vm10239_vm10, %v990_v6, %v982_v54 }
 0x14d   : > { %v1016_v11 = vsel %vm5209_vm11, %v973_v7, %v1002_v10  ;;  %v1017_v12 = vsel %vm5213_vm12, %v977_v8, %v998_v9 }
 0x14e   : > { %v1032_v13 = vmax.f32 %v5139_v39, %v1016_v11  ;;  %v1033_v14 = vmax.f32 %v5137_v38, %v1017_v12  ;;  %v1040_v15 = vmin.f32 %v5139_v39, %v1016_v11  ;;  %v1041_v16 = vmin.f32 %v5137_v38, %v1017_v12 }
 0x150   : > { %v5240_v17 = vsel %vm1030_vm13, %v1032_v13, %v1040_v15  ;;  %v5245_v18 = vsel %vm1031_vm14, %v1033_v14, %v1041_v16  ;;  %v1124_v13 = vshra.s32 %v4966_v37, 2  ;;  %v1125_v14 = vshra.s32 %v4983_v52, 2 }
 0x151   : > { %1081 = vrot.lane.b32.xlu0 %v5240_v17, %s4854_s6  ;;  %1056 = vrot.lane.b32.xlu1 %v5240_v17, %s4852_s29  ;;  %v1112_v16 = vxor.u32 2, %v4966_v37 }
 0x152   : > { %1064 = vrot.lane.b32.xlu2 %v5245_v18, %s4852_s29  ;;  %v971_v20 = vpop.permute.xlu0 %970  ;;  %v984_v57 = vpop.permute.xlu2 %983 }
 0x153   : > { %v961_v21 = vpop.permute.xlu1 %960  ;;  %v976_v35 = vsel %vm10240_vm9, %v963_v19, %v971_v20  ;;  %v980_v49 = vsel %vm10240_vm9, %v971_v20, %v963_v19  ;;  %v1113_v19 = vxor.u32 2, %v4983_v52  ;;  %v1110_v20 = vsel %vm10242_vm15, %v5187_v50, %v5185_v47 }
 0x154   : > { %v975_v23 = vsel %vm10240_vm9, %v961_v21, %v969_v53  ;;  %v979_v25 = vsel %vm10240_vm9, %v969_v53, %v961_v21  ;;  %v1111_v21 = vsel %vm10242_vm15, %v5185_v47, %v5187_v50  ;;  %vm5379_vm2 = vcmp.eq.s32.totalorder %v1110_v20, %v1112_v16 }
 0x155   : > { %v1020_v24 = vsel %vm5209_vm11, %v975_v23, %v1004_v22  ;;  %v1021_v30 = vsel %vm5213_vm12, %v979_v25, %v1000_v28  ;;  %v5375_v22 = vand.u32 1, %v1124_v13  ;;  %v5377_v23 = vand.u32 1, %v1125_v14 }
 0x156   : > { %v1036_v26 = vmax.f32 %v5155_v42, %v1020_v24  ;;  %v1044_v27 = vmin.f32 %v5155_v42, %v1020_v24  ;;  %v1037_v36 = vmax.f32 %v5147_v34, %v1021_v30  ;;  %v1045_v38 = vmin.f32 %v5147_v34, %v1021_v30 }
 0x157   : > { %vm5383_vm3 = vcmp.eq.s32.totalorder %v1111_v21, %v1113_v19  ;;  %vm1128_vm4 = vcmp.eq.s32.totalorder %v5202_v0, %v5375_v22  ;;  %vm1129_vm5 = vcmp.eq.s32.totalorder %v5207_v2, %v5377_v23  ;;  %vm1210_vm6 = vcmp.eq.s32.totalorder %v5200_v63, %v5375_v22 }
 0x158   : > { %v5268_v29 = vsel %vm1030_vm13, %v1036_v26, %v1044_v27  ;;  %v5295_v34 = vsel %vm1031_vm14, %v1037_v36, %v1045_v38  ;;  %vm1211_vm7 = vcmp.eq.s32.totalorder %v5205_v1, %v5377_v23 }
 0x159   : > { %1089 = vrot.lane.b32.xlu1 %v5245_v18, %s4854_s6  ;;  %1060 = vrot.lane.b32.xlu0 %v5268_v29, %s4852_s29 }
 0x15a   : > { %1085 = vrot.lane.b32.xlu2 %v5268_v29, %s4854_s6  ;;  %v959_v31 = vpop.permute.xlu0 %958 }
 0x15b   : > { %v988_v33 = vpop.permute.xlu1 %987 }
 0x15c   : > { %v1005_v39 = vsel %vm10239_vm10, %v996_v32, %v988_v33  ;;  %v1001_v41 = vsel %vm10239_vm10, %v988_v33, %v996_v32 }
 0x15d   : > { %v1022_v40 = vsel %vm5209_vm11, %v976_v35, %v1005_v39  ;;  %v1023_v53 = vsel %vm5213_vm12, %v980_v49, %v1001_v41 }
 0x15e   : > { %v1038_v42 = vmax.f32 %v5165_v44, %v1022_v40  ;;  %v1046_v48 = vmin.f32 %v5165_v44, %v1022_v40  ;;  %v1039_v55 = vmax.f32 %v5157_v43, %v1023_v53  ;;  %v1047_v56 = vmin.f32 %v5157_v43, %v1023_v53 }
 0x160   : > { %v5300_v51 = vsel %vm1030_vm13, %v1038_v42, %v1046_v48  ;;  %v5323_v62 = vsel %vm1031_vm14, %v1039_v55, %v1047_v56 }
 0x161   : > { %1068 = vrot.lane.b32.xlu1 %v5295_v34, %s4852_s29  ;;  %1093 = vrot.lane.b32.xlu0 %v5295_v34, %s4854_s6 }
 0x162   : > { %1062 = vrot.lane.b32.xlu2 %v5300_v51, %s4852_s29  ;;  %v992_v44 = vpop.permute.xlu0 %991 }
 0x163   : > { %v967_v54 = vpop.permute.xlu1 %966  ;;  %v999_v58 = vsel %vm10239_vm10, %v984_v57, %v992_v44  ;;  %v1003_v59 = vsel %vm10239_vm10, %v992_v44, %v984_v57 }
 0x164   : > { %v974_v60 = vsel %vm10240_vm9, %v959_v31, %v967_v54  ;;  %v978_v61 = vsel %vm10240_vm9, %v967_v54, %v959_v31 }
 0x165   : > { %v1018_v43 = vsel %vm5209_vm11, %v974_v60, %v1003_v59  ;;  %v1019_v3 = vsel %vm5213_vm12, %v978_v61, %v999_v58 }
 0x166   : > { %v1034_v6 = vmax.f32 %v5167_v45, %v1018_v43  ;;  %v1035_v7 = vmax.f32 %v5175_v46, %v1019_v3  ;;  %v1042_v8 = vmin.f32 %v5167_v45, %v1018_v43  ;;  %v1043_v9 = vmin.f32 %v5175_v46, %v1019_v3 }
 0x168   : > { %v5342_v10 = vsel %vm1031_vm14, %v1035_v7, %v1043_v9  ;;  %v5347_v11 = vsel %vm1030_vm13, %v1034_v6, %v1042_v8  ;;  %vm10243_vm13 = vcmp.lt.s32.totalorder %v4966_v37, 4 }
 0x169   : > { %1087 = vrot.lane.b32.xlu1 %v5300_v51, %s4854_s6  ;;  %1070 = vrot.lane.b32.xlu0 %v5323_v62, %s4852_s29 }
 0x16a   : > { %1095 = vrot.lane.b32.xlu2 %v5323_v62, %s4854_s6 }
 0x171   : > { %1066 = vrot.lane.b32.xlu1 %v5342_v10, %s4852_s29  ;;  %1058 = vrot.lane.b32.xlu0 %v5347_v11, %s4852_s29 }
 0x172   : > { %1083 = vrot.lane.b32.xlu2 %v5347_v11, %s4854_s6 }
 0x179   : > { %1091 = vrot.lane.b32.xlu0 %v5342_v10, %s4854_s6 }
 0x17a   : > { %1286 = vrot.lane.b32.xlu2 %v4966_v37, %s4855_s7 }
 0x181   : > { %1288 = vrot.lane.b32.xlu0 %v4983_v52, %s4855_s7 }
 0x1ac   : > { %v1065_v45 = vpop.permute.xlu2 %1064 }
 0x1b4   : > { %v1086_v15 = vpop.permute.xlu2 %1085 }
 0x1bc   : > { %v1063_v39 = vpop.permute.xlu2 %1062 }
 0x1c3   : > { %v1082_v46 = vpop.permute.xlu0 %1081  ;;  %v1057_v12 = vpop.permute.xlu1 %1056 }
 0x1c4   : > { %v1073_v28 = vsel %vm10242_vm15, %v1057_v12, %v1065_v45  ;;  %v1077_v47 = vsel %vm10242_vm15, %v1065_v45, %v1057_v12  ;;  %v1096_v58 = vpop.permute.xlu2 %1095 }
 0x1cb   : > { %v1061_v26 = vpop.permute.xlu0 %1060  ;;  %v1090_v27 = vpop.permute.xlu1 %1089 }
 0x1cc   : > { %v1098_v50 = vsel %vm10241_vm1, %v1082_v46, %v1090_v27  ;;  %v1102_v30 = vsel %vm10241_vm1, %v1090_v27, %v1082_v46  ;;  %v1084_v19 = vpop.permute.xlu2 %1083 }
 0x1cd   : > { %v1116_v31 = vsel %vm5379_vm2, %v1073_v28, %v1102_v30  ;;  %v1117_v32 = vsel %vm5383_vm3, %v1077_v47, %v1098_v50 }
 0x1ce   : > { %v1130_v33 = vmax.f32 %v5240_v17, %v1116_v31  ;;  %v1131_v35 = vmax.f32 %v5245_v18, %v1117_v32  ;;  %v1138_v36 = vmin.f32 %v5240_v17, %v1116_v31  ;;  %v1139_v38 = vmin.f32 %v5245_v18, %v1117_v32 }
 0x1d0   : > { %v5410_v40 = vsel %vm1128_vm4, %v1130_v33, %v1138_v36  ;;  %v5415_v41 = vsel %vm1129_vm5, %v1131_v35, %v1139_v38 }
 0x1d1   : > { %1178 = vrot.lane.b32.xlu1 %v5410_v40, %s4853_s30  ;;  %1154 = vrot.lane.b32.xlu2 %v5410_v40, %s4851_s28 }
 0x1d2   : > { %1162 = vrot.lane.b32.xlu0 %v5415_v41, %s4851_s28 }
 0x1d3   : > { %v1094_v17 = vpop.permute.xlu0 %1093  ;;  %v1069_v18 = vpop.permute.xlu1 %1068 }
 0x1d4   : > { %v1104_v42 = vsel %vm10241_vm1, %v1094_v17, %v1086_v15  ;;  %v1075_v48 = vsel %vm10242_vm15, %v1061_v26, %v1069_v18  ;;  %v1100_v53 = vsel %vm10241_vm1, %v1086_v15, %v1094_v17  ;;  %v1079_v44 = vsel %vm10242_vm15, %v1069_v18, %v1061_v26 }
 0x1d5   : > { %v1120_v49 = vsel %vm5379_vm2, %v1075_v48, %v1104_v42  ;;  %v1121_v57 = vsel %vm5383_vm3, %v1079_v44, %v1100_v53 }
 0x1d6   : > { %v1134_v54 = vmax.f32 %v5268_v29, %v1120_v49  ;;  %v1142_v55 = vmin.f32 %v5268_v29, %v1120_v49  ;;  %v1135_v60 = vmax.f32 %v5295_v34, %v1121_v57  ;;  %v1143_v61 = vmin.f32 %v5295_v34, %v1121_v57 }
 0x1d8   : > { %v5438_v56 = vsel %vm1128_vm4, %v1134_v54, %v1142_v55  ;;  %v5465_v34 = vsel %vm1129_vm5, %v1135_v60, %v1143_v61 }
 0x1d9   : > { %1186 = vrot.lane.b32.xlu2 %v5415_v41, %s4853_s30  ;;  %1158 = vrot.lane.b32.xlu1 %v5438_v56, %s4851_s28 }
 0x1da   : > { %1182 = vrot.lane.b32.xlu0 %v5438_v56, %s4853_s30 }
 0x1db   : > { %v1071_v59 = vpop.permute.xlu0 %1070  ;;  %v1088_v29 = vpop.permute.xlu1 %1087 }
 0x1dc   : > { %v1076_v43 = vsel %vm10242_vm15, %v1063_v39, %v1071_v59  ;;  %v1105_v3 = vsel %vm10241_vm1, %v1096_v58, %v1088_v29  ;;  %v1080_v7 = vsel %vm10242_vm15, %v1071_v59, %v1063_v39  ;;  %v1101_v8 = vsel %vm10241_vm1, %v1088_v29, %v1096_v58 }
 0x1dd   : > { %v1122_v6 = vsel %vm5379_vm2, %v1076_v43, %v1105_v3  ;;  %v1123_v12 = vsel %vm5383_vm3, %v1080_v7, %v1101_v8 }
 0x1de   : > { %v1136_v9 = vmax.f32 %v5300_v51, %v1122_v6  ;;  %v1144_v45 = vmin.f32 %v5300_v51, %v1122_v6  ;;  %v1137_v13 = vmax.f32 %v5323_v62, %v1123_v12  ;;  %v1145_v14 = vmin.f32 %v5323_v62, %v1123_v12 }
 0x1e0   : > { %v5470_v46 = vsel %vm1128_vm4, %v1136_v9, %v1144_v45  ;;  %v5485_v15 = vsel %vm1129_vm5, %v1137_v13, %v1145_v14 }
 0x1e1   : > { %1166 = vrot.lane.b32.xlu2 %v5465_v34, %s4851_s28  ;;  %1190 = vrot.lane.b32.xlu1 %v5465_v34, %s4853_s30 }
 0x1e2   : > { %1160 = vrot.lane.b32.xlu0 %v5470_v46, %s4851_s28 }
 0x1e3   : > { %v1059_v51 = vpop.permute.xlu0 %1058  ;;  %v1067_v16 = vpop.permute.xlu1 %1066 }
 0x1e4   : > { %v1074_v62 = vsel %vm10242_vm15, %v1059_v51, %v1067_v16  ;;  %v1078_v21 = vsel %vm10242_vm15, %v1067_v16, %v1059_v51 }
 0x1e9   : > { %1184 = vrot.lane.b32.xlu2 %v5470_v46, %s4853_s30  ;;  %1168 = vrot.lane.b32.xlu1 %v5485_v15, %s4851_s28 }
 0x1ea   : > { %1192 = vrot.lane.b32.xlu0 %v5485_v15, %s4853_s30 }
 0x1eb   : > { %v1092_v20 = vpop.permute.xlu0 %1091 }
 0x1ec   : > { %v1099_v26 = vsel %vm10241_vm1, %v1084_v19, %v1092_v20  ;;  %v1103_v27 = vsel %vm10241_vm1, %v1092_v20, %v1084_v19 }
 0x1ed   : > { %v1118_v28 = vsel %vm5379_vm2, %v1074_v62, %v1103_v27  ;;  %v1119_v47 = vsel %vm5383_vm3, %v1078_v21, %v1099_v26 }
 0x1ee   : > { %v1132_v50 = vmax.f32 %v5347_v11, %v1118_v28  ;;  %v1133_v30 = vmax.f32 %v5342_v10, %v1119_v47  ;;  %v1140_v31 = vmin.f32 %v5347_v11, %v1118_v28  ;;  %v1141_v32 = vmin.f32 %v5342_v10, %v1119_v47  ;;  %v5527_v10 = vpop.permute.xlu2 %1286 }
 0x1f0   : > { %v5512_v33 = vsel %vm1129_vm5, %v1133_v30, %v1141_v32  ;;  %v5517_v35 = vsel %vm1128_vm4, %v1132_v50, %v1140_v31 }
 0x1f1   : > { %1164 = vrot.lane.b32.xlu2 %v5512_v33, %s4851_s28  ;;  %1156 = vrot.lane.b32.xlu1 %v5517_v35, %s4851_s28 }
 0x1f2   : > { %1180 = vrot.lane.b32.xlu0 %v5517_v35, %s4853_s30 }
 0x1f3   : > { %v5529_v36 = vpop.permute.xlu0 %1288 }
 0x1f9   : > { %1188 = vrot.lane.b32.xlu1 %v5512_v33, %s4853_s30 }
 0x22b   : > { %v1155_v11 = vpop.permute.xlu2 %1154 }
 0x233   : > { %v1187_v38 = vpop.permute.xlu2 %1186 }
 0x23b   : > { %v1167_v60 = vpop.permute.xlu2 %1166 }
 0x243   : > { %v1179_v39 = vpop.permute.xlu1 %1178 }
 0x244   : > { %v1163_v17 = vpop.permute.xlu0 %1162  ;;  %v1194_v18 = vsel %vm10239_vm10, %v1179_v39, %v1187_v38  ;;  %v1198_v42 = vsel %vm10239_vm10, %v1187_v38, %v1179_v39 }
 0x245   : > { %v1170_v48 = vsel %vm10240_vm9, %v1155_v11, %v1163_v17  ;;  %v1174_v49 = vsel %vm10240_vm9, %v1163_v17, %v1155_v11 }
 0x246   : > { %v1202_v53 = vsel %vm5209_vm11, %v1170_v48, %v1198_v42  ;;  %v1203_v44 = vsel %vm5213_vm12, %v1174_v49, %v1194_v18 }
 0x247   : > { %v1212_v54 = vmax.f32 %v5410_v40, %v1202_v53  ;;  %v1213_v55 = vmax.f32 %v5415_v41, %v1203_v44  ;;  %v1220_v57 = vmin.f32 %v5410_v40, %v1202_v53  ;;  %v1221_v58 = vmin.f32 %v5415_v41, %v1203_v44 }
 0x249   : > { %v5554_v59 = vsel %vm1210_vm6, %v1212_v54, %v1220_v57  ;;  %v5559_v29 = vsel %vm1211_vm7, %v1213_v55, %v1221_v58 }
 0x24a   : > { %1261 = vrot.lane.b32.xlu1 %v5554_v59, %s4856_s8  ;;  %1236 = vrot.lane.b32.xlu2 %v5554_v59, %s4855_s7 }
 0x24b   : > { %1244 = vrot.lane.b32.xlu0 %v5559_v29, %s4855_s7  ;;  %v1159_v40 = vpop.permute.xlu1 %1158 }
 0x24c   : > { %v1183_v41 = vpop.permute.xlu0 %1182  ;;  %v1172_v43 = vsel %vm10240_vm9, %v1159_v40, %v1167_v60  ;;  %v1176_v3 = vsel %vm10240_vm9, %v1167_v60, %v1159_v40  ;;  %v1305_v60 = vshra.s32 %v4983_v52, 3 }
 0x252   : > { %1269 = vrot.lane.b32.xlu2 %v5559_v29, %s4856_s8 }
 0x253   : > { %v1191_v61 = vpop.permute.xlu1 %1190 }
 0x254   : > { %v1161_v6 = vpop.permute.xlu0 %1160  ;;  %v1196_v7 = vsel %vm10239_vm10, %v1183_v41, %v1191_v61  ;;  %v1200_v8 = vsel %vm10239_vm10, %v1191_v61, %v1183_v41  ;;  %v1292_v61 = vxor.u32 4, %v4966_v37 }
 0x255   : > { %v1206_v9 = vsel %vm5209_vm11, %v1172_v43, %v1200_v8  ;;  %v1207_v45 = vsel %vm5213_vm12, %v1176_v3, %v1196_v7  ;;  %v1293_v43 = vxor.u32 4, %v4983_v52  ;;  %v1290_v3 = vsel %vm10244_vm8, %v5527_v10, %v5529_v36 }
 0x256   : > { %v1216_v12 = vmax.f32 %v5438_v56, %v1206_v9  ;;  %v1217_v51 = vmax.f32 %v5465_v34, %v1207_v45  ;;  %v1224_v13 = vmin.f32 %v5438_v56, %v1206_v9  ;;  %v1225_v14 = vmin.f32 %v5465_v34, %v1207_v45  ;;  %v1185_v34 = vpop.permute.xlu2 %1184 }
 0x257   : > { %v5687_v8 = vand.u32 1, %v1305_v60  ;;  %vm5693_vm14 = vcmp.eq.s32.totalorder %v1290_v3, %v1292_v61 }
 0x258   : > { %v5588_v16 = vsel %vm1210_vm6, %v1216_v12, %v1224_v13  ;;  %v5593_v19 = vsel %vm1211_vm7, %v1217_v51, %v1225_v14 }
 0x259   : > { %1265 = vrot.lane.b32.xlu0 %v5588_v16, %s4856_s8  ;;  %1240 = vrot.lane.b32.xlu1 %v5588_v16, %s4855_s7 }
 0x25a   : > { %1248 = vrot.lane.b32.xlu2 %v5593_v19, %s4855_s7 }
 0x25b   : > { %v1169_v56 = vpop.permute.xlu1 %1168 }
 0x25c   : > { %v1193_v20 = vpop.permute.xlu0 %1192  ;;  %v1173_v62 = vsel %vm10240_vm9, %v1161_v6, %v1169_v56  ;;  %v1177_v27 = vsel %vm10240_vm9, %v1169_v56, %v1161_v6  ;;  %v1291_v6 = vsel %vm10244_vm8, %v5529_v36, %v5527_v10 }
 0x25d   : > { %v1201_v21 = vsel %vm10239_vm10, %v1193_v20, %v1185_v34  ;;  %v1197_v26 = vsel %vm10239_vm10, %v1185_v34, %v1193_v20  ;;  %vm5697_vm4 = vcmp.eq.s32.totalorder %v1291_v6, %v1293_v43 }
 0x25e   : > { %v1208_v28 = vsel %vm5209_vm11, %v1173_v62, %v1201_v21  ;;  %v1209_v30 = vsel %vm5213_vm12, %v1177_v27, %v1197_v26  ;;  %v1165_v39 = vpop.permute.xlu2 %1164 }
 0x25f   : > { %v1218_v47 = vmax.f32 %v5470_v46, %v1208_v28  ;;  %v1226_v50 = vmin.f32 %v5470_v46, %v1208_v28  ;;  %v1219_v46 = vmax.f32 %v5485_v15, %v1209_v30  ;;  %v1227_v11 = vmin.f32 %v5485_v15, %v1209_v30 }
 0x261   : > { %1273 = vrot.lane.b32.xlu1 %v5593_v19, %s4856_s8  ;;  %v5620_v31 = vsel %vm1210_vm6, %v1218_v47, %v1226_v50  ;;  %v5631_v38 = vsel %vm1211_vm7, %v1219_v46, %v1227_v11 }
 0x262   : > { %1267 = vrot.lane.b32.xlu2 %v5620_v31, %s4856_s8  ;;  %1242 = vrot.lane.b32.xlu0 %v5620_v31, %s4855_s7 }
 0x263   : > { %v1157_v32 = vpop.permute.xlu1 %1156 }
 0x264   : > { %v1181_v17 = vpop.permute.xlu0 %1180  ;;  %v1171_v42 = vsel %vm10240_vm9, %v1157_v32, %v1165_v39  ;;  %v1175_v15 = vsel %vm10240_vm9, %v1165_v39, %v1157_v32 }
 0x269   : > { %1250 = vrot.lane.b32.xlu1 %v5631_v38, %s4855_s7 }
 0x26a   : > { %1275 = vrot.lane.b32.xlu0 %v5631_v38, %s4856_s8 }
 0x26b   : > { %v1189_v18 = vpop.permute.xlu1 %1188 }
 0x26c   : > { %v1195_v48 = vsel %vm10239_vm10, %v1181_v17, %v1189_v18  ;;  %v1199_v49 = vsel %vm10239_vm10, %v1189_v18, %v1181_v17 }
 0x26d   : > { %v1204_v53 = vsel %vm5209_vm11, %v1171_v42, %v1199_v49  ;;  %v1205_v44 = vsel %vm5213_vm12, %v1175_v15, %v1195_v48 }
 0x26e   : > { %v1214_v54 = vmax.f32 %v5517_v35, %v1204_v53  ;;  %v1215_v55 = vmax.f32 %v5512_v33, %v1205_v44  ;;  %v1222_v57 = vmin.f32 %v5517_v35, %v1204_v53  ;;  %v1223_v58 = vmin.f32 %v5512_v33, %v1205_v44 }
 0x26f   : > { %v1304_v35 = vshra.s32 %v4966_v37, 3 }
 0x270   : > { %v5656_v40 = vsel %vm1210_vm6, %v1214_v54, %v1222_v57  ;;  %v5661_v41 = vsel %vm1211_vm7, %v1215_v55, %v1223_v58  ;;  %vm1309_vm6 = vcmp.eq.s32.totalorder %v5377_v23, %v5687_v8  ;;  %vm1391_vm7 = vcmp.eq.s32.totalorder %v5207_v2, %v5687_v8 }
 0x271   : > { %1238 = vrot.lane.b32.xlu1 %v5656_v40, %s4855_s7  ;;  %1246 = vrot.lane.b32.xlu2 %v5661_v41, %s4855_s7  ;;  %v5685_v7 = vand.u32 1, %v1304_v35 }
 0x272   : > { %1263 = vrot.lane.b32.xlu0 %v5656_v40, %s4856_s8 }
 0x273   : > { %vm1308_vm5 = vcmp.eq.s32.totalorder %v5375_v22, %v5685_v7 }
 0x279   : > { %1271 = vrot.lane.b32.xlu1 %v5661_v41, %s4856_s8 }
 0x2a4   : > { %v1237_v33 = vpop.permute.xlu2 %1236 }
 0x2ac   : > { %v1270_v9 = vpop.permute.xlu2 %1269 }
 0x2b4   : > { %v1249_v50 = vpop.permute.xlu2 %1248 }
 0x2bc   : > { %v1262_v45 = vpop.permute.xlu1 %1261  ;;  %v1268_v55 = vpop.permute.xlu2 %1267 }
 0x2bd   : > { %v1245_v12 = vpop.permute.xlu0 %1244  ;;  %v1278_v51 = vsel %vm10243_vm13, %v1262_v45, %v1270_v9  ;;  %v1282_v13 = vsel %vm10243_vm13, %v1270_v9, %v1262_v45 }
 0x2be   : > { %v1253_v10 = vsel %vm10244_vm8, %v1237_v33, %v1245_v12  ;;  %v1257_v36 = vsel %vm10244_vm8, %v1245_v12, %v1237_v33 }
 0x2bf   : > { %v1296_v34 = vsel %vm5693_vm14, %v1253_v10, %v1282_v13  ;;  %v1297_v20 = vsel %vm5697_vm4, %v1257_v36, %v1278_v51 }
 0x2c0   : > { %v1310_v62 = vmax.f32 %v5554_v59, %v1296_v34  ;;  %v1311_v21 = vmax.f32 %v5559_v29, %v1297_v20  ;;  %v1318_v26 = vmin.f32 %v5554_v59, %v1296_v34  ;;  %v1319_v27 = vmin.f32 %v5559_v29, %v1297_v20 }
 0x2c2   : > { %v5720_v28 = vsel %vm1308_vm5, %v1310_v62, %v1318_v26  ;;  %v5725_v47 = vsel %vm1309_vm6, %v1311_v21, %v1319_v27 }
 0x2c3   : > { %1358 = vrot.lane.b32.xlu2 %v5720_v28, %s4854_s6  ;;  %1334 = vrot.lane.b32.xlu0 %v5720_v28, %s4852_s29 }
 0x2c4   : > { %1342 = vrot.lane.b32.xlu1 %v5725_v47, %s4852_s29 }
 0x2cb   : > { %1366 = vrot.lane.b32.xlu0 %v5725_v47, %s4854_s6  ;;  %v1266_v59 = vpop.permute.xlu0 %1265  ;;  %v1241_v29 = vpop.permute.xlu1 %1240 }
 0x2cc   : > { %v1255_v46 = vsel %vm10244_vm8, %v1241_v29, %v1249_v50  ;;  %v1259_v11 = vsel %vm10244_vm8, %v1249_v50, %v1241_v29  ;;  %v1247_v51 = vpop.permute.xlu2 %1246 }
 0x2d3   : > { %v1274_v32 = vpop.permute.xlu1 %1273 }
 0x2d4   : > { %v1243_v30 = vpop.permute.xlu0 %1242  ;;  %v1280_v39 = vsel %vm10243_vm13, %v1266_v59, %v1274_v32  ;;  %v1284_v17 = vsel %vm10243_vm13, %v1274_v32, %v1266_v59 }
 0x2d5   : > { %v1300_v18 = vsel %vm5693_vm14, %v1255_v46, %v1284_v17  ;;  %v1301_v42 = vsel %vm5697_vm4, %v1259_v11, %v1280_v39 }
 0x2d6   : > { %v1314_v15 = vmax.f32 %v5588_v16, %v1300_v18  ;;  %v1315_v48 = vmax.f32 %v5593_v19, %v1301_v42  ;;  %v1322_v49 = vmin.f32 %v5588_v16, %v1300_v18  ;;  %v1323_v53 = vmin.f32 %v5593_v19, %v1301_v42 }
 0x2d8   : > { %v5754_v44 = vsel %vm1308_vm5, %v1314_v15, %v1322_v49  ;;  %v5759_v54 = vsel %vm1309_vm6, %v1315_v48, %v1323_v53 }
 0x2d9   : > { %1362 = vrot.lane.b32.xlu1 %v5754_v44, %s4854_s6  ;;  %1338 = vrot.lane.b32.xlu2 %v5754_v44, %s4852_s29 }
 0x2da   : > { %1346 = vrot.lane.b32.xlu0 %v5759_v54, %s4852_s29 }
 0x2db   : > { %v1251_v19 = vpop.permute.xlu1 %1250 }
 0x2dc   : > { %v1276_v16 = vpop.permute.xlu0 %1275  ;;  %v1256_v58 = vsel %vm10244_vm8, %v1243_v30, %v1251_v19  ;;  %v1260_v60 = vsel %vm10244_vm8, %v1251_v19, %v1243_v30 }
 0x2dd   : > { %v1285_v57 = vsel %vm10243_vm13, %v1276_v16, %v1268_v55  ;;  %v1281_v35 = vsel %vm10243_vm13, %v1268_v55, %v1276_v16 }
 0x2de   : > { %v1302_v33 = vsel %vm5693_vm14, %v1256_v58, %v1285_v57  ;;  %v1303_v6 = vsel %vm5697_vm4, %v1260_v60, %v1281_v35 }
 0x2df   : > { %v1316_v61 = vmax.f32 %v5620_v31, %v1302_v33  ;;  %v1324_v43 = vmin.f32 %v5620_v31, %v1302_v33  ;;  %v1317_v31 = vmax.f32 %v5631_v38, %v1303_v6  ;;  %v1325_v45 = vmin.f32 %v5631_v38, %v1303_v6 }
 0x2e1   : > { %v5782_v3 = vsel %vm1308_vm5, %v1316_v61, %v1324_v43  ;;  %1370 = vrot.lane.b32.xlu2 %v5759_v54, %s4854_s6  ;;  %v5797_v12 = vsel %vm1309_vm6, %v1317_v31, %v1325_v45 }
 0x2e2   : > { %1340 = vrot.lane.b32.xlu1 %v5782_v3, %s4852_s29  ;;  %1364 = vrot.lane.b32.xlu0 %v5782_v3, %s4854_s6 }
 0x2e3   : > { %v1239_v9 = vpop.permute.xlu1 %1238 }
 0x2e4   : > { %v1264_v13 = vpop.permute.xlu0 %1263  ;;  %v1254_v36 = vsel %vm10244_vm8, %v1239_v9, %v1247_v51  ;;  %v1258_v38 = vsel %vm10244_vm8, %v1247_v51, %v1239_v9 }
 0x2e9   : > { %1348 = vrot.lane.b32.xlu2 %v5797_v12, %s4852_s29 }
 0x2ea   : > { %1372 = vrot.lane.b32.xlu1 %v5797_v12, %s4854_s6 }
 0x2eb   : > { %v1272_v10 = vpop.permute.xlu1 %1271 }
 0x2ec   : > { %v1279_v34 = vsel %vm10243_vm13, %v1264_v13, %v1272_v10  ;;  %v1283_v20 = vsel %vm10243_vm13, %v1272_v10, %v1264_v13 }
 0x2ed   : > { %v1298_v62 = vsel %vm5693_vm14, %v1254_v36, %v1283_v20  ;;  %v1299_v21 = vsel %vm5697_vm4, %v1258_v38, %v1279_v34 }
 0x2ee   : > { %v1312_v26 = vmax.f32 %v5656_v40, %v1298_v62  ;;  %v1313_v27 = vmax.f32 %v5661_v41, %v1299_v21  ;;  %v1320_v59 = vmin.f32 %v5656_v40, %v1298_v62  ;;  %v1321_v29 = vmin.f32 %v5661_v41, %v1299_v21 }
 0x2f0   : > { %v5822_v50 = vsel %vm1308_vm5, %v1312_v26, %v1320_v59  ;;  %v5827_v30 = vsel %vm1309_vm6, %v1313_v27, %v1321_v29  ;;  %vm1390_vm5 = vcmp.eq.s32.totalorder %v5202_v0, %v5685_v7  ;;  %vm1472_vm6 = vcmp.eq.s32.totalorder %v5200_v63, %v5685_v7 }
 0x2f1   : > { %1336 = vrot.lane.b32.xlu2 %v5822_v50, %s4852_s29  ;;  %1344 = vrot.lane.b32.xlu0 %v5827_v30, %s4852_s29 }
 0x2f2   : > { %1360 = vrot.lane.b32.xlu1 %v5822_v50, %s4854_s6 }
 0x2f9   : > { %1368 = vrot.lane.b32.xlu2 %v5827_v30, %s4854_s6 }
 0x2fa   : > { %1548 = vrot.lane.b32.xlu1 %v4966_v37, %s4857_s9 }
 0x31d   : > { %v1359_v40 = vpop.permute.xlu2 %1358 }
 0x333   : > { %v1339_v46 = vpop.permute.xlu2 %1338 }
 0x335   : > { %v1335_v41 = vpop.permute.xlu0 %1334 }
 0x336   : > { %v1343_v32 = vpop.permute.xlu1 %1342 }
 0x337   : > { %v1350_v39 = vsel %vm10242_vm15, %v1335_v41, %v1343_v32  ;;  %v1354_v17 = vsel %vm10242_vm15, %v1343_v32, %v1335_v41 }
 0x33d   : > { %v1367_v11 = vpop.permute.xlu0 %1366 }
 0x33e   : > { %v1374_v18 = vsel %vm10241_vm1, %v1359_v40, %v1367_v11  ;;  %v1378_v42 = vsel %vm10241_vm1, %v1367_v11, %v1359_v40 }
 0x33f   : > { %v1382_v15 = vsel %vm5379_vm2, %v1350_v39, %v1378_v42  ;;  %v1383_v48 = vsel %vm5383_vm3, %v1354_v17, %v1374_v18 }
 0x340   : > { %v1392_v49 = vmax.f32 %v5720_v28, %v1382_v15  ;;  %v1393_v53 = vmax.f32 %v5725_v47, %v1383_v48  ;;  %v1400_v55 = vmin.f32 %v5720_v28, %v1382_v15  ;;  %v1401_v16 = vmin.f32 %v5725_v47, %v1383_v48  ;;  %v1371_v28 = vpop.permute.xlu2 %1370 }
 0x342   : > { %v5862_v19 = vsel %vm1391_vm7, %v1393_v53, %v1401_v16  ;;  %v5867_v57 = vsel %vm1390_vm5, %v1392_v49, %v1400_v55 }
 0x343   : > { %1424 = vrot.lane.b32.xlu2 %v5862_v19, %s4851_s28  ;;  %1440 = vrot.lane.b32.xlu0 %v5867_v57, %s4853_s30 }
 0x344   : > { %1416 = vrot.lane.b32.xlu1 %v5867_v57, %s4851_s28 }
 0x348   : > { %v1349_v9 = vpop.permute.xlu2 %1348 }
 0x34b   : > { %v1363_v47 = vpop.permute.xlu1 %1362 }
 0x34c   : > { %1448 = vrot.lane.b32.xlu1 %v5862_v19, %s4853_s30  ;;  %v1347_v58 = vpop.permute.xlu0 %1346  ;;  %v1376_v33 = vsel %vm10241_vm1, %v1363_v47, %v1371_v28  ;;  %v1380_v35 = vsel %vm10241_vm1, %v1371_v28, %v1363_v47 }
 0x34d   : > { %v1352_v60 = vsel %vm10242_vm15, %v1339_v46, %v1347_v58  ;;  %v1356_v61 = vsel %vm10242_vm15, %v1347_v58, %v1339_v46 }
 0x34e   : > { %v1386_v43 = vsel %vm5379_vm2, %v1352_v60, %v1380_v35  ;;  %v1387_v6 = vsel %vm5383_vm3, %v1356_v61, %v1376_v33 }
 0x34f   : > { %v1396_v31 = vmax.f32 %v5754_v44, %v1386_v43  ;;  %v1397_v45 = vmax.f32 %v5759_v54, %v1387_v6  ;;  %v1404_v51 = vmin.f32 %v5754_v44, %v1386_v43  ;;  %v1405_v13 = vmin.f32 %v5759_v54, %v1387_v6 }
 0x350   : > { %v1337_v54 = vpop.permute.xlu2 %1336 }
 0x351   : > { %v5896_v10 = vsel %vm1390_vm5, %v1396_v31, %v1404_v51  ;;  %v5901_v36 = vsel %vm1391_vm7, %v1397_v45, %v1405_v13 }
 0x352   : > { %1444 = vrot.lane.b32.xlu2 %v5896_v10, %s4853_s30  ;;  %1420 = vrot.lane.b32.xlu0 %v5896_v10, %s4851_s28 }
 0x354   : > { %1428 = vrot.lane.b32.xlu1 %v5901_v36, %s4851_s28  ;;  %v1341_v44 = vpop.permute.xlu1 %1340  ;;  %v1365_v38 = vpop.permute.xlu0 %1364 }
 0x355   : > { %v1353_v20 = vsel %vm10242_vm15, %v1341_v44, %v1349_v9  ;;  %v1357_v62 = vsel %vm10242_vm15, %v1349_v9, %v1341_v44 }
 0x35a   : > { %1452 = vrot.lane.b32.xlu0 %v5901_v36, %s4853_s30 }
 0x35c   : > { %v1373_v34 = vpop.permute.xlu1 %1372 }
 0x35d   : > { %v1377_v21 = vsel %vm10241_vm1, %v1365_v38, %v1373_v34  ;;  %v1381_v26 = vsel %vm10241_vm1, %v1373_v34, %v1365_v38 }
 0x35e   : > { %v1388_v27 = vsel %vm5379_vm2, %v1353_v20, %v1381_v26  ;;  %v1389_v59 = vsel %vm5383_vm3, %v1357_v62, %v1377_v21 }
 0x35f   : > { %v1398_v29 = vmax.f32 %v5782_v3, %v1388_v27  ;;  %v1399_v40 = vmax.f32 %v5797_v12, %v1389_v59  ;;  %v1406_v41 = vmin.f32 %v5782_v3, %v1388_v27  ;;  %v1407_v32 = vmin.f32 %v5797_v12, %v1389_v59  ;;  %v1369_v3 = vpop.permute.xlu2 %1368 }
 0x361   : > { %v5930_v46 = vsel %vm1390_vm5, %v1398_v29, %v1406_v41  ;;  %v5935_v11 = vsel %vm1391_vm7, %v1399_v40, %v1407_v32 }
 0x362   : > { %1446 = vrot.lane.b32.xlu1 %v5930_v46, %s4853_s30  ;;  %1422 = vrot.lane.b32.xlu2 %v5930_v46, %s4851_s28 }
 0x363   : > { %1430 = vrot.lane.b32.xlu0 %v5935_v11, %s4851_s28  ;;  %v1345_v39 = vpop.permute.xlu0 %1344 }
 0x364   : > { %v1361_v12 = vpop.permute.xlu1 %1360  ;;  %v1351_v42 = vsel %vm10242_vm15, %v1337_v54, %v1345_v39  ;;  %v1355_v15 = vsel %vm10242_vm15, %v1345_v39, %v1337_v54 }
 0x365   : > { %v1375_v17 = vsel %vm10241_vm1, %v1361_v12, %v1369_v3  ;;  %v1379_v18 = vsel %vm10241_vm1, %v1369_v3, %v1361_v12 }
 0x366   : > { %v1384_v48 = vsel %vm5379_vm2, %v1351_v42, %v1379_v18  ;;  %v1385_v49 = vsel %vm5383_vm3, %v1355_v15, %v1375_v17 }
 0x367   : > { %v1394_v53 = vmax.f32 %v5822_v50, %v1384_v48  ;;  %v1395_v55 = vmax.f32 %v5827_v30, %v1385_v49  ;;  %v1402_v16 = vmin.f32 %v5822_v50, %v1384_v48  ;;  %v1403_v28 = vmin.f32 %v5827_v30, %v1385_v49 }
 0x369   : > { %v5964_v47 = vsel %vm1390_vm5, %v1394_v53, %v1402_v16  ;;  %v5969_v58 = vsel %vm1391_vm7, %v1395_v55, %v1403_v28  ;;  %vm1473_vm7 = vcmp.eq.s32.totalorder %v5205_v1, %v5687_v8  ;;  %vm10246_vm5 = vcmp.lt.s32.totalorder %v4966_v37, 120 }
 0x36a   : > { %1454 = vrot.lane.b32.xlu2 %v5935_v11, %s4853_s30  ;;  %1426 = vrot.lane.b32.xlu1 %v5969_v58, %s4851_s28 }
 0x36b   : > { %1418 = vrot.lane.b32.xlu0 %v5964_v47, %s4851_s28 }
 0x36c   : > { %v5981_v50 = vpop.permute.xlu1 %1548 }
 0x372   : > { %1442 = vrot.lane.b32.xlu2 %v5964_v47, %s4853_s30 }
 0x373   : > { %1450 = vrot.lane.b32.xlu0 %v5969_v58, %s4853_s30 }
 0x37a   : > { %1550 = vrot.lane.b32.xlu2 %v4983_v52, %s4857_s9 }
 0x39d   : > { %v1425_v33 = vpop.permute.xlu2 %1424 }
 0x3ac   : > { %v1445_v38 = vpop.permute.xlu2 %1444 }
 0x3b5   : > { %v1441_v35 = vpop.permute.xlu0 %1440 }
 0x3b6   : > { %v1417_v30 = vpop.permute.xlu1 %1416 }
 0x3b7   : > { %v1432_v61 = vsel %vm10240_vm9, %v1417_v30, %v1425_v33  ;;  %v1436_v43 = vsel %vm10240_vm9, %v1425_v33, %v1417_v30 }
 0x3be   : > { %v1449_v60 = vpop.permute.xlu1 %1448 }
 0x3bf   : > { %v1456_v6 = vsel %vm10239_vm10, %v1441_v35, %v1449_v60  ;;  %v1460_v9 = vsel %vm10239_vm10, %v1449_v60, %v1441_v35 }
 0x3c0   : > { %v1464_v31 = vsel %vm5209_vm11, %v1432_v61, %v1460_v9  ;;  %v1465_v45 = vsel %vm5213_vm12, %v1436_v43, %v1456_v6 }
 0x3c1   : > { %v1474_v51 = vmax.f32 %v5867_v57, %v1464_v31  ;;  %v1475_v13 = vmax.f32 %v5862_v19, %v1465_v45  ;;  %v1482_v44 = vmin.f32 %v5867_v57, %v1464_v31  ;;  %v1483_v54 = vmin.f32 %v5862_v19, %v1465_v45  ;;  %v1423_v57 = vpop.permute.xlu2 %1422 }
 0x3c3   : > { %v6006_v34 = vsel %vm1472_vm6, %v1474_v51, %v1482_v44  ;;  %v6011_v20 = vsel %vm1473_vm7, %v1475_v13, %v1483_v54 }
 0x3c4   : > { %1523 = vrot.lane.b32.xlu0 %v6006_v34, %s4858_s10  ;;  %1498 = vrot.lane.b32.xlu1 %v6006_v34, %s4857_s9  ;;  %v1421_v19 = vpop.permute.xlu0 %1420 }
 0x3c5   : > { %1506 = vrot.lane.b32.xlu2 %v6011_v20, %s4857_s9 }
 0x3c6   : > { %v1429_v62 = vpop.permute.xlu1 %1428 }
 0x3c7   : > { %v1434_v26 = vsel %vm10240_vm9, %v1421_v19, %v1429_v62  ;;  %v1438_v27 = vsel %vm10240_vm9, %v1429_v62, %v1421_v19 }
 0x3c9   : > { %v1455_v42 = vpop.permute.xlu2 %1454 }
 0x3cc   : > { %1531 = vrot.lane.b32.xlu1 %v6011_v20, %s4858_s10  ;;  %v1453_v21 = vpop.permute.xlu0 %1452 }
 0x3cd   : > { %v1458_v59 = vsel %vm10239_vm10, %v1445_v38, %v1453_v21  ;;  %v1462_v29 = vsel %vm10239_vm10, %v1453_v21, %v1445_v38 }
 0x3ce   : > { %v1468_v40 = vsel %vm5209_vm11, %v1434_v26, %v1462_v29  ;;  %v1469_v41 = vsel %vm5213_vm12, %v1438_v27, %v1458_v59  ;;  %v1566_v26 = vshra.s32 %v4966_v37, 4  ;;  %v1567_v27 = vshra.s32 %v4983_v52, 4 }
 0x3cf   : > { %v1478_v32 = vmax.f32 %v5896_v10, %v1468_v40  ;;  %v1479_v3 = vmax.f32 %v5901_v36, %v1469_v41  ;;  %v1486_v12 = vmin.f32 %v5896_v10, %v1468_v40  ;;  %v1487_v39 = vmin.f32 %v5901_v36, %v1469_v41 }
 0x3d0   : > { %v1554_v29 = vxor.u32 8, %v4966_v37  ;;  %v1555_v40 = vxor.u32 8, %v4983_v52 }
 0x3d1   : > { %v6040_v17 = vsel %vm1473_vm7, %v1479_v3, %v1487_v39  ;;  %v6045_v18 = vsel %vm1472_vm6, %v1478_v32, %v1486_v12  ;;  %v1443_v6 = vpop.permute.xlu2 %1442  ;;  %v6135_v3 = vand.u32 1, %v1566_v26  ;;  %v6137_v12 = vand.u32 1, %v1567_v27 }
 0x3d2   : > { %1527 = vrot.lane.b32.xlu2 %v6045_v18, %s4858_s10  ;;  %1502 = vrot.lane.b32.xlu0 %v6045_v18, %s4857_s9 }
 0x3d4   : > { %1510 = vrot.lane.b32.xlu1 %v6040_v17, %s4857_s9  ;;  %v1447_v10 = vpop.permute.xlu1 %1446 }
 0x3d5   : > { %v1431_v36 = vpop.permute.xlu0 %1430  ;;  %v1463_v15 = vsel %vm10239_vm10, %v1455_v42, %v1447_v10  ;;  %v1459_v55 = vsel %vm10239_vm10, %v1447_v10, %v1455_v42 }
 0x3d6   : > { %v1435_v48 = vsel %vm10240_vm9, %v1423_v57, %v1431_v36  ;;  %v1439_v53 = vsel %vm10240_vm9, %v1431_v36, %v1423_v57 }
 0x3d7   : > { %v1470_v49 = vsel %vm5209_vm11, %v1435_v48, %v1463_v15  ;;  %v1471_v33 = vsel %vm5213_vm12, %v1439_v53, %v1459_v55 }
 0x3d8   : > { %v1480_v16 = vmax.f32 %v5930_v46, %v1470_v49  ;;  %v1488_v28 = vmin.f32 %v5930_v46, %v1470_v49  ;;  %v1481_v46 = vmax.f32 %v5935_v11, %v1471_v33  ;;  %v1489_v60 = vmin.f32 %v5935_v11, %v1471_v33 }
 0x3da   : > { %v6068_v30 = vsel %vm1472_vm6, %v1480_v16, %v1488_v28  ;;  %1535 = vrot.lane.b32.xlu0 %v6040_v17, %s4858_s10  ;;  %v6083_v61 = vsel %vm1473_vm7, %v1481_v46, %v1489_v60 }
 0x3db   : > { %1504 = vrot.lane.b32.xlu2 %v6068_v30, %s4857_s9 }
 0x3dc   : > { %1529 = vrot.lane.b32.xlu1 %v6068_v30, %s4858_s10  ;;  %v1427_v43 = vpop.permute.xlu1 %1426 }
 0x3dd   : > { %v1419_v35 = vpop.permute.xlu0 %1418 }
 0x3de   : > { %v1433_v31 = vsel %vm10240_vm9, %v1419_v35, %v1427_v43  ;;  %v1437_v11 = vsel %vm10240_vm9, %v1427_v43, %v1419_v35  ;;  %vm1571_vm9 = vcmp.eq.s32.totalorder %v5687_v8, %v6137_v12 }
 0x3e2   : > { %1512 = vrot.lane.b32.xlu0 %v6083_v61, %s4857_s9 }
 0x3e3   : > { %1537 = vrot.lane.b32.xlu2 %v6083_v61, %s4858_s10 }
 0x3e5   : > { %v1451_v9 = vpop.permute.xlu0 %1450 }
 0x3e6   : > { %v1457_v45 = vsel %vm10239_vm10, %v1443_v6, %v1451_v9  ;;  %v1461_v51 = vsel %vm10239_vm10, %v1451_v9, %v1443_v6  ;;  %vm1570_vm10 = vcmp.eq.s32.totalorder %v5685_v7, %v6135_v3 }
 0x3e7   : > { %v1466_v13 = vsel %vm5209_vm11, %v1433_v31, %v1461_v51  ;;  %v1467_v44 = vsel %vm5213_vm12, %v1437_v11, %v1457_v45 }
 0x3e8   : > { %v1476_v54 = vmax.f32 %v5964_v47, %v1466_v13  ;;  %v1477_v38 = vmax.f32 %v5969_v58, %v1467_v44  ;;  %v1484_v19 = vmin.f32 %v5964_v47, %v1466_v13  ;;  %v1485_v57 = vmin.f32 %v5969_v58, %v1467_v44  ;;  %v1551_v47 = vpop.permute.xlu2 %1550 }
 0x3e9   : > { %v1552_v41 = vsel %vm10246_vm5, %v5981_v50, %v1551_v47  ;;  %v1553_v32 = vsel %vm10246_vm5, %v1551_v47, %v5981_v50 }
 0x3ea   : > { %v6108_v62 = vsel %vm1473_vm7, %v1477_v38, %v1485_v57  ;;  %v6113_v21 = vsel %vm1472_vm6, %v1476_v54, %v1484_v19  ;;  %vm10245_vm6 = vcmp.lt.s32.totalorder %v4966_v37, 8  ;;  %vm6139_vm7 = vcmp.eq.s32.totalorder %v1552_v41, %v1554_v29 }
 0x3eb   : > { %1508 = vrot.lane.b32.xlu1 %v6108_v62, %s4857_s9  ;;  %1525 = vrot.lane.b32.xlu2 %v6113_v21, %s4858_s10  ;;  %vm6143_vm0 = vcmp.eq.s32.totalorder %v1553_v32, %v1555_v40 }
 0x3ec   : > { %1500 = vrot.lane.b32.xlu0 %v6113_v21, %s4857_s9 }
 0x3f4   : > { %1533 = vrot.lane.b32.xlu0 %v6108_v62, %s4858_s10 }
 0x41f   : > { %v1507_v59 = vpop.permute.xlu2 %1506 }
 0x42c   : > { %v1528_v16 = vpop.permute.xlu2 %1527 }
 0x435   : > { %v1505_v6 = vpop.permute.xlu2 %1504 }
 0x436   : > { %v1499_v58 = vpop.permute.xlu1 %1498  ;;  %v1524_v39 = vpop.permute.xlu0 %1523 }
 0x437   : > { %v1515_v15 = vsel %vm10246_vm5, %v1499_v58, %v1507_v59  ;;  %v1519_v50 = vsel %vm10246_vm5, %v1507_v59, %v1499_v58 }
 0x43e   : > { %v1532_v36 = vpop.permute.xlu1 %1531 }
 0x43f   : > { %v1540_v48 = vsel %vm10245_vm6, %v1524_v39, %v1532_v36  ;;  %v1544_v49 = vsel %vm10245_vm6, %v1532_v36, %v1524_v39 }
 0x440   : > { %v1558_v53 = vsel %vm6139_vm7, %v1515_v15, %v1544_v49  ;;  %v1559_v55 = vsel %vm6143_vm0, %v1519_v50, %v1540_v48 }
 0x441   : > { %v1572_v28 = vmax.f32 %v6006_v34, %v1558_v53  ;;  %v1573_v33 = vmax.f32 %v6011_v20, %v1559_v55  ;;  %v1580_v35 = vmin.f32 %v6006_v34, %v1558_v53  ;;  %v1581_v46 = vmin.f32 %v6011_v20, %v1559_v55 }
 0x443   : > { %v6170_v60 = vsel %vm1570_vm10, %v1572_v28, %v1580_v35  ;;  %v6175_v43 = vsel %vm1571_vm9, %v1573_v33, %v1581_v46 }
 0x444   : > { %1620 = vrot.lane.b32.xlu1 %v6170_v60, %s4856_s8  ;;  %1596 = vrot.lane.b32.xlu2 %v6170_v60, %s4855_s7  ;;  %v1503_v34 = vpop.permute.xlu0 %1502 }
 0x445   : > { %1604 = vrot.lane.b32.xlu0 %v6175_v43, %s4855_s7 }
 0x446   : > { %v1511_v20 = vpop.permute.xlu1 %1510 }
 0x447   : > { %v1517_v31 = vsel %vm10246_vm5, %v1503_v34, %v1511_v20  ;;  %v1521_v11 = vsel %vm10246_vm5, %v1511_v20, %v1503_v34 }
 0x44c   : > { %1628 = vrot.lane.b32.xlu2 %v6175_v43, %s4856_s8  ;;  %v1536_v9 = vpop.permute.xlu0 %1535 }
 0x44d   : > { %v1542_v45 = vsel %vm10245_vm6, %v1528_v16, %v1536_v9  ;;  %v1546_v51 = vsel %vm10245_vm6, %v1536_v9, %v1528_v16 }
 0x44e   : > { %v1562_v13 = vsel %vm6139_vm7, %v1517_v31, %v1546_v51  ;;  %v1563_v44 = vsel %vm6143_vm0, %v1521_v11, %v1542_v45  ;;  %v1530_v26 = vpop.permute.xlu1 %1529 }
 0x44f   : > { %v1576_v54 = vmax.f32 %v6045_v18, %v1562_v13  ;;  %v1577_v38 = vmax.f32 %v6040_v17, %v1563_v44  ;;  %v1584_v19 = vmin.f32 %v6045_v18, %v1562_v13  ;;  %v1585_v57 = vmin.f32 %v6040_v17, %v1563_v44  ;;  %v1538_v17 = vpop.permute.xlu2 %1537 }
 0x450   : > { %v1547_v27 = vsel %vm10245_vm6, %v1538_v17, %v1530_v26  ;;  %v1543_v39 = vsel %vm10245_vm6, %v1530_v26, %v1538_v17 }
 0x451   : > { %v6204_v47 = vsel %vm1571_vm9, %v1577_v38, %v1585_v57  ;;  %v6209_v58 = vsel %vm1570_vm10, %v1576_v54, %v1584_v19 }
 0x452   : > { %1624 = vrot.lane.b32.xlu0 %v6209_v58, %s4856_s8  ;;  %1600 = vrot.lane.b32.xlu1 %v6209_v58, %s4855_s7 }
 0x454   : > { %1608 = vrot.lane.b32.xlu2 %v6204_v47, %s4855_s7  ;;  %v1513_v18 = vpop.permute.xlu0 %1512 }
 0x455   : > { %v1518_v59 = vsel %vm10246_vm5, %v1505_v6, %v1513_v18  ;;  %v1522_v40 = vsel %vm10246_vm5, %v1513_v18, %v1505_v6 }
 0x456   : > { %v1564_v29 = vsel %vm6139_vm7, %v1518_v59, %v1547_v27  ;;  %v1565_v15 = vsel %vm6143_vm0, %v1522_v40, %v1543_v39 }
 0x457   : > { %v1578_v41 = vmax.f32 %v6068_v30, %v1564_v29  ;;  %v1586_v32 = vmin.f32 %v6068_v30, %v1564_v29  ;;  %v1579_v30 = vmax.f32 %v6083_v61, %v1565_v15  ;;  %v1587_v50 = vmin.f32 %v6083_v61, %v1565_v15  ;;  %v1526_v55 = vpop.permute.xlu2 %1525 }
 0x459   : > { %v6232_v36 = vsel %vm1570_vm10, %v1578_v41, %v1586_v32  ;;  %v6247_v49 = vsel %vm1571_vm9, %v1579_v30, %v1587_v50 }
 0x45a   : > { %1632 = vrot.lane.b32.xlu1 %v6204_v47, %s4856_s8  ;;  %1602 = vrot.lane.b32.xlu0 %v6232_v36, %s4855_s7 }
 0x45c   : > { %1626 = vrot.lane.b32.xlu2 %v6232_v36, %s4856_s8 }
 0x45d   : > { %v1509_v53 = vpop.permute.xlu1 %1508 }
 0x45e   : > { %v1501_v48 = vpop.permute.xlu0 %1500 }
 0x45f   : > { %v1516_v28 = vsel %vm10246_vm5, %v1501_v48, %v1509_v53  ;;  %v1520_v61 = vsel %vm10246_vm5, %v1509_v53, %v1501_v48 }
 0x462   : > { %1634 = vrot.lane.b32.xlu0 %v6247_v49, %s4856_s8  ;;  %1610 = vrot.lane.b32.xlu1 %v6247_v49, %s4855_s7 }
 0x466   : > { %v1534_v16 = vpop.permute.xlu0 %1533 }
 0x467   : > { %v1541_v33 = vsel %vm10245_vm6, %v1526_v55, %v1534_v16  ;;  %v1545_v35 = vsel %vm10245_vm6, %v1534_v16, %v1526_v55 }
 0x468   : > { %v1560_v46 = vsel %vm6139_vm7, %v1516_v28, %v1545_v35  ;;  %v1561_v34 = vsel %vm6143_vm0, %v1520_v61, %v1541_v33 }
 0x469   : > { %v1574_v20 = vmax.f32 %v6113_v21, %v1560_v46  ;;  %v1575_v6 = vmax.f32 %v6108_v62, %v1561_v34  ;;  %v1582_v9 = vmin.f32 %v6113_v21, %v1560_v46  ;;  %v1583_v31 = vmin.f32 %v6108_v62, %v1561_v34 }
 0x46b   : > { %v6272_v11 = vsel %vm1571_vm9, %v1575_v6, %v1583_v31  ;;  %v6277_v45 = vsel %vm1570_vm10, %v1574_v20, %v1582_v9  ;;  %vm1652_vm9 = vcmp.eq.s32.totalorder %v5375_v22, %v6135_v3  ;;  %vm1653_vm10 = vcmp.eq.s32.totalorder %v5377_v23, %v6137_v12 }
 0x46c   : > { %1606 = vrot.lane.b32.xlu2 %v6272_v11, %s4855_s7  ;;  %1622 = vrot.lane.b32.xlu0 %v6277_v45, %s4856_s8 }
 0x46d   : > { %1598 = vrot.lane.b32.xlu1 %v6277_v45, %s4855_s7 }
 0x475   : > { %1630 = vrot.lane.b32.xlu1 %v6272_v11, %s4856_s8 }
 0x49e   : > { %v1597_v62 = vpop.permute.xlu2 %1596 }
 0x4a6   : > { %v1629_v21 = vpop.permute.xlu2 %1628 }
 0x4ae   : > { %v1609_v41 = vpop.permute.xlu2 %1608 }
 0x4b6   : > { %v1621_v51 = vpop.permute.xlu1 %1620  ;;  %v1627_v34 = vpop.permute.xlu2 %1626 }
 0x4b7   : > { %v1605_v13 = vpop.permute.xlu0 %1604  ;;  %v1636_v44 = vsel %vm10243_vm13, %v1621_v51, %v1629_v21  ;;  %v1640_v54 = vsel %vm10243_vm13, %v1629_v21, %v1621_v51 }
 0x4b8   : > { %v1612_v38 = vsel %vm10244_vm8, %v1597_v62, %v1605_v13  ;;  %v1616_v19 = vsel %vm10244_vm8, %v1605_v13, %v1597_v62 }
 0x4b9   : > { %v1644_v57 = vsel %vm5693_vm14, %v1612_v38, %v1640_v54  ;;  %v1645_v26 = vsel %vm5697_vm4, %v1616_v19, %v1636_v44 }
 0x4ba   : > { %v1654_v17 = vmax.f32 %v6170_v60, %v1644_v57  ;;  %v1655_v18 = vmax.f32 %v6175_v43, %v1645_v26  ;;  %v1662_v27 = vmin.f32 %v6170_v60, %v1644_v57  ;;  %v1663_v59 = vmin.f32 %v6175_v43, %v1645_v26 }
 0x4bc   : > { %v6310_v29 = vsel %vm1652_vm9, %v1654_v17, %v1662_v27  ;;  %v6315_v40 = vsel %vm1653_vm10, %v1655_v18, %v1663_v59 }
 0x4bd   : > { %1702 = vrot.lane.b32.xlu2 %v6310_v29, %s4854_s6  ;;  %1678 = vrot.lane.b32.xlu0 %v6310_v29, %s4852_s29 }
 0x4be   : > { %1686 = vrot.lane.b32.xlu1 %v6315_v40, %s4852_s29 }
 0x4c4   : > { %v1625_v60 = vpop.permute.xlu0 %1624  ;;  %v1601_v43 = vpop.permute.xlu1 %1600 }
 0x4c5   : > { %1710 = vrot.lane.b32.xlu0 %v6315_v40, %s4854_s6  ;;  %v1614_v15 = vsel %vm10244_vm8, %v1601_v43, %v1609_v41  ;;  %v1618_v30 = vsel %vm10244_vm8, %v1609_v41, %v1601_v43 }
 0x4c6   : > { %v1607_v57 = vpop.permute.xlu2 %1606 }
 0x4cc   : > { %v1603_v32 = vpop.permute.xlu0 %1602  ;;  %v1633_v39 = vpop.permute.xlu1 %1632 }
 0x4cd   : > { %v1638_v50 = vsel %vm10243_vm13, %v1625_v60, %v1633_v39  ;;  %v1642_v48 = vsel %vm10243_vm13, %v1633_v39, %v1625_v60 }
 0x4ce   : > { %v1648_v53 = vsel %vm5693_vm14, %v1614_v15, %v1642_v48  ;;  %v1649_v55 = vsel %vm5697_vm4, %v1618_v30, %v1638_v50 }
 0x4cf   : > { %v1658_v16 = vmax.f32 %v6209_v58, %v1648_v53  ;;  %v1659_v28 = vmax.f32 %v6204_v47, %v1649_v55  ;;  %v1666_v61 = vmin.f32 %v6209_v58, %v1648_v53  ;;  %v1667_v33 = vmin.f32 %v6204_v47, %v1649_v55 }
 0x4d1   : > { %v6344_v35 = vsel %vm1652_vm9, %v1658_v16, %v1666_v61  ;;  %v6349_v46 = vsel %vm1653_vm10, %v1659_v28, %v1667_v33 }
 0x4d2   : > { %1706 = vrot.lane.b32.xlu1 %v6344_v35, %s4854_s6  ;;  %1682 = vrot.lane.b32.xlu2 %v6344_v35, %s4852_s29 }
 0x4d3   : > { %1690 = vrot.lane.b32.xlu0 %v6349_v46, %s4852_s29 }
 0x4d4   : > { %v1635_v47 = vpop.permute.xlu0 %1634  ;;  %v1611_v58 = vpop.permute.xlu1 %1610 }
 0x4d5   : > { %v1643_v20 = vsel %vm10243_vm13, %v1635_v47, %v1627_v34  ;;  %v1615_v6 = vsel %vm10244_vm8, %v1603_v32, %v1611_v58  ;;  %v1639_v31 = vsel %vm10243_vm13, %v1627_v34, %v1635_v47  ;;  %v1619_v62 = vsel %vm10244_vm8, %v1611_v58, %v1603_v32 }
 0x4d6   : > { %v1650_v9 = vsel %vm5693_vm14, %v1615_v6, %v1643_v20  ;;  %v1651_v44 = vsel %vm5697_vm4, %v1619_v62, %v1639_v31 }
 0x4d7   : > { %v1660_v21 = vmax.f32 %v6232_v36, %v1650_v9  ;;  %v1668_v51 = vmin.f32 %v6232_v36, %v1650_v9  ;;  %v1661_v54 = vmax.f32 %v6247_v49, %v1651_v44  ;;  %v1669_v36 = vmin.f32 %v6247_v49, %v1651_v44 }
 0x4d9   : > { %v6372_v13 = vsel %vm1652_vm9, %v1660_v21, %v1668_v51  ;;  %v6387_v19 = vsel %vm1653_vm10, %v1661_v54, %v1669_v36 }
 0x4da   : > { %1714 = vrot.lane.b32.xlu2 %v6349_v46, %s4854_s6  ;;  %1684 = vrot.lane.b32.xlu1 %v6372_v13, %s4852_s29 }
 0x4db   : > { %1708 = vrot.lane.b32.xlu0 %v6372_v13, %s4854_s6 }
 0x4de   : > { %v1623_v26 = vpop.permute.xlu0 %1622 }
 0x4df   : > { %v1599_v38 = vpop.permute.xlu1 %1598 }
 0x4e0   : > { %v1613_v18 = vsel %vm10244_vm8, %v1599_v38, %v1607_v57  ;;  %v1617_v49 = vsel %vm10244_vm8, %v1607_v57, %v1599_v38 }
 0x4e2   : > { %1692 = vrot.lane.b32.xlu2 %v6387_v19, %s4852_s29  ;;  %1716 = vrot.lane.b32.xlu1 %v6387_v19, %s4854_s6 }
 0x4e7   : > { %v1631_v17 = vpop.permute.xlu1 %1630 }
 0x4e8   : > { %v1637_v27 = vsel %vm10243_vm13, %v1623_v26, %v1631_v17  ;;  %v1641_v59 = vsel %vm10243_vm13, %v1631_v17, %v1623_v26  ;;  %vm1816_vm13 = vcmp.eq.s32.totalorder %v5200_v63, %v6135_v3 }
 0x4e9   : > { %v1646_v60 = vsel %vm5693_vm14, %v1613_v18, %v1641_v59  ;;  %v1647_v43 = vsel %vm5697_vm4, %v1617_v49, %v1637_v27 }
 0x4ea   : > { %v1656_v41 = vmax.f32 %v6277_v45, %v1646_v60  ;;  %v1657_v32 = vmax.f32 %v6272_v11, %v1647_v43  ;;  %v1664_v39 = vmin.f32 %v6277_v45, %v1646_v60  ;;  %v1665_v15 = vmin.f32 %v6272_v11, %v1647_v43 }
 0x4ec   : > { %v6412_v30 = vsel %vm1652_vm9, %v1656_v41, %v1664_v39  ;;  %v6417_v50 = vsel %vm1653_vm10, %v1657_v32, %v1665_v15  ;;  %vm1735_vm9 = vcmp.eq.s32.totalorder %v5207_v2, %v6137_v12  ;;  %vm1734_vm10 = vcmp.eq.s32.totalorder %v5202_v0, %v6135_v3 }
 0x4ed   : > { %1704 = vrot.lane.b32.xlu1 %v6412_v30, %s4854_s6  ;;  %1680 = vrot.lane.b32.xlu2 %v6412_v30, %s4852_s29 }
 0x4ee   : > { %1688 = vrot.lane.b32.xlu0 %v6417_v50, %s4852_s29 }
 0x4f5   : > { %1712 = vrot.lane.b32.xlu2 %v6417_v50, %s4854_s6  ;;  %1892 = vrot.lane.b32.xlu1 %v4966_v37, %s4859_s11 }
 0x517   : > { %v1703_v11 = vpop.permute.xlu2 %1702 }
 0x52c   : > { %v1683_v53 = vpop.permute.xlu2 %1682 }
 0x52f   : > { %v1679_v45 = vpop.permute.xlu0 %1678 }
 0x530   : > { %v1687_v48 = vpop.permute.xlu1 %1686 }
 0x531   : > { %v1694_v16 = vsel %vm10242_vm15, %v1679_v45, %v1687_v48  ;;  %v1698_v28 = vsel %vm10242_vm15, %v1687_v48, %v1679_v45 }
 0x537   : > { %v1711_v55 = vpop.permute.xlu0 %1710 }
 0x538   : > { %v1718_v61 = vsel %vm10241_vm1, %v1703_v11, %v1711_v55  ;;  %v1722_v33 = vsel %vm10241_vm1, %v1711_v55, %v1703_v11 }
 0x539   : > { %v1726_v34 = vsel %vm5379_vm2, %v1694_v16, %v1722_v33  ;;  %v1727_v47 = vsel %vm5383_vm3, %v1698_v28, %v1718_v61 }
 0x53a   : > { %v1736_v58 = vmax.f32 %v6310_v29, %v1726_v34  ;;  %v1737_v20 = vmax.f32 %v6315_v40, %v1727_v47  ;;  %v1744_v6 = vmin.f32 %v6310_v29, %v1726_v34  ;;  %v1745_v9 = vmin.f32 %v6315_v40, %v1727_v47  ;;  %v1715_v29 = vpop.permute.xlu2 %1714 }
 0x53c   : > { %v6452_v31 = vsel %vm1735_vm9, %v1737_v20, %v1745_v9  ;;  %v6457_v62 = vsel %vm1734_vm10, %v1736_v58, %v1744_v6 }
 0x53d   : > { %1768 = vrot.lane.b32.xlu2 %v6452_v31, %s4851_s28  ;;  %1784 = vrot.lane.b32.xlu0 %v6457_v62, %s4853_s30 }
 0x53e   : > { %1760 = vrot.lane.b32.xlu1 %v6457_v62, %s4851_s28 }
 0x542   : > { %v1693_v27 = vpop.permute.xlu2 %1692 }
 0x544   : > { %v1707_v40 = vpop.permute.xlu1 %1706 }
 0x545   : > { %v1691_v21 = vpop.permute.xlu0 %1690  ;;  %v1720_v51 = vsel %vm10241_vm1, %v1707_v40, %v1715_v29  ;;  %v1724_v44 = vsel %vm10241_vm1, %v1715_v29, %v1707_v40 }
 0x546   : > { %1792 = vrot.lane.b32.xlu1 %v6452_v31, %s4853_s30  ;;  %v1696_v54 = vsel %vm10242_vm15, %v1683_v53, %v1691_v21  ;;  %v1700_v36 = vsel %vm10242_vm15, %v1691_v21, %v1683_v53 }
 0x547   : > { %v1730_v38 = vsel %vm5379_vm2, %v1696_v54, %v1724_v44  ;;  %v1731_v57 = vsel %vm5383_vm3, %v1700_v36, %v1720_v51 }
 0x548   : > { %v1740_v26 = vmax.f32 %v6344_v35, %v1730_v38  ;;  %v1741_v17 = vmax.f32 %v6349_v46, %v1731_v57  ;;  %v1748_v18 = vmin.f32 %v6344_v35, %v1730_v38  ;;  %v1749_v49 = vmin.f32 %v6349_v46, %v1731_v57 }
 0x54a   : > { %v6486_v59 = vsel %vm1734_vm10, %v1740_v26, %v1748_v18  ;;  %v6491_v60 = vsel %vm1735_vm9, %v1741_v17, %v1749_v49  ;;  %v1681_v46 = vpop.permute.xlu2 %1680 }
 0x54b   : > { %1788 = vrot.lane.b32.xlu2 %v6486_v59, %s4853_s30  ;;  %1764 = vrot.lane.b32.xlu0 %v6486_v59, %s4851_s28 }
 0x54c   : > { %v1685_v35 = vpop.permute.xlu1 %1684 }
 0x54d   : > { %v1709_v43 = vpop.permute.xlu0 %1708  ;;  %v1697_v32 = vsel %vm10242_vm15, %v1685_v35, %v1693_v27  ;;  %v1701_v39 = vsel %vm10242_vm15, %v1693_v27, %v1685_v35 }
 0x54e   : > { %1772 = vrot.lane.b32.xlu1 %v6491_v60, %s4851_s28 }
 0x553   : > { %1796 = vrot.lane.b32.xlu0 %v6491_v60, %s4853_s30 }
 0x554   : > { %v1717_v41 = vpop.permute.xlu1 %1716 }
 0x555   : > { %v1721_v15 = vsel %vm10241_vm1, %v1709_v43, %v1717_v41  ;;  %v1725_v11 = vsel %vm10241_vm1, %v1717_v41, %v1709_v43 }
 0x556   : > { %v1732_v45 = vsel %vm5379_vm2, %v1697_v32, %v1725_v11  ;;  %v1733_v48 = vsel %vm5383_vm3, %v1701_v39, %v1721_v15 }
 0x557   : > { %v1742_v53 = vmax.f32 %v6372_v13, %v1732_v45  ;;  %v1743_v55 = vmax.f32 %v6387_v19, %v1733_v48  ;;  %v1750_v16 = vmin.f32 %v6372_v13, %v1732_v45  ;;  %v1751_v28 = vmin.f32 %v6387_v19, %v1733_v48  ;;  %v1713_v13 = vpop.permute.xlu2 %1712 }
 0x559   : > { %v6520_v61 = vsel %vm1734_vm10, %v1742_v53, %v1750_v16  ;;  %v6525_v33 = vsel %vm1735_vm9, %v1743_v55, %v1751_v28 }
 0x55a   : > { %1790 = vrot.lane.b32.xlu1 %v6520_v61, %s4853_s30  ;;  %1766 = vrot.lane.b32.xlu2 %v6520_v61, %s4851_s28 }
 0x55b   : > { %1774 = vrot.lane.b32.xlu0 %v6525_v33, %s4851_s28 }
 0x55f   : > { %v1705_v19 = vpop.permute.xlu1 %1704 }
 0x560   : > { %v1689_v34 = vpop.permute.xlu0 %1688  ;;  %v1719_v47 = vsel %vm10241_vm1, %v1705_v19, %v1713_v13  ;;  %v1723_v58 = vsel %vm10241_vm1, %v1713_v13, %v1705_v19  ;;  %vm10298_vm1 = vcmp.lt.s32.totalorder %v4966_v37, 1 }
 0x561   : > { %v1695_v20 = vsel %vm10242_vm15, %v1681_v46, %v1689_v34  ;;  %v1699_v6 = vsel %vm10242_vm15, %v1689_v34, %v1681_v46  ;;  %vm10299_vm15 = vmmov %vm10298_vm1 }
 0x562   : > { %v1728_v9 = vsel %vm5379_vm2, %v1695_v20, %v1723_v58  ;;  %v1729_v29 = vsel %vm5383_vm3, %v1699_v6, %v1719_v47  ;;  %1798 = vrot.lane.b32.xlu2 %v6525_v33, %s4853_s30 }
 0x563   : > { %v1738_v40 = vmax.f32 %v6412_v30, %v1728_v9  ;;  %v1739_v21 = vmax.f32 %v6417_v50, %v1729_v29  ;;  %v1746_v51 = vmin.f32 %v6412_v30, %v1728_v9  ;;  %v1747_v44 = vmin.f32 %v6417_v50, %v1729_v29 }
 0x565   : > { %v6554_v54 = vsel %vm1734_vm10, %v1738_v40, %v1746_v51  ;;  %v6559_v36 = vsel %vm1735_vm9, %v1739_v21, %v1747_v44  ;;  %vm10296_vm9 = vcmp.lt.s32.totalorder %v4966_v37, 127 }
 0x566   : > { %1762 = vrot.lane.b32.xlu0 %v6554_v54, %s4851_s28  ;;  %1770 = vrot.lane.b32.xlu1 %v6559_v36, %s4851_s28  ;;  %vm10297_vm10 = vmmov %vm10296_vm9 }
 0x567   : > { %v6571_v30 = vpop.permute.xlu1 %1892 }
 0x56a   : > { %1786 = vrot.lane.b32.xlu2 %v6554_v54, %s4853_s30 }
 0x56e   : > { %1794 = vrot.lane.b32.xlu0 %v6559_v36, %s4853_s30 }
 0x572   : > { %1894 = vrot.lane.b32.xlu2 %v4983_v52, %s4859_s11 }
 0x597   : > { %v1769_v38 = vpop.permute.xlu2 %1768 }
 0x5a5   : > { %v1789_v43 = vpop.permute.xlu2 %1788 }
 0x5af   : > { %v1785_v57 = vpop.permute.xlu0 %1784 }
 0x5b0   : > { %v1761_v50 = vpop.permute.xlu1 %1760 }
 0x5b1   : > { %v1776_v17 = vsel %vm10296_vm9, %v1761_v50, %v1769_v38  ;;  %v1780_v18 = vsel %vm10297_vm10, %v1769_v38, %v1761_v50  ;;  %vm1817_vm9 = vcmp.eq.s32.totalorder %v5205_v1, %v6137_v12 }
 0x5b8   : > { %v1793_v26 = vpop.permute.xlu1 %1792 }
 0x5b9   : > { %v1800_v49 = vsel %vm10298_vm1, %v1785_v57, %v1793_v26  ;;  %v1804_v27 = vsel %vm10299_vm15, %v1793_v26, %v1785_v57  ;;  %vm10300_vm15 = vmmov %vm10297_vm10 }
 0x5ba   : > { %v1808_v35 = vsel %vm5209_vm11, %v1776_v17, %v1804_v27  ;;  %v1809_v46 = vsel %vm5213_vm12, %v1780_v18, %v1800_v49  ;;  %vm10301_vm1 = vmmov %vm10297_vm10  ;;  %vm10302_vm10 = vcmp.lt.s32.totalorder %v4966_v37, 1 }
 0x5bb   : > { %v1818_v41 = vmax.f32 %v6457_v62, %v1808_v35  ;;  %v1819_v32 = vmax.f32 %v6452_v31, %v1809_v46  ;;  %v1826_v39 = vmin.f32 %v6457_v62, %v1808_v35  ;;  %v1827_v15 = vmin.f32 %v6452_v31, %v1809_v46  ;;  %v1767_v31 = vpop.permute.xlu2 %1766  ;;  %vm10303_vm8 = vmmov %vm10302_vm10 }
 0x5bd   : > { %v6596_v11 = vsel %vm1816_vm13, %v1818_v41, %v1826_v39  ;;  %v6601_v45 = vsel %vm1817_vm9, %v1819_v32, %v1827_v15  ;;  %v1765_v62 = vpop.permute.xlu0 %1764 }
 0x5be   : > { %1867 = vrot.lane.b32.xlu0 %v6596_v11, %s4860_s12  ;;  %1842 = vrot.lane.b32.xlu1 %v6596_v11, %s4859_s11 }
 0x5bf   : > { %1850 = vrot.lane.b32.xlu2 %v6601_v45, %s4859_s11 }
 0x5c0   : > { %v1773_v48 = vpop.permute.xlu1 %1772 }
 0x5c1   : > { %v1778_v55 = vsel %vm10300_vm15, %v1765_v62, %v1773_v48  ;;  %v1782_v16 = vsel %vm10301_vm1, %v1773_v48, %v1765_v62  ;;  %vm10304_vm15 = vmmov %vm10301_vm1 }
 0x5c3   : > { %v1799_v40 = vpop.permute.xlu2 %1798 }
 0x5c5   : > { %v1797_v53 = vpop.permute.xlu0 %1796 }
 0x5c6   : > { %1875 = vrot.lane.b32.xlu1 %v6601_v45, %s4860_s12  ;;  %v1802_v28 = vsel %vm10302_vm10, %v1789_v43, %v1797_v53  ;;  %v1806_v13 = vsel %vm10303_vm8, %v1797_v53, %v1789_v43  ;;  %vm10305_vm10 = vmmov %vm10303_vm8 }
 0x5c7   : > { %v1812_v19 = vsel %vm5209_vm11, %v1778_v55, %v1806_v13  ;;  %v1813_v34 = vsel %vm5213_vm12, %v1782_v16, %v1802_v28 }
 0x5c8   : > { %v1822_v47 = vmax.f32 %v6486_v59, %v1812_v19  ;;  %v1823_v58 = vmax.f32 %v6491_v60, %v1813_v34  ;;  %v1830_v20 = vmin.f32 %v6486_v59, %v1812_v19  ;;  %v1831_v6 = vmin.f32 %v6491_v60, %v1813_v34 }
 0x5c9   : > { %v1910_v34 = vshra.s32 %v4966_v37, 5 }
 0x5ca   : > { %v6630_v9 = vsel %vm1817_vm9, %v1823_v58, %v1831_v6  ;;  %v6635_v29 = vsel %vm1816_vm13, %v1822_v47, %v1830_v20  ;;  %v1911_v47 = vshra.s32 %v4983_v52, 5  ;;  %v1898_v58 = vxor.u32 16, %v4966_v37 }
 0x5cb   : > { %1871 = vrot.lane.b32.xlu2 %v6635_v29, %s4860_s12  ;;  %1846 = vrot.lane.b32.xlu0 %v6635_v29, %s4859_s11  ;;  %v1787_v43 = vpop.permute.xlu2 %1786  ;;  %v1899_v20 = vxor.u32 16, %v4983_v52 }
 0x5cc   : > { %v1791_v59 = vpop.permute.xlu1 %1790 }
 0x5cd   : > { %v1775_v60 = vpop.permute.xlu0 %1774  ;;  %v1807_v21 = vsel %vm10303_vm8, %v1799_v40, %v1791_v59  ;;  %v1803_v38 = vsel %vm10305_vm10, %v1791_v59, %v1799_v40  ;;  %vm10306_vm8 = vmmov %vm10301_vm1 }
 0x5ce   : > { %1854 = vrot.lane.b32.xlu1 %v6630_v9, %s4859_s11  ;;  %v1779_v51 = vsel %vm10304_vm15, %v1767_v31, %v1775_v60  ;;  %v1783_v50 = vsel %vm10301_vm1, %v1775_v60, %v1767_v31  ;;  %vm10307_vm15 = vmmov %vm10301_vm1  ;;  %v6725_v60 = vand.u32 1, %v1910_v34 }
 0x5cf   : > { %v1814_v44 = vsel %vm5209_vm11, %v1779_v51, %v1807_v21  ;;  %v1815_v18 = vsel %vm5213_vm12, %v1783_v50, %v1803_v38  ;;  %vm10308_vm1 = vmmov %vm10305_vm10  ;;  %v6727_v21 = vand.u32 1, %v1911_v47 }
 0x5d0   : > { %v1824_v57 = vmax.f32 %v6520_v61, %v1814_v44  ;;  %v1832_v26 = vmin.f32 %v6520_v61, %v1814_v44  ;;  %v1825_v49 = vmax.f32 %v6525_v33, %v1815_v18  ;;  %v1833_v61 = vmin.f32 %v6525_v33, %v1815_v18  ;;  %vm10309_vm10 = vmmov %vm10308_vm1 }
 0x5d2   : > { %v6658_v17 = vsel %vm1816_vm13, %v1824_v57, %v1832_v26  ;;  %v6673_v35 = vsel %vm1817_vm9, %v1825_v49, %v1833_v61 }
 0x5d3   : > { %1879 = vrot.lane.b32.xlu0 %v6630_v9, %s4860_s12  ;;  %1848 = vrot.lane.b32.xlu2 %v6658_v17, %s4859_s11 }
 0x5d6   : > { %1873 = vrot.lane.b32.xlu1 %v6658_v17, %s4860_s12 }
 0x5d8   : > { %v1763_v27 = vpop.permute.xlu0 %1762  ;;  %v1771_v46 = vpop.permute.xlu1 %1770 }
 0x5d9   : > { %v1777_v32 = vsel %vm10306_vm8, %v1763_v27, %v1771_v46  ;;  %v1781_v33 = vsel %vm10307_vm15, %v1771_v46, %v1763_v27 }
 0x5db   : > { %1881 = vrot.lane.b32.xlu2 %v6673_v35, %s4860_s12  ;;  %1856 = vrot.lane.b32.xlu0 %v6673_v35, %s4859_s11 }
 0x5e0   : > { %v1795_v41 = vpop.permute.xlu0 %1794 }
 0x5e1   : > { %v1801_v39 = vsel %vm10308_vm1, %v1787_v43, %v1795_v41  ;;  %v1805_v15 = vsel %vm10309_vm10, %v1795_v41, %v1787_v43  ;;  %vm1914_vm1 = vcmp.eq.s32.totalorder %v6135_v3, %v6725_v60  ;;  %vm1915_vm10 = vcmp.eq.s32.totalorder %v6137_v12, %v6727_v21 }
 0x5e2   : > { %v1810_v62 = vsel %vm5209_vm11, %v1777_v32, %v1805_v15  ;;  %v1811_v31 = vsel %vm5213_vm12, %v1781_v33, %v1801_v39 }
 0x5e3   : > { %v1820_v48 = vmax.f32 %v6554_v54, %v1810_v62  ;;  %v1821_v53 = vmax.f32 %v6559_v36, %v1811_v31  ;;  %v1828_v55 = vmin.f32 %v6554_v54, %v1810_v62  ;;  %v1829_v16 = vmin.f32 %v6559_v36, %v1811_v31  ;;  %v1895_v54 = vpop.permute.xlu2 %1894 }
 0x5e5   : > { %v6698_v28 = vsel %vm1817_vm9, %v1821_v53, %v1829_v16  ;;  %v6703_v13 = vsel %vm1816_vm13, %v1820_v48, %v1828_v55  ;;  %vm10248_vm9 = vcmp.lt.s32.totalorder %v4966_v37, 112  ;;  %vm10247_vm13 = vcmp.lt.s32.totalorder %v4966_v37, 16 }
 0x5e6   : > { %1852 = vrot.lane.b32.xlu1 %v6698_v28, %s4859_s11  ;;  %1869 = vrot.lane.b32.xlu2 %v6703_v13, %s4860_s12  ;;  %v1896_v6 = vsel %vm10248_vm9, %v6571_v30, %v1895_v54  ;;  %v1897_v40 = vsel %vm10248_vm9, %v1895_v54, %v6571_v30 }
 0x5e7   : > { %1844 = vrot.lane.b32.xlu0 %v6703_v13, %s4859_s11  ;;  %vm6729_vm8 = vcmp.eq.s32.totalorder %v1896_v6, %v1898_v58  ;;  %vm6733_vm15 = vcmp.eq.s32.totalorder %v1897_v40, %v1899_v20 }
 0x5ef   : > { %1877 = vrot.lane.b32.xlu0 %v6698_v28, %s4860_s12 }
 0x619   : > { %v1851_v19 = vpop.permute.xlu2 %1850 }
 0x625   : > { %v1872_v18 = vpop.permute.xlu2 %1871 }
 0x630   : > { %v1843_v36 = vpop.permute.xlu1 %1842  ;;  %v1868_v59 = vpop.permute.xlu0 %1867 }
 0x631   : > { %v1859_v38 = vsel %vm10248_vm9, %v1843_v36, %v1851_v19  ;;  %v1863_v30 = vsel %vm10248_vm9, %v1851_v19, %v1843_v36 }
 0x638   : > { %v1876_v50 = vpop.permute.xlu1 %1875 }
 0x639   : > { %v1884_v57 = vsel %vm10247_vm13, %v1868_v59, %v1876_v50  ;;  %v1888_v26 = vsel %vm10247_vm13, %v1876_v50, %v1868_v59 }
 0x63a   : > { %v1902_v49 = vsel %vm6729_vm8, %v1859_v38, %v1888_v26  ;;  %v1903_v61 = vsel %vm6733_vm15, %v1863_v30, %v1884_v57 }
 0x63b   : > { %v1916_v27 = vmax.f32 %v6596_v11, %v1902_v49  ;;  %v1917_v46 = vmax.f32 %v6601_v45, %v1903_v61  ;;  %v1924_v43 = vmin.f32 %v6596_v11, %v1902_v49  ;;  %v1925_v41 = vmin.f32 %v6601_v45, %v1903_v61  ;;  %v1849_v45 = vpop.permute.xlu2 %1848 }
 0x63d   : > { %v6760_v32 = vsel %vm1914_vm1, %v1916_v27, %v1924_v43  ;;  %v6765_v33 = vsel %vm1915_vm10, %v1917_v46, %v1925_v41  ;;  %v1847_v39 = vpop.permute.xlu0 %1846 }
 0x63e   : > { %1964 = vrot.lane.b32.xlu1 %v6760_v32, %s4858_s10  ;;  %1940 = vrot.lane.b32.xlu2 %v6760_v32, %s4857_s9 }
 0x63f   : > { %1948 = vrot.lane.b32.xlu0 %v6765_v33, %s4857_s9 }
 0x640   : > { %v1855_v11 = vpop.permute.xlu1 %1854 }
 0x641   : > { %v1861_v62 = vsel %vm10248_vm9, %v1847_v39, %v1855_v11  ;;  %v1865_v31 = vsel %vm10248_vm9, %v1855_v11, %v1847_v39 }
 0x645   : > { %v1880_v15 = vpop.permute.xlu0 %1879 }
 0x646   : > { %1972 = vrot.lane.b32.xlu2 %v6765_v33, %s4858_s10  ;;  %v1886_v48 = vsel %vm10247_vm13, %v1872_v18, %v1880_v15  ;;  %v1890_v53 = vsel %vm10247_vm13, %v1880_v15, %v1872_v18 }
 0x647   : > { %v1906_v55 = vsel %vm6729_vm8, %v1861_v62, %v1890_v53  ;;  %v1907_v16 = vsel %vm6733_vm15, %v1865_v31, %v1886_v48 }
 0x648   : > { %v1920_v54 = vmax.f32 %v6635_v29, %v1906_v55  ;;  %v1921_v36 = vmax.f32 %v6630_v9, %v1907_v16  ;;  %v1928_v19 = vmin.f32 %v6635_v29, %v1906_v55  ;;  %v1929_v34 = vmin.f32 %v6630_v9, %v1907_v16  ;;  %v1874_v20 = vpop.permute.xlu1 %1873  ;;  %v1882_v29 = vpop.permute.xlu2 %1881 }
 0x649   : > { %v1891_v6 = vsel %vm10247_vm13, %v1882_v29, %v1874_v20  ;;  %v1887_v57 = vsel %vm10247_vm13, %v1874_v20, %v1882_v29 }
 0x64a   : > { %v6794_v47 = vsel %vm1915_vm10, %v1921_v36, %v1929_v34  ;;  %v6799_v58 = vsel %vm1914_vm1, %v1920_v54, %v1928_v19 }
 0x64b   : > { %1968 = vrot.lane.b32.xlu0 %v6799_v58, %s4858_s10  ;;  %1944 = vrot.lane.b32.xlu1 %v6799_v58, %s4857_s9 }
 0x64d   : > { %v1857_v9 = vpop.permute.xlu0 %1856 }
 0x64e   : > { %1952 = vrot.lane.b32.xlu2 %v6794_v47, %s4857_s9  ;;  %v1862_v40 = vsel %vm10248_vm9, %v1849_v45, %v1857_v9  ;;  %v1866_v50 = vsel %vm10248_vm9, %v1857_v9, %v1849_v45 }
 0x64f   : > { %v1908_v59 = vsel %vm6729_vm8, %v1862_v40, %v1891_v6  ;;  %v1909_v18 = vsel %vm6733_vm15, %v1866_v50, %v1887_v57 }
 0x650   : > { %v1922_v38 = vmax.f32 %v6658_v17, %v1908_v59  ;;  %v1930_v30 = vmin.f32 %v6658_v17, %v1908_v59  ;;  %v1923_v17 = vmax.f32 %v6673_v35, %v1909_v18  ;;  %v1931_v49 = vmin.f32 %v6673_v35, %v1909_v18  ;;  %v1870_v43 = vpop.permute.xlu2 %1869 }
 0x652   : > { %v6822_v26 = vsel %vm1914_vm1, %v1922_v38, %v1930_v30  ;;  %v6837_v27 = vsel %vm1915_vm10, %v1923_v17, %v1931_v49 }
 0x653   : > { %1976 = vrot.lane.b32.xlu1 %v6794_v47, %s4858_s10  ;;  %1946 = vrot.lane.b32.xlu0 %v6822_v26, %s4857_s9 }
 0x656   : > { %1970 = vrot.lane.b32.xlu2 %v6822_v26, %s4858_s10 }
 0x658   : > { %v1853_v46 = vpop.permute.xlu1 %1852 }
 0x659   : > { %v1845_v61 = vpop.permute.xlu0 %1844 }
 0x65a   : > { %v1860_v39 = vsel %vm10248_vm9, %v1845_v61, %v1853_v46  ;;  %v1864_v35 = vsel %vm10248_vm9, %v1853_v46, %v1845_v61 }
 0x65b   : > { %1978 = vrot.lane.b32.xlu0 %v6837_v27, %s4858_s10  ;;  %1954 = vrot.lane.b32.xlu1 %v6837_v27, %s4857_s9 }
 0x661   : > { %v1878_v41 = vpop.permute.xlu0 %1877 }
 0x662   : > { %v1885_v11 = vsel %vm10247_vm13, %v1870_v43, %v1878_v41  ;;  %v1889_v45 = vsel %vm10247_vm13, %v1878_v41, %v1870_v43  ;;  %vm2079_vm13 = vcmp.eq.s32.totalorder %v5377_v23, %v6727_v21 }
 0x663   : > { %v1904_v15 = vsel %vm6729_vm8, %v1860_v39, %v1889_v45  ;;  %v1905_v62 = vsel %vm6733_vm15, %v1864_v35, %v1885_v11 }
 0x664   : > { %v1918_v31 = vmax.f32 %v6703_v13, %v1904_v15  ;;  %v1919_v48 = vmax.f32 %v6698_v28, %v1905_v62  ;;  %v1926_v53 = vmin.f32 %v6703_v13, %v1904_v15  ;;  %v1927_v55 = vmin.f32 %v6698_v28, %v1905_v62 }
 0x666   : > { %v6862_v16 = vsel %vm1915_vm10, %v1919_v48, %v1927_v55  ;;  %v6867_v54 = vsel %vm1914_vm1, %v1918_v31, %v1926_v53  ;;  %vm1996_vm1 = vcmp.eq.s32.totalorder %v5685_v7, %v6725_v60  ;;  %vm1997_vm10 = vcmp.eq.s32.totalorder %v5687_v8, %v6727_v21 }
 0x667   : > { %1950 = vrot.lane.b32.xlu2 %v6862_v16, %s4857_s9  ;;  %1966 = vrot.lane.b32.xlu0 %v6867_v54, %s4858_s10 }
 0x668   : > { %1942 = vrot.lane.b32.xlu1 %v6867_v54, %s4857_s9 }
 0x670   : > { %1974 = vrot.lane.b32.xlu1 %v6862_v16, %s4858_s10 }
 0x698   : > { %v1941_v28 = vpop.permute.xlu2 %1940 }
 0x6a0   : > { %v1973_v13 = vpop.permute.xlu2 %1972 }
 0x6a8   : > { %v1953_v17 = vpop.permute.xlu2 %1952 }
 0x6b0   : > { %v1965_v36 = vpop.permute.xlu1 %1964  ;;  %v1971_v55 = vpop.permute.xlu2 %1970 }
 0x6b1   : > { %v1949_v19 = vpop.permute.xlu0 %1948  ;;  %v1980_v34 = vsel %vm10245_vm6, %v1965_v36, %v1973_v13  ;;  %v1984_v20 = vsel %vm10245_vm6, %v1973_v13, %v1965_v36 }
 0x6b2   : > { %v1956_v29 = vsel %vm10246_vm5, %v1941_v28, %v1949_v19  ;;  %v1960_v9 = vsel %vm10246_vm5, %v1949_v19, %v1941_v28 }
 0x6b3   : > { %v1988_v6 = vsel %vm6139_vm7, %v1956_v29, %v1984_v20  ;;  %v1989_v40 = vsel %vm6143_vm0, %v1960_v9, %v1980_v34 }
 0x6b4   : > { %v1998_v59 = vmax.f32 %v6760_v32, %v1988_v6  ;;  %v1999_v50 = vmax.f32 %v6765_v33, %v1989_v40  ;;  %v2006_v38 = vmin.f32 %v6760_v32, %v1988_v6  ;;  %v2007_v30 = vmin.f32 %v6765_v33, %v1989_v40 }
 0x6b6   : > { %v6900_v57 = vsel %vm1996_vm1, %v1998_v59, %v2006_v38  ;;  %v6905_v18 = vsel %vm1997_vm10, %v1999_v50, %v2007_v30 }
 0x6b7   : > { %2046 = vrot.lane.b32.xlu2 %v6900_v57, %s4856_s8  ;;  %2022 = vrot.lane.b32.xlu0 %v6900_v57, %s4855_s7 }
 0x6b8   : > { %2030 = vrot.lane.b32.xlu1 %v6905_v18, %s4855_s7 }
 0x6bd   : > { %v1969_v32 = vpop.permute.xlu0 %1968  ;;  %v1945_v33 = vpop.permute.xlu1 %1944 }
 0x6be   : > { %v1958_v46 = vsel %vm10246_vm5, %v1945_v33, %v1953_v17  ;;  %v1962_v43 = vsel %vm10246_vm5, %v1953_v17, %v1945_v33 }
 0x6bf   : > { %2054 = vrot.lane.b32.xlu0 %v6905_v18, %s4856_s8 }
 0x6c1   : > { %v1951_v38 = vpop.permute.xlu2 %1950 }
 0x6c5   : > { %v1947_v49 = vpop.permute.xlu0 %1946  ;;  %v1977_v61 = vpop.permute.xlu1 %1976 }
 0x6c6   : > { %v1982_v41 = vsel %vm10245_vm6, %v1969_v32, %v1977_v61  ;;  %v1986_v39 = vsel %vm10245_vm6, %v1977_v61, %v1969_v32 }
 0x6c7   : > { %v1992_v35 = vsel %vm6139_vm7, %v1958_v46, %v1986_v39  ;;  %v1993_v11 = vsel %vm6143_vm0, %v1962_v43, %v1982_v41 }
 0x6c8   : > { %v2002_v45 = vmax.f32 %v6799_v58, %v1992_v35  ;;  %v2003_v15 = vmax.f32 %v6794_v47, %v1993_v11  ;;  %v2010_v62 = vmin.f32 %v6799_v58, %v1992_v35  ;;  %v2011_v31 = vmin.f32 %v6794_v47, %v1993_v11 }
 0x6ca   : > { %v6934_v48 = vsel %vm1996_vm1, %v2002_v45, %v2010_v62  ;;  %v6939_v53 = vsel %vm1997_vm10, %v2003_v15, %v2011_v31 }
 0x6cb   : > { %2050 = vrot.lane.b32.xlu1 %v6934_v48, %s4856_s8  ;;  %2026 = vrot.lane.b32.xlu2 %v6934_v48, %s4855_s7 }
 0x6cc   : > { %2034 = vrot.lane.b32.xlu0 %v6939_v53, %s4855_s7 }
 0x6cd   : > { %v1979_v47 = vpop.permute.xlu0 %1978  ;;  %v1955_v58 = vpop.permute.xlu1 %1954 }
 0x6ce   : > { %v1987_v28 = vsel %vm10245_vm6, %v1979_v47, %v1971_v55  ;;  %v1959_v13 = vsel %vm10246_vm5, %v1947_v49, %v1955_v58  ;;  %v1983_v19 = vsel %vm10245_vm6, %v1971_v55, %v1979_v47  ;;  %v1963_v34 = vsel %vm10246_vm5, %v1955_v58, %v1947_v49 }
 0x6cf   : > { %v1994_v36 = vsel %vm6139_vm7, %v1959_v13, %v1987_v28  ;;  %v1995_v6 = vsel %vm6143_vm0, %v1963_v34, %v1983_v19 }
 0x6d0   : > { %v2004_v20 = vmax.f32 %v6822_v26, %v1994_v36  ;;  %v2012_v29 = vmin.f32 %v6822_v26, %v1994_v36  ;;  %v2005_v40 = vmax.f32 %v6837_v27, %v1995_v6  ;;  %v2013_v26 = vmin.f32 %v6837_v27, %v1995_v6 }
 0x6d2   : > { %v6962_v9 = vsel %vm1996_vm1, %v2004_v20, %v2012_v29  ;;  %v6977_v50 = vsel %vm1997_vm10, %v2005_v40, %v2013_v26 }
 0x6d3   : > { %2058 = vrot.lane.b32.xlu2 %v6939_v53, %s4856_s8  ;;  %2028 = vrot.lane.b32.xlu1 %v6962_v9, %s4855_s7 }
 0x6d4   : > { %2052 = vrot.lane.b32.xlu0 %v6962_v9, %s4856_s8 }
 0x6d9   : > { %v1967_v30 = vpop.permute.xlu0 %1966 }
 0x6da   : > { %v1943_v59 = vpop.permute.xlu1 %1942 }
 0x6db   : > { %2036 = vrot.lane.b32.xlu2 %v6977_v50, %s4855_s7  ;;  %2060 = vrot.lane.b32.xlu1 %v6977_v50, %s4856_s8  ;;  %v1957_v33 = vsel %vm10246_vm5, %v1943_v59, %v1951_v38  ;;  %v1961_v27 = vsel %vm10246_vm5, %v1951_v38, %v1943_v59 }
 0x6e2   : > { %v1975_v32 = vpop.permute.xlu1 %1974 }
 0x6e3   : > { %v1981_v17 = vsel %vm10245_vm6, %v1967_v30, %v1975_v32  ;;  %v1985_v49 = vsel %vm10245_vm6, %v1975_v32, %v1967_v30  ;;  %vm10316_vm6 = vcmp.lt.s32.totalorder %v4966_v37, 4 }
 0x6e4   : > { %v1990_v61 = vsel %vm6139_vm7, %v1957_v33, %v1985_v49  ;;  %v1991_v46 = vsel %vm6143_vm0, %v1961_v27, %v1981_v17  ;;  %vm10317_vm5 = vmmov %vm10316_vm6 }
 0x6e5   : > { %v2000_v43 = vmax.f32 %v6867_v54, %v1990_v61  ;;  %v2001_v41 = vmax.f32 %v6862_v16, %v1991_v46  ;;  %v2008_v39 = vmin.f32 %v6867_v54, %v1990_v61  ;;  %v2009_v35 = vmin.f32 %v6862_v16, %v1991_v46 }
 0x6e7   : > { %v7002_v11 = vsel %vm1996_vm1, %v2000_v43, %v2008_v39  ;;  %v7007_v45 = vsel %vm1997_vm10, %v2001_v41, %v2009_v35  ;;  %vm10314_vm1 = vcmp.lt.s32.totalorder %v4966_v37, 124 }
 0x6e8   : > { %2048 = vrot.lane.b32.xlu1 %v7002_v11, %s4856_s8  ;;  %2024 = vrot.lane.b32.xlu2 %v7002_v11, %s4855_s7  ;;  %vm10315_vm10 = vmmov %vm10314_vm1 }
 0x6e9   : > { %2032 = vrot.lane.b32.xlu0 %v7007_v45, %s4855_s7  ;;  %vm10319_vm9 = vmmov %vm10315_vm10 }
 0x6f0   : > { %2056 = vrot.lane.b32.xlu2 %v7007_v45, %s4856_s8 }
 0x711   : > { %v2047_v54 = vpop.permute.xlu2 %2046 }
 0x725   : > { %v2027_v31 = vpop.permute.xlu2 %2026 }
 0x729   : > { %v2023_v16 = vpop.permute.xlu0 %2022 }
 0x72a   : > { %v2031_v15 = vpop.permute.xlu1 %2030 }
 0x72b   : > { %v2038_v55 = vsel %vm10314_vm1, %v2023_v16, %v2031_v15  ;;  %v2042_v47 = vsel %vm10315_vm10, %v2031_v15, %v2023_v16  ;;  %vm2078_vm1 = vcmp.eq.s32.totalorder %v5375_v22, %v6725_v60 }
 0x731   : > { %v2055_v62 = vpop.permute.xlu0 %2054 }
 0x732   : > { %v2062_v58 = vsel %vm10316_vm6, %v2047_v54, %v2055_v62  ;;  %v2066_v28 = vsel %vm10317_vm5, %v2055_v62, %v2047_v54  ;;  %vm10318_vm6 = vmmov %vm10317_vm5 }
 0x733   : > { %v2070_v13 = vsel %vm5693_vm14, %v2038_v55, %v2066_v28  ;;  %v2071_v36 = vsel %vm5697_vm4, %v2042_v47, %v2062_v58 }
 0x734   : > { %v2080_v19 = vmax.f32 %v6900_v57, %v2070_v13  ;;  %v2081_v34 = vmax.f32 %v6905_v18, %v2071_v36  ;;  %v2088_v20 = vmin.f32 %v6900_v57, %v2070_v13  ;;  %v2089_v29 = vmin.f32 %v6905_v18, %v2071_v36  ;;  %v2059_v57 = vpop.permute.xlu2 %2058 }
 0x736   : > { %v7040_v6 = vsel %vm2079_vm13, %v2081_v34, %v2089_v29  ;;  %v7045_v40 = vsel %vm2078_vm1, %v2080_v19, %v2088_v20 }
 0x737   : > { %2112 = vrot.lane.b32.xlu2 %v7040_v6, %s4852_s29  ;;  %2128 = vrot.lane.b32.xlu0 %v7045_v40, %s4854_s6 }
 0x738   : > { %2104 = vrot.lane.b32.xlu1 %v7045_v40, %s4852_s29 }
 0x73c   : > { %v2037_v39 = vpop.permute.xlu2 %2036 }
 0x73d   : > { %v2051_v18 = vpop.permute.xlu1 %2050 }
 0x73e   : > { %v2035_v26 = vpop.permute.xlu0 %2034  ;;  %v2064_v59 = vsel %vm10317_vm5, %v2051_v18, %v2059_v57  ;;  %v2068_v38 = vsel %vm10318_vm6, %v2059_v57, %v2051_v18  ;;  %vm10320_vm5 = vmmov %vm10319_vm9 }
 0x73f   : > { %v2040_v30 = vsel %vm10315_vm10, %v2027_v31, %v2035_v26  ;;  %v2044_v32 = vsel %vm10319_vm9, %v2035_v26, %v2027_v31  ;;  %vm10321_vm10 = vmmov %vm10318_vm6 }
 0x740   : > { %2136 = vrot.lane.b32.xlu1 %v7040_v6, %s4854_s6  ;;  %v2074_v33 = vsel %vm5693_vm14, %v2040_v30, %v2068_v38  ;;  %v2075_v27 = vsel %vm5697_vm4, %v2044_v32, %v2064_v59 }
 0x741   : > { %v2084_v17 = vmax.f32 %v6934_v48, %v2074_v33  ;;  %v2085_v49 = vmax.f32 %v6939_v53, %v2075_v27  ;;  %v2092_v61 = vmin.f32 %v6934_v48, %v2074_v33  ;;  %v2093_v46 = vmin.f32 %v6939_v53, %v2075_v27 }
 0x743   : > { %v7074_v43 = vsel %vm2078_vm1, %v2084_v17, %v2092_v61  ;;  %v7083_v41 = vsel %vm2079_vm13, %v2085_v49, %v2093_v46 }
 0x744   : > { %2132 = vrot.lane.b32.xlu2 %v7074_v43, %s4854_s6  ;;  %2108 = vrot.lane.b32.xlu0 %v7074_v43, %s4852_s29  ;;  %v2025_v31 = vpop.permute.xlu2 %2024 }
 0x745   : > { %v2029_v48 = vpop.permute.xlu1 %2028 }
 0x746   : > { %v2053_v53 = vpop.permute.xlu0 %2052  ;;  %v2041_v16 = vsel %vm10319_vm9, %v2029_v48, %v2037_v39  ;;  %v2045_v54 = vsel %vm10320_vm5, %v2037_v39, %v2029_v48  ;;  %vm10322_vm9 = vmmov %vm10318_vm6 }
 0x747   : > { %vm10323_vm5 = vmmov %vm10318_vm6 }
 0x748   : > { %2116 = vrot.lane.b32.xlu1 %v7083_v41, %s4852_s29 }
 0x74c   : > { %2140 = vrot.lane.b32.xlu0 %v7083_v41, %s4854_s6 }
 0x74d   : > { %v2061_v35 = vpop.permute.xlu1 %2060 }
 0x74e   : > { %v2065_v15 = vsel %vm10318_vm6, %v2053_v53, %v2061_v35  ;;  %v2069_v62 = vsel %vm10321_vm10, %v2061_v35, %v2053_v53  ;;  %vm10324_vm6 = vcmp.lt.s32.totalorder %v4966_v37, 124 }
 0x74f   : > { %v2076_v55 = vsel %vm5693_vm14, %v2041_v16, %v2069_v62  ;;  %v2077_v47 = vsel %vm5697_vm4, %v2045_v54, %v2065_v15  ;;  %vm10325_vm10 = vmmov %vm10324_vm6 }
 0x750   : > { %v2086_v58 = vmax.f32 %v6962_v9, %v2076_v55  ;;  %v2087_v28 = vmax.f32 %v6977_v50, %v2077_v47  ;;  %v2094_v13 = vmin.f32 %v6962_v9, %v2076_v55  ;;  %v2095_v36 = vmin.f32 %v6977_v50, %v2077_v47  ;;  %v2057_v9 = vpop.permute.xlu2 %2056 }
 0x752   : > { %v7108_v19 = vsel %vm2078_vm1, %v2086_v58, %v2094_v13  ;;  %v7113_v34 = vsel %vm2079_vm13, %v2087_v28, %v2095_v36 }
 0x753   : > { %2134 = vrot.lane.b32.xlu1 %v7108_v19, %s4854_s6  ;;  %2110 = vrot.lane.b32.xlu2 %v7108_v19, %s4852_s29 }
 0x754   : > { %2118 = vrot.lane.b32.xlu0 %v7113_v34, %s4852_s29 }
 0x75a   : > { %v2049_v50 = vpop.permute.xlu1 %2048 }
 0x75b   : > { %v2033_v20 = vpop.permute.xlu0 %2032  ;;  %v2063_v29 = vsel %vm10322_vm9, %v2049_v50, %v2057_v9  ;;  %v2067_v57 = vsel %vm10323_vm5, %v2057_v9, %v2049_v50  ;;  %2142 = vrot.lane.b32.xlu2 %v7113_v34, %s4854_s6  ;;  %vm10328_vm9 = vcmp.lt.s32.totalorder %v4966_v37, 2 }
 0x75c   : > { %v2039_v18 = vsel %vm10324_vm6, %v2025_v31, %v2033_v20  ;;  %v2043_v26 = vsel %vm10325_vm10, %v2033_v20, %v2025_v31  ;;  %vm10329_vm5 = vmmov %vm10328_vm9  ;;  %vm2160_vm6 = vcmp.eq.s32.totalorder %v5202_v0, %v6725_v60  ;;  %vm2161_vm10 = vcmp.eq.s32.totalorder %v5207_v2, %v6727_v21 }
 0x75d   : > { %v2072_v59 = vsel %vm5693_vm14, %v2039_v18, %v2067_v57  ;;  %v2073_v38 = vsel %vm5697_vm4, %v2043_v26, %v2063_v29 }
 0x75e   : > { %v2082_v30 = vmax.f32 %v7002_v11, %v2072_v59  ;;  %v2083_v32 = vmax.f32 %v7007_v45, %v2073_v38  ;;  %v2090_v33 = vmin.f32 %v7002_v11, %v2072_v59  ;;  %v2091_v27 = vmin.f32 %v7007_v45, %v2073_v38 }
 0x760   : > { %v7142_v17 = vsel %vm2078_vm1, %v2082_v30, %v2090_v33  ;;  %v7147_v49 = vsel %vm2079_vm13, %v2083_v32, %v2091_v27  ;;  %vm10326_vm13 = vcmp.lt.s32.totalorder %v4966_v37, 126 }
 0x761   : > { %2106 = vrot.lane.b32.xlu0 %v7142_v17, %s4852_s29  ;;  %2114 = vrot.lane.b32.xlu1 %v7147_v49, %s4852_s29  ;;  %vm10327_vm1 = vmmov %vm10326_vm13 }
 0x763   : > { %2130 = vrot.lane.b32.xlu2 %v7142_v17, %s4854_s6 }
 0x769   : > { %2138 = vrot.lane.b32.xlu0 %v7147_v49, %s4854_s6 }
 0x76b   : > { %2318 = vrot.lane.b32.xlu2 %v4966_v37, %s4861_s13 }
 0x791   : > { %v2113_v45 = vpop.permute.xlu2 %2112 }
 0x79e   : > { %v2133_v16 = vpop.permute.xlu2 %2132 }
 0x7a9   : > { %v2129_v61 = vpop.permute.xlu0 %2128 }
 0x7aa   : > { %v2105_v11 = vpop.permute.xlu1 %2104 }
 0x7ab   : > { %v2120_v39 = vsel %vm10326_vm13, %v2105_v11, %v2113_v45  ;;  %v2124_v48 = vsel %vm10327_vm1, %v2113_v45, %v2105_v11  ;;  %vm10330_vm13 = vmmov %vm10327_vm1 }
 0x7b2   : > { %v2137_v46 = vpop.permute.xlu1 %2136 }
 0x7b3   : > { %v2144_v53 = vsel %vm10328_vm9, %v2129_v61, %v2137_v46  ;;  %v2148_v35 = vsel %vm10329_vm5, %v2137_v46, %v2129_v61  ;;  %vm10331_vm9 = vmmov %vm10329_vm5 }
 0x7b4   : > { %v2152_v54 = vsel %vm5379_vm2, %v2120_v39, %v2148_v35  ;;  %v2153_v15 = vsel %vm5383_vm3, %v2124_v48, %v2144_v53 }
 0x7b5   : > { %v2162_v62 = vmax.f32 %v7045_v40, %v2152_v54  ;;  %v2163_v31 = vmax.f32 %v7040_v6, %v2153_v15  ;;  %v2170_v55 = vmin.f32 %v7045_v40, %v2152_v54  ;;  %v2171_v47 = vmin.f32 %v7040_v6, %v2153_v15  ;;  %v2111_v6 = vpop.permute.xlu2 %2110 }
 0x7b6   : > { %v2109_v13 = vpop.permute.xlu0 %2108 }
 0x7b7   : > { %v7182_v58 = vsel %vm2160_vm6, %v2162_v62, %v2170_v55  ;;  %v7187_v28 = vsel %vm2161_vm10, %v2163_v31, %v2171_v47 }
 0x7b8   : > { %2210 = vrot.lane.b32.xlu1 %v7182_v58, %s4853_s30  ;;  %2186 = vrot.lane.b32.xlu2 %v7182_v58, %s4851_s28 }
 0x7b9   : > { %2194 = vrot.lane.b32.xlu0 %v7187_v28, %s4851_s28 }
 0x7ba   : > { %v2117_v40 = vpop.permute.xlu1 %2116 }
 0x7bb   : > { %v2122_v9 = vsel %vm10330_vm13, %v2109_v13, %v2117_v40  ;;  %v2126_v50 = vsel %vm10327_vm1, %v2117_v40, %v2109_v13  ;;  %vm10332_vm13 = vmmov %vm10329_vm5 }
 0x7bd   : > { %v2143_v27 = vpop.permute.xlu2 %2142 }
 0x7be   : > { %v2141_v36 = vpop.permute.xlu0 %2140 }
 0x7bf   : > { %v2146_v20 = vsel %vm10331_vm9, %v2133_v16, %v2141_v36  ;;  %v2150_v29 = vsel %vm10329_vm5, %v2141_v36, %v2133_v16  ;;  %vm10333_vm9 = vmmov %vm10327_vm1 }
 0x7c0   : > { %2218 = vrot.lane.b32.xlu2 %v7187_v28, %s4853_s30  ;;  %v2156_v57 = vsel %vm5379_vm2, %v2122_v9, %v2150_v29  ;;  %v2157_v18 = vsel %vm5383_vm3, %v2126_v50, %v2146_v20 }
 0x7c1   : > { %v2166_v26 = vmax.f32 %v7074_v43, %v2156_v57  ;;  %v2167_v59 = vmax.f32 %v7083_v41, %v2157_v18  ;;  %v2174_v38 = vmin.f32 %v7074_v43, %v2156_v57  ;;  %v2175_v30 = vmin.f32 %v7083_v41, %v2157_v18 }
 0x7c3   : > { %v7216_v32 = vsel %vm2160_vm6, %v2166_v26, %v2174_v38  ;;  %v7221_v33 = vsel %vm2161_vm10, %v2167_v59, %v2175_v30 }
 0x7c4   : > { %2214 = vrot.lane.b32.xlu0 %v7216_v32, %s4853_s30  ;;  %2190 = vrot.lane.b32.xlu1 %v7216_v32, %s4851_s28 }
 0x7c5   : > { %v2135_v43 = vpop.permute.xlu1 %2134  ;;  %v2131_v55 = vpop.permute.xlu2 %2130 }
 0x7c6   : > { %v2119_v11 = vpop.permute.xlu0 %2118  ;;  %v2151_v41 = vsel %vm10332_vm13, %v2143_v27, %v2135_v43  ;;  %v2147_v39 = vsel %vm10329_vm5, %v2135_v43, %v2143_v27  ;;  %vm10334_vm13 = vmmov %vm10327_vm1 }
 0x7c7   : > { %v2123_v45 = vsel %vm10327_vm1, %v2111_v6, %v2119_v11  ;;  %v2127_v46 = vsel %vm10333_vm9, %v2119_v11, %v2111_v6  ;;  %vm10335_vm9 = vmmov %vm10329_vm5 }
 0x7c8   : > { %2198 = vrot.lane.b32.xlu2 %v7221_v33, %s4851_s28  ;;  %v2158_v61 = vsel %vm5379_vm2, %v2123_v45, %v2151_v41  ;;  %v2159_v16 = vsel %vm5383_vm3, %v2127_v46, %v2147_v39 }
 0x7c9   : > { %v2168_v48 = vmax.f32 %v7108_v19, %v2158_v61  ;;  %v2176_v53 = vmin.f32 %v7108_v19, %v2158_v61  ;;  %v2169_v54 = vmax.f32 %v7113_v34, %v2159_v16  ;;  %v2177_v15 = vmin.f32 %v7113_v34, %v2159_v16 }
 0x7cb   : > { %v7244_v35 = vsel %vm2160_vm6, %v2168_v48, %v2176_v53  ;;  %v7259_v62 = vsel %vm2161_vm10, %v2169_v54, %v2177_v15 }
 0x7cc   : > { %2222 = vrot.lane.b32.xlu1 %v7221_v33, %s4853_s30  ;;  %2192 = vrot.lane.b32.xlu0 %v7244_v35, %s4851_s28 }
 0x7d0   : > { %2216 = vrot.lane.b32.xlu2 %v7244_v35, %s4853_s30 }
 0x7d3   : > { %v2107_v19 = vpop.permute.xlu0 %2106  ;;  %v2115_v31 = vpop.permute.xlu1 %2114 }
 0x7d4   : > { %2224 = vrot.lane.b32.xlu0 %v7259_v62, %s4853_s30  ;;  %2200 = vrot.lane.b32.xlu1 %v7259_v62, %s4851_s28  ;;  %v2121_v34 = vsel %vm10334_vm13, %v2107_v19, %v2115_v31  ;;  %v2125_v13 = vsel %vm10327_vm1, %v2115_v31, %v2107_v19  ;;  %vm10338_vm13 = vcmp.lt.s32.totalorder %v4966_v37, 127 }
 0x7d5   : > { %vm10339_vm1 = vmmov %vm10338_vm13 }
 0x7db   : > { %v2139_v47 = vpop.permute.xlu0 %2138 }
 0x7dc   : > { %v2145_v6 = vsel %vm10335_vm9, %v2131_v55, %v2139_v47  ;;  %v2149_v40 = vsel %vm10329_vm5, %v2139_v47, %v2131_v55  ;;  %vm2242_vm9 = vcmp.eq.s32.totalorder %v5200_v63, %v6725_v60  ;;  %vm2243_vm5 = vcmp.eq.s32.totalorder %v5205_v1, %v6727_v21 }
 0x7dd   : > { %v2154_v36 = vsel %vm5379_vm2, %v2121_v34, %v2149_v40  ;;  %v2155_v9 = vsel %vm5383_vm3, %v2125_v13, %v2145_v6 }
 0x7de   : > { %v2164_v50 = vmax.f32 %v7142_v17, %v2154_v36  ;;  %v2165_v20 = vmax.f32 %v7147_v49, %v2155_v9  ;;  %v2172_v29 = vmin.f32 %v7142_v17, %v2154_v36  ;;  %v2173_v57 = vmin.f32 %v7147_v49, %v2155_v9  ;;  %v7301_v17 = vpop.permute.xlu2 %2318 }
 0x7e0   : > { %v7284_v18 = vsel %vm2161_vm10, %v2165_v20, %v2173_v57  ;;  %v7289_v26 = vsel %vm2160_vm6, %v2164_v50, %v2172_v29  ;;  %vm10336_vm6 = vcmp.lt.s32.totalorder %v4966_v37, 1 }
 0x7e1   : > { %2196 = vrot.lane.b32.xlu2 %v7284_v18, %s4851_s28  ;;  %2212 = vrot.lane.b32.xlu0 %v7289_v26, %s4853_s30  ;;  %vm10337_vm10 = vmmov %vm10336_vm6 }
 0x7e2   : > { %2188 = vrot.lane.b32.xlu1 %v7289_v26, %s4851_s28 }
 0x7e9   : > { %2320 = vrot.lane.b32.xlu0 %v4983_v52, %s4861_s13 }
 0x7ea   : > { %2220 = vrot.lane.b32.xlu1 %v7284_v18, %s4853_s30 }
 0x812   : > { %v2187_v49 = vpop.permute.xlu2 %2186 }
 0x81a   : > { %v2219_v59 = vpop.permute.xlu2 %2218 }
 0x822   : > { %v2199_v15 = vpop.permute.xlu2 %2198 }
 0x82a   : > { %v2211_v38 = vpop.permute.xlu1 %2210 }
 0x82b   : > { %v2195_v30 = vpop.permute.xlu0 %2194  ;;  %v2226_v27 = vsel %vm10336_vm6, %v2211_v38, %v2219_v59  ;;  %v2230_v43 = vsel %vm10337_vm10, %v2219_v59, %v2211_v38  ;;  %vm10340_vm6 = vmmov %vm10339_vm1 }
 0x82c   : > { %v2202_v11 = vsel %vm10338_vm13, %v2187_v49, %v2195_v30  ;;  %v2206_v41 = vsel %vm10339_vm1, %v2195_v30, %v2187_v49  ;;  %vm10341_vm10 = vmmov %vm10339_vm1  ;;  %vm10342_vm13 = vcmp.lt.s32.totalorder %v4966_v37, 1  ;;  %v2217_v49 = vpop.permute.xlu2 %2216 }
 0x82d   : > { %v2234_v45 = vsel %vm5209_vm11, %v2202_v11, %v2230_v43  ;;  %v2235_v61 = vsel %vm5213_vm12, %v2206_v41, %v2226_v27  ;;  %vm10343_vm1 = vmmov %vm10342_vm13 }
 0x82e   : > { %v2244_v46 = vmax.f32 %v7182_v58, %v2234_v45  ;;  %v2245_v39 = vmax.f32 %v7187_v28, %v2235_v61  ;;  %v2252_v48 = vmin.f32 %v7182_v58, %v2234_v45  ;;  %v2253_v53 = vmin.f32 %v7187_v28, %v2235_v61 }
 0x830   : > { %v7326_v16 = vsel %vm2242_vm9, %v2244_v46, %v2252_v48  ;;  %v7331_v54 = vsel %vm2243_vm5, %v2245_v39, %v2253_v53 }
 0x831   : > { %2293 = vrot.lane.b32.xlu1 %v7326_v16, %s4862_s14  ;;  %2268 = vrot.lane.b32.xlu2 %v7326_v16, %s4861_s13 }
 0x832   : > { %2276 = vrot.lane.b32.xlu0 %v7331_v54, %s4861_s13 }
 0x836   : > { %v2215_v58 = vpop.permute.xlu0 %2214  ;;  %v2191_v28 = vpop.permute.xlu1 %2190 }
 0x837   : > { %v2204_v55 = vsel %vm10340_vm6, %v2191_v28, %v2199_v15  ;;  %v2208_v47 = vsel %vm10341_vm10, %v2199_v15, %v2191_v28  ;;  %vm10344_vm6 = vmmov %vm10343_vm1 }
 0x839   : > { %2301 = vrot.lane.b32.xlu2 %v7331_v54, %s4862_s14 }
 0x83b   : > { %v2197_v53 = vpop.permute.xlu2 %2196 }
 0x83e   : > { %v2193_v19 = vpop.permute.xlu0 %2192  ;;  %v2223_v31 = vpop.permute.xlu1 %2222 }
 0x83f   : > { %v2228_v34 = vsel %vm10342_vm13, %v2215_v58, %v2223_v31  ;;  %v2232_v13 = vsel %vm10343_vm1, %v2223_v31, %v2215_v58  ;;  %vm10345_vm13 = vmmov %vm10343_vm1 }
 0x840   : > { %v2238_v6 = vsel %vm5209_vm11, %v2204_v55, %v2232_v13  ;;  %v2239_v40 = vsel %vm5213_vm12, %v2208_v47, %v2228_v34  ;;  %vm10346_vm1 = vmmov %vm10341_vm10 }
 0x841   : > { %v2248_v36 = vmax.f32 %v7216_v32, %v2238_v6  ;;  %v2249_v9 = vmax.f32 %v7221_v33, %v2239_v40  ;;  %v2256_v50 = vmin.f32 %v7216_v32, %v2238_v6  ;;  %v2257_v20 = vmin.f32 %v7221_v33, %v2239_v40 }
 0x843   : > { %v7360_v29 = vsel %vm2242_vm9, %v2248_v36, %v2256_v50  ;;  %v7365_v57 = vsel %vm2243_vm5, %v2249_v9, %v2257_v20  ;;  %v2336_v50 = vshra.s32 %v4966_v37, 6  ;;  %v2337_v20 = vshra.s32 %v4983_v52, 6 }
 0x844   : > { %2297 = vrot.lane.b32.xlu0 %v7360_v29, %s4862_s14  ;;  %2272 = vrot.lane.b32.xlu1 %v7360_v29, %s4861_s13 }
 0x845   : > { %2280 = vrot.lane.b32.xlu2 %v7365_v57, %s4861_s13 }
 0x846   : > { %v2225_v32 = vpop.permute.xlu0 %2224  ;;  %v2201_v33 = vpop.permute.xlu1 %2200 }
 0x847   : > { %v2233_v59 = vsel %vm10344_vm6, %v2225_v32, %v2217_v49  ;;  %v2205_v38 = vsel %vm10341_vm10, %v2193_v19, %v2201_v33  ;;  %v2229_v27 = vsel %vm10345_vm13, %v2217_v49, %v2225_v32  ;;  %v2209_v43 = vsel %vm10346_vm1, %v2201_v33, %v2193_v19  ;;  %vm10347_vm6 = vmmov %vm10346_vm1 }
 0x848   : > { %v2240_v30 = vsel %vm5209_vm11, %v2205_v38, %v2233_v59  ;;  %v2241_v61 = vsel %vm5213_vm12, %v2209_v43, %v2229_v27  ;;  %vm10348_vm10 = vmmov %vm10346_vm1  ;;  %v2324_v49 = vxor.u32 32, %v4966_v37  ;;  %v2325_v32 = vxor.u32 32, %v4983_v52 }
 0x849   : > { %v2250_v11 = vmax.f32 %v7244_v35, %v2240_v30  ;;  %v2258_v41 = vmin.f32 %v7244_v35, %v2240_v30  ;;  %v2251_v46 = vmax.f32 %v7259_v62, %v2241_v61  ;;  %v2259_v35 = vmin.f32 %v7259_v62, %v2241_v61  ;;  %vm10349_vm1 = vmmov %vm10345_vm13 }
 0x84a   : > { %v7455_v38 = vand.u32 1, %v2336_v50  ;;  %v7457_v30 = vand.u32 1, %v2337_v20 }
 0x84b   : > { %v7388_v45 = vsel %vm2242_vm9, %v2250_v11, %v2258_v41  ;;  %v7403_v48 = vsel %vm2243_vm5, %v2251_v46, %v2259_v35  ;;  %v10352_v35 = vmov 0 }
 0x84c   : > { %2305 = vrot.lane.b32.xlu1 %v7365_v57, %s4862_s14  ;;  %2274 = vrot.lane.b32.xlu0 %v7388_v45, %s4861_s13 }
 0x84d   : > { %2299 = vrot.lane.b32.xlu2 %v7388_v45, %s4862_s14 }
 0x853   : > { %v2213_v58 = vpop.permute.xlu0 %2212 }
 0x854   : > { %v2189_v39 = vpop.permute.xlu1 %2188  ;;  %2282 = vrot.lane.b32.xlu1 %v7403_v48, %s4861_s13  ;;  %2307 = vrot.lane.b32.xlu0 %v7403_v48, %s4862_s14 }
 0x855   : > { %v2203_v15 = vsel %vm10347_vm6, %v2189_v39, %v2197_v53  ;;  %v2207_v62 = vsel %vm10348_vm10, %v2197_v53, %v2189_v39 }
 0x85c   : > { %v2221_v28 = vpop.permute.xlu1 %2220 }
 0x85d   : > { %v2227_v19 = vsel %vm10345_vm13, %v2213_v58, %v2221_v28  ;;  %v2231_v31 = vsel %vm10349_vm1, %v2221_v28, %v2213_v58  ;;  %vm2340_vm13 = vcmp.eq.s32.totalorder %v6725_v60, %v7455_v38  ;;  %vm2341_vm1 = vcmp.eq.s32.totalorder %v6727_v21, %v7457_v30 }
 0x85e   : > { %v2236_v55 = vsel %vm5209_vm11, %v2203_v15, %v2231_v31  ;;  %v2237_v47 = vsel %vm5213_vm12, %v2207_v62, %v2227_v19 }
 0x85f   : > { %v2246_v34 = vmax.f32 %v7289_v26, %v2236_v55  ;;  %v2247_v13 = vmax.f32 %v7284_v18, %v2237_v47  ;;  %v2254_v6 = vmin.f32 %v7289_v26, %v2236_v55  ;;  %v2255_v40 = vmin.f32 %v7284_v18, %v2237_v47  ;;  %v2321_v26 = vpop.permute.xlu0 %2320 }
 0x861   : > { %v7428_v36 = vsel %vm2242_vm9, %v2246_v34, %v2254_v6  ;;  %v7433_v9 = vsel %vm2243_vm5, %v2247_v13, %v2255_v40  ;;  %vm10250_vm9 = vcmp.lt.s32.totalorder %v4966_v37, 96  ;;  %vm10249_vm5 = vcmp.lt.s32.totalorder %v4966_v37, 32 }
 0x862   : > { %2295 = vrot.lane.b32.xlu0 %v7428_v36, %s4862_s14  ;;  %2270 = vrot.lane.b32.xlu1 %v7428_v36, %s4861_s13  ;;  %v2322_v33 = vsel %vm10250_vm9, %v7301_v17, %v2321_v26  ;;  %v2323_v59 = vsel %vm10250_vm9, %v2321_v26, %v7301_v17 }
 0x863   : > { %2278 = vrot.lane.b32.xlu2 %v7433_v9, %s4861_s13  ;;  %vm7463_vm6 = vcmp.eq.s32.totalorder %v2322_v33, %v2324_v49  ;;  %vm7467_vm10 = vcmp.eq.s32.totalorder %v2323_v59, %v2325_v32 }
 0x864   : > { %v10353_v35 = vsel %vm7467_vm10, 4294967295, %v10352_v35 }
 0x86a   : > { %2303 = vrot.lane.b32.xlu1 %v7433_v9, %s4862_s14 }
 0x88b   : > { %v2269_v18 = vpop.permute.xlu2 %2268 }
 0x893   : > { %v2302_v27 = vpop.permute.xlu2 %2301 }
 0x89f   : > { %v2281_v47 = vpop.permute.xlu2 %2280 }
 0x8a3   : > { %v2294_v43 = vpop.permute.xlu1 %2293 }
 0x8a4   : > { %v2277_v11 = vpop.permute.xlu0 %2276  ;;  %v2310_v41 = vsel %vm10249_vm5, %v2294_v43, %v2302_v27  ;;  %v2314_v61 = vsel %vm10249_vm5, %v2302_v27, %v2294_v43 }
 0x8a5   : > { %v2285_v17 = vsel %vm10250_vm9, %v2269_v18, %v2277_v11  ;;  %v2289_v39 = vsel %vm10250_vm9, %v2277_v11, %v2269_v18 }
 0x8a6   : > { %v2328_v53 = vsel %vm7463_vm6, %v2285_v17, %v2314_v61  ;;  %v2329_v58 = vsel %vm7467_vm10, %v2289_v39, %v2310_v41 }
 0x8a7   : > { %v2342_v28 = vmax.f32 %v7326_v16, %v2328_v53  ;;  %v2343_v15 = vmax.f32 %v7331_v54, %v2329_v58  ;;  %v2350_v62 = vmin.f32 %v7326_v16, %v2328_v53  ;;  %v2351_v19 = vmin.f32 %v7331_v54, %v2329_v58  ;;  %v2300_v11 = vpop.permute.xlu2 %2299 }
 0x8a9   : > { %v7490_v31 = vsel %vm2340_vm13, %v2342_v28, %v2350_v62  ;;  %v7495_v55 = vsel %vm2341_vm1, %v2343_v15, %v2351_v19 }
 0x8aa   : > { %2390 = vrot.lane.b32.xlu2 %v7490_v31, %s4860_s12  ;;  %2366 = vrot.lane.b32.xlu0 %v7490_v31, %s4859_s11 }
 0x8ab   : > { %2374 = vrot.lane.b32.xlu1 %v7495_v55, %s4859_s11 }
 0x8b2   : > { %2398 = vrot.lane.b32.xlu0 %v7495_v55, %s4860_s12 }
 0x8b6   : > { %v2298_v16 = vpop.permute.xlu0 %2297  ;;  %v2273_v54 = vpop.permute.xlu1 %2272 }
 0x8b7   : > { %v2287_v6 = vsel %vm10250_vm9, %v2273_v54, %v2281_v47  ;;  %v2291_v40 = vsel %vm10250_vm9, %v2281_v47, %v2273_v54 }
 0x8bd   : > { %v2279_v47 = vpop.permute.xlu2 %2278 }
 0x8be   : > { %v2275_v34 = vpop.permute.xlu0 %2274  ;;  %v2306_v13 = vpop.permute.xlu1 %2305 }
 0x8bf   : > { %v2312_v18 = vsel %vm10249_vm5, %v2298_v16, %v2306_v13  ;;  %v2316_v26 = vsel %vm10249_vm5, %v2306_v13, %v2298_v16 }
 0x8c0   : > { %v2332_v50 = vsel %vm7463_vm6, %v2287_v6, %v2316_v26  ;;  %v2333_v20 = vsel %vm7467_vm10, %v2291_v40, %v2312_v18 }
 0x8c1   : > { %v2346_v49 = vmax.f32 %v7360_v29, %v2332_v50  ;;  %v2347_v32 = vmax.f32 %v7365_v57, %v2333_v20  ;;  %v2354_v33 = vmin.f32 %v7360_v29, %v2332_v50  ;;  %v2355_v59 = vmin.f32 %v7365_v57, %v2333_v20 }
 0x8c3   : > { %v7524_v27 = vsel %vm2340_vm13, %v2346_v49, %v2354_v33  ;;  %v7529_v43 = vsel %vm2341_vm1, %v2347_v32, %v2355_v59 }
 0x8c4   : > { %2394 = vrot.lane.b32.xlu1 %v7524_v27, %s4860_s12  ;;  %2370 = vrot.lane.b32.xlu2 %v7524_v27, %s4859_s11 }
 0x8c5   : > { %2378 = vrot.lane.b32.xlu0 %v7529_v43, %s4859_s11 }
 0x8c6   : > { %v2308_v29 = vpop.permute.xlu0 %2307  ;;  %v2283_v57 = vpop.permute.xlu1 %2282 }
 0x8c7   : > { %v2317_v41 = vsel %vm10249_vm5, %v2308_v29, %v2300_v11  ;;  %v2288_v61 = vsel %vm10250_vm9, %v2275_v34, %v2283_v57  ;;  %v2313_v39 = vsel %vm10249_vm5, %v2300_v11, %v2308_v29  ;;  %v2292_v53 = vsel %vm10250_vm9, %v2283_v57, %v2275_v34 }
 0x8c8   : > { %v2334_v17 = vsel %vm7463_vm6, %v2288_v61, %v2317_v41  ;;  %v2335_v62 = vsel %vm7467_vm10, %v2292_v53, %v2313_v39 }
 0x8c9   : > { %v2348_v58 = vmax.f32 %v7388_v45, %v2334_v17  ;;  %v2356_v28 = vmin.f32 %v7388_v45, %v2334_v17  ;;  %v2349_v19 = vmax.f32 %v7403_v48, %v2335_v62  ;;  %v2357_v45 = vmin.f32 %v7403_v48, %v2335_v62 }
 0x8cb   : > { %v7552_v15 = vsel %vm2340_vm13, %v2348_v58, %v2356_v28  ;;  %v7567_v54 = vsel %vm2341_vm1, %v2349_v19, %v2357_v45 }
 0x8cc   : > { %2402 = vrot.lane.b32.xlu2 %v7529_v43, %s4860_s12  ;;  %2372 = vrot.lane.b32.xlu1 %v7552_v15, %s4859_s11 }
 0x8cd   : > { %2396 = vrot.lane.b32.xlu0 %v7552_v15, %s4860_s12 }
 0x8d4   : > { %v2271_v16 = vpop.permute.xlu1 %2270  ;;  %2380 = vrot.lane.b32.xlu2 %v7567_v54, %s4859_s11  ;;  %2404 = vrot.lane.b32.xlu1 %v7567_v54, %s4860_s12  ;;  %v2296_v34 = vpop.permute.xlu0 %2295 }
 0x8d5   : > { %v2286_v6 = vsel %vm10250_vm9, %v2271_v16, %v2279_v47  ;;  %v2290_v48 = vsel %vm10250_vm9, %v2279_v47, %v2271_v16 }
 0x8dc   : > { %v2304_v13 = vpop.permute.xlu1 %2303 }
 0x8dd   : > { %v2311_v40 = vsel %vm10249_vm5, %v2296_v34, %v2304_v13  ;;  %v2315_v18 = vsel %vm10249_vm5, %v2304_v13, %v2296_v34  ;;  %vm10356_vm5 = vcmp.lt.s32.totalorder %v4966_v37, 16 }
 0x8de   : > { %v2330_v26 = vsel %vm7463_vm6, %v2286_v6, %v2315_v18  ;;  %v2331_v50 = vsel %vm7467_vm10, %v2290_v48, %v2311_v40  ;;  %vm10357_vm9 = vmmov %vm10356_vm5  ;;  %vm10253_vm10 = vcmp.eq.s32.totalorder %v6137_v12, %v7457_v30 }
 0x8df   : > { %v2344_v20 = vmax.f32 %v7428_v36, %v2330_v26  ;;  %v2345_v49 = vmax.f32 %v7433_v9, %v2331_v50  ;;  %v2352_v32 = vmin.f32 %v7428_v36, %v2330_v26  ;;  %v2353_v33 = vmin.f32 %v7433_v9, %v2331_v50 }
 0x8e1   : > { %v7592_v59 = vsel %vm2340_vm13, %v2344_v20, %v2352_v32  ;;  %v7597_v11 = vsel %vm2341_vm1, %v2345_v49, %v2353_v33  ;;  %vm10354_vm13 = vcmp.lt.s32.totalorder %v4966_v37, 112 }
 0x8e2   : > { %2392 = vrot.lane.b32.xlu1 %v7592_v59, %s4860_s12  ;;  %2368 = vrot.lane.b32.xlu2 %v7592_v59, %s4859_s11  ;;  %vm10355_vm1 = vmmov %vm10354_vm13 }
 0x8e3   : > { %2376 = vrot.lane.b32.xlu0 %v7597_v11, %s4859_s11 }
 0x8ea   : > { %2400 = vrot.lane.b32.xlu2 %v7597_v11, %s4860_s12 }
 0x904   : > { %v2391_v29 = vpop.permute.xlu2 %2390 }
 0x91c   : > { %v2367_v36 = vpop.permute.xlu0 %2366 }
 0x91d   : > { %v2375_v9 = vpop.permute.xlu1 %2374 }
 0x91e   : > { %v2382_v41 = vsel %vm10354_vm13, %v2367_v36, %v2375_v9  ;;  %v2386_v61 = vsel %vm10355_vm1, %v2375_v9, %v2367_v36  ;;  %vm2422_vm13 = vcmp.eq.s32.totalorder %v6135_v3, %v7455_v38 }
 0x924   : > { %v2399_v57 = vpop.permute.xlu0 %2398 }
 0x925   : > { %v2406_v17 = vsel %vm10356_vm5, %v2391_v29, %v2399_v57  ;;  %v2410_v39 = vsel %vm10357_vm9, %v2399_v57, %v2391_v29  ;;  %vm10358_vm9 = vmmov %vm10356_vm5 }
 0x926   : > { %v2414_v53 = vsel %vm6729_vm8, %v2382_v41, %v2410_v39  ;;  %v2415_v58 = vsel %vm6733_vm15, %v2386_v61, %v2406_v17 }
 0x927   : > { %v2424_v28 = vmax.f32 %v7490_v31, %v2414_v53  ;;  %v2425_v62 = vmax.f32 %v7495_v55, %v2415_v58  ;;  %v2432_v19 = vmin.f32 %v7490_v31, %v2414_v53  ;;  %v2433_v45 = vmin.f32 %v7495_v55, %v2415_v58  ;;  %v2371_v31 = vpop.permute.xlu2 %2370 }
 0x929   : > { %v7630_v16 = vsel %vm10253_vm10, %v2425_v62, %v2433_v45  ;;  %v7635_v47 = vsel %vm2422_vm13, %v2424_v28, %v2432_v19  ;;  %vm10359_vm10 = vmmov %vm10355_vm1 }
 0x92a   : > { %2456 = vrot.lane.b32.xlu2 %v7630_v16, %s4857_s9  ;;  %2472 = vrot.lane.b32.xlu0 %v7635_v47, %s4858_s10 }
 0x92b   : > { %2448 = vrot.lane.b32.xlu1 %v7635_v47, %s4857_s9 }
 0x92f   : > { %v2403_v55 = vpop.permute.xlu2 %2402 }
 0x933   : > { %2480 = vrot.lane.b32.xlu1 %v7630_v16, %s4858_s10 }
 0x936   : > { %v2395_v34 = vpop.permute.xlu1 %2394 }
 0x937   : > { %v2379_v13 = vpop.permute.xlu0 %2378  ;;  %v2408_v6 = vsel %vm10358_vm9, %v2395_v34, %v2403_v55  ;;  %v2412_v48 = vsel %vm10356_vm5, %v2403_v55, %v2395_v34  ;;  %vm10361_vm9 = vmmov %vm10355_vm1 }
 0x938   : > { %v2384_v40 = vsel %vm10355_vm1, %v2371_v31, %v2379_v13  ;;  %v2388_v18 = vsel %vm10359_vm10, %v2379_v13, %v2371_v31  ;;  %vm10360_vm10 = vcmp.eq.s32.totalorder %v6137_v12, %v7457_v30  ;;  %vm10362_vm5 = vmmov %vm10355_vm1  ;;  %vm10363_vm1 = vcmp.lt.s32.totalorder %v4966_v37, 16 }
 0x939   : > { %v2418_v26 = vsel %vm6729_vm8, %v2384_v40, %v2412_v48  ;;  %v2419_v50 = vsel %vm6733_vm15, %v2388_v18, %v2408_v6 }
 0x93a   : > { %v2428_v20 = vmax.f32 %v7524_v27, %v2418_v26  ;;  %v2429_v49 = vmax.f32 %v7529_v43, %v2419_v50  ;;  %v2436_v32 = vmin.f32 %v7524_v27, %v2418_v26  ;;  %v2437_v33 = vmin.f32 %v7529_v43, %v2419_v50  ;;  %v2381_v43 = vpop.permute.xlu2 %2380 }
 0x93c   : > { %v7664_v36 = vsel %vm2422_vm13, %v2428_v20, %v2436_v32  ;;  %v7669_v9 = vsel %vm10360_vm10, %v2429_v49, %v2437_v33  ;;  %vm10364_vm10 = vmmov %vm10363_vm1 }
 0x93d   : > { %2476 = vrot.lane.b32.xlu2 %v7664_v36, %s4858_s10  ;;  %2452 = vrot.lane.b32.xlu0 %v7664_v36, %s4857_s9 }
 0x93e   : > { %2460 = vrot.lane.b32.xlu1 %v7669_v9, %s4857_s9  ;;  %v2373_v27 = vpop.permute.xlu1 %2372 }
 0x93f   : > { %v2397_v29 = vpop.permute.xlu0 %2396  ;;  %v2385_v41 = vsel %vm10361_vm9, %v2373_v27, %v2381_v43  ;;  %v2389_v61 = vsel %vm10362_vm5, %v2381_v43, %v2373_v27  ;;  %vm10365_vm9 = vcmp.eq.s32.totalorder %v6137_v12, %v7457_v30  ;;  %vm10366_vm5 = vmmov %vm10363_vm1 }
 0x942   : > { %v2369_v28 = vpop.permute.xlu2 %2368 }
 0x945   : > { %2484 = vrot.lane.b32.xlu0 %v7669_v9, %s4858_s10 }
 0x946   : > { %v2405_v57 = vpop.permute.xlu1 %2404 }
 0x947   : > { %v2409_v17 = vsel %vm10363_vm1, %v2397_v29, %v2405_v57  ;;  %v2413_v39 = vsel %vm10364_vm10, %v2405_v57, %v2397_v29  ;;  %vm10367_vm10 = vcmp.lt.s32.totalorder %v4966_v37, 112 }
 0x948   : > { %v2420_v53 = vsel %vm6729_vm8, %v2385_v41, %v2413_v39  ;;  %v2421_v58 = vsel %vm6733_vm15, %v2389_v61, %v2409_v17 }
 0x949   : > { %v2430_v62 = vmax.f32 %v7552_v15, %v2420_v53  ;;  %v2431_v19 = vmax.f32 %v7567_v54, %v2421_v58  ;;  %v2438_v45 = vmin.f32 %v7552_v15, %v2420_v53  ;;  %v2439_v31 = vmin.f32 %v7567_v54, %v2421_v58 }
 0x94a   : > { %v2401_v15 = vpop.permute.xlu2 %2400 }
 0x94b   : > { %v7698_v55 = vsel %vm2422_vm13, %v2430_v62, %v2438_v45  ;;  %v7703_v34 = vsel %vm10365_vm9, %v2431_v19, %v2439_v31  ;;  %vm10368_vm9 = vmmov %vm10367_vm10 }
 0x94c   : > { %2478 = vrot.lane.b32.xlu1 %v7698_v55, %s4858_s10  ;;  %2454 = vrot.lane.b32.xlu2 %v7698_v55, %s4857_s9 }
 0x94d   : > { %2462 = vrot.lane.b32.xlu0 %v7703_v34, %s4857_s9 }
 0x954   : > { %v2393_v54 = vpop.permute.xlu1 %2392  ;;  %2486 = vrot.lane.b32.xlu2 %v7703_v34, %s4858_s10 }
 0x955   : > { %v2377_v13 = vpop.permute.xlu0 %2376  ;;  %v2407_v6 = vsel %vm10366_vm5, %v2393_v54, %v2401_v15  ;;  %v2411_v48 = vsel %vm10363_vm1, %v2401_v15, %v2393_v54  ;;  %vm10369_vm5 = vcmp.eq.s32.totalorder %v6137_v12, %v7457_v30 }
 0x956   : > { %v2383_v40 = vsel %vm10367_vm10, %v2369_v28, %v2377_v13  ;;  %v2387_v18 = vsel %vm10368_vm9, %v2377_v13, %v2369_v28  ;;  %vm10372_vm10 = vcmp.lt.s32.totalorder %v4966_v37, 8 }
 0x957   : > { %v2416_v26 = vsel %vm6729_vm8, %v2383_v40, %v2411_v48  ;;  %v2417_v50 = vsel %vm6733_vm15, %v2387_v18, %v2407_v6  ;;  %vm10373_vm9 = vmmov %vm10372_vm10 }
 0x958   : > { %v2426_v20 = vmax.f32 %v7592_v59, %v2416_v26  ;;  %v2427_v49 = vmax.f32 %v7597_v11, %v2417_v50  ;;  %v2434_v32 = vmin.f32 %v7592_v59, %v2416_v26  ;;  %v2435_v33 = vmin.f32 %v7597_v11, %v2417_v50 }
 0x95a   : > { %v7732_v27 = vsel %vm2422_vm13, %v2426_v20, %v2434_v32  ;;  %v7737_v43 = vsel %vm10369_vm5, %v2427_v49, %v2435_v33  ;;  %vm10370_vm13 = vcmp.lt.s32.totalorder %v4966_v37, 120  ;;  %vm10254_vm5 = vcmp.eq.s32.totalorder %v5685_v7, %v7455_v38 }
 0x95b   : > { %2450 = vrot.lane.b32.xlu0 %v7732_v27, %s4857_s9  ;;  %2458 = vrot.lane.b32.xlu1 %v7737_v43, %s4857_s9  ;;  %vm10371_vm1 = vmmov %vm10370_vm13 }
 0x95c   : > { %2474 = vrot.lane.b32.xlu2 %v7732_v27, %s4858_s10 }
 0x963   : > { %2482 = vrot.lane.b32.xlu0 %v7737_v43, %s4858_s10 }
 0x984   : > { %v2457_v11 = vpop.permute.xlu2 %2456 }
 0x99c   : > { %v2473_v29 = vpop.permute.xlu0 %2472 }
 0x99d   : > { %v2449_v59 = vpop.permute.xlu1 %2448 }
 0x99e   : > { %v2464_v41 = vsel %vm10370_vm13, %v2449_v59, %v2457_v11  ;;  %v2468_v61 = vsel %vm10371_vm1, %v2457_v11, %v2449_v59  ;;  %vm10255_vm13 = vcmp.eq.s32.totalorder %v5687_v8, %v7457_v30 }
 0x9a5   : > { %v2481_v57 = vpop.permute.xlu1 %2480 }
 0x9a6   : > { %v2488_v17 = vsel %vm10372_vm10, %v2473_v29, %v2481_v57  ;;  %v2492_v39 = vsel %vm10373_vm9, %v2481_v57, %v2473_v29  ;;  %vm10374_vm10 = vmmov %vm10371_vm1 }
 0x9a7   : > { %v2496_v53 = vsel %vm6139_vm7, %v2464_v41, %v2492_v39  ;;  %v2497_v58 = vsel %vm6143_vm0, %v2468_v61, %v2488_v17 }
 0x9a8   : > { %v2506_v28 = vmax.f32 %v7635_v47, %v2496_v53  ;;  %v2507_v62 = vmax.f32 %v7630_v16, %v2497_v58  ;;  %v2514_v19 = vmin.f32 %v7635_v47, %v2496_v53  ;;  %v2515_v45 = vmin.f32 %v7630_v16, %v2497_v58  ;;  %v2477_v16 = vpop.permute.xlu2 %2476 }
 0x9aa   : > { %v7770_v31 = vsel %vm10254_vm5, %v2506_v28, %v2514_v19  ;;  %v7775_v15 = vsel %vm10255_vm13, %v2507_v62, %v2515_v45  ;;  %vm10375_vm5 = vmmov %vm10373_vm9 }
 0x9ab   : > { %2554 = vrot.lane.b32.xlu1 %v7770_v31, %s4856_s8  ;;  %2530 = vrot.lane.b32.xlu2 %v7770_v31, %s4855_s7 }
 0x9ac   : > { %2538 = vrot.lane.b32.xlu0 %v7775_v15, %s4855_s7 }
 0x9af   : > { %v2453_v47 = vpop.permute.xlu0 %2452 }
 0x9b0   : > { %v2455_v54 = vpop.permute.xlu2 %2454  ;;  %v2461_v13 = vpop.permute.xlu1 %2460 }
 0x9b1   : > { %v2466_v48 = vsel %vm10371_vm1, %v2453_v47, %v2461_v13  ;;  %v2470_v40 = vsel %vm10374_vm10, %v2461_v13, %v2453_v47  ;;  %vm10377_vm1 = vmmov %vm10373_vm9 }
 0x9b3   : > { %2562 = vrot.lane.b32.xlu2 %v7775_v15, %s4856_s8 }
 0x9b7   : > { %v2485_v6 = vpop.permute.xlu0 %2484 }
 0x9b8   : > { %v2490_v18 = vsel %vm10373_vm9, %v2477_v16, %v2485_v6  ;;  %v2494_v26 = vsel %vm10375_vm5, %v2485_v6, %v2477_v16  ;;  %vm10376_vm5 = vcmp.eq.s32.totalorder %v5685_v7, %v7455_v38  ;;  %v2487_v57 = vpop.permute.xlu2 %2486  ;;  %vm10378_vm9 = vmmov %vm10374_vm10 }
 0x9b9   : > { %v2500_v50 = vsel %vm6139_vm7, %v2466_v48, %v2494_v26  ;;  %v2501_v20 = vsel %vm6143_vm0, %v2470_v40, %v2490_v18 }
 0x9ba   : > { %v2510_v49 = vmax.f32 %v7664_v36, %v2500_v50  ;;  %v2511_v32 = vmax.f32 %v7669_v9, %v2501_v20  ;;  %v2518_v33 = vmin.f32 %v7664_v36, %v2500_v50  ;;  %v2519_v59 = vmin.f32 %v7669_v9, %v2501_v20 }
 0x9bc   : > { %v7804_v11 = vsel %vm10255_vm13, %v2511_v32, %v2519_v59  ;;  %v7809_v29 = vsel %vm10376_vm5, %v2510_v49, %v2518_v33  ;;  %vm10379_vm5 = vmmov %vm10377_vm1  ;;  %vm10380_vm13 = vcmp.eq.s32.totalorder %v5685_v7, %v7455_v38 }
 0x9bd   : > { %2542 = vrot.lane.b32.xlu2 %v7804_v11, %s4855_s7  ;;  %2558 = vrot.lane.b32.xlu0 %v7809_v29, %s4856_s8 }
 0x9be   : > { %2534 = vrot.lane.b32.xlu1 %v7809_v29, %s4855_s7  ;;  %v2479_v36 = vpop.permute.xlu1 %2478 }
 0x9bf   : > { %v2463_v9 = vpop.permute.xlu0 %2462  ;;  %v2495_v41 = vsel %vm10377_vm1, %v2487_v57, %v2479_v36  ;;  %v2491_v53 = vsel %vm10379_vm5, %v2479_v36, %v2487_v57  ;;  %vm10382_vm1 = vmmov %vm10378_vm9 }
 0x9c0   : > { %v2467_v61 = vsel %vm10374_vm10, %v2455_v54, %v2463_v9  ;;  %v2471_v39 = vsel %vm10378_vm9, %v2463_v9, %v2455_v54  ;;  %v2475_v13 = vpop.permute.xlu2 %2474  ;;  %vm10383_vm10 = vmmov %vm10382_vm1 }
 0x9c1   : > { %v2502_v17 = vsel %vm6139_vm7, %v2467_v61, %v2495_v41  ;;  %v2503_v19 = vsel %vm6143_vm0, %v2471_v39, %v2491_v53  ;;  %vm10384_vm9 = vmmov %vm10379_vm5 }
 0x9c2   : > { %v2512_v58 = vmax.f32 %v7698_v55, %v2502_v17  ;;  %v2520_v28 = vmin.f32 %v7698_v55, %v2502_v17  ;;  %v2513_v45 = vmax.f32 %v7703_v34, %v2503_v19  ;;  %v2521_v55 = vmin.f32 %v7703_v34, %v2503_v19 }
 0x9c4   : > { %v7832_v62 = vsel %vm10380_vm13, %v2512_v58, %v2520_v28  ;;  %vm10381_vm13 = vcmp.eq.s32.totalorder %v5687_v8, %v7457_v30 }
 0x9c5   : > { %2560 = vrot.lane.b32.xlu2 %v7832_v62, %s4856_s8  ;;  %2536 = vrot.lane.b32.xlu0 %v7832_v62, %s4855_s7  ;;  %v7847_v47 = vsel %vm10381_vm13, %v2513_v45, %v2521_v55 }
 0x9c6   : > { %2566 = vrot.lane.b32.xlu1 %v7804_v11, %s4856_s8 }
 0x9cd   : > { %v2451_v16 = vpop.permute.xlu0 %2450  ;;  %2568 = vrot.lane.b32.xlu0 %v7847_v47, %s4856_s8  ;;  %v2459_v54 = vpop.permute.xlu1 %2458 }
 0x9ce   : > { %2544 = vrot.lane.b32.xlu1 %v7847_v47, %s4855_s7  ;;  %v2465_v48 = vsel %vm10382_vm1, %v2451_v16, %v2459_v54  ;;  %v2469_v34 = vsel %vm10383_vm10, %v2459_v54, %v2451_v16  ;;  %vm10385_vm1 = vcmp.eq.s32.totalorder %v5685_v7, %v7455_v38  ;;  %vm10386_vm10 = vcmp.lt.s32.totalorder %v4966_v37, 4 }
 0x9d5   : > { %v2483_v6 = vpop.permute.xlu0 %2482 }
 0x9d6   : > { %v2489_v40 = vsel %vm10384_vm9, %v2475_v13, %v2483_v6  ;;  %v2493_v18 = vsel %vm10379_vm5, %v2483_v6, %v2475_v13  ;;  %vm10387_vm9 = vmmov %vm10386_vm10  ;;  %vm10388_vm5 = vcmp.lt.s32.totalorder %v4966_v37, 124 }
 0x9d7   : > { %v2498_v26 = vsel %vm6139_vm7, %v2465_v48, %v2493_v18  ;;  %v2499_v50 = vsel %vm6143_vm0, %v2469_v34, %v2489_v40 }
 0x9d8   : > { %v2508_v20 = vmax.f32 %v7732_v27, %v2498_v26  ;;  %v2509_v49 = vmax.f32 %v7737_v43, %v2499_v50  ;;  %v2516_v32 = vmin.f32 %v7732_v27, %v2498_v26  ;;  %v2517_v33 = vmin.f32 %v7737_v43, %v2499_v50 }
 0x9da   : > { %v7872_v59 = vsel %vm10381_vm13, %v2509_v49, %v2517_v33  ;;  %v7877_v57 = vsel %vm10385_vm1, %v2508_v20, %v2516_v32  ;;  %vm10389_vm13 = vmmov %vm10388_vm5  ;;  %vm2586_vm1 = vcmp.eq.s32.totalorder %v5375_v22, %v7455_v38 }
 0x9db   : > { %2540 = vrot.lane.b32.xlu2 %v7872_v59, %s4855_s7  ;;  %2556 = vrot.lane.b32.xlu0 %v7877_v57, %s4856_s8 }
 0x9dc   : > { %2532 = vrot.lane.b32.xlu1 %v7877_v57, %s4855_s7 }
 0x9e4   : > { %2564 = vrot.lane.b32.xlu1 %v7872_v59, %s4856_s8 }
 0xa05   : > { %v2531_v27 = vpop.permute.xlu2 %2530 }
 0xa0d   : > { %v2563_v43 = vpop.permute.xlu2 %2562 }
 0xa17   : > { %v2543_v13 = vpop.permute.xlu2 %2542 }
 0xa1d   : > { %v2555_v36 = vpop.permute.xlu1 %2554 }
 0xa1e   : > { %v2539_v9 = vpop.permute.xlu0 %2538  ;;  %v2570_v41 = vsel %vm10386_vm10, %v2555_v36, %v2563_v43  ;;  %v2574_v61 = vsel %vm10387_vm9, %v2563_v43, %v2555_v36  ;;  %vm10256_vm10 = vcmp.eq.s32.totalorder %v5377_v23, %v7457_v30  ;;  %vm10390_vm9 = vmmov %vm10388_vm5 }
 0xa1f   : > { %v2546_v17 = vsel %vm10388_vm5, %v2531_v27, %v2539_v9  ;;  %v2550_v39 = vsel %vm10389_vm13, %v2539_v9, %v2531_v27  ;;  %vm10391_vm13 = vcmp.lt.s32.totalorder %v4966_v37, 4  ;;  %v2561_v9 = vpop.permute.xlu2 %2560 }
 0xa20   : > { %v2578_v53 = vsel %vm5693_vm14, %v2546_v17, %v2574_v61  ;;  %v2579_v58 = vsel %vm5697_vm4, %v2550_v39, %v2570_v41 }
 0xa21   : > { %v2588_v28 = vmax.f32 %v7770_v31, %v2578_v53  ;;  %v2589_v19 = vmax.f32 %v7775_v15, %v2579_v58  ;;  %v2596_v45 = vmin.f32 %v7770_v31, %v2578_v53  ;;  %v2597_v55 = vmin.f32 %v7775_v15, %v2579_v58 }
 0xa23   : > { %v7910_v16 = vsel %vm2586_vm1, %v2588_v28, %v2596_v45  ;;  %v7915_v54 = vsel %vm10256_vm10, %v2589_v19, %v2597_v55  ;;  %vm10392_vm10 = vmmov %vm10391_vm13 }
 0xa24   : > { %2636 = vrot.lane.b32.xlu2 %v7910_v16, %s4854_s6  ;;  %2612 = vrot.lane.b32.xlu0 %v7910_v16, %s4852_s29 }
 0xa25   : > { %2620 = vrot.lane.b32.xlu1 %v7915_v54, %s4852_s29 }
 0xa2c   : > { %2644 = vrot.lane.b32.xlu0 %v7915_v54, %s4854_s6 }
 0xa2f   : > { %v2559_v31 = vpop.permute.xlu0 %2558 }
 0xa30   : > { %v2535_v15 = vpop.permute.xlu1 %2534 }
 0xa31   : > { %v2548_v34 = vsel %vm10390_vm9, %v2535_v15, %v2543_v13  ;;  %v2552_v40 = vsel %vm10388_vm5, %v2543_v13, %v2535_v15  ;;  %vm10394_vm9 = vmmov %vm10391_vm13 }
 0xa35   : > { %v2541_v13 = vpop.permute.xlu2 %2540 }
 0xa37   : > { %v2537_v6 = vpop.permute.xlu0 %2536 }
 0xa38   : > { %v2567_v48 = vpop.permute.xlu1 %2566 }
 0xa39   : > { %v2572_v18 = vsel %vm10391_vm13, %v2559_v31, %v2567_v48  ;;  %v2576_v26 = vsel %vm10392_vm10, %v2567_v48, %v2559_v31  ;;  %vm10393_vm10 = vcmp.eq.s32.totalorder %v5377_v23, %v7457_v30  ;;  %vm10395_vm13 = vmmov %vm10394_vm9 }
 0xa3a   : > { %v2582_v50 = vsel %vm5693_vm14, %v2548_v34, %v2576_v26  ;;  %v2583_v20 = vsel %vm5697_vm4, %v2552_v40, %v2572_v18 }
 0xa3b   : > { %v2592_v49 = vmax.f32 %v7809_v29, %v2582_v50  ;;  %v2593_v32 = vmax.f32 %v7804_v11, %v2583_v20  ;;  %v2600_v33 = vmin.f32 %v7809_v29, %v2582_v50  ;;  %v2601_v27 = vmin.f32 %v7804_v11, %v2583_v20 }
 0xa3d   : > { %v7944_v43 = vsel %vm2586_vm1, %v2592_v49, %v2600_v33  ;;  %v7949_v36 = vsel %vm10393_vm10, %v2593_v32, %v2601_v27  ;;  %vm10396_vm10 = vmmov %vm10388_vm5 }
 0xa3e   : > { %2640 = vrot.lane.b32.xlu1 %v7944_v43, %s4854_s6  ;;  %2616 = vrot.lane.b32.xlu2 %v7944_v43, %s4852_s29 }
 0xa3f   : > { %2624 = vrot.lane.b32.xlu0 %v7949_v36, %s4852_s29  ;;  %v2569_v11 = vpop.permute.xlu0 %2568 }
 0xa40   : > { %v2577_v29 = vsel %vm10394_vm9, %v2569_v11, %v2561_v9  ;;  %v2545_v41 = vpop.permute.xlu1 %2544  ;;  %v2573_v39 = vsel %vm10395_vm13, %v2561_v9, %v2569_v11  ;;  %vm10397_vm9 = vcmp.eq.s32.totalorder %v5377_v23, %v7457_v30  ;;  %vm10398_vm13 = vmmov %vm10388_vm5 }
 0xa41   : > { %v2549_v61 = vsel %vm10388_vm5, %v2537_v6, %v2545_v41  ;;  %v2553_v53 = vsel %vm10396_vm10, %v2545_v41, %v2537_v6  ;;  %vm10399_vm10 = vcmp.lt.s32.totalorder %v4966_v37, 4 }
 0xa42   : > { %v2584_v17 = vsel %vm5693_vm14, %v2549_v61, %v2577_v29  ;;  %v2585_v45 = vsel %vm5697_vm4, %v2553_v53, %v2573_v39 }
 0xa43   : > { %v2594_v58 = vmax.f32 %v7832_v62, %v2584_v17  ;;  %v2602_v28 = vmin.f32 %v7832_v62, %v2584_v17  ;;  %v2595_v55 = vmax.f32 %v7847_v47, %v2585_v45  ;;  %v2603_v62 = vmin.f32 %v7847_v47, %v2585_v45 }
 0xa45   : > { %v7972_v19 = vsel %vm2586_vm1, %v2594_v58, %v2602_v28  ;;  %v7987_v15 = vsel %vm10397_vm9, %v2595_v55, %v2603_v62  ;;  %vm10400_vm9 = vmmov %vm10399_vm10 }
 0xa46   : > { %2648 = vrot.lane.b32.xlu2 %v7949_v36, %s4854_s6  ;;  %2618 = vrot.lane.b32.xlu1 %v7972_v19, %s4852_s29 }
 0xa47   : > { %2642 = vrot.lane.b32.xlu0 %v7972_v19, %s4854_s6 }
 0xa4d   : > { %v2557_v6 = vpop.permute.xlu0 %2556 }
 0xa4e   : > { %v2533_v31 = vpop.permute.xlu1 %2532  ;;  %2626 = vrot.lane.b32.xlu2 %v7987_v15, %s4852_s29  ;;  %2650 = vrot.lane.b32.xlu1 %v7987_v15, %s4854_s6 }
 0xa4f   : > { %v2547_v34 = vsel %vm10388_vm5, %v2533_v31, %v2541_v13  ;;  %v2551_v47 = vsel %vm10398_vm13, %v2541_v13, %v2533_v31  ;;  %vm10401_vm5 = vcmp.eq.s32.totalorder %v5377_v23, %v7457_v30 }
 0xa56   : > { %v2565_v48 = vpop.permute.xlu1 %2564 }
 0xa57   : > { %v2571_v40 = vsel %vm10399_vm10, %v2557_v6, %v2565_v48  ;;  %v2575_v18 = vsel %vm10400_vm9, %v2565_v48, %v2557_v6  ;;  %vm10404_vm10 = vcmp.lt.s32.totalorder %v4966_v37, 2 }
 0xa58   : > { %v2580_v26 = vsel %vm5693_vm14, %v2547_v34, %v2575_v18  ;;  %v2581_v50 = vsel %vm5697_vm4, %v2551_v47, %v2571_v40  ;;  %vm10405_vm9 = vmmov %vm10404_vm10 }
 0xa59   : > { %v2590_v20 = vmax.f32 %v7877_v57, %v2580_v26  ;;  %v2591_v49 = vmax.f32 %v7872_v59, %v2581_v50  ;;  %v2598_v32 = vmin.f32 %v7877_v57, %v2580_v26  ;;  %v2599_v33 = vmin.f32 %v7872_v59, %v2581_v50 }
 0xa5b   : > { %v8012_v27 = vsel %vm2586_vm1, %v2590_v20, %v2598_v32  ;;  %v8017_v9 = vsel %vm10401_vm5, %v2591_v49, %v2599_v33  ;;  %vm10402_vm1 = vcmp.lt.s32.totalorder %v4966_v37, 126  ;;  %vm10257_vm5 = vcmp.eq.s32.totalorder %v5207_v2, %v7457_v30 }
 0xa5c   : > { %2638 = vrot.lane.b32.xlu1 %v8012_v27, %s4854_s6  ;;  %2614 = vrot.lane.b32.xlu2 %v8012_v27, %s4852_s29  ;;  %vm10403_vm13 = vmmov %vm10402_vm1 }
 0xa5d   : > { %2622 = vrot.lane.b32.xlu0 %v8017_v9, %s4852_s29 }
 0xa64   : > { %2646 = vrot.lane.b32.xlu2 %v8017_v9, %s4854_s6 }
 0xa7e   : > { %v2637_v11 = vpop.permute.xlu2 %2636 }
 0xa96   : > { %v2613_v59 = vpop.permute.xlu0 %2612 }
 0xa97   : > { %v2621_v57 = vpop.permute.xlu1 %2620 }
 0xa98   : > { %v2628_v41 = vsel %vm10402_vm1, %v2613_v59, %v2621_v57  ;;  %v2632_v61 = vsel %vm10403_vm13, %v2621_v57, %v2613_v59  ;;  %vm2668_vm1 = vcmp.eq.s32.totalorder %v5202_v0, %v7455_v38  ;;  %vm10406_vm13 = vmmov %vm10405_vm9 }
 0xa9e   : > { %v2645_v29 = vpop.permute.xlu0 %2644 }
 0xa9f   : > { %v2652_v17 = vsel %vm10404_vm10, %v2637_v11, %v2645_v29  ;;  %v2656_v39 = vsel %vm10405_vm9, %v2645_v29, %v2637_v11  ;;  %vm10407_vm10 = vmmov %vm10405_vm9  ;;  %vm10408_vm9 = vcmp.lt.s32.totalorder %v4966_v37, 126 }
 0xaa0   : > { %v2660_v53 = vsel %vm5379_vm2, %v2628_v41, %v2656_v39  ;;  %v2661_v58 = vsel %vm5383_vm3, %v2632_v61, %v2652_v17 }
 0xaa1   : > { %v2670_v28 = vmax.f32 %v7910_v16, %v2660_v53  ;;  %v2671_v45 = vmax.f32 %v7915_v54, %v2661_v58  ;;  %v2678_v55 = vmin.f32 %v7910_v16, %v2660_v53  ;;  %v2679_v62 = vmin.f32 %v7915_v54, %v2661_v58  ;;  %v2617_v16 = vpop.permute.xlu2 %2616 }
 0xaa3   : > { %v8050_v31 = vsel %vm10257_vm5, %v2671_v45, %v2679_v62  ;;  %v8055_v13 = vsel %vm2668_vm1, %v2670_v28, %v2678_v55  ;;  %vm10409_vm5 = vmmov %vm10408_vm9 }
 0xaa4   : > { %2702 = vrot.lane.b32.xlu2 %v8050_v31, %s4851_s28  ;;  %2718 = vrot.lane.b32.xlu0 %v8055_v13, %s4853_s30 }
 0xaa5   : > { %2694 = vrot.lane.b32.xlu1 %v8055_v13, %s4851_s28 }
 0xaa9   : > { %v2649_v54 = vpop.permute.xlu2 %2648 }
 0xaad   : > { %2726 = vrot.lane.b32.xlu1 %v8050_v31, %s4853_s30 }
 0xab0   : > { %v2641_v6 = vpop.permute.xlu1 %2640 }
 0xab1   : > { %v2625_v48 = vpop.permute.xlu0 %2624  ;;  %v2654_v34 = vsel %vm10406_vm13, %v2641_v6, %v2649_v54  ;;  %v2658_v47 = vsel %vm10407_vm10, %v2649_v54, %v2641_v6  ;;  %vm10411_vm13 = vmmov %vm10408_vm9 }
 0xab2   : > { %v2630_v40 = vsel %vm10408_vm9, %v2617_v16, %v2625_v48  ;;  %v2634_v18 = vsel %vm10409_vm5, %v2625_v48, %v2617_v16  ;;  %vm10410_vm5 = vcmp.eq.s32.totalorder %v5207_v2, %v7457_v30  ;;  %vm10412_vm10 = vmmov %vm10408_vm9  ;;  %vm10413_vm9 = vcmp.lt.s32.totalorder %v4966_v37, 2 }
 0xab3   : > { %v2664_v26 = vsel %vm5379_vm2, %v2630_v40, %v2658_v47  ;;  %v2665_v50 = vsel %vm5383_vm3, %v2634_v18, %v2654_v34 }
 0xab4   : > { %v2674_v20 = vmax.f32 %v7944_v43, %v2664_v26  ;;  %v2675_v49 = vmax.f32 %v7949_v36, %v2665_v50  ;;  %v2682_v32 = vmin.f32 %v7944_v43, %v2664_v26  ;;  %v2683_v33 = vmin.f32 %v7949_v36, %v2665_v50  ;;  %v2627_v36 = vpop.permute.xlu2 %2626 }
 0xab6   : > { %v8084_v59 = vsel %vm2668_vm1, %v2674_v20, %v2682_v32  ;;  %v8089_v57 = vsel %vm10410_vm5, %v2675_v49, %v2683_v33  ;;  %vm10414_vm5 = vmmov %vm10413_vm9 }
 0xab7   : > { %2722 = vrot.lane.b32.xlu2 %v8084_v59, %s4853_s30  ;;  %2698 = vrot.lane.b32.xlu0 %v8084_v59, %s4851_s28 }
 0xab8   : > { %2706 = vrot.lane.b32.xlu1 %v8089_v57, %s4851_s28  ;;  %v2619_v43 = vpop.permute.xlu1 %2618 }
 0xab9   : > { %v2643_v11 = vpop.permute.xlu0 %2642  ;;  %v2631_v41 = vsel %vm10411_vm13, %v2619_v43, %v2627_v36  ;;  %v2635_v61 = vsel %vm10412_vm10, %v2627_v36, %v2619_v43  ;;  %vm10415_vm13 = vcmp.eq.s32.totalorder %v5207_v2, %v7457_v30  ;;  %vm10416_vm10 = vmmov %vm10414_vm5 }
 0xabc   : > { %v2615_v28 = vpop.permute.xlu2 %2614 }
 0xabf   : > { %2730 = vrot.lane.b32.xlu0 %v8089_v57, %s4853_s30 }
 0xac0   : > { %v2651_v29 = vpop.permute.xlu1 %2650 }
 0xac1   : > { %v2655_v17 = vsel %vm10413_vm9, %v2643_v11, %v2651_v29  ;;  %v2659_v39 = vsel %vm10414_vm5, %v2651_v29, %v2643_v11  ;;  %vm10417_vm9 = vmmov %vm10414_vm5  ;;  %vm10418_vm5 = vcmp.lt.s32.totalorder %v4966_v37, 126 }
 0xac2   : > { %v2666_v53 = vsel %vm5379_vm2, %v2631_v41, %v2659_v39  ;;  %v2667_v58 = vsel %vm5383_vm3, %v2635_v61, %v2655_v17 }
 0xac3   : > { %v2676_v45 = vmax.f32 %v7972_v19, %v2666_v53  ;;  %v2677_v55 = vmax.f32 %v7987_v15, %v2667_v58  ;;  %v2684_v62 = vmin.f32 %v7972_v19, %v2666_v53  ;;  %v2685_v16 = vmin.f32 %v7987_v15, %v2667_v58 }
 0xac4   : > { %v2647_v19 = vpop.permute.xlu2 %2646 }
 0xac5   : > { %v8118_v54 = vsel %vm2668_vm1, %v2676_v45, %v2684_v62  ;;  %v8123_v6 = vsel %vm10415_vm13, %v2677_v55, %v2685_v16  ;;  %vm10419_vm13 = vmmov %vm10418_vm5 }
 0xac6   : > { %2724 = vrot.lane.b32.xlu1 %v8118_v54, %s4853_s30  ;;  %2700 = vrot.lane.b32.xlu2 %v8118_v54, %s4851_s28 }
 0xac7   : > { %2708 = vrot.lane.b32.xlu0 %v8123_v6, %s4851_s28 }
 0xace   : > { %v2639_v15 = vpop.permute.xlu1 %2638  ;;  %2732 = vrot.lane.b32.xlu2 %v8123_v6, %s4853_s30 }
 0xacf   : > { %v2623_v48 = vpop.permute.xlu0 %2622  ;;  %v2653_v34 = vsel %vm10416_vm10, %v2639_v15, %v2647_v19  ;;  %v2657_v47 = vsel %vm10417_vm9, %v2647_v19, %v2639_v15  ;;  %vm10420_vm10 = vcmp.eq.s32.totalorder %v5207_v2, %v7457_v30  ;;  %vm10422_vm9 = vcmp.lt.s32.totalorder %v4966_v37, 1 }
 0xad0   : > { %v2629_v40 = vsel %vm10418_vm5, %v2615_v28, %v2623_v48  ;;  %v2633_v18 = vsel %vm10419_vm13, %v2623_v48, %v2615_v28  ;;  %vm10258_vm5 = vcmp.eq.s32.totalorder %v5200_v63, %v7455_v38 }
 0xad1   : > { %v2662_v26 = vsel %vm5379_vm2, %v2629_v40, %v2657_v47  ;;  %v2663_v50 = vsel %vm5383_vm3, %v2633_v18, %v2653_v34 }
 0xad2   : > { %v2672_v20 = vmax.f32 %v8012_v27, %v2662_v26  ;;  %v2673_v49 = vmax.f32 %v8017_v9, %v2663_v50  ;;  %v2680_v32 = vmin.f32 %v8012_v27, %v2662_v26  ;;  %v2681_v33 = vmin.f32 %v8017_v9, %v2663_v50 }
 0xad4   : > { %v8152_v43 = vsel %vm2668_vm1, %v2672_v20, %v2680_v32  ;;  %v8157_v36 = vsel %vm10420_vm10, %v2673_v49, %v2681_v33  ;;  %vm10421_vm1 = vcmp.lt.s32.totalorder %v4966_v37, 127 }
 0xad5   : > { %2696 = vrot.lane.b32.xlu0 %v8152_v43, %s4851_s28  ;;  %2704 = vrot.lane.b32.xlu1 %v8157_v36, %s4851_s28  ;;  %vm10423_vm13 = vmmov %vm10421_vm1 }
 0xad6   : > { %2720 = vrot.lane.b32.xlu2 %v8152_v43, %s4853_s30  ;;  %vm10424_vm10 = vmmov %vm10421_vm1 }
 0xadd   : > { %2728 = vrot.lane.b32.xlu0 %v8157_v36, %s4853_s30  ;;  %2801 = vrot.lane.b32.xlu1 %v4966_v37, %s4863_s15 }
 0xade   : > { %2803 = vrot.lane.b32.xlu2 %v4983_v52, %s4863_s15 }
 0xafe   : > { %v2703_v9 = vpop.permute.xlu2 %2702 }
 0xb11   : > { %v2723_v28 = vpop.permute.xlu2 %2722 }
 0xb16   : > { %v2719_v11 = vpop.permute.xlu0 %2718 }
 0xb17   : > { %v2695_v27 = vpop.permute.xlu1 %2694 }
 0xb18   : > { %v2710_v41 = vsel %vm10421_vm1, %v2695_v27, %v2703_v9  ;;  %vm10425_vm1 = vmmov %vm10422_vm9  ;;  %v2714_v49 = vsel %vm10424_vm10, %v2703_v9, %v2695_v27 }
 0xb1f   : > { %v2727_v29 = vpop.permute.xlu1 %2726 }
 0xb20   : > { %v2738_v61 = vsel %vm10422_vm9, %v2727_v29, %v2719_v11  ;;  %v2701_v55 = vpop.permute.xlu2 %2700  ;;  %vm10426_vm9 = vmmov %vm10425_vm1 }
 0xb21   : > { %v2742_v17 = vsel %vm5209_vm11, %v2710_v41, %v2738_v61 }
 0xb22   : > { %v2752_v39 = vmax.f32 %v8055_v13, %v2742_v17  ;;  %v2760_v53 = vmin.f32 %v8055_v13, %v2742_v17 }
 0xb24   : > { %v8184_v58 = vsel %vm10258_vm5, %v2752_v39, %v2760_v53  ;;  %vm10427_vm5 = vmmov %vm10425_vm1 }
 0xb25   : > { %2776 = vrot.lane.b32.xlu2 %v8184_v58, %s4863_s15  ;;  %v2734_v34 = vsel %vm10427_vm5, %v2719_v11, %v2727_v29  ;;  %vm10428_vm5 = vcmp.eq.s32.totalorder %v5200_v63, %v7455_v38 }
 0xb29   : > { %v2699_v45 = vpop.permute.xlu0 %2698 }
 0xb2a   : > { %v2707_v62 = vpop.permute.xlu1 %2706 }
 0xb2b   : > { %v2712_v19 = vsel %vm10423_vm13, %v2699_v45, %v2707_v62  ;;  %v2716_v15 = vsel %vm10424_vm10, %v2707_v62, %v2699_v45  ;;  %vm2751_vm13 = vcmp.eq.s32.totalorder %v5205_v1, %v7457_v30 }
 0xb31   : > { %v2731_v16 = vpop.permute.xlu0 %2730 }
 0xb32   : > { %v2736_v13 = vsel %vm10425_vm1, %v2723_v28, %v2731_v16  ;;  %v2740_v48 = vsel %vm10426_vm9, %v2731_v16, %v2723_v28  ;;  %vm10429_vm9 = vmmov %vm10425_vm1 }
 0xb33   : > { %v2746_v47 = vsel %vm5209_vm11, %v2712_v19, %v2740_v48  ;;  %v2747_v40 = vsel %vm5213_vm12, %v2716_v15, %v2736_v13 }
 0xb34   : > { %v2756_v18 = vmax.f32 %v8084_v59, %v2746_v47  ;;  %v2757_v26 = vmax.f32 %v8089_v57, %v2747_v40  ;;  %v2764_v50 = vmin.f32 %v8084_v59, %v2746_v47  ;;  %v2765_v20 = vmin.f32 %v8089_v57, %v2747_v40  ;;  %v2733_v57 = vpop.permute.xlu2 %2732 }
 0xb35   : > { %v2743_v59 = vsel %vm5213_vm12, %v2714_v49, %v2734_v34 }
 0xb36   : > { %v8213_v32 = vsel %vm2751_vm13, %v2757_v26, %v2765_v20  ;;  %v8218_v33 = vsel %vm10428_vm5, %v2756_v18, %v2764_v50  ;;  %v2753_v41 = vmax.f32 %v8050_v31, %v2743_v59  ;;  %v2761_v61 = vmin.f32 %v8050_v31, %v2743_v59  ;;  %vm10430_vm5 = vmmov %vm10424_vm10 }
 0xb37   : > { %2788 = vrot.lane.b32.xlu1 %v8213_v32, %s4863_s15  ;;  %2780 = vrot.lane.b32.xlu0 %v8218_v33, %s4863_s15 }
 0xb38   : > { %v2725_v27 = vpop.permute.xlu1 %2724  ;;  %v2769_v19 = vsel %vm2751_vm13, %v2753_v41, %v2761_v61  ;;  %v2819_v41 = vshra.s32 %v4966_v37, 7  ;;  %v2807_v61 = vxor.u32 64, %v4966_v37 }
 0xb39   : > { %v2709_v9 = vpop.permute.xlu0 %2708  ;;  %v2737_v11 = vsel %vm10425_vm1, %v2725_v27, %v2733_v57  ;;  %v2741_v29 = vsel %vm10429_vm9, %v2733_v57, %v2725_v27  ;;  %vm10431_vm1 = vcmp.eq.s32.totalorder %v5200_v63, %v7455_v38  ;;  %vm10432_vm9 = vmmov %vm10430_vm5 }
 0xb3a   : > { %v2713_v17 = vsel %vm10424_vm10, %v2701_v55, %v2709_v9  ;;  %v2717_v39 = vsel %vm10430_vm5, %v2709_v9, %v2701_v55  ;;  %vm10433_vm10 = vmmov %vm10430_vm5  ;;  %vm10434_vm5 = vcmp.lt.s32.totalorder %v4966_v37, 1 }
 0xb3b   : > { %v2748_v53 = vsel %vm5209_vm11, %v2713_v17, %v2741_v29  ;;  %v2749_v28 = vsel %vm5213_vm12, %v2717_v39, %v2737_v11  ;;  %v2808_v17 = vxor.u32 64, %v4983_v52 }
 0xb3c   : > { %v2758_v45 = vmax.f32 %v8118_v54, %v2748_v53  ;;  %v2759_v62 = vmax.f32 %v8123_v6, %v2749_v28  ;;  %v2766_v16 = vmin.f32 %v8118_v54, %v2748_v53  ;;  %v2767_v31 = vmin.f32 %v8123_v6, %v2749_v28  ;;  %v2721_v13 = vpop.permute.xlu2 %2720 }
 0xb3e   : > { %v8250_v55 = vsel %vm10431_vm1, %v2758_v45, %v2766_v16  ;;  %v8255_v15 = vsel %vm2751_vm13, %v2759_v62, %v2767_v31  ;;  %vm10435_vm1 = vmmov %vm10434_vm5  ;;  %v8303_v31 = vand.u32 1, %v2819_v41 }
 0xb3f   : > { %2784 = vrot.lane.b32.xlu0 %v2769_v19, %s4863_s15  ;;  %2782 = vrot.lane.b32.xlu1 %v8250_v55, %s4863_s15 }
 0xb40   : > { %2790 = vrot.lane.b32.xlu2 %v8255_v15, %s4863_s15 }
 0xb47   : > { %v2697_v54 = vpop.permute.xlu0 %2696  ;;  %v2705_v6 = vpop.permute.xlu1 %2704 }
 0xb48   : > { %v2711_v34 = vsel %vm10432_vm9, %v2697_v54, %v2705_v6  ;;  %v2715_v47 = vsel %vm10433_vm10, %v2705_v6, %v2697_v54  ;;  %vm10436_vm9 = vcmp.eq.s32.totalorder %v5200_v63, %v7455_v38  ;;  %vm10259_vm10 = vcmp.lt.s32.totalorder %v4966_v37, 64 }
 0xb49   : > { %v10437_v54 = vmov 0  ;;  %v10439_v6 = vmov 0 }
 0xb4f   : > { %v2729_v48 = vpop.permute.xlu0 %2728  ;;  %v2802_v11 = vpop.permute.xlu1 %2801 }
 0xb50   : > { %v2735_v40 = vsel %vm10434_vm5, %v2721_v13, %v2729_v48  ;;  %v2739_v18 = vsel %vm10435_vm1, %v2729_v48, %v2721_v13 }
 0xb51   : > { %v2744_v26 = vsel %vm5209_vm11, %v2711_v34, %v2739_v18  ;;  %v2745_v50 = vsel %vm5213_vm12, %v2715_v47, %v2735_v40 }
 0xb52   : > { %v2754_v20 = vmax.f32 %v8152_v43, %v2744_v26  ;;  %v2755_v49 = vmax.f32 %v8157_v36, %v2745_v50  ;;  %v2762_v59 = vmin.f32 %v8152_v43, %v2744_v26  ;;  %v2763_v57 = vmin.f32 %v8157_v36, %v2745_v50  ;;  %v2804_v43 = vpop.permute.xlu2 %2803 }
 0xb53   : > { %v2820_v36 = vshra.s32 %v4983_v52, 7  ;;  %v2805_v39 = vsel %vm10259_vm10, %v2802_v11, %v2804_v43  ;;  %v2806_v53 = vsel %vm10259_vm10, %v2804_v43, %v2802_v11 }
 0xb54   : > { %v8281_v27 = vsel %vm2751_vm13, %v2755_v49, %v2763_v57  ;;  %v8286_v9 = vsel %vm10436_vm9, %v2754_v20, %v2762_v59  ;;  %vm8305_vm13 = vcmp.eq.s32.totalorder %v2805_v39, %v2807_v61  ;;  %vm8309_vm5 = vcmp.eq.s32.totalorder %v2806_v53, %v2808_v17 }
 0xb55   : > { %2786 = vrot.lane.b32.xlu1 %v8281_v27, %s4863_s15  ;;  %2778 = vrot.lane.b32.xlu0 %v8286_v9, %s4863_s15  ;;  %v8301_v16 = vand.u32 1, %v2820_v36  ;;  %v10438_v54 = vsel %vm8305_vm13, 4294967295, %v10437_v54  ;;  %v10440_v6 = vsel %vm8309_vm5, 4294967295, %v10439_v6  ;;  %vm2823_vm9 = vcmp.eq.s32.totalorder %v7455_v38, %v8303_v31 }
 0xb57   : > { %vm2824_vm1 = vcmp.eq.s32.totalorder %v7457_v30, %v8301_v16  ;;  %vm10266_vm12 = vcmp.eq.s32.totalorder %v6727_v21, %v8301_v16 }
 0xb7f   : > { %v2777_v45 = vpop.permute.xlu2 %2776 }
 0xba9   : > { %v2781_v29 = vpop.permute.xlu0 %2780  ;;  %v2789_v28 = vpop.permute.xlu1 %2788 }
 0xbaa   : > { %v2795_v34 = vsel %vm10259_vm10, %v2781_v29, %v2789_v28  ;;  %v2799_v47 = vsel %vm10259_vm10, %v2789_v28, %v2781_v29  ;;  %v2791_v29 = vpop.permute.xlu2 %2790 }
 0xbab   : > { %v2816_v17 = vsel %vm8309_vm5, %v2799_v47, %v2795_v34 }
 0xbac   : > { %v2838_v53 = vmin.f32 %v8213_v32, %v2816_v17 }
 0xbb1   : > { %v2785_v62 = vpop.permute.xlu0 %2784 }
 0xbb2   : > { %v2793_v13 = vsel %vm10259_vm10, %v2777_v45, %v2785_v62  ;;  %v2797_v48 = vsel %vm10259_vm10, %v2785_v62, %v2777_v45 }
 0xbb3   : > { %v2811_v40 = vsel %vm8305_vm13, %v2793_v13, %v2797_v48  ;;  %v2812_v18 = vsel %vm8309_vm5, %v2797_v48, %v2793_v13 }
 0xbb4   : > { %v2825_v26 = vmax.f32 %v8184_v58, %v2811_v40  ;;  %v2826_v50 = vmax.f32 %v2769_v19, %v2812_v18  ;;  %v2833_v20 = vmin.f32 %v8184_v58, %v2811_v40  ;;  %v2834_v49 = vmin.f32 %v2769_v19, %v2812_v18  ;;  %v2783_v19 = vpop.permute.xlu1 %2782 }
 0xbb5   : > { %v2815_v58 = vsel %vm8305_vm13, %v2795_v34, %v2799_v47  ;;  %v2796_v36 = vsel %vm10259_vm10, %v2783_v19, %v2791_v29  ;;  %v2800_v41 = vsel %vm10259_vm10, %v2791_v29, %v2783_v19 }
 0xbb6   : > { %v8334_v59 = vsel %vm2824_vm1, %v2826_v50, %v2834_v49  ;;  %v8339_v57 = vsel %vm2823_vm9, %v2825_v26, %v2833_v20  ;;  %v2829_v11 = vmax.f32 %v8218_v33, %v2815_v58  ;;  %v2837_v43 = vmin.f32 %v8218_v33, %v2815_v58 }
 0xbb7   : > { %2857 = vrot.lane.b32.xlu1 %v8334_v59, %s4861_s13  ;;  %2873 = vrot.lane.b32.xlu2 %v8339_v57, %s4862_s14  ;;  %v2817_v39 = vsel %vm8305_vm13, %v2796_v36, %v2800_v41  ;;  %v2830_v33 = vmax.f32 %v8213_v32, %v2816_v17  ;;  %v2818_v48 = vsel %vm8309_vm5, %v2800_v41, %v2796_v36 }
 0xbb8   : > { %2849 = vrot.lane.b32.xlu0 %v8339_v57, %s4861_s13  ;;  %v8358_v61 = vsel %vm2823_vm9, %v2829_v11, %v2837_v43  ;;  %v2831_v28 = vmax.f32 %v8250_v55, %v2817_v39  ;;  %v2839_v45 = vmin.f32 %v8250_v55, %v2817_v39  ;;  %v2832_v34 = vmax.f32 %v8255_v15, %v2818_v48 }
 0xbb9   : > { %v8377_v62 = vsel %vm2824_vm1, %v2830_v33, %v2838_v53  ;;  %v2840_v47 = vmin.f32 %v8255_v15, %v2818_v48 }
 0xbba   : > { %v8382_v13 = vsel %vm2823_vm9, %v2831_v28, %v2839_v45 }
 0xbbb   : > { %v8401_v26 = vsel %vm2824_vm1, %v2832_v34, %v2840_v47 }
 0xbbf   : > { %2877 = vrot.lane.b32.xlu1 %v8358_v61, %s4862_s14  ;;  %2853 = vrot.lane.b32.xlu2 %v8358_v61, %s4861_s13 }
 0xbc0   : > { %2881 = vrot.lane.b32.xlu0 %v8334_v59, %s4862_s14 }
 0xbc7   : > { %2885 = vrot.lane.b32.xlu2 %v8377_v62, %s4862_s14  ;;  %2855 = vrot.lane.b32.xlu1 %v8382_v13, %s4861_s13  ;;  %v2779_v32 = vpop.permute.xlu0 %2778  ;;  %v2787_v55 = vpop.permute.xlu1 %2786 }
 0xbc8   : > { %2861 = vrot.lane.b32.xlu0 %v8377_v62, %s4861_s13  ;;  %v2794_v40 = vsel %vm10259_vm10, %v2779_v32, %v2787_v55  ;;  %v2798_v18 = vsel %vm10259_vm10, %v2787_v55, %v2779_v32  ;;  %vm10443_vm10 = vcmp.lt.s32.totalorder %v4966_v37, 32 }
 0xbc9   : > { %v2813_v50 = vsel %vm8305_vm13, %v2794_v40, %v2798_v18  ;;  %v2814_v15 = vsel %vm8309_vm5, %v2798_v18, %v2794_v40  ;;  %vm10444_vm5 = vmmov %vm10443_vm10  ;;  %vm10445_vm13 = vnez %v10353_v35 }
 0xbca   : > { %v2827_v20 = vmax.f32 %v8286_v9, %v2813_v50  ;;  %v2835_v49 = vmin.f32 %v8286_v9, %v2813_v50  ;;  %v2828_v58 = vmax.f32 %v8281_v27, %v2814_v15  ;;  %v2836_v19 = vmin.f32 %v8281_v27, %v2814_v15 }
 0xbcc   : > { %v8420_v11 = vsel %vm2823_vm9, %v2827_v20, %v2835_v49  ;;  %v8425_v43 = vsel %vm2824_vm1, %v2828_v58, %v2836_v19  ;;  %vm10441_vm1 = vcmp.lt.s32.totalorder %v4966_v37, 96 }
 0xbcd   : > { %vm10442_vm9 = vmmov %vm10441_vm1 }
 0xbcf   : > { %2863 = vrot.lane.b32.xlu2 %v8401_v26, %s4861_s13  ;;  %2887 = vrot.lane.b32.xlu1 %v8401_v26, %s4862_s14 }
 0xbd0   : > { %2879 = vrot.lane.b32.xlu0 %v8382_v13, %s4862_s14 }
 0xbd7   : > { %2875 = vrot.lane.b32.xlu1 %v8420_v11, %s4862_s14  ;;  %2851 = vrot.lane.b32.xlu2 %v8420_v11, %s4861_s13 }
 0xbd8   : > { %2859 = vrot.lane.b32.xlu0 %v8425_v43, %s4861_s13 }
 0xbdf   : > { %2883 = vrot.lane.b32.xlu2 %v8425_v43, %s4862_s14 }
 0xc11   : > { %v2874_v27 = vpop.permute.xlu2 %2873 }
 0xc19   : > { %v2854_v9 = vpop.permute.xlu2 %2853 }
 0xc21   : > { %v2886_v41 = vpop.permute.xlu2 %2885 }
 0xc29   : > { %v2858_v29 = vpop.permute.xlu1 %2857  ;;  %v2864_v15 = vpop.permute.xlu2 %2863 }
 0xc2a   : > { %v2850_v36 = vpop.permute.xlu0 %2849 }
 0xc2b   : > { %v2865_v33 = vsel %vm10441_vm1, %v2850_v36, %v2858_v29  ;;  %v2869_v53 = vsel %vm10442_vm9, %v2858_v29, %v2850_v36  ;;  %vm10267_vm1 = vcmp.eq.s32.totalorder %v6725_v60, %v8303_v31 }
 0xc31   : > { %v2878_v17 = vpop.permute.xlu1 %2877 }
 0xc32   : > { %v2882_v39 = vpop.permute.xlu0 %2881 }
 0xc33   : > { %v2889_v28 = vsel %vm10443_vm10, %v2874_v27, %v2882_v39  ;;  %v2893_v45 = vsel %vm10444_vm5, %v2882_v39, %v2874_v27  ;;  %vm10446_vm10 = vmmov %vm10444_vm5 }
 0xc34   : > { %v2897_v48 = vsel %vm7463_vm6, %v2865_v33, %v2893_v45  ;;  %v2898_v32 = vsel %vm10445_vm13, %v2869_v53, %v2889_v28  ;;  %v2895_v20 = vsel %vm10446_vm10, %v2886_v41, %v2878_v17  ;;  %vm10447_vm5 = vmmov %vm10442_vm9 }
 0xc35   : > { %v2907_v55 = vmax.f32 %v8339_v57, %v2897_v48  ;;  %v2908_v34 = vmax.f32 %v8334_v59, %v2898_v32  ;;  %v2915_v47 = vmin.f32 %v8339_v57, %v2897_v48  ;;  %v2916_v40 = vmin.f32 %v8334_v59, %v2898_v32  ;;  %vm10448_vm9 = vmmov %vm10447_vm5 }
 0xc37   : > { %v8458_v18 = vsel %vm10266_vm12, %v2908_v34, %v2916_v40  ;;  %v8463_v50 = vsel %vm10267_vm1, %v2907_v55, %v2915_v47  ;;  %vm10449_vm12 = vmmov %vm10446_vm10 }
 0xc38   : > { %2939 = vrot.lane.b32.xlu2 %v8458_v18, %s4859_s11  ;;  %2955 = vrot.lane.b32.xlu0 %v8463_v50, %s4860_s12  ;;  %v2891_v36 = vsel %vm10449_vm12, %v2878_v17, %v2886_v41  ;;  %vm10450_vm12 = vmmov %vm10447_vm5 }
 0xc39   : > { %2931 = vrot.lane.b32.xlu1 %v8463_v50, %s4859_s11  ;;  %v2856_v59 = vpop.permute.xlu1 %2855 }
 0xc3a   : > { %v2862_v57 = vpop.permute.xlu0 %2861  ;;  %v2868_v28 = vsel %vm10450_vm12, %v2856_v59, %v2864_v15  ;;  %v2872_v47 = vsel %vm10448_vm9, %v2864_v15, %v2856_v59  ;;  %vm10453_vm12 = vcmp.eq.s32.totalorder %v6725_v60, %v8303_v31 }
 0xc3b   : > { %v2867_v49 = vsel %vm10447_vm5, %v2854_v9, %v2862_v57  ;;  %v2871_v19 = vsel %vm10448_vm9, %v2862_v57, %v2854_v9  ;;  %v2852_v9 = vpop.permute.xlu2 %2851  ;;  %vm10451_vm5 = vmmov %vm10446_vm10 }
 0xc3c   : > { %v2901_v58 = vsel %vm7463_vm6, %v2867_v49, %v2895_v20  ;;  %v2902_v33 = vsel %vm10445_vm13, %v2871_v19, %v2891_v36 }
 0xc3d   : > { %v2911_v27 = vmax.f32 %v8358_v61, %v2901_v58  ;;  %v2919_v29 = vmin.f32 %v8358_v61, %v2901_v58  ;;  %v2912_v17 = vmax.f32 %v8377_v62, %v2902_v33  ;;  %v2920_v53 = vmin.f32 %v8377_v62, %v2902_v33 }
 0xc3f   : > { %v8486_v39 = vsel %vm10267_vm1, %v2911_v27, %v2919_v29  ;;  %vm10452_vm1 = vcmp.eq.s32.totalorder %v6727_v21, %v8301_v16 }
 0xc40   : > { %2959 = vrot.lane.b32.xlu2 %v8486_v39, %s4860_s12  ;;  %2935 = vrot.lane.b32.xlu0 %v8486_v39, %s4859_s11  ;;  %v8513_v62 = vsel %vm10452_vm1, %v2912_v17, %v2920_v53  ;;  %vm10454_vm1 = vmmov %vm10448_vm9 }
 0xc41   : > { %2963 = vrot.lane.b32.xlu1 %v8458_v18, %s4860_s12  ;;  %v2888_v61 = vpop.permute.xlu1 %2887 }
 0xc42   : > { %v2880_v41 = vpop.permute.xlu0 %2879 }
 0xc43   : > { %v2896_v45 = vsel %vm10446_vm10, %v2888_v61, %v2880_v41  ;;  %v2892_v32 = vsel %vm10451_vm5, %v2880_v41, %v2888_v61  ;;  %v2884_v49 = vpop.permute.xlu2 %2883  ;;  %vm10455_vm10 = vmmov %vm10451_vm5 }
 0xc44   : > { %v2903_v48 = vsel %vm7463_vm6, %v2868_v28, %v2896_v45  ;;  %v2904_v57 = vsel %vm10445_vm13, %v2872_v47, %v2892_v32  ;;  %vm10456_vm5 = vmmov %vm10454_vm1 }
 0xc45   : > { %v2913_v55 = vmax.f32 %v8382_v13, %v2903_v48  ;;  %v2921_v34 = vmin.f32 %v8382_v13, %v2903_v48  ;;  %v2914_v59 = vmax.f32 %v8401_v26, %v2904_v57  ;;  %v2922_v20 = vmin.f32 %v8401_v26, %v2904_v57  ;;  %vm10457_vm9 = vmmov %vm10455_vm10 }
 0xc47   : > { %v8518_v40 = vsel %vm10453_vm12, %v2913_v55, %v2921_v34  ;;  %vm10458_vm12 = vcmp.eq.s32.totalorder %v6727_v21, %v8301_v16 }
 0xc48   : > { %2967 = vrot.lane.b32.xlu0 %v8513_v62, %s4860_s12  ;;  %2937 = vrot.lane.b32.xlu2 %v8518_v40, %s4859_s11  ;;  %v8541_v36 = vsel %vm10458_vm12, %v2914_v59, %v2922_v20 }
 0xc49   : > { %2943 = vrot.lane.b32.xlu1 %v8513_v62, %s4859_s11  ;;  %v2876_v15 = vpop.permute.xlu1 %2875 }
 0xc4a   : > { %v2860_v13 = vpop.permute.xlu0 %2859  ;;  %v2894_v19 = vsel %vm10455_vm10, %v2884_v49, %v2876_v15  ;;  %v2890_v29 = vsel %vm10457_vm9, %v2876_v15, %v2884_v49  ;;  %vm10460_vm10 = vmmov %vm10458_vm12  ;;  %vm10463_vm12 = vcmp.lt.s32.totalorder %v4966_v37, 16 }
 0xc4b   : > { %v2866_v58 = vsel %vm10454_vm1, %v2852_v9, %v2860_v13  ;;  %v2870_v27 = vsel %vm10456_vm5, %v2860_v13, %v2852_v9  ;;  %vm10459_vm1 = vcmp.eq.s32.totalorder %v6725_v60, %v8303_v31  ;;  %vm10461_vm5 = vcmp.lt.s32.totalorder %v4966_v37, 112 }
 0xc4c   : > { %v2899_v26 = vsel %vm7463_vm6, %v2866_v58, %v2894_v19  ;;  %v2900_v33 = vsel %vm10445_vm13, %v2870_v27, %v2890_v29  ;;  %vm10462_vm9 = vmmov %vm10461_vm5 }
 0xc4d   : > { %v2909_v61 = vmax.f32 %v8420_v11, %v2899_v26  ;;  %v2917_v9 = vmin.f32 %v8420_v11, %v2899_v26  ;;  %v2910_v41 = vmax.f32 %v8425_v43, %v2900_v33  ;;  %v2918_v17 = vmin.f32 %v8425_v43, %v2900_v33 }
 0xc4f   : > { %v8560_v53 = vsel %vm10459_vm1, %v2909_v61, %v2917_v9  ;;  %v8569_v28 = vsel %vm10460_vm10, %v2910_v41, %v2918_v17  ;;  %vm10464_vm1 = vmmov %vm10463_vm12  ;;  %vm2987_vm10 = vcmp.eq.s32.totalorder %v6135_v3, %v8303_v31 }
 0xc50   : > { %2969 = vrot.lane.b32.xlu2 %v8541_v36, %s4860_s12  ;;  %2945 = vrot.lane.b32.xlu0 %v8541_v36, %s4859_s11 }
 0xc51   : > { %2961 = vrot.lane.b32.xlu1 %v8518_v40, %s4860_s12 }
 0xc58   : > { %2957 = vrot.lane.b32.xlu2 %v8560_v53, %s4860_s12  ;;  %2933 = vrot.lane.b32.xlu0 %v8560_v53, %s4859_s11 }
 0xc59   : > { %2941 = vrot.lane.b32.xlu1 %v8569_v28, %s4859_s11 }
 0xc60   : > { %2965 = vrot.lane.b32.xlu0 %v8569_v28, %s4860_s12 }
 0xc92   : > { %v2940_v11 = vpop.permute.xlu2 %2939 }
 0xc9a   : > { %v2960_v48 = vpop.permute.xlu2 %2959 }
 0xca2   : > { %v2938_v26 = vpop.permute.xlu2 %2937 }
 0xcaa   : > { %v2956_v43 = vpop.permute.xlu0 %2955 }
 0xcab   : > { %v2932_v45 = vpop.permute.xlu1 %2931 }
 0xcac   : > { %v2947_v34 = vsel %vm10461_vm5, %v2932_v45, %v2940_v11  ;;  %v2951_v47 = vsel %vm10462_vm9, %v2940_v11, %v2932_v45  ;;  %vm10268_vm5 = vcmp.eq.s32.totalorder %v6137_v12, %v8301_v16  ;;  %vm10465_vm9 = vmmov %vm10464_vm1 }
 0xcb2   : > { %v2936_v32 = vpop.permute.xlu0 %2935 }
 0xcb3   : > { %v2964_v55 = vpop.permute.xlu1 %2963 }
 0xcb4   : > { %v2971_v57 = vsel %vm10463_vm12, %v2956_v43, %v2964_v55  ;;  %v2975_v13 = vsel %vm10464_vm1, %v2964_v55, %v2956_v43  ;;  %vm10466_vm12 = vcmp.lt.s32.totalorder %v4966_v37, 112 }
 0xcb5   : > { %v2979_v15 = vsel %vm6729_vm8, %v2947_v34, %v2975_v13  ;;  %v2980_v59 = vsel %vm6733_vm15, %v2951_v47, %v2971_v57 }
 0xcb6   : > { %v2989_v20 = vmax.f32 %v8463_v50, %v2979_v15  ;;  %v2990_v49 = vmax.f32 %v8458_v18, %v2980_v59  ;;  %v2997_v58 = vmin.f32 %v8463_v50, %v2979_v15  ;;  %v2998_v19 = vmin.f32 %v8458_v18, %v2980_v59 }
 0xcb8   : > { %v8598_v27 = vsel %vm2987_vm10, %v2989_v20, %v2997_v58  ;;  %v8603_v29 = vsel %vm10268_vm5, %v2990_v49, %v2998_v19  ;;  %vm10467_vm5 = vmmov %vm10466_vm12 }
 0xcb9   : > { %3037 = vrot.lane.b32.xlu1 %v8598_v27, %s4858_s10  ;;  %3013 = vrot.lane.b32.xlu2 %v8598_v27, %s4857_s9 }
 0xcba   : > { %3021 = vrot.lane.b32.xlu0 %v8603_v29, %s4857_s9  ;;  %v2968_v18 = vpop.permute.xlu0 %2967 }
 0xcbb   : > { %v2977_v50 = vsel %vm10465_vm9, %v2968_v18, %v2960_v48  ;;  %v2944_v33 = vpop.permute.xlu1 %2943  ;;  %v2973_v41 = vsel %vm10464_vm1, %v2960_v48, %v2968_v18  ;;  %vm10468_vm9 = vmmov %vm10464_vm1 }
 0xcbc   : > { %v2949_v61 = vsel %vm10466_vm12, %v2936_v32, %v2944_v33  ;;  %v2953_v17 = vsel %vm10467_vm5, %v2944_v33, %v2936_v32  ;;  %v2970_v32 = vpop.permute.xlu2 %2969  ;;  %vm10469_vm12 = vmmov %vm10467_vm5 }
 0xcbd   : > { %v2983_v9 = vsel %vm6729_vm8, %v2949_v61, %v2977_v50  ;;  %v2984_v55 = vsel %vm6733_vm15, %v2953_v17, %v2973_v41 }
 0xcbe   : > { %v2993_v11 = vmax.f32 %v8486_v39, %v2983_v9  ;;  %v3001_v43 = vmin.f32 %v8486_v39, %v2983_v9  ;;  %v2994_v47 = vmax.f32 %v8513_v62, %v2984_v55  ;;  %v3002_v57 = vmin.f32 %v8513_v62, %v2984_v55 }
 0xcc0   : > { %v8626_v45 = vsel %vm2987_vm10, %v2993_v11, %v3001_v43 }
 0xcc1   : > { %3045 = vrot.lane.b32.xlu2 %v8603_v29, %s4858_s10  ;;  %3017 = vrot.lane.b32.xlu1 %v8626_v45, %s4857_s9 }
 0xcc2   : > { %3041 = vrot.lane.b32.xlu0 %v8626_v45, %s4858_s10  ;;  %v2946_v48 = vpop.permute.xlu0 %2945 }
 0xcc3   : > { %v2950_v39 = vsel %vm10467_vm5, %v2938_v26, %v2946_v48  ;;  %v2962_v34 = vpop.permute.xlu1 %2961  ;;  %v2954_v59 = vsel %vm10469_vm12, %v2946_v48, %v2938_v26  ;;  %vm10470_vm5 = vcmp.eq.s32.totalorder %v6137_v12, %v8301_v16 }
 0xcc4   : > { %v2978_v13 = vsel %vm10468_vm9, %v2970_v32, %v2962_v34  ;;  %v2974_v20 = vsel %vm10464_vm1, %v2962_v34, %v2970_v32  ;;  %v8653_v62 = vsel %vm10470_vm5, %v2994_v47, %v3002_v57  ;;  %vm10471_vm9 = vmmov %vm10470_vm5  ;;  %v2958_v9 = vpop.permute.xlu2 %2957  ;;  %vm10473_vm5 = vcmp.lt.s32.totalorder %v4966_v37, 16 }
 0xcc5   : > { %v2985_v15 = vsel %vm6729_vm8, %v2950_v39, %v2978_v13  ;;  %v2986_v26 = vsel %vm6733_vm15, %v2954_v59, %v2974_v20  ;;  %vm10472_vm1 = vmmov %vm10469_vm12 }
 0xcc6   : > { %v2995_v49 = vmax.f32 %v8518_v40, %v2985_v15  ;;  %v3003_v58 = vmin.f32 %v8518_v40, %v2985_v15  ;;  %v2996_v18 = vmax.f32 %v8541_v36, %v2986_v26  ;;  %v3004_v50 = vmin.f32 %v8541_v36, %v2986_v26 }
 0xcc8   : > { %v8658_v19 = vsel %vm2987_vm10, %v2995_v49, %v3003_v58  ;;  %v8673_v61 = vsel %vm10471_vm9, %v2996_v18, %v3004_v50  ;;  %vm10474_vm9 = vmmov %vm10473_vm5 }
 0xcc9   : > { %3025 = vrot.lane.b32.xlu2 %v8653_v62, %s4857_s9  ;;  %3049 = vrot.lane.b32.xlu1 %v8653_v62, %s4858_s10 }
 0xcca   : > { %3019 = vrot.lane.b32.xlu0 %v8658_v19, %s4857_s9  ;;  %v2934_v40 = vpop.permute.xlu0 %2933 }
 0xccb   : > { %v2942_v33 = vpop.permute.xlu1 %2941 }
 0xccc   : > { %v2948_v36 = vsel %vm10469_vm12, %v2934_v40, %v2942_v33  ;;  %v2952_v17 = vsel %vm10472_vm1, %v2942_v33, %v2934_v40  ;;  %vm10475_vm12 = vcmp.eq.s32.totalorder %v6137_v12, %v8301_v16  ;;  %vm10476_vm1 = vcmp.lt.s32.totalorder %v4966_v37, 8 }
 0xcd1   : > { %3043 = vrot.lane.b32.xlu2 %v8658_v19, %s4858_s10  ;;  %3027 = vrot.lane.b32.xlu1 %v8673_v61, %s4857_s9 }
 0xcd2   : > { %3051 = vrot.lane.b32.xlu0 %v8673_v61, %s4858_s10  ;;  %v2966_v41 = vpop.permute.xlu0 %2965 }
 0xcd3   : > { %v2972_v11 = vsel %vm10473_vm5, %v2958_v9, %v2966_v41  ;;  %v2976_v43 = vsel %vm10474_vm9, %v2966_v41, %v2958_v9  ;;  %vm10478_vm5 = vcmp.lt.s32.totalorder %v4966_v37, 120 }
 0xcd4   : > { %v2981_v55 = vsel %vm6729_vm8, %v2948_v36, %v2976_v43  ;;  %v2982_v48 = vsel %vm6733_vm15, %v2952_v17, %v2972_v11  ;;  %vm10479_vm9 = vmmov %vm10478_vm5 }
 0xcd5   : > { %v2991_v32 = vmax.f32 %v8560_v53, %v2981_v55  ;;  %v2992_v39 = vmax.f32 %v8569_v28, %v2982_v48  ;;  %v2999_v34 = vmin.f32 %v8560_v53, %v2981_v55  ;;  %v3000_v47 = vmin.f32 %v8569_v28, %v2982_v48 }
 0xcd7   : > { %v8700_v57 = vsel %vm10475_vm12, %v2992_v39, %v3000_v47  ;;  %v8705_v13 = vsel %vm2987_vm10, %v2991_v32, %v2999_v34  ;;  %vm10477_vm10 = vmmov %vm10476_vm1  ;;  %vm3069_vm12 = vcmp.eq.s32.totalorder %v5685_v7, %v8303_v31 }
 0xcd9   : > { %3023 = vrot.lane.b32.xlu2 %v8700_v57, %s4857_s9  ;;  %3015 = vrot.lane.b32.xlu1 %v8705_v13, %s4857_s9 }
 0xcda   : > { %3039 = vrot.lane.b32.xlu0 %v8705_v13, %s4858_s10 }
 0xce1   : > { %3047 = vrot.lane.b32.xlu1 %v8700_v57, %s4858_s10 }
 0xd13   : > { %v3014_v53 = vpop.permute.xlu2 %3013 }
 0xd1b   : > { %v3046_v28 = vpop.permute.xlu2 %3045 }
 0xd23   : > { %v3026_v11 = vpop.permute.xlu2 %3025 }
 0xd2b   : > { %v3038_v15 = vpop.permute.xlu1 %3037 }
 0xd2c   : > { %v3022_v59 = vpop.permute.xlu0 %3021  ;;  %v3053_v20 = vsel %vm10476_vm1, %v3038_v15, %v3046_v28  ;;  %v3057_v49 = vsel %vm10477_vm10, %v3046_v28, %v3038_v15  ;;  %vm10269_vm1 = vcmp.eq.s32.totalorder %v5687_v8, %v8301_v16  ;;  %vm10480_vm10 = vmmov %vm10478_vm5 }
 0xd2d   : > { %v3029_v58 = vsel %vm10478_vm5, %v3014_v53, %v3022_v59  ;;  %v3033_v26 = vsel %vm10479_vm9, %v3022_v59, %v3014_v53  ;;  %vm10481_vm9 = vcmp.lt.s32.totalorder %v4966_v37, 8 }
 0xd2e   : > { %v3061_v40 = vsel %vm6139_vm7, %v3029_v58, %v3057_v49  ;;  %v3062_v18 = vsel %vm6143_vm0, %v3033_v26, %v3053_v20 }
 0xd2f   : > { %v3071_v50 = vmax.f32 %v8598_v27, %v3061_v40  ;;  %v3072_v33 = vmax.f32 %v8603_v29, %v3062_v18  ;;  %v3079_v9 = vmin.f32 %v8598_v27, %v3061_v40  ;;  %v3080_v41 = vmin.f32 %v8603_v29, %v3062_v18 }
 0xd31   : > { %v8738_v36 = vsel %vm3069_vm12, %v3071_v50, %v3079_v9  ;;  %v8743_v17 = vsel %vm10269_vm1, %v3072_v33, %v3080_v41  ;;  %vm10482_vm1 = vmmov %vm10481_vm9 }
 0xd32   : > { %3119 = vrot.lane.b32.xlu2 %v8738_v36, %s4856_s8  ;;  %3095 = vrot.lane.b32.xlu0 %v8738_v36, %s4855_s7 }
 0xd33   : > { %3103 = vrot.lane.b32.xlu1 %v8743_v17, %s4855_s7  ;;  %v3018_v27 = vpop.permute.xlu1 %3017 }
 0xd34   : > { %v3042_v29 = vpop.permute.xlu0 %3041  ;;  %v3031_v55 = vsel %vm10480_vm10, %v3018_v27, %v3026_v11  ;;  %v3035_v48 = vsel %vm10478_vm5, %v3026_v11, %v3018_v27  ;;  %vm10484_vm10 = vmmov %vm10478_vm5 }
 0xd35   : > { %vm10485_vm5 = vmmov %vm10481_vm9 }
 0xd3a   : > { %3127 = vrot.lane.b32.xlu0 %v8743_v17, %s4856_s8 }
 0xd3b   : > { %v3050_v43 = vpop.permute.xlu1 %3049 }
 0xd3c   : > { %v3020_v32 = vpop.permute.xlu0 %3019  ;;  %v3055_v39 = vsel %vm10481_vm9, %v3042_v29, %v3050_v43  ;;  %v3059_v34 = vsel %vm10482_vm1, %v3050_v43, %v3042_v29  ;;  %vm10483_vm1 = vcmp.eq.s32.totalorder %v5687_v8, %v8301_v16  ;;  %vm10486_vm9 = vmmov %vm10485_vm5 }
 0xd3d   : > { %v3065_v47 = vsel %vm6139_vm7, %v3031_v55, %v3059_v34  ;;  %v3066_v53 = vsel %vm6143_vm0, %v3035_v48, %v3055_v39 }
 0xd3e   : > { %v3075_v28 = vmax.f32 %v8626_v45, %v3065_v47  ;;  %v3076_v15 = vmax.f32 %v8653_v62, %v3066_v53  ;;  %v3083_v59 = vmin.f32 %v8626_v45, %v3065_v47  ;;  %v3084_v20 = vmin.f32 %v8653_v62, %v3066_v53  ;;  %v3044_v62 = vpop.permute.xlu2 %3043 }
 0xd40   : > { %v8772_v49 = vsel %vm3069_vm12, %v3075_v28, %v3083_v59  ;;  %v8777_v58 = vsel %vm10483_vm1, %v3076_v15, %v3084_v20  ;;  %vm10487_vm1 = vmmov %vm10484_vm10 }
 0xd41   : > { %3123 = vrot.lane.b32.xlu1 %v8772_v49, %s4856_s8  ;;  %3099 = vrot.lane.b32.xlu2 %v8772_v49, %s4855_s7 }
 0xd42   : > { %3107 = vrot.lane.b32.xlu0 %v8777_v58, %s4855_s7 }
 0xd43   : > { %v3028_v45 = vpop.permute.xlu1 %3027 }
 0xd44   : > { %v3052_v26 = vpop.permute.xlu0 %3051  ;;  %v3032_v40 = vsel %vm10484_vm10, %v3020_v32, %v3028_v45  ;;  %v3036_v33 = vsel %vm10487_vm1, %v3028_v45, %v3020_v32  ;;  %vm10488_vm10 = vcmp.eq.s32.totalorder %v5687_v8, %v8301_v16 }
 0xd45   : > { %v3060_v18 = vsel %vm10485_vm5, %v3052_v26, %v3044_v62  ;;  %v3056_v50 = vsel %vm10486_vm9, %v3044_v62, %v3052_v26  ;;  %vm10489_vm5 = vmmov %vm10487_vm1 }
 0xd46   : > { %v3067_v9 = vsel %vm6139_vm7, %v3032_v40, %v3060_v18  ;;  %v3068_v29 = vsel %vm6143_vm0, %v3036_v33, %v3056_v50  ;;  %v3024_v32 = vpop.permute.xlu2 %3023  ;;  %vm10490_vm9 = vmmov %vm10487_vm1  ;;  %vm10491_vm1 = vcmp.lt.s32.totalorder %v4966_v37, 8 }
 0xd47   : > { %v3077_v41 = vmax.f32 %v8658_v19, %v3067_v9  ;;  %v3085_v27 = vmin.f32 %v8658_v19, %v3067_v9  ;;  %v3078_v19 = vmax.f32 %v8673_v61, %v3068_v29  ;;  %v3086_v55 = vmin.f32 %v8673_v61, %v3068_v29 }
 0xd49   : > { %3131 = vrot.lane.b32.xlu2 %v8777_v58, %s4856_s8  ;;  %v8804_v11 = vsel %vm3069_vm12, %v3077_v41, %v3085_v27  ;;  %v8815_v48 = vsel %vm10488_vm10, %v3078_v19, %v3086_v55  ;;  %vm10492_vm10 = vmmov %vm10491_vm1 }
 0xd4a   : > { %3125 = vrot.lane.b32.xlu0 %v8804_v11, %s4856_s8  ;;  %3101 = vrot.lane.b32.xlu1 %v8804_v11, %s4855_s7 }
 0xd4b   : > { %v3016_v43 = vpop.permute.xlu1 %3015 }
 0xd4c   : > { %v3040_v39 = vpop.permute.xlu0 %3039  ;;  %v3030_v47 = vsel %vm10489_vm5, %v3016_v43, %v3024_v32  ;;  %v3034_v61 = vsel %vm10490_vm9, %v3024_v32, %v3016_v43  ;;  %vm10493_vm5 = vcmp.eq.s32.totalorder %v5687_v8, %v8301_v16 }
 0xd51   : > { %3109 = vrot.lane.b32.xlu2 %v8815_v48, %s4855_s7 }
 0xd52   : > { %3133 = vrot.lane.b32.xlu1 %v8815_v48, %s4856_s8 }
 0xd53   : > { %v3048_v34 = vpop.permute.xlu1 %3047 }
 0xd54   : > { %v3054_v53 = vsel %vm10491_vm1, %v3040_v39, %v3048_v34  ;;  %v3058_v28 = vsel %vm10492_vm10, %v3048_v34, %v3040_v39  ;;  %vm10496_vm1 = vcmp.lt.s32.totalorder %v4966_v37, 4 }
 0xd55   : > { %v3063_v15 = vsel %vm6139_vm7, %v3030_v47, %v3058_v28  ;;  %v3064_v59 = vsel %vm6143_vm0, %v3034_v61, %v3054_v53  ;;  %vm10497_vm10 = vmmov %vm10496_vm1 }
 0xd56   : > { %v3073_v20 = vmax.f32 %v8705_v13, %v3063_v15  ;;  %v3074_v45 = vmax.f32 %v8700_v57, %v3064_v59  ;;  %v3081_v62 = vmin.f32 %v8705_v13, %v3063_v15  ;;  %v3082_v26 = vmin.f32 %v8700_v57, %v3064_v59 }
 0xd58   : > { %v8840_v40 = vsel %vm3069_vm12, %v3073_v20, %v3081_v62  ;;  %v8845_v18 = vsel %vm10493_vm5, %v3074_v45, %v3082_v26  ;;  %vm10494_vm12 = vcmp.lt.s32.totalorder %v4966_v37, 124  ;;  %vm10270_vm5 = vcmp.eq.s32.totalorder %v5377_v23, %v8301_v16 }
 0xd59   : > { %3097 = vrot.lane.b32.xlu2 %v8840_v40, %s4855_s7  ;;  %3105 = vrot.lane.b32.xlu0 %v8845_v18, %s4855_s7  ;;  %vm10495_vm9 = vmmov %vm10494_vm12 }
 0xd5a   : > { %3121 = vrot.lane.b32.xlu1 %v8840_v40, %s4856_s8 }
 0xd61   : > { %3129 = vrot.lane.b32.xlu2 %v8845_v18, %s4856_s8 }
 0xd8c   : > { %v3120_v57 = vpop.permute.xlu2 %3119 }
 0xd9b   : > { %v3100_v13 = vpop.permute.xlu2 %3099 }
 0xda3   : > { %v3132_v19 = vpop.permute.xlu2 %3131 }
 0xda4   : > { %v3096_v50 = vpop.permute.xlu0 %3095 }
 0xda5   : > { %v3104_v33 = vpop.permute.xlu1 %3103 }
 0xda6   : > { %v3111_v41 = vsel %vm10494_vm12, %v3096_v50, %v3104_v33  ;;  %v3115_v27 = vsel %vm10495_vm9, %v3104_v33, %v3096_v50  ;;  %vm3151_vm12 = vcmp.eq.s32.totalorder %v5375_v22, %v8303_v31  ;;  %vm10498_vm9 = vmmov %vm10496_vm1 }
 0xdab   : > { %v3110_v50 = vpop.permute.xlu2 %3109 }
 0xdac   : > { %v3128_v9 = vpop.permute.xlu0 %3127 }
 0xdad   : > { %v3135_v29 = vsel %vm10496_vm1, %v3120_v57, %v3128_v9  ;;  %v3139_v43 = vsel %vm10497_vm10, %v3128_v9, %v3120_v57  ;;  %vm10499_vm1 = vcmp.lt.s32.totalorder %v4966_v37, 124 }
 0xdae   : > { %v3143_v55 = vsel %vm5693_vm14, %v3111_v41, %v3139_v43  ;;  %v3144_v32 = vsel %vm5697_vm4, %v3115_v27, %v3135_v29  ;;  %vm10500_vm10 = vmmov %vm10499_vm1 }
 0xdaf   : > { %v3153_v39 = vmax.f32 %v8738_v36, %v3143_v55  ;;  %v3154_v34 = vmax.f32 %v8743_v17, %v3144_v32  ;;  %v3161_v47 = vmin.f32 %v8738_v36, %v3143_v55  ;;  %v3162_v61 = vmin.f32 %v8743_v17, %v3144_v32 }
 0xdb1   : > { %v8878_v53 = vsel %vm10270_vm5, %v3154_v34, %v3162_v61  ;;  %v8883_v28 = vsel %vm3151_vm12, %v3153_v39, %v3161_v47  ;;  %vm10501_vm5 = vmmov %vm10498_vm9 }
 0xdb2   : > { %3185 = vrot.lane.b32.xlu2 %v8878_v53, %s4852_s29  ;;  %3201 = vrot.lane.b32.xlu0 %v8883_v28, %s4854_s6 }
 0xdb3   : > { %3177 = vrot.lane.b32.xlu1 %v8883_v28, %s4852_s29  ;;  %v3124_v36 = vpop.permute.xlu1 %3123  ;;  %v3098_v29 = vpop.permute.xlu2 %3097 }
 0xdb4   : > { %v3108_v17 = vpop.permute.xlu0 %3107  ;;  %v3141_v15 = vsel %vm10498_vm9, %v3132_v19, %v3124_v36  ;;  %v3137_v62 = vsel %vm10501_vm5, %v3124_v36, %v3132_v19  ;;  %vm10502_vm5 = vcmp.eq.s32.totalorder %v5377_v23, %v8301_v16  ;;  %vm10503_vm9 = vmmov %vm10499_vm1 }
 0xdb5   : > { %v3113_v59 = vsel %vm10499_vm1, %v3100_v13, %v3108_v17  ;;  %v3117_v45 = vsel %vm10500_vm10, %v3108_v17, %v3100_v13  ;;  %vm10504_vm10 = vcmp.lt.s32.totalorder %v4966_v37, 4 }
 0xdb6   : > { %v3147_v20 = vsel %vm5693_vm14, %v3113_v59, %v3141_v15  ;;  %v3148_v9 = vsel %vm5697_vm4, %v3117_v45, %v3137_v62 }
 0xdb7   : > { %v3157_v26 = vmax.f32 %v8772_v49, %v3147_v20  ;;  %v3165_v57 = vmin.f32 %v8772_v49, %v3147_v20  ;;  %v3158_v49 = vmax.f32 %v8777_v58, %v3148_v9  ;;  %v3166_v41 = vmin.f32 %v8777_v58, %v3148_v9 }
 0xdb9   : > { %v8906_v33 = vsel %vm3151_vm12, %v3157_v26, %v3165_v57  ;;  %v8921_v27 = vsel %vm10502_vm5, %v3158_v49, %v3166_v41  ;;  %vm10505_vm5 = vmmov %vm10504_vm10 }
 0xdba   : > { %3205 = vrot.lane.b32.xlu2 %v8906_v33, %s4854_s6  ;;  %3181 = vrot.lane.b32.xlu0 %v8906_v33, %s4852_s29 }
 0xdbb   : > { %3209 = vrot.lane.b32.xlu1 %v8878_v53, %s4854_s6 }
 0xdbc   : > { %v3102_v13 = vpop.permute.xlu1 %3101  ;;  %v3126_v43 = vpop.permute.xlu0 %3125 }
 0xdbd   : > { %v3114_v55 = vsel %vm10503_vm9, %v3102_v13, %v3110_v50  ;;  %v3118_v58 = vsel %vm10499_vm1, %v3110_v50, %v3102_v13  ;;  %vm10506_vm9 = vcmp.eq.s32.totalorder %v5377_v23, %v8301_v16 }
 0xdc2   : > { %3213 = vrot.lane.b32.xlu0 %v8921_v27, %s4854_s6 }
 0xdc3   : > { %3189 = vrot.lane.b32.xlu1 %v8921_v27, %s4852_s29 }
 0xdc4   : > { %v3134_v19 = vpop.permute.xlu1 %3133 }
 0xdc5   : > { %v3138_v32 = vsel %vm10504_vm10, %v3126_v43, %v3134_v19  ;;  %v3142_v39 = vsel %vm10505_vm5, %v3134_v19, %v3126_v43  ;;  %vm10507_vm10 = vmmov %vm10499_vm1 }
 0xdc6   : > { %v3149_v34 = vsel %vm5693_vm14, %v3114_v55, %v3142_v39  ;;  %v3150_v47 = vsel %vm5697_vm4, %v3118_v58, %v3138_v32 }
 0xdc7   : > { %v3159_v61 = vmax.f32 %v8804_v11, %v3149_v34  ;;  %v3160_v36 = vmax.f32 %v8815_v48, %v3150_v47  ;;  %v3167_v17 = vmin.f32 %v8804_v11, %v3149_v34  ;;  %v3168_v15 = vmin.f32 %v8815_v48, %v3150_v47  ;;  %v3130_v48 = vpop.permute.xlu2 %3129 }
 0xdc9   : > { %v8946_v59 = vsel %vm3151_vm12, %v3159_v61, %v3167_v17  ;;  %v8951_v20 = vsel %vm10506_vm9, %v3160_v36, %v3168_v15  ;;  %vm10508_vm9 = vmmov %vm10505_vm5 }
 0xdca   : > { %3183 = vrot.lane.b32.xlu2 %v8946_v59, %s4852_s29  ;;  %3191 = vrot.lane.b32.xlu0 %v8951_v20, %s4852_s29 }
 0xdcb   : > { %3207 = vrot.lane.b32.xlu1 %v8946_v59, %s4854_s6  ;;  %v3106_v11 = vpop.permute.xlu0 %3105 }
 0xdcc   : > { %v3112_v45 = vsel %vm10499_vm1, %v3098_v29, %v3106_v11  ;;  %v3116_v62 = vsel %vm10507_vm10, %v3106_v11, %v3098_v29  ;;  %v3122_v26 = vpop.permute.xlu1 %3121  ;;  %vm10509_vm1 = vcmp.eq.s32.totalorder %v5377_v23, %v8301_v16 }
 0xdcd   : > { %v3136_v57 = vsel %vm10505_vm5, %v3122_v26, %v3130_v48  ;;  %v3140_v50 = vsel %vm10508_vm9, %v3130_v48, %v3122_v26  ;;  %vm10512_vm5 = vcmp.lt.s32.totalorder %v4966_v37, 2 }
 0xdce   : > { %v3145_v9 = vsel %vm5693_vm14, %v3112_v45, %v3140_v50  ;;  %v3146_v13 = vsel %vm5697_vm4, %v3116_v62, %v3136_v57  ;;  %vm10513_vm9 = vmmov %vm10512_vm5 }
 0xdcf   : > { %v3155_v49 = vmax.f32 %v8840_v40, %v3145_v9  ;;  %v3156_v41 = vmax.f32 %v8845_v18, %v3146_v13  ;;  %v3163_v43 = vmin.f32 %v8840_v40, %v3145_v9  ;;  %v3164_v29 = vmin.f32 %v8845_v18, %v3146_v13 }
 0xdd1   : > { %v8978_v19 = vsel %vm3151_vm12, %v3155_v49, %v3163_v43  ;;  %v8983_v55 = vsel %vm10509_vm1, %v3156_v41, %v3164_v29  ;;  %vm10510_vm12 = vcmp.lt.s32.totalorder %v4966_v37, 126  ;;  %vm3233_vm1 = vcmp.eq.s32.totalorder %v5202_v0, %v8303_v31 }
 0xdd2   : > { %3215 = vrot.lane.b32.xlu2 %v8951_v20, %s4854_s6  ;;  %3179 = vrot.lane.b32.xlu0 %v8978_v19, %s4852_s29  ;;  %vm10511_vm10 = vmmov %vm10510_vm12 }
 0xdd3   : > { %3187 = vrot.lane.b32.xlu1 %v8983_v55, %s4852_s29 }
 0xdda   : > { %3203 = vrot.lane.b32.xlu2 %v8978_v19, %s4854_s6  ;;  %3211 = vrot.lane.b32.xlu0 %v8983_v55, %s4854_s6 }
 0xe0c   : > { %v3186_v40 = vpop.permute.xlu2 %3185 }
 0xe14   : > { %v3206_v32 = vpop.permute.xlu2 %3205 }
 0xe24   : > { %v3202_v18 = vpop.permute.xlu0 %3201  ;;  %v3184_v9 = vpop.permute.xlu2 %3183 }
 0xe25   : > { %v3178_v58 = vpop.permute.xlu1 %3177 }
 0xe26   : > { %v3193_v47 = vsel %vm10510_vm12, %v3178_v58, %v3186_v40  ;;  %v3197_v61 = vsel %vm10511_vm10, %v3186_v40, %v3178_v58  ;;  %vm10271_vm12 = vcmp.eq.s32.totalorder %v5207_v2, %v8301_v16  ;;  %vm10514_vm10 = vmmov %vm10512_vm5 }
 0xe2c   : > { %v3182_v39 = vpop.permute.xlu0 %3181 }
 0xe2d   : > { %v3210_v34 = vpop.permute.xlu1 %3209 }
 0xe2e   : > { %v3217_v36 = vsel %vm10512_vm5, %v3202_v18, %v3210_v34  ;;  %v3221_v17 = vsel %vm10513_vm9, %v3210_v34, %v3202_v18  ;;  %vm10515_vm5 = vcmp.lt.s32.totalorder %v4966_v37, 126 }
 0xe2f   : > { %v3225_v15 = vsel %vm5379_vm2, %v3193_v47, %v3221_v17  ;;  %v3226_v11 = vsel %vm5383_vm3, %v3197_v61, %v3217_v36 }
 0xe30   : > { %v3235_v48 = vmax.f32 %v8883_v28, %v3225_v15  ;;  %v3236_v45 = vmax.f32 %v8878_v53, %v3226_v11  ;;  %v3243_v62 = vmin.f32 %v8883_v28, %v3225_v15  ;;  %v3244_v26 = vmin.f32 %v8878_v53, %v3226_v11 }
 0xe32   : > { %v9018_v57 = vsel %vm3233_vm1, %v3235_v48, %v3243_v62  ;;  %v9023_v50 = vsel %vm10271_vm12, %v3236_v45, %v3244_v26  ;;  %vm10516_vm12 = vmmov %vm10515_vm5 }
 0xe33   : > { %3283 = vrot.lane.b32.xlu1 %v9018_v57, %s4853_s30  ;;  %3259 = vrot.lane.b32.xlu2 %v9018_v57, %s4851_s28 }
 0xe34   : > { %3267 = vrot.lane.b32.xlu0 %v9023_v50, %s4851_s28  ;;  %v3214_v53 = vpop.permute.xlu0 %3213 }
 0xe35   : > { %v3223_v28 = vsel %vm10514_vm10, %v3214_v53, %v3206_v32  ;;  %v3190_v13 = vpop.permute.xlu1 %3189  ;;  %v3219_v43 = vsel %vm10513_vm9, %v3206_v32, %v3214_v53  ;;  %vm10518_vm10 = vmmov %vm10513_vm9 }
 0xe36   : > { %v3195_v49 = vsel %vm10515_vm5, %v3182_v39, %v3190_v13  ;;  %v3199_v29 = vsel %vm10516_vm12, %v3190_v13, %v3182_v39  ;;  %v3216_v39 = vpop.permute.xlu2 %3215  ;;  %vm10517_vm12 = vmmov %vm10515_vm5 }
 0xe37   : > { %v3229_v41 = vsel %vm5379_vm2, %v3195_v49, %v3223_v28  ;;  %v3230_v34 = vsel %vm5383_vm3, %v3199_v29, %v3219_v43 }
 0xe38   : > { %v3239_v40 = vmax.f32 %v8906_v33, %v3229_v41  ;;  %v3247_v18 = vmin.f32 %v8906_v33, %v3229_v41  ;;  %v3240_v61 = vmax.f32 %v8921_v27, %v3230_v34  ;;  %v3248_v36 = vmin.f32 %v8921_v27, %v3230_v34 }
 0xe3a   : > { %v9046_v58 = vsel %vm3233_vm1, %v3239_v40, %v3247_v18 }
 0xe3b   : > { %3291 = vrot.lane.b32.xlu2 %v9023_v50, %s4853_s30  ;;  %3263 = vrot.lane.b32.xlu1 %v9046_v58, %s4851_s28 }
 0xe3c   : > { %3287 = vrot.lane.b32.xlu0 %v9046_v58, %s4853_s30  ;;  %v3192_v32 = vpop.permute.xlu0 %3191 }
 0xe3d   : > { %v3196_v33 = vsel %vm10517_vm12, %v3184_v9, %v3192_v32  ;;  %v3208_v47 = vpop.permute.xlu1 %3207  ;;  %v3200_v11 = vsel %vm10515_vm5, %v3192_v32, %v3184_v9  ;;  %vm10519_vm12 = vcmp.eq.s32.totalorder %v5207_v2, %v8301_v16 }
 0xe3e   : > { %v3224_v17 = vsel %vm10518_vm10, %v3216_v39, %v3208_v47  ;;  %v3220_v48 = vsel %vm10513_vm9, %v3208_v47, %v3216_v39  ;;  %v9073_v27 = vsel %vm10519_vm12, %v3240_v61, %v3248_v36  ;;  %vm10520_vm10 = vmmov %vm10519_vm12  ;;  %v3204_v41 = vpop.permute.xlu2 %3203  ;;  %vm10522_vm12 = vcmp.lt.s32.totalorder %v4966_v37, 2 }
 0xe3f   : > { %v3231_v15 = vsel %vm5379_vm2, %v3196_v33, %v3224_v17  ;;  %v3232_v9 = vsel %vm5383_vm3, %v3200_v11, %v3220_v48  ;;  %vm10521_vm9 = vmmov %vm10515_vm5 }
 0xe40   : > { %v3241_v45 = vmax.f32 %v8946_v59, %v3231_v15  ;;  %v3249_v62 = vmin.f32 %v8946_v59, %v3231_v15  ;;  %v3242_v53 = vmax.f32 %v8951_v20, %v3232_v9  ;;  %v3250_v28 = vmin.f32 %v8951_v20, %v3232_v9 }
 0xe42   : > { %v9078_v26 = vsel %vm3233_vm1, %v3241_v45, %v3249_v62  ;;  %v9093_v49 = vsel %vm10520_vm10, %v3242_v53, %v3250_v28  ;;  %vm10523_vm10 = vmmov %vm10522_vm12 }
 0xe43   : > { %3271 = vrot.lane.b32.xlu2 %v9073_v27, %s4851_s28  ;;  %3295 = vrot.lane.b32.xlu1 %v9073_v27, %s4853_s30 }
 0xe44   : > { %3265 = vrot.lane.b32.xlu0 %v9078_v26, %s4851_s28  ;;  %v3180_v59 = vpop.permute.xlu0 %3179 }
 0xe45   : > { %v3188_v13 = vpop.permute.xlu1 %3187 }
 0xe46   : > { %v3194_v20 = vsel %vm10515_vm5, %v3180_v59, %v3188_v13  ;;  %v3198_v29 = vsel %vm10521_vm9, %v3188_v13, %v3180_v59  ;;  %vm10524_vm5 = vcmp.eq.s32.totalorder %v5207_v2, %v8301_v16 }
 0xe4b   : > { %3289 = vrot.lane.b32.xlu2 %v9078_v26, %s4853_s30  ;;  %3273 = vrot.lane.b32.xlu1 %v9093_v49, %s4851_s28 }
 0xe4c   : > { %3297 = vrot.lane.b32.xlu0 %v9093_v49, %s4853_s30  ;;  %v3212_v43 = vpop.permute.xlu0 %3211 }
 0xe4d   : > { %v3218_v40 = vsel %vm10522_vm12, %v3204_v41, %v3212_v43  ;;  %v3222_v18 = vsel %vm10523_vm10, %v3212_v43, %v3204_v41  ;;  %vm10527_vm12 = vcmp.lt.s32.totalorder %v4966_v37, 127 }
 0xe4e   : > { %v3227_v34 = vsel %vm5379_vm2, %v3194_v20, %v3222_v18  ;;  %v3228_v32 = vsel %vm5383_vm3, %v3198_v29, %v3218_v40  ;;  %vm10528_vm10 = vmmov %vm10527_vm12 }
 0xe4f   : > { %v3237_v39 = vmax.f32 %v8978_v19, %v3227_v34  ;;  %v3238_v33 = vmax.f32 %v8983_v55, %v3228_v32  ;;  %v3245_v47 = vmin.f32 %v8978_v19, %v3227_v34  ;;  %v3246_v61 = vmin.f32 %v8983_v55, %v3228_v32 }
 0xe50   : > { %v3341_v55 = vshra.s32 %v4966_v37, 8 }
 0xe51   : > { %v9120_v36 = vsel %vm10524_vm5, %v3238_v33, %v3246_v61  ;;  %v9125_v17 = vsel %vm3233_vm1, %v3237_v39, %v3245_v47  ;;  %vm10525_vm1 = vcmp.lt.s32.totalorder %v4966_v37, 1  ;;  %vm10529_vm5 = vnez %v10283_v5 }
 0xe52   : > { %vm10526_vm9 = vmmov %vm10525_vm1  ;;  %v9144_v53 = vand.u32 1, %v3341_v55 }
 0xe53   : > { %3269 = vrot.lane.b32.xlu2 %v9120_v36, %s4851_s28  ;;  %3261 = vrot.lane.b32.xlu1 %v9125_v17, %s4851_s28 }
 0xe54   : > { %3285 = vrot.lane.b32.xlu0 %v9125_v17, %s4853_s30 }
 0xe5b   : > { %3293 = vrot.lane.b32.xlu1 %v9120_v36, %s4853_s30 }
 0xe8d   : > { %v3260_v19 = vpop.permute.xlu2 %3259 }
 0xe95   : > { %v3292_v15 = vpop.permute.xlu2 %3291 }
 0xe9d   : > { %v3272_v47 = vpop.permute.xlu2 %3271 }
 0xea5   : > { %v3284_v11 = vpop.permute.xlu1 %3283 }
 0xea6   : > { %v3268_v48 = vpop.permute.xlu0 %3267  ;;  %v3299_v45 = vsel %vm10525_vm1, %v3284_v11, %v3292_v15  ;;  %v3303_v62 = vsel %vm10526_vm9, %v3292_v15, %v3284_v11  ;;  %vm10273_vm1 = vcmp.eq.s32.totalorder %v5200_v63, %v8303_v31  ;;  %vm10272_vm9 = vcmp.eq.s32.totalorder %v5205_v1, %v8301_v16 }
 0xea7   : > { %v3275_v9 = vsel %vm10527_vm12, %v3260_v19, %v3268_v48  ;;  %v3279_v59 = vsel %vm10528_vm10, %v3268_v48, %v3260_v19  ;;  %vm10274_vm12 = vcmp.eq.s32.totalorder %v8303_v31, %v9144_v53 }
 0xea8   : > { %v3307_v28 = vsel %vm5209_vm11, %v3275_v9, %v3303_v62  ;;  %v3308_v13 = vsel %vm10529_vm5, %v3279_v59, %v3299_v45 }
 0xea9   : > { %v3317_v41 = vmax.f32 %v9018_v57, %v3307_v28  ;;  %v3318_v43 = vmax.f32 %v9023_v50, %v3308_v13  ;;  %v3325_v20 = vmin.f32 %v9018_v57, %v3307_v28  ;;  %v3326_v29 = vmin.f32 %v9023_v50, %v3308_v13 }
 0xeaa   : > { %v3342_v50 = vshra.s32 %v4983_v52, 8 }
 0xeab   : > { %v3333_v40 = vsel %vm10273_vm1, %v3317_v41, %v3325_v20  ;;  %v3334_v18 = vsel %vm10272_vm9, %v3318_v43, %v3326_v29  ;;  %vm10530_vm9 = vmmov %vm10528_vm10  ;;  %vm10531_vm1 = vcmp.lt.s32.totalorder %v4966_v37, 1 }
 0xeac   : > { %v3347_v34 = vmax.f32 %v3333_v40, %v3334_v18  ;;  %v3351_v32 = vmin.f32 %v3333_v40, %v3334_v18  ;;  %v9186_v62 = vand.u32 1, %v3342_v50  ;;  %v3290_v18 = vpop.permute.xlu2 %3289 }
 0xead   : > { %v3264_v39 = vpop.permute.xlu1 %3263 }
 0xeae   : > { %v3288_v33 = vpop.permute.xlu0 %3287  ;;  %v9169_v57 = vsel %vm10274_vm12, %v3347_v34, %v3351_v32  ;;  %v3277_v19 = vsel %vm10528_vm10, %v3264_v39, %v3272_v47  ;;  %v3281_v55 = vsel %vm10530_vm9, %v3272_v47, %v3264_v39  ;;  %vm10532_vm12 = vmmov %vm10531_vm1  ;;  %vm10534_vm9 = vcmp.eq.s32.totalorder %v5205_v1, %v8301_v16 }
 0xeaf   : > { %3363 = vrot.lane.b32.xlu1 %v9169_v57, %s4863_s15  ;;  %vm10535_vm10 = vcmp.eq.s32.totalorder %v8303_v31, %v9144_v53 }
 0xeb5   : > { %v3296_v61 = vpop.permute.xlu1 %3295 }
 0xeb6   : > { %v3266_v15 = vpop.permute.xlu0 %3265  ;;  %v3301_v11 = vsel %vm10531_vm1, %v3288_v33, %v3296_v61  ;;  %v3305_v48 = vsel %vm10532_vm12, %v3296_v61, %v3288_v33  ;;  %vm10533_vm1 = vcmp.eq.s32.totalorder %v5200_v63, %v8303_v31  ;;  %vm10275_vm12 = vcmp.eq.s32.totalorder %v8301_v16, %v9186_v62 }
 0xeb7   : > { %v3311_v45 = vsel %vm5209_vm11, %v3277_v19, %v3305_v48  ;;  %v3312_v52 = vsel %vm10529_vm5, %v3281_v55, %v3301_v11 }
 0xeb8   : > { %v3321_v9 = vmax.f32 %v9046_v58, %v3311_v45  ;;  %v3322_v59 = vmax.f32 %v9073_v27, %v3312_v52  ;;  %v3329_v28 = vmin.f32 %v9046_v58, %v3311_v45  ;;  %v3330_v13 = vmin.f32 %v9073_v27, %v3312_v52 }
 0xeba   : > { %v3337_v41 = vsel %vm10533_vm1, %v3321_v9, %v3329_v28  ;;  %v3338_v43 = vsel %vm10534_vm9, %v3322_v59, %v3330_v13  ;;  %vm10536_vm1 = vcmp.lt.s32.totalorder %v4966_v37, 127 }
 0xebb   : > { %v3349_v20 = vmax.f32 %v3337_v41, %v3338_v43  ;;  %v3353_v29 = vmin.f32 %v3337_v41, %v3338_v43  ;;  %vm10537_vm9 = vmmov %vm10536_vm1  ;;  %v3270_v43 = vpop.permute.xlu2 %3269 }
 0xebd   : > { %v3274_v40 = vpop.permute.xlu1 %3273  ;;  %v9203_v58 = vsel %vm10275_vm12, %v3349_v20, %v3353_v29  ;;  %v9208_v27 = vsel %vm10535_vm10, %v3349_v20, %v3353_v29  ;;  %vm10538_vm12 = vcmp.lt.s32.totalorder %v4966_v37, 1 }
 0xebe   : > { %v3298_v39 = vpop.permute.xlu0 %3297  ;;  %v3278_v33 = vsel %vm10536_vm1, %v3266_v15, %v3274_v40  ;;  %v3282_v50 = vsel %vm10537_vm9, %v3274_v40, %v3266_v15  ;;  %3375 = vrot.lane.b32.xlu0 %v9203_v58, %s4863_s15  ;;  %3367 = vrot.lane.b32.xlu2 %v9208_v27, %s4863_s15  ;;  %vm10539_vm10 = vmmov %vm10538_vm12  ;;  %vm10541_vm1 = vcmp.eq.s32.totalorder %v5205_v1, %v8301_v16 }
 0xebf   : > { %v3302_v47 = vsel %vm10538_vm12, %v3290_v18, %v3298_v39  ;;  %v3306_v61 = vsel %vm10539_vm10, %v3298_v39, %v3290_v18  ;;  %vm10540_vm12 = vcmp.eq.s32.totalorder %v5200_v63, %v8303_v31  ;;  %vm10542_vm9 = vcmp.eq.s32.totalorder %v8301_v16, %v9186_v62 }
 0xec0   : > { %v3313_v19 = vsel %vm5209_vm11, %v3278_v33, %v3306_v61  ;;  %v3314_v55 = vsel %vm10529_vm5, %v3282_v50, %v3302_v47  ;;  %v3356_v41 = vsel %vm10542_vm9, %v3347_v34, %v3351_v32  ;;  %vm10543_vm10 = vmmov %vm10542_vm9 }
 0xec1   : > { %v3323_v15 = vmax.f32 %v9078_v26, %v3313_v19  ;;  %v3324_v11 = vmax.f32 %v9093_v49, %v3314_v55  ;;  %v3331_v48 = vmin.f32 %v9078_v26, %v3313_v19  ;;  %v3332_v45 = vmin.f32 %v9093_v49, %v3314_v55 }
 0xec3   : > { %v3339_v52 = vsel %vm10540_vm12, %v3323_v15, %v3331_v48  ;;  %v3340_v9 = vsel %vm10541_vm1, %v3324_v11, %v3332_v45  ;;  %vm10544_vm12 = vcmp.eq.s32.totalorder %v8303_v31, %v9144_v53  ;;  %vm10545_vm1 = vcmp.lt.s32.totalorder %v4966_v37, 127 }
 0xec4   : > { %v3350_v59 = vmax.f32 %v3339_v52, %v3340_v9  ;;  %v3354_v28 = vmin.f32 %v3339_v52, %v3340_v9  ;;  %vm10546_vm9 = vmmov %vm10545_vm1 }
 0xec5   : > { %v3262_v13 = vpop.permute.xlu1 %3261 }
 0xec6   : > { %3371 = vrot.lane.b32.xlu2 %v3356_v41, %s4863_s15  ;;  %v9243_v26 = vsel %vm10543_vm10, %v3350_v59, %v3354_v28  ;;  %v9248_v49 = vsel %vm10544_vm12, %v3350_v59, %v3354_v28  ;;  %v3286_v34 = vpop.permute.xlu0 %3285  ;;  %v3276_v20 = vsel %vm10545_vm1, %v3262_v13, %v3270_v43  ;;  %v3280_v29 = vsel %vm10546_vm9, %v3270_v43, %v3262_v13 }
 0xec7   : > { %3377 = vrot.lane.b32.xlu1 %v9243_v26, %s4863_s15  ;;  %3369 = vrot.lane.b32.xlu0 %v9248_v49, %s4863_s15  ;;  %vm10547_vm10 = vcmp.lt.s32.totalorder %v4966_v37, 1  ;;  %vm10549_vm1 = vcmp.eq.s32.totalorder %v5200_v63, %v8303_v31  ;;  %vm10550_vm9 = vcmp.eq.s32.totalorder %v5205_v1, %v8301_v16 }
 0xec8   : > { %vm10548_vm12 = vmmov %vm10547_vm10 }
 0xecd   : > { %v3294_v32 = vpop.permute.xlu1 %3293 }
 0xece   : > { %v3300_v40 = vsel %vm10547_vm10, %v3286_v34, %v3294_v32  ;;  %v3304_v18 = vsel %vm10548_vm12, %v3294_v32, %v3286_v34  ;;  %vm10552_vm10 = vcmp.eq.s32.totalorder %v8303_v31, %v9144_v53  ;;  %vm10553_vm12 = vcmp.lt.s32.totalorder %v4966_v37, 64 }
 0xecf   : > { %v3309_v39 = vsel %vm5209_vm11, %v3276_v20, %v3304_v18  ;;  %v3310_v33 = vsel %vm10529_vm5, %v3280_v29, %v3300_v40  ;;  %vm10551_vm5 = vcmp.eq.s32.totalorder %v8301_v16, %v9186_v62  ;;  %vm3395_vm11 = vcmp.eq.s32.totalorder %v7455_v38, %v9144_v53 }
 0xed0   : > { %v3319_v50 = vmax.f32 %v9125_v17, %v3309_v39  ;;  %v3320_v47 = vmax.f32 %v9120_v36, %v3310_v33  ;;  %v3327_v61 = vmin.f32 %v9125_v17, %v3309_v39  ;;  %v3328_v19 = vmin.f32 %v9120_v36, %v3310_v33 }
 0xed2   : > { %v3335_v55 = vsel %vm10549_vm1, %v3319_v50, %v3327_v61  ;;  %v3336_v15 = vsel %vm10550_vm9, %v3320_v47, %v3328_v19  ;;  %vm10554_vm1 = vmmov %vm10553_vm12  ;;  %vm10555_vm9 = vnez %v10438_v54 }
 0xed3   : > { %v3348_v11 = vmax.f32 %v3335_v55, %v3336_v15  ;;  %v3352_v48 = vmin.f32 %v3335_v55, %v3336_v15 }
 0xed5   : > { %v9279_v5 = vsel %vm10551_vm5, %v3348_v11, %v3352_v48  ;;  %v9284_v17 = vsel %vm10552_vm10, %v3348_v11, %v3352_v48  ;;  %vm10556_vm5 = vnez %v10440_v6  ;;  %vm3396_vm10 = vcmp.eq.s32.totalorder %v7457_v30, %v9186_v62 }
 0xed6   : > { %3373 = vrot.lane.b32.xlu0 %v9279_v5, %s4863_s15  ;;  %3365 = vrot.lane.b32.xlu2 %v9284_v17, %s4863_s15 }
 0xf18   : > { %v3368_v1 = vpop.permute.xlu2 %3367 }
 0xf20   : > { %v3372_v36 = vpop.permute.xlu2 %3371 }
 0xf21   : > { %v3364_v45 = vpop.permute.xlu1 %3363 }
 0xf22   : > { %v3379_v52 = vsel %vm10553_vm12, %v3364_v45, %v3372_v36  ;;  %v3383_v16 = vsel %vm10554_vm1, %v3372_v36, %v3364_v45  ;;  %vm10557_vm12 = vmmov %vm10554_vm1 }
 0xf23   : > { %v3387_v31 = vsel %vm10555_vm9, %v3379_v52, %v3383_v16  ;;  %v3388_v9 = vsel %vm10556_vm5, %v3383_v16, %v3379_v52 }
 0xf24   : > { %v3397_v59 = vmax.f32 %v9169_v57, %v3387_v31  ;;  %v3398_v28 = vmax.f32 %v3356_v41, %v3388_v9  ;;  %v3405_v13 = vmin.f32 %v9169_v57, %v3387_v31  ;;  %v3406_v43 = vmin.f32 %v3356_v41, %v3388_v9 }
 0xf26   : > { %v9307_v34 = vsel %vm3396_vm10, %v3398_v28, %v3406_v43  ;;  %v9312_v32 = vsel %vm3395_vm11, %v3397_v59, %v3405_v13 }
 0xf27   : > { %3429 = vrot.lane.b32.xlu0 %v9307_v34, %s4861_s13  ;;  %3445 = vrot.lane.b32.xlu1 %v9312_v32, %s4862_s14 }
 0xf28   : > { %3421 = vrot.lane.b32.xlu2 %v9312_v32, %s4861_s13 }
 0xf30   : > { %3453 = vrot.lane.b32.xlu2 %v9307_v34, %s4862_s14  ;;  %v3376_v57 = vpop.permute.xlu0 %3375  ;;  %v3366_v16 = vpop.permute.xlu2 %3365 }
 0xf31   : > { %v3381_v41 = vsel %vm10557_vm12, %v3368_v1, %v3376_v57  ;;  %v3385_v20 = vsel %vm10554_vm1, %v3376_v57, %v3368_v1  ;;  %vm10558_vm12 = vmmov %vm10554_vm1 }
 0xf32   : > { %v3391_v29 = vsel %vm10555_vm9, %v3381_v41, %v3385_v20  ;;  %v3392_v40 = vsel %vm10556_vm5, %v3385_v20, %v3381_v41 }
 0xf33   : > { %v3401_v18 = vmax.f32 %v9208_v27, %v3391_v29  ;;  %v3402_v39 = vmax.f32 %v9203_v58, %v3392_v40  ;;  %v3409_v33 = vmin.f32 %v9208_v27, %v3391_v29  ;;  %v3410_v50 = vmin.f32 %v9203_v58, %v3392_v40 }
 0xf35   : > { %v9337_v47 = vsel %vm3395_vm11, %v3401_v18, %v3409_v33  ;;  %v9342_v61 = vsel %vm3396_vm10, %v3402_v39, %v3410_v50 }
 0xf36   : > { %3449 = vrot.lane.b32.xlu0 %v9337_v47, %s4862_s14  ;;  %3425 = vrot.lane.b32.xlu1 %v9337_v47, %s4861_s13 }
 0xf38   : > { %3433 = vrot.lane.b32.xlu2 %v9342_v61, %s4861_s13 }
 0xf39   : > { %v3370_v58 = vpop.permute.xlu0 %3369  ;;  %v3378_v27 = vpop.permute.xlu1 %3377 }
 0xf3a   : > { %v3382_v19 = vsel %vm10558_vm12, %v3370_v58, %v3378_v27  ;;  %v3386_v55 = vsel %vm10554_vm1, %v3378_v27, %v3370_v58  ;;  %vm10559_vm12 = vmmov %vm10554_vm1 }
 0xf3b   : > { %v3393_v15 = vsel %vm10555_vm9, %v3382_v19, %v3386_v55  ;;  %v3394_v1 = vsel %vm10556_vm5, %v3386_v55, %v3382_v19 }
 0xf3c   : > { %v3403_v11 = vmax.f32 %v9248_v49, %v3393_v15  ;;  %v3411_v48 = vmin.f32 %v9248_v49, %v3393_v15  ;;  %v3404_v45 = vmax.f32 %v9243_v26, %v3394_v1  ;;  %v3412_v49 = vmin.f32 %v9243_v26, %v3394_v1 }
 0xf3e   : > { %3457 = vrot.lane.b32.xlu1 %v9342_v61, %s4862_s14  ;;  %v9365_v36 = vsel %vm3395_vm11, %v3403_v11, %v3411_v48  ;;  %v9376_v52 = vsel %vm3396_vm10, %v3404_v45, %v3412_v49 }
 0xf3f   : > { %3427 = vrot.lane.b32.xlu0 %v9365_v36, %s4861_s13 }
 0xf40   : > { %3451 = vrot.lane.b32.xlu2 %v9365_v36, %s4862_s14 }
 0xf46   : > { %3435 = vrot.lane.b32.xlu1 %v9376_v52, %s4861_s13 }
 0xf47   : > { %3459 = vrot.lane.b32.xlu0 %v9376_v52, %s4862_s14 }
 0xf48   : > { %v3374_v31 = vpop.permute.xlu0 %3373 }
 0xf49   : > { %v3380_v9 = vsel %vm10559_vm12, %v3366_v16, %v3374_v31  ;;  %v3384_v59 = vsel %vm10554_vm1, %v3374_v31, %v3366_v16  ;;  %vm3477_vm12 = vcmp.eq.s32.totalorder %v6725_v60, %v9144_v53  ;;  %vm3478_vm1 = vcmp.eq.s32.totalorder %v6727_v21, %v9186_v62 }
 0xf4a   : > { %v3389_v26 = vsel %vm10555_vm9, %v3380_v9, %v3384_v59  ;;  %v3390_v28 = vsel %vm10556_vm5, %v3384_v59, %v3380_v9  ;;  %vm10562_vm5 = vcmp.lt.s32.totalorder %v4966_v37, 32 }
 0xf4b   : > { %v3399_v13 = vmax.f32 %v9284_v17, %v3389_v26  ;;  %v3400_v43 = vmax.f32 %v9279_v5, %v3390_v28  ;;  %v3407_v57 = vmin.f32 %v9284_v17, %v3389_v26  ;;  %v3408_v41 = vmin.f32 %v9279_v5, %v3390_v28 }
 0xf4d   : > { %v9397_v20 = vsel %vm3395_vm11, %v3399_v13, %v3407_v57  ;;  %v9402_v54 = vsel %vm3396_vm10, %v3400_v43, %v3408_v41  ;;  %vm10560_vm11 = vcmp.lt.s32.totalorder %v4966_v37, 96  ;;  %vm10563_vm10 = vmmov %vm10562_vm5 }
 0xf4e   : > { %3423 = vrot.lane.b32.xlu1 %v9397_v20, %s4861_s13  ;;  %3431 = vrot.lane.b32.xlu2 %v9402_v54, %s4861_s13  ;;  %vm10561_vm9 = vmmov %vm10560_vm11 }
 0xf4f   : > { %3447 = vrot.lane.b32.xlu0 %v9397_v20, %s4862_s14 }
 0xf56   : > { %3455 = vrot.lane.b32.xlu1 %v9402_v54, %s4862_s14 }
 0xf82   : > { %v3422_v38 = vpop.permute.xlu2 %3421 }
 0xf8a   : > { %v3454_v6 = vpop.permute.xlu2 %3453 }
 0xf92   : > { %v3434_v11 = vpop.permute.xlu2 %3433 }
 0xf99   : > { %v3430_v5 = vpop.permute.xlu0 %3429  ;;  %v3446_v17 = vpop.permute.xlu1 %3445 }
 0xf9a   : > { %v3437_v30 = vsel %vm10560_vm11, %v3422_v38, %v3430_v5  ;;  %v3441_v29 = vsel %vm10561_vm9, %v3430_v5, %v3422_v38  ;;  %v3461_v40 = vsel %vm10562_vm5, %v3446_v17, %v3454_v6  ;;  %v3465_v18 = vsel %vm10563_vm10, %v3454_v6, %v3446_v17  ;;  %vm10564_vm11 = vmmov %vm10561_vm9  ;;  %v3452_v38 = vpop.permute.xlu2 %3451 }
 0xf9b   : > { %v3469_v39 = vsel %vm7463_vm6, %v3437_v30, %v3465_v18  ;;  %v3470_v33 = vsel %vm10445_vm13, %v3441_v29, %v3461_v40  ;;  %vm10565_vm10 = vmmov %vm10562_vm5 }
 0xf9c   : > { %v3479_v50 = vmax.f32 %v9312_v32, %v3469_v39  ;;  %v3480_v58 = vmax.f32 %v9307_v34, %v3470_v33  ;;  %v3487_v27 = vmin.f32 %v9312_v32, %v3469_v39  ;;  %v3488_v19 = vmin.f32 %v9307_v34, %v3470_v33 }
 0xf9e   : > { %v9435_v55 = vsel %vm3477_vm12, %v3479_v50, %v3487_v27  ;;  %v9440_v15 = vsel %vm3478_vm1, %v3480_v58, %v3488_v19 }
 0xf9f   : > { %3527 = vrot.lane.b32.xlu2 %v9435_v55, %s4860_s12  ;;  %3503 = vrot.lane.b32.xlu0 %v9435_v55, %s4859_s11 }
 0xfa0   : > { %3511 = vrot.lane.b32.xlu1 %v9440_v15, %s4859_s11 }
 0xfa7   : > { %3535 = vrot.lane.b32.xlu0 %v9440_v15, %s4860_s12 }
 0xfa8   : > { %v3450_v34 = vpop.permute.xlu0 %3449  ;;  %v3426_v32 = vpop.permute.xlu1 %3425 }
 0xfa9   : > { %v3439_v45 = vsel %vm10564_vm11, %v3426_v32, %v3434_v11  ;;  %v3443_v49 = vsel %vm10561_vm9, %v3434_v11, %v3426_v32  ;;  %vm10566_vm11 = vmmov %vm10562_vm5  ;;  %v3432_v19 = vpop.permute.xlu2 %3431 }
 0xfb0   : > { %v3458_v1 = vpop.permute.xlu1 %3457 }
 0xfb1   : > { %v3428_v48 = vpop.permute.xlu0 %3427  ;;  %v3463_v16 = vsel %vm10562_vm5, %v3450_v34, %v3458_v1  ;;  %v3467_v31 = vsel %vm10565_vm10, %v3458_v1, %v3450_v34  ;;  %vm10567_vm10 = vmmov %vm10561_vm9 }
 0xfb2   : > { %v3473_v9 = vsel %vm7463_vm6, %v3439_v45, %v3467_v31  ;;  %v3474_v59 = vsel %vm10445_vm13, %v3443_v49, %v3463_v16 }
 0xfb3   : > { %v3483_v26 = vmax.f32 %v9337_v47, %v3473_v9  ;;  %v3484_v28 = vmax.f32 %v9342_v61, %v3474_v59  ;;  %v3491_v13 = vmin.f32 %v9337_v47, %v3473_v9  ;;  %v3492_v43 = vmin.f32 %v9342_v61, %v3474_v59 }
 0xfb5   : > { %v9469_v57 = vsel %vm3477_vm12, %v3483_v26, %v3491_v13  ;;  %v9474_v41 = vsel %vm3478_vm1, %v3484_v28, %v3492_v43 }
 0xfb6   : > { %3531 = vrot.lane.b32.xlu1 %v9469_v57, %s4860_s12  ;;  %3507 = vrot.lane.b32.xlu2 %v9469_v57, %s4859_s11 }
 0xfb7   : > { %3515 = vrot.lane.b32.xlu0 %v9474_v41, %s4859_s11 }
 0xfb8   : > { %v3436_v61 = vpop.permute.xlu1 %3435 }
 0xfb9   : > { %v3460_v47 = vpop.permute.xlu0 %3459  ;;  %v3440_v5 = vsel %vm10561_vm9, %v3428_v48, %v3436_v61  ;;  %v3444_v29 = vsel %vm10567_vm10, %v3436_v61, %v3428_v48  ;;  %vm10569_vm10 = vmmov %vm10562_vm5 }
 0xfba   : > { %v3468_v6 = vsel %vm10566_vm11, %v3460_v47, %v3452_v38  ;;  %v3464_v30 = vsel %vm10562_vm5, %v3452_v38, %v3460_v47  ;;  %vm10568_vm11 = vmmov %vm10561_vm9 }
 0xfbb   : > { %v3475_v17 = vsel %vm7463_vm6, %v3440_v5, %v3468_v6  ;;  %v3476_v33 = vsel %vm10445_vm13, %v3444_v29, %v3464_v30 }
 0xfbc   : > { %v3485_v40 = vmax.f32 %v9365_v36, %v3475_v17  ;;  %v3493_v18 = vmin.f32 %v9365_v36, %v3475_v17  ;;  %v3486_v36 = vmax.f32 %v9376_v52, %v3476_v33  ;;  %v3494_v58 = vmin.f32 %v9376_v52, %v3476_v33 }
 0xfbe   : > { %v9497_v39 = vsel %vm3477_vm12, %v3485_v40, %v3493_v18  ;;  %3539 = vrot.lane.b32.xlu2 %v9474_v41, %s4860_s12  ;;  %v9512_v27 = vsel %vm3478_vm1, %v3486_v36, %v3494_v58 }
 0xfbf   : > { %3509 = vrot.lane.b32.xlu1 %v9497_v39, %s4859_s11  ;;  %3533 = vrot.lane.b32.xlu0 %v9497_v39, %s4860_s12 }
 0xfc0   : > { %v3424_v50 = vpop.permute.xlu1 %3423 }
 0xfc1   : > { %v3448_v34 = vpop.permute.xlu0 %3447  ;;  %v3438_v11 = vsel %vm10568_vm11, %v3424_v50, %v3432_v19  ;;  %v3442_v52 = vsel %vm10561_vm9, %v3432_v19, %v3424_v50  ;;  %vm3560_vm11 = vcmp.eq.s32.totalorder %v6137_v12, %v9186_v62  ;;  %vm3559_vm9 = vcmp.eq.s32.totalorder %v6135_v3, %v9144_v53 }
 0xfc6   : > { %3517 = vrot.lane.b32.xlu2 %v9512_v27, %s4859_s11 }
 0xfc7   : > { %3541 = vrot.lane.b32.xlu1 %v9512_v27, %s4860_s12 }
 0xfc8   : > { %v3456_v32 = vpop.permute.xlu1 %3455 }
 0xfc9   : > { %v3462_v48 = vsel %vm10562_vm5, %v3448_v34, %v3456_v32  ;;  %v3466_v1 = vsel %vm10569_vm10, %v3456_v32, %v3448_v34 }
 0xfca   : > { %v3471_v45 = vsel %vm7463_vm6, %v3438_v11, %v3466_v1  ;;  %v3472_v49 = vsel %vm10445_vm13, %v3442_v52, %v3462_v48  ;;  %vm10570_vm6 = vcmp.lt.s32.totalorder %v4966_v37, 112 }
 0xfcb   : > { %v3481_v16 = vmax.f32 %v9397_v20, %v3471_v45  ;;  %v3482_v31 = vmax.f32 %v9402_v54, %v3472_v49  ;;  %v3489_v9 = vmin.f32 %v9397_v20, %v3471_v45  ;;  %v3490_v59 = vmin.f32 %v9402_v54, %v3472_v49  ;;  %vm10571_vm13 = vmmov %vm10570_vm6 }
 0xfcd   : > { %v9537_v26 = vsel %vm3477_vm12, %v3481_v16, %v3489_v9  ;;  %v9542_v46 = vsel %vm3478_vm1, %v3482_v31, %v3490_v59  ;;  %vm10572_vm12 = vcmp.lt.s32.totalorder %v4966_v37, 16 }
 0xfce   : > { %3505 = vrot.lane.b32.xlu2 %v9537_v26, %s4859_s11  ;;  %3513 = vrot.lane.b32.xlu0 %v9542_v46, %s4859_s11  ;;  %vm10573_vm1 = vmmov %vm10572_vm12 }
 0xfcf   : > { %3529 = vrot.lane.b32.xlu1 %v9537_v26, %s4860_s12  ;;  %vm10574_vm5 = vmmov %vm10573_vm1 }
 0xfd0   : > { %vm10575_vm10 = vmmov %vm10573_vm1 }
 0xfd6   : > { %3537 = vrot.lane.b32.xlu2 %v9542_v46, %s4860_s12 }
 0xff9   : > { %v3528_v60 = vpop.permute.xlu2 %3527 }
0x1010   : > { %v3508_v54 = vpop.permute.xlu2 %3507 }
0x1011   : > { %v3504_v35 = vpop.permute.xlu0 %3503 }
0x1012   : > { %v3512_v20 = vpop.permute.xlu1 %3511 }
0x1013   : > { %v3519_v21 = vsel %vm10570_vm6, %v3504_v35, %v3512_v20  ;;  %v3523_v13 = vsel %vm10571_vm13, %v3512_v20, %v3504_v35  ;;  %vm10576_vm13 = vmmov %vm10570_vm6 }
0x1019   : > { %v3536_v28 = vpop.permute.xlu0 %3535 }
0x101a   : > { %v3543_v43 = vsel %vm10572_vm12, %v3528_v60, %v3536_v28  ;;  %v3547_v38 = vsel %vm10573_vm1, %v3536_v28, %v3528_v60  ;;  %vm10577_vm12 = vmmov %vm10570_vm6 }
0x101b   : > { %v3551_v47 = vsel %vm6729_vm8, %v3519_v21, %v3547_v38  ;;  %v3552_v61 = vsel %vm6733_vm15, %v3523_v13, %v3543_v43  ;;  %vm10578_vm1 = vmmov %vm10570_vm6 }
0x101c   : > { %v3561_v6 = vmax.f32 %v9435_v55, %v3551_v47  ;;  %v3562_v5 = vmax.f32 %v9440_v15, %v3552_v61  ;;  %v3569_v17 = vmin.f32 %v9435_v55, %v3551_v47  ;;  %v3570_v30 = vmin.f32 %v9440_v15, %v3552_v61  ;;  %v3540_v55 = vpop.permute.xlu2 %3539 }
0x101e   : > { %v9575_v29 = vsel %vm3560_vm11, %v3562_v5, %v3570_v30  ;;  %v9580_v40 = vsel %vm3559_vm9, %v3561_v6, %v3569_v17 }
0x101f   : > { %3593 = vrot.lane.b32.xlu2 %v9575_v29, %s4857_s9  ;;  %3609 = vrot.lane.b32.xlu0 %v9580_v40, %s4858_s10 }
0x1020   : > { %3585 = vrot.lane.b32.xlu1 %v9580_v40, %s4857_s9 }
0x1024   : > { %v3518_v32 = vpop.permute.xlu2 %3517 }
0x1028   : > { %3617 = vrot.lane.b32.xlu1 %v9575_v29, %s4858_s10  ;;  %v3532_v15 = vpop.permute.xlu1 %3531 }
0x1029   : > { %v3516_v18 = vpop.permute.xlu0 %3515  ;;  %v3545_v33 = vsel %vm10574_vm5, %v3532_v15, %v3540_v55  ;;  %v3549_v50 = vsel %vm10575_vm10, %v3540_v55, %v3532_v15  ;;  %vm10579_vm10 = vmmov %vm10574_vm5 }
0x102a   : > { %v3521_v36 = vsel %vm10570_vm6, %v3508_v54, %v3516_v18  ;;  %v3525_v58 = vsel %vm10576_vm13, %v3516_v18, %v3508_v54  ;;  %vm10580_vm6 = vmmov %vm10574_vm5 }
0x102b   : > { %v3555_v19 = vsel %vm6729_vm8, %v3521_v36, %v3549_v50  ;;  %v3556_v34 = vsel %vm6733_vm15, %v3525_v58, %v3545_v33  ;;  %vm10581_vm13 = vmmov %vm10574_vm5 }
0x102c   : > { %v3565_v11 = vmax.f32 %v9469_v57, %v3555_v19  ;;  %v3566_v52 = vmax.f32 %v9474_v41, %v3556_v34  ;;  %v3573_v48 = vmin.f32 %v9469_v57, %v3555_v19  ;;  %v3574_v1 = vmin.f32 %v9474_v41, %v3556_v34  ;;  %v3506_v41 = vpop.permute.xlu2 %3505 }
0x102e   : > { %v9609_v45 = vsel %vm3559_vm9, %v3565_v11, %v3573_v48  ;;  %v9614_v49 = vsel %vm3560_vm11, %v3566_v52, %v3574_v1 }
0x102f   : > { %3613 = vrot.lane.b32.xlu2 %v9609_v45, %s4858_s10  ;;  %3589 = vrot.lane.b32.xlu0 %v9609_v45, %s4857_s9 }
0x1030   : > { %3597 = vrot.lane.b32.xlu1 %v9614_v49, %s4857_s9 }
0x1031   : > { %v3510_v57 = vpop.permute.xlu1 %3509  ;;  %v3534_v16 = vpop.permute.xlu0 %3533 }
0x1032   : > { %v3522_v9 = vsel %vm10577_vm12, %v3510_v57, %v3518_v32  ;;  %v3526_v59 = vsel %vm10578_vm1, %v3518_v32, %v3510_v57  ;;  %vm10582_vm12 = vmmov %vm10578_vm1 }
0x1037   : > { %3621 = vrot.lane.b32.xlu0 %v9614_v49, %s4858_s10 }
0x1039   : > { %v3542_v31 = vpop.permute.xlu1 %3541 }
0x103a   : > { %v3546_v60 = vsel %vm10574_vm5, %v3534_v16, %v3542_v31  ;;  %v3550_v35 = vsel %vm10579_vm10, %v3542_v31, %v3534_v16  ;;  %vm3641_vm5 = vcmp.eq.s32.totalorder %v5685_v7, %v9144_v53  ;;  %vm3642_vm10 = vcmp.eq.s32.totalorder %v5687_v8, %v9186_v62 }
0x103b   : > { %v3557_v20 = vsel %vm6729_vm8, %v3522_v9, %v3550_v35  ;;  %v3558_v54 = vsel %vm6733_vm15, %v3526_v59, %v3546_v60 }
0x103c   : > { %v3567_v28 = vmax.f32 %v9497_v39, %v3557_v20  ;;  %v3568_v21 = vmax.f32 %v9512_v27, %v3558_v54  ;;  %v3575_v13 = vmin.f32 %v9497_v39, %v3557_v20  ;;  %v3576_v43 = vmin.f32 %v9512_v27, %v3558_v54  ;;  %v3538_v39 = vpop.permute.xlu2 %3537 }
0x103e   : > { %v9643_v38 = vsel %vm3559_vm9, %v3567_v28, %v3575_v13  ;;  %v9648_v47 = vsel %vm3560_vm11, %v3568_v21, %v3576_v43 }
0x103f   : > { %3615 = vrot.lane.b32.xlu1 %v9643_v38, %s4858_s10  ;;  %3591 = vrot.lane.b32.xlu2 %v9643_v38, %s4857_s9 }
0x1040   : > { %3599 = vrot.lane.b32.xlu0 %v9648_v47, %s4857_s9  ;;  %v3514_v61 = vpop.permute.xlu0 %3513 }
0x1041   : > { %v3530_v27 = vpop.permute.xlu1 %3529  ;;  %v3520_v17 = vsel %vm10582_vm12, %v3506_v41, %v3514_v61  ;;  %v3524_v30 = vsel %vm10578_vm1, %v3514_v61, %v3506_v41 }
0x1042   : > { %v3544_v6 = vsel %vm10580_vm6, %v3530_v27, %v3538_v39  ;;  %v3548_v5 = vsel %vm10581_vm13, %v3538_v39, %v3530_v27 }
0x1043   : > { %v3553_v55 = vsel %vm6729_vm8, %v3520_v17, %v3548_v5  ;;  %v3554_v15 = vsel %vm6733_vm15, %v3524_v30, %v3544_v6  ;;  %vm10583_vm8 = vcmp.lt.s32.totalorder %v4966_v37, 120 }
0x1044   : > { %v3563_v18 = vmax.f32 %v9537_v26, %v3553_v55  ;;  %v3564_v33 = vmax.f32 %v9542_v46, %v3554_v15  ;;  %v3571_v50 = vmin.f32 %v9537_v26, %v3553_v55  ;;  %v3572_v36 = vmin.f32 %v9542_v46, %v3554_v15  ;;  %vm10584_vm15 = vmmov %vm10583_vm8 }
0x1045   : > { %vm10587_vm6 = vmmov %vm10583_vm8 }
0x1046   : > { %v9677_v58 = vsel %vm3559_vm9, %v3563_v18, %v3571_v50  ;;  %v9682_v51 = vsel %vm3560_vm11, %v3564_v33, %v3572_v36  ;;  %vm10585_vm11 = vcmp.lt.s32.totalorder %v4966_v37, 8  ;;  %vm10588_vm13 = vmmov %vm10587_vm6 }
0x1047   : > { %3623 = vrot.lane.b32.xlu2 %v9648_v47, %s4858_s10  ;;  %3595 = vrot.lane.b32.xlu1 %v9682_v51, %s4857_s9  ;;  %vm10586_vm9 = vmmov %vm10585_vm11 }
0x1048   : > { %3587 = vrot.lane.b32.xlu0 %v9677_v58, %s4857_s9  ;;  %vm10589_vm12 = vmmov %vm10586_vm9 }
0x1049   : > { %vm10590_vm1 = vmmov %vm10586_vm9 }
0x104f   : > { %3611 = vrot.lane.b32.xlu2 %v9677_v58, %s4858_s10 }
0x1050   : > { %3619 = vrot.lane.b32.xlu0 %v9682_v51, %s4858_s10 }
0x1079   : > { %v3594_v44 = vpop.permute.xlu2 %3593 }
0x1089   : > { %v3614_v16 = vpop.permute.xlu2 %3613 }
0x1091   : > { %v3610_v26 = vpop.permute.xlu0 %3609 }
0x1092   : > { %v3586_v3 = vpop.permute.xlu1 %3585 }
0x1093   : > { %v3601_v12 = vsel %vm10583_vm8, %v3586_v3, %v3594_v44  ;;  %v3605_v19 = vsel %vm10584_vm15, %v3594_v44, %v3586_v3  ;;  %vm10591_vm8 = vmmov %vm10590_vm1 }
0x1094   : > { %vm10592_vm15 = vmmov %vm10587_vm6 }
0x109a   : > { %v3618_v46 = vpop.permute.xlu1 %3617 }
0x109b   : > { %v3625_v34 = vsel %vm10585_vm11, %v3610_v26, %v3618_v46  ;;  %v3629_v32 = vsel %vm10586_vm9, %v3618_v46, %v3610_v26  ;;  %vm10593_vm11 = vmmov %vm10587_vm6 }
0x109c   : > { %v3633_v11 = vsel %vm6139_vm7, %v3601_v12, %v3629_v32  ;;  %v3634_v52 = vsel %vm6143_vm0, %v3605_v19, %v3625_v34  ;;  %vm10594_vm9 = vmmov %vm10590_vm1 }
0x109d   : > { %v3643_v48 = vmax.f32 %v9580_v40, %v3633_v11  ;;  %v3644_v1 = vmax.f32 %v9575_v29, %v3634_v52  ;;  %v3651_v57 = vmin.f32 %v9580_v40, %v3633_v11  ;;  %v3652_v41 = vmin.f32 %v9575_v29, %v3634_v52  ;;  %v3592_v40 = vpop.permute.xlu2 %3591 }
0x109f   : > { %v9715_v31 = vsel %vm3641_vm5, %v3643_v48, %v3651_v57  ;;  %v9720_v9 = vsel %vm3642_vm10, %v3644_v1, %v3652_v41 }
0x10a0   : > { %3691 = vrot.lane.b32.xlu1 %v9715_v31, %s4856_s8  ;;  %3667 = vrot.lane.b32.xlu2 %v9715_v31, %s4855_s7 }
0x10a1   : > { %3675 = vrot.lane.b32.xlu0 %v9720_v9, %s4855_s7  ;;  %v3590_v29 = vpop.permute.xlu0 %3589 }
0x10a2   : > { %v3598_v59 = vpop.permute.xlu1 %3597 }
0x10a3   : > { %v3603_v35 = vsel %vm10587_vm6, %v3590_v29, %v3598_v59  ;;  %v3607_v20 = vsel %vm10588_vm13, %v3598_v59, %v3590_v29  ;;  %vm10595_vm13 = vmmov %vm10587_vm6 }
0x10a5   : > { %v3624_v17 = vpop.permute.xlu2 %3623 }
0x10a8   : > { %3699 = vrot.lane.b32.xlu2 %v9720_v9, %s4856_s8 }
0x10a9   : > { %v3622_v60 = vpop.permute.xlu0 %3621 }
0x10aa   : > { %v3627_v54 = vsel %vm10589_vm12, %v3614_v16, %v3622_v60  ;;  %v3631_v28 = vsel %vm10590_vm1, %v3622_v60, %v3614_v16  ;;  %vm10596_vm12 = vmmov %vm10590_vm1 }
0x10ab   : > { %v3637_v21 = vsel %vm6139_vm7, %v3603_v35, %v3631_v28  ;;  %v3638_v13 = vsel %vm6143_vm0, %v3607_v20, %v3627_v54 }
0x10ac   : > { %v3647_v43 = vmax.f32 %v9609_v45, %v3637_v21  ;;  %v3648_v39 = vmax.f32 %v9614_v49, %v3638_v13  ;;  %v3655_v27 = vmin.f32 %v9609_v45, %v3637_v21  ;;  %v3656_v61 = vmin.f32 %v9614_v49, %v3638_v13 }
0x10ad   : > { %v3612_v34 = vpop.permute.xlu2 %3611 }
0x10ae   : > { %v9749_v6 = vsel %vm3642_vm10, %v3648_v39, %v3656_v61  ;;  %v9754_v5 = vsel %vm3641_vm5, %v3647_v43, %v3655_v27 }
0x10af   : > { %3695 = vrot.lane.b32.xlu0 %v9754_v5, %s4856_s8  ;;  %3671 = vrot.lane.b32.xlu1 %v9754_v5, %s4855_s7 }
0x10b0   : > { %3679 = vrot.lane.b32.xlu2 %v9749_v6, %s4855_s7 }
0x10b1   : > { %v3616_v45 = vpop.permute.xlu1 %3615 }
0x10b2   : > { %v3600_v49 = vpop.permute.xlu0 %3599  ;;  %v3632_v30 = vsel %vm10591_vm8, %v3624_v17, %v3616_v45  ;;  %v3628_v33 = vsel %vm10594_vm9, %v3616_v45, %v3624_v17  ;;  %vm3723_vm8 = vcmp.eq.s32.totalorder %v5375_v22, %v9144_v53 }
0x10b3   : > { %v3604_v55 = vsel %vm10592_vm15, %v3592_v40, %v3600_v49  ;;  %v3608_v18 = vsel %vm10593_vm11, %v3600_v49, %v3592_v40  ;;  %vm3724_vm15 = vcmp.eq.s32.totalorder %v5377_v23, %v9186_v62 }
0x10b4   : > { %v3639_v15 = vsel %vm6139_vm7, %v3604_v55, %v3632_v30  ;;  %v3640_v44 = vsel %vm6143_vm0, %v3608_v18, %v3628_v33 }
0x10b5   : > { %v3649_v50 = vmax.f32 %v9643_v38, %v3639_v15  ;;  %v3657_v36 = vmin.f32 %v9643_v38, %v3639_v15  ;;  %v3650_v38 = vmax.f32 %v9648_v47, %v3640_v44  ;;  %v3658_v46 = vmin.f32 %v9648_v47, %v3640_v44 }
0x10b7   : > { %v9777_v3 = vsel %vm3641_vm5, %v3649_v50, %v3657_v36  ;;  %3703 = vrot.lane.b32.xlu1 %v9749_v6, %s4856_s8  ;;  %v9792_v12 = vsel %vm3642_vm10, %v3650_v38, %v3658_v46 }
0x10b8   : > { %3697 = vrot.lane.b32.xlu2 %v9777_v3, %s4856_s8  ;;  %3673 = vrot.lane.b32.xlu0 %v9777_v3, %s4855_s7 }
0x10b9   : > { %v3596_v19 = vpop.permute.xlu1 %3595 }
0x10ba   : > { %v3588_v26 = vpop.permute.xlu0 %3587 }
0x10bb   : > { %v3602_v11 = vsel %vm10587_vm6, %v3588_v26, %v3596_v19  ;;  %v3606_v47 = vsel %vm10595_vm13, %v3596_v19, %v3588_v26 }
0x10bf   : > { %3681 = vrot.lane.b32.xlu1 %v9792_v12, %s4855_s7 }
0x10c0   : > { %3705 = vrot.lane.b32.xlu0 %v9792_v12, %s4856_s8 }
0x10c2   : > { %v3620_v32 = vpop.permute.xlu0 %3619 }
0x10c3   : > { %v3626_v52 = vsel %vm10596_vm12, %v3612_v34, %v3620_v32  ;;  %v3630_v48 = vsel %vm10590_vm1, %v3620_v32, %v3612_v34 }
0x10c4   : > { %v3635_v1 = vsel %vm6139_vm7, %v3602_v11, %v3630_v48  ;;  %v3636_v57 = vsel %vm6143_vm0, %v3606_v47, %v3626_v52  ;;  %vm10597_vm0 = vcmp.lt.s32.totalorder %v4966_v37, 4 }
0x10c5   : > { %v3645_v41 = vmax.f32 %v9677_v58, %v3635_v1  ;;  %v3646_v16 = vmax.f32 %v9682_v51, %v3636_v57  ;;  %v3653_v29 = vmin.f32 %v9677_v58, %v3635_v1  ;;  %v3654_v40 = vmin.f32 %v9682_v51, %v3636_v57  ;;  %vm10598_vm7 = vmmov %vm10597_vm0 }
0x10c6   : > { %vm10603_vm6 = vmmov %vm10597_vm0 }
0x10c7   : > { %v9817_v59 = vsel %vm3642_vm10, %v3646_v16, %v3654_v40  ;;  %v9822_v42 = vsel %vm3641_vm5, %v3645_v41, %v3653_v29  ;;  %vm10599_vm5 = vcmp.lt.s32.totalorder %v4966_v37, 124  ;;  %vm10604_vm13 = vmmov %vm10597_vm0 }
0x10c8   : > { %3677 = vrot.lane.b32.xlu2 %v9817_v59, %s4855_s7  ;;  %3693 = vrot.lane.b32.xlu0 %v9822_v42, %s4856_s8  ;;  %vm10600_vm10 = vmmov %vm10599_vm5 }
0x10c9   : > { %3669 = vrot.lane.b32.xlu1 %v9822_v42, %s4855_s7  ;;  %vm10601_vm11 = vmmov %vm10599_vm5 }
0x10ca   : > { %vm10602_vm9 = vmmov %vm10599_vm5 }
0x10cb   : > { %vm10605_vm12 = vmmov %vm10597_vm0 }
0x10cc   : > { %vm10606_vm1 = vmmov %vm10599_vm5 }
0x10d1   : > { %3701 = vrot.lane.b32.xlu1 %v9817_v59, %s4856_s8 }
0x10fa   : > { %v3668_v8 = vpop.permute.xlu2 %3667 }
0x1102   : > { %v3700_v10 = vpop.permute.xlu2 %3699 }
0x110a   : > { %v3680_v17 = vpop.permute.xlu2 %3679 }
0x1112   : > { %v3692_v58 = vpop.permute.xlu1 %3691  ;;  %v3698_v34 = vpop.permute.xlu2 %3697 }
0x1113   : > { %v3676_v51 = vpop.permute.xlu0 %3675  ;;  %v3707_v7 = vsel %vm10597_vm0, %v3692_v58, %v3700_v10  ;;  %v3711_v60 = vsel %vm10598_vm7, %v3700_v10, %v3692_v58  ;;  %vm10607_vm7 = vmmov %vm10606_vm1 }
0x1114   : > { %v3683_v35 = vsel %vm10599_vm5, %v3668_v8, %v3676_v51  ;;  %v3687_v20 = vsel %vm10600_vm10, %v3676_v51, %v3668_v8  ;;  %vm10608_vm5 = vmmov %vm10606_vm1 }
0x1115   : > { %v3715_v54 = vsel %vm5693_vm14, %v3683_v35, %v3711_v60  ;;  %v3716_v28 = vsel %vm5697_vm4, %v3687_v20, %v3707_v7  ;;  %vm10609_vm10 = vmmov %vm10606_vm1 }
0x1116   : > { %v3725_v21 = vmax.f32 %v9715_v31, %v3715_v54  ;;  %v3726_v13 = vmax.f32 %v9720_v9, %v3716_v28  ;;  %v3733_v43 = vmin.f32 %v9715_v31, %v3715_v54  ;;  %v3734_v39 = vmin.f32 %v9720_v9, %v3716_v28 }
0x1118   : > { %v9855_v27 = vsel %vm3723_vm8, %v3725_v21, %v3733_v43  ;;  %v9860_v61 = vsel %vm3724_vm15, %v3726_v13, %v3734_v39 }
0x1119   : > { %3773 = vrot.lane.b32.xlu2 %v9855_v27, %s4854_s6  ;;  %3749 = vrot.lane.b32.xlu0 %v9855_v27, %s4852_s29 }
0x111a   : > { %3757 = vrot.lane.b32.xlu1 %v9860_v61, %s4852_s29 }
0x1121   : > { %3781 = vrot.lane.b32.xlu0 %v9860_v61, %s4854_s6  ;;  %v3696_v31 = vpop.permute.xlu0 %3695  ;;  %v3672_v9 = vpop.permute.xlu1 %3671 }
0x1122   : > { %v3685_v30 = vsel %vm10601_vm11, %v3672_v9, %v3680_v17  ;;  %v3689_v55 = vsel %vm10602_vm9, %v3680_v17, %v3672_v9  ;;  %v3678_v10 = vpop.permute.xlu2 %3677  ;;  %vm10610_vm11 = vmmov %vm10597_vm0 }
0x1123   : > { %vm10611_vm9 = vmmov %vm10597_vm0 }
0x1129   : > { %v3704_v49 = vpop.permute.xlu1 %3703 }
0x112a   : > { %v3674_v45 = vpop.permute.xlu0 %3673  ;;  %v3709_v15 = vsel %vm10603_vm6, %v3696_v31, %v3704_v49  ;;  %v3713_v18 = vsel %vm10604_vm13, %v3704_v49, %v3696_v31  ;;  %vm3806_vm6 = vcmp.eq.s32.totalorder %v5207_v2, %v9186_v62  ;;  %vm3805_vm13 = vcmp.eq.s32.totalorder %v5202_v0, %v9144_v53 }
0x112b   : > { %v3719_v33 = vsel %vm5693_vm14, %v3685_v30, %v3713_v18  ;;  %v3720_v50 = vsel %vm5697_vm4, %v3689_v55, %v3709_v15 }
0x112c   : > { %v3729_v36 = vmax.f32 %v9754_v5, %v3719_v33  ;;  %v3730_v44 = vmax.f32 %v9749_v6, %v3720_v50  ;;  %v3737_v26 = vmin.f32 %v9754_v5, %v3719_v33  ;;  %v3738_v38 = vmin.f32 %v9749_v6, %v3720_v50 }
0x112e   : > { %v9889_v46 = vsel %vm3723_vm8, %v3729_v36, %v3737_v26  ;;  %v9894_v19 = vsel %vm3724_vm15, %v3730_v44, %v3738_v38 }
0x112f   : > { %3777 = vrot.lane.b32.xlu1 %v9889_v46, %s4854_s6  ;;  %3753 = vrot.lane.b32.xlu2 %v9889_v46, %s4852_s29 }
0x1130   : > { %3761 = vrot.lane.b32.xlu0 %v9894_v19, %s4852_s29 }
0x1131   : > { %v3682_v32 = vpop.permute.xlu1 %3681 }
0x1132   : > { %v3706_v6 = vpop.permute.xlu0 %3705  ;;  %v3686_v11 = vsel %vm10606_vm1, %v3674_v45, %v3682_v32  ;;  %v3690_v48 = vsel %vm10607_vm7, %v3682_v32, %v3674_v45 }
0x1133   : > { %v3714_v5 = vsel %vm10605_vm12, %v3706_v6, %v3698_v34  ;;  %v3710_v52 = vsel %vm10597_vm0, %v3698_v34, %v3706_v6 }
0x1134   : > { %v3721_v47 = vsel %vm5693_vm14, %v3686_v11, %v3714_v5  ;;  %v3722_v16 = vsel %vm5697_vm4, %v3690_v48, %v3710_v52 }
0x1135   : > { %v3731_v1 = vmax.f32 %v9777_v3, %v3721_v47  ;;  %v3739_v57 = vmin.f32 %v9777_v3, %v3721_v47  ;;  %v3732_v3 = vmax.f32 %v9792_v12, %v3722_v16  ;;  %v3740_v40 = vmin.f32 %v9792_v12, %v3722_v16 }
0x1137   : > { %v9917_v41 = vsel %vm3723_vm8, %v3731_v1, %v3739_v57  ;;  %3785 = vrot.lane.b32.xlu2 %v9894_v19, %s4854_s6  ;;  %v9932_v8 = vsel %vm3724_vm15, %v3732_v3, %v3740_v40 }
0x1138   : > { %3755 = vrot.lane.b32.xlu1 %v9917_v41, %s4852_s29  ;;  %3779 = vrot.lane.b32.xlu0 %v9917_v41, %s4854_s6 }
0x113a   : > { %v3694_v58 = vpop.permute.xlu0 %3693 }
0x113b   : > { %v3670_v29 = vpop.permute.xlu1 %3669 }
0x113c   : > { %v3684_v7 = vsel %vm10608_vm5, %v3670_v29, %v3678_v10  ;;  %v3688_v12 = vsel %vm10609_vm10, %v3678_v10, %v3670_v29 }
0x113f   : > { %3763 = vrot.lane.b32.xlu2 %v9932_v8, %s4852_s29 }
0x1140   : > { %3787 = vrot.lane.b32.xlu1 %v9932_v8, %s4854_s6 }
0x1143   : > { %v3702_v51 = vpop.permute.xlu1 %3701 }
0x1144   : > { %v3708_v60 = vsel %vm10610_vm11, %v3694_v58, %v3702_v51  ;;  %v3712_v35 = vsel %vm10611_vm9, %v3702_v51, %v3694_v58 }
0x1145   : > { %v3717_v20 = vsel %vm5693_vm14, %v3684_v7, %v3712_v35  ;;  %v3718_v54 = vsel %vm5697_vm4, %v3688_v12, %v3708_v60  ;;  %vm10612_vm14 = vcmp.lt.s32.totalorder %v4966_v37, 126 }
0x1146   : > { %v3727_v28 = vmax.f32 %v9822_v42, %v3717_v20  ;;  %v3728_v21 = vmax.f32 %v9817_v59, %v3718_v54  ;;  %v3735_v13 = vmin.f32 %v9822_v42, %v3717_v20  ;;  %v3736_v43 = vmin.f32 %v9817_v59, %v3718_v54  ;;  %vm10613_vm4 = vmmov %vm10612_vm14 }
0x1147   : > { %vm10618_vm0 = vmmov %vm10613_vm4 }
0x1148   : > { %v9957_v39 = vsel %vm3723_vm8, %v3727_v28, %v3735_v13  ;;  %v9962_v14 = vsel %vm3724_vm15, %v3728_v21, %v3736_v43  ;;  %vm10614_vm8 = vcmp.lt.s32.totalorder %v4966_v37, 2  ;;  %vm10619_vm7 = vmmov %vm10618_vm0 }
0x1149   : > { %3775 = vrot.lane.b32.xlu1 %v9957_v39, %s4854_s6  ;;  %3751 = vrot.lane.b32.xlu2 %v9957_v39, %s4852_s29  ;;  %vm10615_vm15 = vmmov %vm10614_vm8 }
0x114a   : > { %3759 = vrot.lane.b32.xlu0 %v9962_v14, %s4852_s29  ;;  %vm10616_vm12 = vmmov %vm10614_vm8 }
0x114b   : > { %vm10617_vm1 = vmmov %vm10614_vm8 }
0x114c   : > { %vm10620_vm5 = vmmov %vm10618_vm0 }
0x114d   : > { %vm10621_vm10 = vmmov %vm10618_vm0 }
0x114e   : > { %vm10622_vm11 = vmmov %vm10617_vm1 }
0x114f   : > { %vm10623_vm9 = vmmov %vm10617_vm1 }
0x1151   : > { %3783 = vrot.lane.b32.xlu2 %v9962_v14, %s4854_s6 }
0x1173   : > { %v3774_v22 = vpop.permute.xlu2 %3773 }
0x1189   : > { %v3754_v42 = vpop.permute.xlu2 %3753 }
0x118b   : > { %v3750_v56 = vpop.permute.xlu0 %3749 }
0x118c   : > { %v3758_v59 = vpop.permute.xlu1 %3757 }
0x118d   : > { %v3765_v23 = vsel %vm10612_vm14, %v3750_v56, %v3758_v59  ;;  %v3769_v9 = vsel %vm10613_vm4, %v3758_v59, %v3750_v56  ;;  %vm10624_vm14 = vmmov %vm10617_vm1 }
0x118e   : > { %vm10625_vm4 = vmmov %vm10617_vm1 }
0x1193   : > { %v3782_v31 = vpop.permute.xlu0 %3781 }
0x1194   : > { %v3789_v17 = vsel %vm10614_vm8, %v3774_v22, %v3782_v31  ;;  %v3793_v45 = vsel %vm10615_vm15, %v3782_v31, %v3774_v22  ;;  %vm10626_vm8 = vmmov %vm10618_vm0 }
0x1195   : > { %v3797_v49 = vsel %vm5379_vm2, %v3765_v23, %v3793_v45  ;;  %v3798_v30 = vsel %vm5383_vm3, %v3769_v9, %v3789_v17  ;;  %vm10627_vm15 = vmmov %vm10618_vm0 }
0x1196   : > { %v3807_v55 = vmax.f32 %v9855_v27, %v3797_v49  ;;  %v3808_v15 = vmax.f32 %v9860_v61, %v3798_v30  ;;  %v3815_v18 = vmin.f32 %v9855_v27, %v3797_v49  ;;  %v3816_v33 = vmin.f32 %v9860_v61, %v3798_v30  ;;  %v3786_v27 = vpop.permute.xlu2 %3785 }
0x1198   : > { %v3824_v50 = vsel %vm3806_vm6, %v3808_v15, %v3816_v33  ;;  %v9998_v36 = vsel %vm3805_vm13, %v3807_v55, %v3815_v18 }
0x1199   : > { %3839 = vrot.lane.b32.xlu2 %v3824_v50, %s4851_s28  ;;  %3851 = vrot.lane.b32.xlu0 %v9998_v36, %s4853_s30 }
0x119a   : > { %3831 = vrot.lane.b32.xlu1 %v9998_v36, %s4851_s28 }
0x119e   : > { %v3764_v11 = vpop.permute.xlu2 %3763 }
0x11a1   : > { %v3778_v61 = vpop.permute.xlu1 %3777 }
0x11a2   : > { %3859 = vrot.lane.b32.xlu1 %v3824_v50, %s4853_s30  ;;  %v3762_v44 = vpop.permute.xlu0 %3761  ;;  %v3791_v26 = vsel %vm10616_vm12, %v3778_v61, %v3786_v27  ;;  %v3795_v38 = vsel %vm10617_vm1, %v3786_v27, %v3778_v61  ;;  %vm3888_vm1 = vcmask 523264  }
0x11a3   : > { %v3767_v34 = vsel %vm10618_vm0, %v3754_v42, %v3762_v44  ;;  %v3771_v6 = vsel %vm10619_vm7, %v3762_v44, %v3754_v42  ;;  %vm3875_vm0 = vcmp.eq.s32.totalorder %v5200_v63, %v9144_v53 }
0x11a4   : > { %v3801_v5 = vsel %vm5379_vm2, %v3767_v34, %v3795_v38  ;;  %v3802_v32 = vsel %vm5383_vm3, %v3771_v6, %v3791_v26 }
0x11a5   : > { %v3811_v47 = vmax.f32 %v9889_v46, %v3801_v5  ;;  %v3812_v52 = vmax.f32 %v9894_v19, %v3802_v32  ;;  %v3819_v48 = vmin.f32 %v9889_v46, %v3801_v5  ;;  %v3820_v1 = vmin.f32 %v9894_v19, %v3802_v32  ;;  %v3967_v32 = vld [vmem:[#allocation2 + $0x50] sm:$0xff] }
0x11a6   : > { %v3752_v29 = vpop.permute.xlu2 %3751 }
0x11a7   : > { %v10025_v57 = vsel %vm3805_vm13, %v3811_v47, %v3819_v48  ;;  %v3828_v16 = vsel %vm3806_vm6, %v3812_v52, %v3820_v1 }
0x11a8   : > { %3855 = vrot.lane.b32.xlu2 %v10025_v57, %s4853_s30  ;;  %3835 = vrot.lane.b32.xlu0 %v10025_v57, %s4851_s28 }
0x11aa   : > { %3843 = vrot.lane.b32.xlu1 %v3828_v16, %s4851_s28  ;;  %v3756_v46 = vpop.permute.xlu1 %3755  ;;  %v3780_v19 = vpop.permute.xlu0 %3779 }
0x11ab   : > { %v3768_v40 = vsel %vm10620_vm5, %v3756_v46, %v3764_v11  ;;  %v3772_v10 = vsel %vm10621_vm10, %v3764_v11, %v3756_v46 }
0x11ae   : > { %v3784_v13 = vpop.permute.xlu2 %3783 }
0x11b0   : > { %3863 = vrot.lane.b32.xlu0 %v3828_v16, %s4853_s30 }
0x11b2   : > { %v3788_v3 = vpop.permute.xlu1 %3787 }
0x11b3   : > { %v3792_v58 = vsel %vm10622_vm11, %v3780_v19, %v3788_v3  ;;  %v3796_v51 = vsel %vm10623_vm9, %v3788_v3, %v3780_v19  ;;  %v3968_v19 = vld [vmem:[#allocation2 + $0x58] sm:$0xff]  ;;  %vm3941_vm9 = vcmask 64512  }
0x11b4   : > { %v3803_v7 = vsel %vm5379_vm2, %v3768_v40, %v3796_v51  ;;  %v3804_v12 = vsel %vm5383_vm3, %v3772_v10, %v3792_v58 }
0x11b5   : > { %v3813_v60 = vmax.f32 %v9917_v41, %v3803_v7  ;;  %v3814_v35 = vmax.f32 %v9932_v8, %v3804_v12  ;;  %v3821_v20 = vmin.f32 %v9917_v41, %v3803_v7  ;;  %v3822_v54 = vmin.f32 %v9932_v8, %v3804_v12 }
0x11b7   : > { %v3829_v28 = vsel %vm3805_vm13, %v3813_v60, %v3821_v20  ;;  %v3830_v21 = vsel %vm3806_vm6, %v3814_v35, %v3822_v54 }
0x11b8   : > { %3857 = vrot.lane.b32.xlu1 %v3829_v28, %s4853_s30  ;;  %3837 = vrot.lane.b32.xlu2 %v3829_v28, %s4851_s28 }
0x11b9   : > { %3845 = vrot.lane.b32.xlu0 %v3830_v21, %s4851_s28 }
0x11bb   : > { %v3776_v43 = vpop.permute.xlu1 %3775 }
0x11bc   : > { %v3760_v22 = vpop.permute.xlu0 %3759  ;;  %v3790_v41 = vsel %vm10624_vm14, %v3776_v43, %v3784_v13  ;;  %v3794_v8 = vsel %vm10625_vm4, %v3784_v13, %v3776_v43  ;;  %vm4194_vm14 = vcmask 1041408   ;;  %vm4190_vm4 = vcmask 15360  }
0x11bd   : > { %v3766_v56 = vsel %vm10626_vm8, %v3752_v29, %v3760_v22  ;;  %v3770_v59 = vsel %vm10627_vm15, %v3760_v22, %v3752_v29  ;;  %vm10637_vm8 = vcmask 1043456  }
0x11be   : > { %v3799_v42 = vsel %vm5379_vm2, %v3766_v56, %v3794_v8  ;;  %v3800_v31 = vsel %vm5383_vm3, %v3770_v59, %v3790_v41  ;;  %vm10628_vm2 = vcmp.lt.s32.totalorder %v4966_v37, 1  ;;  %vm10629_vm3 = vcmp.lt.s32.totalorder %v4966_v37, 127  ;;  %vm10638_vm15 = vmmov %vm10637_vm8 }
0x11bf   : > { %v3809_v23 = vmax.f32 %v9957_v39, %v3799_v42  ;;  %v3810_v9 = vmax.f32 %v9962_v14, %v3800_v31  ;;  %v3817_v17 = vmin.f32 %v9957_v39, %v3799_v42  ;;  %v3818_v45 = vmin.f32 %v9962_v14, %v3800_v31  ;;  %vm10632_vm12 = vmmov %vm10628_vm2 }
0x11c0   : > { %3865 = vrot.lane.b32.xlu2 %v3830_v21, %s4853_s30  ;;  %vm10633_vm7 = vmmov %vm10628_vm2 }
0x11c1   : > { %v3825_v49 = vsel %vm3805_vm13, %v3809_v23, %v3817_v17  ;;  %v3826_v24 = vsel %vm3806_vm6, %v3810_v9, %v3818_v45  ;;  %vm10630_vm6 = vnez %v10281_v4  ;;  %vm10631_vm13 = vmmov %vm10629_vm3 }
0x11c2   : > { %3833 = vrot.lane.b32.xlu0 %v3825_v49, %s4851_s28  ;;  %3841 = vrot.lane.b32.xlu1 %v3826_v24, %s4851_s28  ;;  %vm10634_vm5 = vmmov %vm10629_vm3 }
0x11c3   : > { %vm10635_vm10 = vmmov %vm10629_vm3 }
0x11c4   : > { %vm10636_vm11 = vmmov %vm10628_vm2 }
0x11c8   : > { %3853 = vrot.lane.b32.xlu2 %v3825_v49, %s4853_s30 }
0x11ca   : > { %3861 = vrot.lane.b32.xlu0 %v3826_v24, %s4853_s30 }
0x11f3   : > { %v3840_v39 = vpop.permute.xlu2 %3839 }
0x1202   : > { %v3856_v55 = vpop.permute.xlu2 %3855 }
0x120b   : > { %v3852_v14 = vpop.permute.xlu0 %3851 }
0x120c   : > { %v3832_v25 = vpop.permute.xlu1 %3831 }
0x120d   : > { %v3847_v62 = vsel %vm10629_vm3, %v3832_v25, %v3840_v39 }
0x1212   : > { %v3838_v0 = vpop.permute.xlu2 %3837 }
0x1214   : > { %v3860_v30 = vpop.permute.xlu1 %3859 }
0x1215   : > { %v3867_v18 = vsel %vm10628_vm2, %v3860_v30, %v3852_v14  ;;  %vm10639_vm2 = vmmov %vm10637_vm8 }
0x1216   : > { %v3871_v50 = vsel %vm10630_vm6, %v3847_v62, %v3867_v18  ;;  %vm10640_vm3 = vmmov %vm10639_vm2 }
0x1217   : > { %v3876_v34 = vmax.f32 %v9998_v36, %v3871_v50  ;;  %v3880_v6 = vmin.f32 %v9998_v36, %v3871_v50 }
0x1219   : > { %v3884_v36 = vsel %vm3875_vm0, %v3876_v34, %v3880_v6 }
0x121a   : > { %v3836_v15 = vpop.permute.xlu0 %3835  ;;  %v3866_v11 = vpop.permute.xlu2 %3865 }
0x121c   : > { %v3844_v2 = vpop.permute.xlu1 %3843 }
0x121d   : > { %v3849_v27 = vsel %vm10631_vm13, %v3836_v15, %v3844_v2  ;;  %vm10642_vm13 = vmmov %vm10639_vm2 }
0x1222   : > { %v3864_v33 = vpop.permute.xlu0 %3863  ;;  %v3854_v10 = vpop.permute.xlu2 %3853 }
0x1223   : > { %v3869_v61 = vsel %vm10632_vm12, %v3864_v33, %v3856_v55  ;;  %vm10643_vm12 = vmmov %vm10639_vm2 }
0x1224   : > { %v3873_v44 = vsel %vm10630_vm6, %v3849_v27, %v3869_v61 }
0x1225   : > { %v3878_v26 = vmax.f32 %v10025_v57, %v3873_v44  ;;  %v3882_v38 = vmin.f32 %v10025_v57, %v3873_v44 }
0x1227   : > { %v3886_v5 = vsel %vm3875_vm0, %v3878_v26, %v3882_v38 }
0x1228   : > { %4766 = vmatpush.xpose.msk.msra.mxu0 %vm3888_vm1, %v3886_v5 }
0x122a   : > { %v3858_v47 = vpop.permute.xlu1 %3857 }
0x122b   : > { %v3846_v52 = vpop.permute.xlu0 %3845  ;;  %v3870_v48 = vsel %vm10633_vm7, %v3866_v11, %v3858_v47  ;;  %4767 = vmatmul.msk.f32.vlgmr.msra.gmra.mxu0 %vm3888_vm1, %v3884_v36 }
0x122c   : > { %4030 = vmatpush.msrb.mxu0 %v3967_v32  ;;  %v3850_v1 = vsel %vm10634_vm5, %v3838_v0, %v3846_v52 }
0x122d   : > { %v3874_v57 = vsel %vm10630_vm6, %v3850_v1, %v3870_v48  ;;  %v4159_v1 = vld [vmem:[%s10236_s4] sm:$0xf] }
0x122e   : > { %v3879_v16 = vmax.f32 %v3829_v28, %v3874_v57  ;;  %v3883_v46 = vmin.f32 %v3829_v28, %v3874_v57 }
0x1230   : > { %v3887_v29 = vsel %vm3875_vm0, %v3879_v16, %v3883_v46 }
0x1231   : > { %4768 = vmatpush.xpose.msk.msra.mxu1 %vm3888_vm1, %v3887_v29  ;;  %v4154_v29 = vld [vmem:[%s10235_s3] sm:$0xf] }
0x1234   : > { %v3834_v3 = vpop.permute.xlu0 %3833  ;;  %v3842_v40 = vpop.permute.xlu1 %3841 }
0x1235   : > { %4050 = vmatpush.msrb.mxu1 %v3968_v19  ;;  %v3848_v51 = vsel %vm10635_vm10, %v3834_v3, %v3842_v40 }
0x123c   : > { %v3862_v58 = vpop.permute.xlu0 %3861 }
0x123d   : > { %v3868_v7 = vsel %vm10636_vm11, %v3862_v58, %v3854_v10 }
0x123e   : > { %v3872_v12 = vsel %vm10630_vm6, %v3848_v51, %v3868_v7  ;;  %vm10641_vm6 = vmmov %vm10639_vm2 }
0x123f   : > { %v3877_v60 = vmax.f32 %v3825_v49, %v3872_v12  ;;  %v3881_v35 = vmin.f32 %v3825_v49, %v3872_v12 }
0x1241   : > { %v3885_v20 = vsel %vm3875_vm0, %v3877_v60, %v3881_v35  ;;  %v4547_v35 = vld [vmem:[%s4913_s25] sm:$0xff] }
0x1242   : > { %4769 = vmatmul.msk.f32.vlgmr.msra.gmra.mxu1 %vm3888_vm1, %v3885_v20  ;;  %vm10644_vm1 = vmmov %vm10639_vm2 }
0x12a8   : > { %v3912_v54 = vpop.f32.mrf.mxu0 }
0x12a9   : > { %v3942_v28 = vsel %vm3941_vm9, %v3912_v54, -inf }
0x12aa   : > { %3943 = vmax.xlane.f32.xlu1 %v3942_v28 }
0x12bf   : > { %v3938_v21 = vpop.f32.mrf.mxu1 }
0x12c0   : > { %v3945_v37 = vsel %vm3941_vm9, %v3938_v21, -inf }
0x12c1   : > { %3946 = vmax.xlane.f32.xlu2 %v3945_v37 }
0x12c3   : > { %4162 = vperm.xlu1 %4833, %v4159_v1  }
0x131d   : > { %v3944_v13 = vpop.xlane.xlu1 %3943 }
0x131e   : > { %v3948_v4 = vsub.f32 %v3912_v54, %v3944_v13 }
0x1320   : > { %v3950_v43 = vmul.f32 1.442695, %v3948_v4 }
0x1322   : > { %4834 = vpow2.f32 %v3950_v43 }
0x1328   : > { %v4835_v22 = vpop.eup %4834 }
0x1329   : > { %v3954_v41 = vsel %vm3941_vm9, %v4835_v22, 0.0 }
0x132a   : > { %3955 = vadd.xlane.f32.xlu0 %v3954_v41 }
0x1334   : > { %v3947_v63 = vpop.xlane.xlu2 %3946 }
0x1335   : > { %v3949_v53 = vsub.f32 %v3938_v21, %v3947_v63 }
0x1337   : > { %v3952_v8 = vmul.f32 1.442695, %v3949_v53  ;;  %v4548_v53 = vld [vmem:[%s4913_s25 + $0x8] sm:$0xff] }
0x1339   : > { %4836 = vpow2.f32 %v3952_v8  ;;  %v4549_v8 = vld [vmem:[%s4913_s25 + $0x10] sm:$0xff] }
0x133f   : > { %v4837_v56 = vpop.eup %4836 }
0x1340   : > { %v3957_v59 = vsel %vm3941_vm9, %v4837_v56, 0.0 }
0x1341   : > { %3958 = vadd.xlane.f32.xlu2 %v3957_v59  ;;  %v4552_v59 = vld [vmem:[%s4913_s25 + $0x28] sm:$0xff] }
0x139d   : > { %v3956_v42 = vpop.xlane.xlu0 %3955 }
0x139e   : > { %4838 = vrcp.f32 %v3956_v42 }
0x13a4   : > { %v4839_v31 = vpop.eup %4838 }
0x13a5   : > { %v3962_v23 = vmul.f32 %v4839_v31, %v4835_v22  ;;  %v4551_v22 = vld [vmem:[%s4913_s25 + $0x20] sm:$0xff] }
0x13a7   : > { %4770 = vmatmul.msk.f32.vlgmr.msra.gmra.mxu2 %vm3941_vm9, %v3962_v23  ;;  %4771 = vmatmul.msk.f32.vlgmr.msra.gmra.mxu3 %vm3941_vm9, %v3962_v23 }
0x13b4   : > { %v3959_v9 = vpop.xlane.xlu2 %3958 }
0x13b5   : > { %4840 = vrcp.f32 %v3959_v9 }
0x13bb   : > { %v4841_v17 = vpop.eup %4840 }
0x13bc   : > { %v3963_v45 = vmul.f32 %v4841_v17, %v4837_v56  ;;  %v4550_v56 = vld [vmem:[%s4913_s25 + $0x18] sm:$0xff] }
0x13bd   : > { %v4554_v17 = vld [vmem:[%s4913_s25 + $0x38] sm:$0xff] }
0x13be   : > { %4772 = vmatmul.msk.f32.vlgmr.msrb.gmra.mxu0 %vm3941_vm9, %v3963_v45  ;;  %4773 = vmatmul.msk.f32.vlgmr.msrb.gmra.mxu1 %vm3941_vm9, %v3963_v45 }
0x142a   : > { %v3989_v49 = vpop.f32.mrf.mxu2  ;;  %v4009_v24 = vpop.f32.mrf.mxu3 }
0x142b   : > { %4055 = vst [vmem:[#allocation3] sm:$0xff] %v3989_v49 }
0x142c   : > { %4056 = vst [vmem:[#allocation3 + $0x8] sm:$0xff] %v4009_v24  ;;  %v4553_v24 = vld [vmem:[%s4913_s25 + $0x30] sm:$0xff] }
0x1433   : > { %v4059_v25 = vld [vmem:[#allocation3] ss:$8 sm:$0x3]  ;;  %v4071_v55 = vld [vmem:[#allocation3 + $0x1] ss:$8 sm:$0x3] }
0x1434   : > { %4064 = vst [vmem:[#allocation1] ss:$2 sm:$0xff] %v4059_v25  ;;  %v4083_v2 = vld [vmem:[#allocation3 + $0x2] ss:$8 sm:$0x3]  ;;  %v10188_v25 = vpop.permute.xlu1 %4162 }
0x1435   : > { %v4095_v33 = vld [vmem:[#allocation3 + $0x3] ss:$8 sm:$0x3]  ;;  %v4107_v61 = vld [vmem:[#allocation3 + $0x4] ss:$8 sm:$0x3] }
0x1436   : > { %v4119_v34 = vld [vmem:[#allocation3 + $0x5] ss:$8 sm:$0x3]  ;;  %v4131_v47 = vld [vmem:[#allocation3 + $0x6] ss:$8 sm:$0x3] }
0x1437   : > { %v4143_v48 = vld [vmem:[#allocation3 + $0x7] ss:$8 sm:$0x3] }
0x143b   : > { %v4032_v39 = vpop.f32.mrf.mxu0  ;;  %v4052_v14 = vpop.f32.mrf.mxu1 }
0x143c   : > { %4057 = vst [vmem:[#allocation3 + $0x10] sm:$0xff] %v4032_v39 }
0x143d   : > { %4058 = vst [vmem:[#allocation3 + $0x18] sm:$0xff] %v4052_v14 }
0x1444   : > { %v4061_v30 = vld [vmem:[#allocation3 + $0x10] ss:$8 sm:$0x3]  ;;  %v4073_v0 = vld [vmem:[#allocation3 + $0x11] ss:$8 sm:$0x3] }
0x1445   : > { %4066 = vst [vmem:[#allocation1 + $0x1] ss:$2 sm:$0xff] %v4061_v30  ;;  %v4085_v62 = vld [vmem:[#allocation3 + $0x12] ss:$8 sm:$0x3] }
0x1446   : > { %v4097_v27 = vld [vmem:[#allocation3 + $0x13] ss:$8 sm:$0x3]  ;;  %v4109_v26 = vld [vmem:[#allocation3 + $0x14] ss:$8 sm:$0x3] }
0x1447   : > { %v4121_v5 = vld [vmem:[#allocation3 + $0x15] ss:$8 sm:$0x3]  ;;  %v4133_v11 = vld [vmem:[#allocation3 + $0x16] ss:$8 sm:$0x3] }
0x1448   : > { %v4145_v36 = vld [vmem:[#allocation3 + $0x17] ss:$8 sm:$0x3] }
0x144c   : > { %v4067_v15 = vld [vmem:[#allocation1] sm:$0xff] }
0x144d   : > { %4076 = vst [vmem:[#allocation1] ss:$2 sm:$0xff] %v4071_v55 }
0x144e   : > { %4078 = vst [vmem:[#allocation1 + $0x1] ss:$2 sm:$0xff] %v4073_v0 }
0x144f   : > { %4069 = vst [vmem:[#allocation4] sm:$0xf] %v4067_v15 }
0x1455   : > { %v4079_v18 = vld [vmem:[#allocation1] sm:$0xff] }
0x1456   : > { %4081 = vst [vmem:[#allocation4 + $0x4] sm:$0xf] %v4079_v18 }
0x1457   : > { %4088 = vst [vmem:[#allocation1] ss:$2 sm:$0xff] %v4083_v2 }
0x1458   : > { %4090 = vst [vmem:[#allocation1 + $0x1] ss:$2 sm:$0xff] %v4085_v62 }
0x145d   : > { %v4155_v16 = vld [vmem:[#allocation4] sm:$0xff] }
0x145f   : > { %v4091_v50 = vld [vmem:[#allocation1] sm:$0xff] }
0x1460   : > { %4100 = vst [vmem:[#allocation1] ss:$2 sm:$0xff] %v4095_v33 }
0x1461   : > { %4102 = vst [vmem:[#allocation1 + $0x1] ss:$2 sm:$0xff] %v4097_v27 }
0x1462   : > { %4093 = vst [vmem:[#allocation4 + $0x8] sm:$0xf] %v4091_v50 }
0x1468   : > { %v4103_v44 = vld [vmem:[#allocation1] sm:$0xff] }
0x1469   : > { %4112 = vst [vmem:[#allocation1] ss:$2 sm:$0xff] %v4107_v61 }
0x146a   : > { %4114 = vst [vmem:[#allocation1 + $0x1] ss:$2 sm:$0xff] %v4109_v26 }
0x146b   : > { %4105 = vst [vmem:[#allocation4 + $0xc] sm:$0xf] %v4103_v44 }
0x1471   : > { %v4115_v38 = vld [vmem:[#allocation1] sm:$0xff] }
0x1472   : > { %4117 = vst [vmem:[#allocation4 + $0x10] sm:$0xf] %v4115_v38  ;;  %v4156_v6 = vld [vmem:[#allocation4 + $0x8] sm:$0xff] }
0x1473   : > { %4124 = vst [vmem:[#allocation1] ss:$2 sm:$0xff] %v4119_v34 }
0x1474   : > { %4126 = vst [vmem:[#allocation1 + $0x1] ss:$2 sm:$0xff] %v4121_v5 }
0x1475   : > { %4171 = vst [vmem:[#allocation1 + $0x20] ss:$4 sm:$0xff] %v4156_v6 }
0x147b   : > { %v4127_v32 = vld [vmem:[#allocation1] sm:$0xff] }
0x147c   : > { %4129 = vst [vmem:[#allocation4 + $0x14] sm:$0xf] %v4127_v32  ;;  %v4176_v10 = vld.sshfl [vmem:[#allocation1 + $0x20] sm:$0xff pattern:$0x73625140] }
0x147d   : > { %4138 = vst [vmem:[#allocation1 + $0x1] ss:$2 sm:$0xff] %v4133_v11  ;;  %v4177_v58 = vld.sshfl [vmem:[#allocation1 + $0x28] sm:$0xff pattern:$0x73625140] }
0x147e   : > { %4136 = vst [vmem:[#allocation1] ss:$2 sm:$0xff] %v4131_v47  ;;  %v4178_v51 = vld.sshfl [vmem:[#allocation1 + $0x30] sm:$0xff pattern:$0x73625140] }
0x147f   : > { %v4179_v60 = vld.sshfl [vmem:[#allocation1 + $0x38] sm:$0xff pattern:$0x73625140] }
0x1483   : > { %v4157_v46 = vld [vmem:[#allocation4 + $0x10] sm:$0xff] }
0x1485   : > { %v4139_v52 = vld [vmem:[#allocation1] sm:$0xff] }
0x1486   : > { %4141 = vst [vmem:[#allocation4 + $0x18] sm:$0xf] %v4139_v52 }
0x1487   : > { %4148 = vst [vmem:[#allocation1] ss:$2 sm:$0xff] %v4143_v48 }
0x1488   : > { %4150 = vst [vmem:[#allocation1 + $0x1] ss:$2 sm:$0xff] %v4145_v36 }
0x148f   : > { %v4151_v57 = vld [vmem:[#allocation1] sm:$0xff] }
0x1490   : > { %4153 = vst [vmem:[#allocation4 + $0x1c] sm:$0xf] %v4151_v57 }
0x1491   : > { %4169 = vst [vmem:[#allocation1] ss:$4 sm:$0xff] %v4155_v16 }
0x1497   : > { %v4158_v19 = vld [vmem:[#allocation4 + $0x18] sm:$0xff] }
0x1498   : > { %v4172_v3 = vld.sshfl [vmem:[#allocation1] sm:$0xff pattern:$0x73625140]  ;;  %v4173_v40 = vld.sshfl [vmem:[#allocation1 + $0x8] sm:$0xff pattern:$0x73625140] }
0x1499   : > { %4774 = vmatpush.msk.msrb.mxu2 %vm4194_vm14, %v4172_v3  ;;  %4776 = vmatpush.msk.msrb.mxu3 %vm4194_vm14, %v4173_v40  ;;  %v4174_v7 = vld.sshfl [vmem:[#allocation1 + $0x10] sm:$0xff pattern:$0x73625140]  ;;  %v4175_v12 = vld.sshfl [vmem:[#allocation1 + $0x18] sm:$0xff pattern:$0x73625140] }
0x149a   : > { %4778 = vmatpush.msk.msra.mxu0 %vm4194_vm14, %v4174_v7  ;;  %4780 = vmatpush.msk.msra.mxu1 %vm4194_vm14, %v4175_v12  ;;  %4180 = vst [vmem:[#allocation1] ss:$4 sm:$0xff] %v4157_v46 }
0x149b   : > { %4775 = vmatmul.msk.f32.vlgmr.msrb.gmra.mxu2 %vm4190_vm4, %v4154_v29  ;;  %4777 = vmatmul.msk.f32.vlgmr.msrb.gmra.mxu3 %vm4190_vm4, %v4154_v29  ;;  %4181 = vst [vmem:[#allocation1 + $0x20] ss:$4 sm:$0xff] %v4158_v19 }
0x149c   : > { %4779 = vmatmul.msk.f32.vlgmr.msra.gmra.mxu0 %vm4190_vm4, %v4154_v29  ;;  %4781 = vmatmul.msk.f32.vlgmr.msra.gmra.mxu1 %vm4190_vm4, %v4154_v29 }
0x149d   : > { %4782 = vmatpush.msk.msra.mxu2 %vm4194_vm14, %v4176_v10  ;;  %4784 = vmatpush.msk.msra.mxu3 %vm4194_vm14, %v4177_v58 }
0x149e   : > { %4786 = vmatpush.msk.msrb.mxu0 %vm4194_vm14, %v4178_v51  ;;  %4788 = vmatpush.msk.msrb.mxu1 %vm4194_vm14, %v4179_v60 }
0x14a1   : > { %v4182_v20 = vld.sshfl [vmem:[#allocation1] sm:$0xff pattern:$0x73625140]  ;;  %v4183_v54 = vld.sshfl [vmem:[#allocation1 + $0x8] sm:$0xff pattern:$0x73625140] }
0x14a2   : > { %4790 = vmatpush.msk.msrb.mxu2 %vm4194_vm14, %v4182_v20  ;;  %4792 = vmatpush.msk.msrb.mxu3 %vm4194_vm14, %v4183_v54  ;;  %v4184_v28 = vld.sshfl [vmem:[#allocation1 + $0x10] sm:$0xff pattern:$0x73625140]  ;;  %v4185_v21 = vld.sshfl [vmem:[#allocation1 + $0x18] sm:$0xff pattern:$0x73625140] }
0x14a3   : > { %4794 = vmatpush.msk.msra.mxu0 %vm4194_vm14, %v4184_v28  ;;  %4796 = vmatpush.msk.msra.mxu1 %vm4194_vm14, %v4185_v21  ;;  %v4186_v37 = vld.sshfl [vmem:[#allocation1 + $0x20] sm:$0xff pattern:$0x73625140]  ;;  %v4187_v13 = vld.sshfl [vmem:[#allocation1 + $0x28] sm:$0xff pattern:$0x73625140] }
0x14a4   : > { %4783 = vmatmul.msk.f32.vlgmr.msra.gmra.mxu2 %vm4190_vm4, %v4154_v29  ;;  %4785 = vmatmul.msk.f32.vlgmr.msra.gmra.mxu3 %vm4190_vm4, %v4154_v29  ;;  %v4188_v4 = vld.sshfl [vmem:[#allocation1 + $0x30] sm:$0xff pattern:$0x73625140]  ;;  %v4189_v43 = vld.sshfl [vmem:[#allocation1 + $0x38] sm:$0xff pattern:$0x73625140] }
0x14a5   : > { %4787 = vmatmul.msk.f32.vlgmr.msrb.gmra.mxu0 %vm4190_vm4, %v4154_v29  ;;  %4789 = vmatmul.msk.f32.vlgmr.msrb.gmra.mxu1 %vm4190_vm4, %v4154_v29  ;;  %4563 = vst [vmem:[#allocation1] ss:$2 sm:$0xff] %v4547_v35 }
0x14a6   : > { %4798 = vmatpush.msk.msra.mxu2 %vm4194_vm14, %v4186_v37  ;;  %4800 = vmatpush.msk.msra.mxu3 %vm4194_vm14, %v4187_v13  ;;  %4565 = vst [vmem:[#allocation1 + $0x10] ss:$2 sm:$0xff] %v4548_v53 }
0x14a7   : > { %4802 = vmatpush.msk.msrb.mxu0 %vm4194_vm14, %v4188_v4  ;;  %4804 = vmatpush.msk.msrb.mxu1 %vm4194_vm14, %v4189_v43  ;;  %4567 = vst [vmem:[#allocation1 + $0x20] ss:$2 sm:$0xff] %v4549_v8 }
0x14a8   : > { %4569 = vst [vmem:[#allocation1 + $0x30] ss:$2 sm:$0xff] %v4550_v56 }
0x14ac   : > { %4791 = vmatmul.msk.f32.vlgmr.msrb.gmra.mxu2 %vm4190_vm4, %v4154_v29  ;;  %4793 = vmatmul.msk.f32.vlgmr.msrb.gmra.mxu3 %vm4190_vm4, %v4154_v29  ;;  %v4570_v41 = vld.sshfl [vmem:[#allocation1] sm:$0xff pattern:$0x75316420]  ;;  %v4571_v63 = vld.sshfl [vmem:[#allocation1 + $0x8] sm:$0xff pattern:$0x75316420] }
0x14ad   : > { %4797 = vmatmul.msk.f32.vlgmr.msra.gmra.mxu1 %vm4190_vm4, %v4154_v29  ;;  %4795 = vmatmul.msk.f32.vlgmr.msra.gmra.mxu0 %vm4190_vm4, %v4154_v29  ;;  %4578 = vst [vmem:[#allocation1] ss:$2 sm:$0xff] %v4551_v22  ;;  %v4573_v42 = vld.sshfl [vmem:[#allocation1 + $0x18] sm:$0xff pattern:$0x75316420] }
0x14ae   : > { %v4572_v31 = vld.sshfl [vmem:[#allocation1 + $0x10] sm:$0xff pattern:$0x75316420]  ;;  %v4574_v45 = vld.sshfl [vmem:[#allocation1 + $0x20] sm:$0xff pattern:$0x75316420] }
0x14af   : > { %4579 = vst [vmem:[#allocation1 + $0x10] ss:$2 sm:$0xff] %v4552_v59  ;;  %v4577_v23 = vld.sshfl [vmem:[#allocation1 + $0x38] sm:$0xff pattern:$0x75316420] }
0x14b0   : > { %v4576_v9 = vld.sshfl [vmem:[#allocation1 + $0x30] sm:$0xff pattern:$0x75316420]  ;;  %v4575_v49 = vld.sshfl [vmem:[#allocation1 + $0x28] sm:$0xff pattern:$0x75316420] }
0x14b1   : > { %4581 = vst [vmem:[#allocation1 + $0x30] ss:$2 sm:$0xff] %v4554_v17 }
0x14b2   : > { %4580 = vst [vmem:[#allocation1 + $0x20] ss:$2 sm:$0xff] %v4553_v24 }
0x14b4   : > { %4801 = vmatmul.msk.f32.vlgmr.msra.gmra.mxu3 %vm4190_vm4, %v4154_v29  ;;  %4799 = vmatmul.msk.f32.vlgmr.msra.gmra.mxu2 %vm4190_vm4, %v4154_v29  ;;  %v4583_v13 = vld.sshfl [vmem:[#allocation1 + $0x8] sm:$0xff pattern:$0x75316420]  ;;  %v4582_v8 = vld.sshfl [vmem:[#allocation1] sm:$0xff pattern:$0x75316420] }
0x14b5   : > { %4805 = vmatmul.msk.f32.vlgmr.msrb.gmra.mxu1 %vm4190_vm4, %v4154_v29  ;;  %4803 = vmatmul.msk.f32.vlgmr.msrb.gmra.mxu0 %vm4190_vm4, %v4154_v29 }
0x14b6   : > { %v4585_v46 = vld.sshfl [vmem:[#allocation1 + $0x18] sm:$0xff pattern:$0x75316420]  ;;  %v4584_v10 = vld.sshfl [vmem:[#allocation1 + $0x10] sm:$0xff pattern:$0x75316420] }
0x14b8   : > { %v4589_v43 = vld.sshfl [vmem:[#allocation1 + $0x38] sm:$0xff pattern:$0x75316420]  ;;  %v4588_v53 = vld.sshfl [vmem:[#allocation1 + $0x30] sm:$0xff pattern:$0x75316420] }
0x1519   : > { %v4304_v39 = vpop.f32.mrf.mxu1  ;;  %v4284_v14 = vpop.f32.mrf.mxu0 }
0x151a   : > { %v4305_v30 = vadd.f32 %v4304_v39, %v10188_v25  ;;  %v4285_v55 = vadd.f32 %v4284_v14, %v10188_v25 }
0x151c   : > { %v4609_v15 = vadd.f32 %v4573_v42, %v4305_v30  ;;  %v4608_v0 = vadd.f32 %v4572_v31, %v4285_v55  ;;  %v4586_v55 = vld.sshfl [vmem:[#allocation1 + $0x20] sm:$0xff pattern:$0x75316420] }
0x151e   : > { %v4244_v18 = vpop.f32.mrf.mxu2  ;;  %v4264_v2 = vpop.f32.mrf.mxu3  ;;  %v4639_v62 = vrot.slane %v4609_v15, 4 }
0x151f   : > { %v4245_v33 = vadd.f32 %v4244_v18, %v10188_v25  ;;  %v4265_v50 = vadd.f32 %v4264_v2, %v10188_v25 }
0x1520   : > { %v4647_v27 = vsel %vm10637_vm8, %v4608_v0, %v4639_v62 }
0x1521   : > { %v4607_v61 = vadd.f32 %v4571_v63, %v4265_v50  ;;  %4663 = vst [vmem:[%s10197_s26 + $0x8] sm:$0xff] %v4647_v27  ;;  %v4606_v38 = vadd.f32 %v4570_v41, %v4245_v33 }
0x1522   : > { %v4384_v44 = vpop.f32.mrf.mxu1  ;;  %v4364_v26 = vpop.f32.mrf.mxu0 }
0x1523   : > { %v4638_v34 = vrot.slane %v4607_v61, 4  ;;  %v4385_v6 = vadd.f32 %v4384_v44, %v10188_v25  ;;  %v4365_v5 = vadd.f32 %v4364_v26, %v10188_v25 }
0x1525   : > { %v4646_v32 = vsel %vm10638_vm15, %v4606_v38, %v4638_v34  ;;  %v4613_v11 = vadd.f32 %v4577_v23, %v4385_v6  ;;  %v4612_v47 = vadd.f32 %v4576_v9, %v4365_v5 }
0x1526   : > { %4662 = vst [vmem:[%s10197_s26] sm:$0xff] %v4646_v32 }
0x1527   : > { %v4324_v52 = vpop.f32.mrf.mxu2  ;;  %v4344_v48 = vpop.f32.mrf.mxu3  ;;  %v4641_v36 = vrot.slane %v4613_v11, 4 }
0x1528   : > { %v4325_v1 = vadd.f32 %v4324_v52, %v10188_v25  ;;  %v4345_v57 = vadd.f32 %v4344_v48, %v10188_v25 }
0x1529   : > { %v4649_v16 = vsel %vm10639_vm2, %v4612_v47, %v4641_v36 }
0x152a   : > { %v4610_v29 = vadd.f32 %v4574_v45, %v4325_v1  ;;  %v4611_v19 = vadd.f32 %v4575_v49, %v4345_v57  ;;  %4665 = vst [vmem:[%s10197_s26 + $0x18] sm:$0xff] %v4649_v16  ;;  %v4464_v3 = vpop.f32.mrf.mxu1  ;;  %v4444_v40 = vpop.f32.mrf.mxu0  ;;  %v4587_v49 = vld.sshfl [vmem:[#allocation1 + $0x28] sm:$0xff pattern:$0x75316420] }
0x152b   : > { %v4465_v58 = vadd.f32 %v4464_v3, %v10188_v25  ;;  %v4445_v51 = vadd.f32 %v4444_v40, %v10188_v25 }
0x152c   : > { %v4640_v7 = vrot.slane %v4611_v19, 4 }
0x152d   : > { %v4617_v12 = vadd.f32 %v4585_v46, %v4465_v58  ;;  %v4616_v60 = vadd.f32 %v4584_v10, %v4445_v51 }
0x152e   : > { %v4648_v35 = vsel %vm10640_vm3, %v4610_v29, %v4640_v7 }
0x152f   : > { %4664 = vst [vmem:[%s10197_s26 + $0x10] sm:$0xff] %v4648_v35  ;;  %v4404_v20 = vpop.f32.mrf.mxu2  ;;  %v4424_v54 = vpop.f32.mrf.mxu3  ;;  %v4643_v28 = vrot.slane %v4617_v12, 4 }
0x1530   : > { %v4405_v21 = vadd.f32 %v4404_v20, %v10188_v25  ;;  %v4425_v37 = vadd.f32 %v4424_v54, %v10188_v25 }
0x1531   : > { %v4651_v4 = vsel %vm10641_vm6, %v4616_v60, %v4643_v28 }
0x1532   : > { %v4615_v22 = vadd.f32 %v4583_v13, %v4425_v37  ;;  %4667 = vst [vmem:[%s10197_s26 + $0x28] sm:$0xff] %v4651_v4  ;;  %v4544_v41 = vpop.f32.mrf.mxu1  ;;  %v4524_v63 = vpop.f32.mrf.mxu0  ;;  %v4614_v42 = vadd.f32 %v4582_v8, %v4405_v21 }
0x1533   : > { %v4545_v56 = vadd.f32 %v4544_v41, %v10188_v25  ;;  %v4525_v59 = vadd.f32 %v4524_v63, %v10188_v25 }
0x1534   : > { %v4642_v31 = vrot.slane %v4615_v22, 4 }
0x1535   : > { %v4621_v23 = vadd.f32 %v4589_v43, %v4545_v56  ;;  %v4620_v9 = vadd.f32 %v4588_v53, %v4525_v59 }
0x1536   : > { %v4650_v17 = vsel %vm10642_vm13, %v4614_v42, %v4642_v31 }
0x1537   : > { %4666 = vst [vmem:[%s10197_s26 + $0x20] sm:$0xff] %v4650_v17  ;;  %v4504_v45 = vpop.f32.mrf.mxu3  ;;  %v4645_v24 = vrot.slane %v4621_v23, 4  ;;  %v4484_v39 = vpop.f32.mrf.mxu2 }
0x1538   : > { %v4505_v14 = vadd.f32 %v4504_v45, %v10188_v25  ;;  %v4485_v30 = vadd.f32 %v4484_v39, %v10188_v25 }
0x1539   : > { %v4653_v15 = vsel %vm10643_vm12, %v4620_v9, %v4645_v24 }
0x153a   : > { %v4619_v0 = vadd.f32 %v4587_v49, %v4505_v14  ;;  %4669 = vst [vmem:[%s10197_s26 + $0x38] sm:$0xff] %v4653_v15  ;;  %v4618_v2 = vadd.f32 %v4586_v55, %v4485_v30 }
0x153c   : > { %v4644_v18 = vrot.slane %v4619_v0, 4 }
0x153e   : > { %v4652_v62 = vsel %vm10644_vm1, %v4618_v2, %v4644_v18 }
0x153f   : > { %4668 = vst [vmem:[%s10197_s26 + $0x30] sm:$0xff] %v4652_v62 }
0x1540 PF: > { %s15_s18 = sadd.s32 1, %s4848_s18  }
0x1541   : > { %p12_p4 = scmp.ge.s32.totalorder %s15_s18, 4  }
0x1543   :  { %14 = sbr.rel (!%p12_p4) target bundleno = 1 (0x1), region = 148 }

</bundles_post_ra>
